<compile_context>
chip_gen: v5e
topology: v5e:2x2
jax: 0.10.0
libtpu: 0.0.40
codegen_flags: <defaults>
</compile_context>

<pallas_src>
import functools
import math

import jax
import jax.numpy as jnp
from jax import lax
from jax.experimental import pallas as pl
from jax.experimental.pallas import tpu as pltpu


def _round_up(x, m):
    return (x + m - 1) // m * m


# ---------------------------------------------------------------------------
# Kernel 1: fused QKV projection (three 1x1 convs == one channel GEMM)
#   y[b, :, n] = Wqkv[3C, C] @ x[b, :, n] + b_qkv
# ---------------------------------------------------------------------------
def _qkv_proj_kernel(x_ref, w_ref, b_ref, y_ref):
    # x_ref: (C, tn)  w_ref: (3C, C)  b_ref: (3C, 1) f32  y_ref: (3C, tn)
    x = x_ref[...].astype(w_ref.dtype)               # cast to compute dtype in-kernel
    acc = jnp.dot(w_ref[...], x, preferred_element_type=jnp.float32)
    y_ref[...] = (acc + b_ref[...]).astype(y_ref.dtype)


def qkv_proj_pallas(x_cn, w_qkv, b_qkv, *, out_dtype, tn_max=512):
    """x_cn: (B, C, N_pad); w_qkv: (3C, C); b_qkv: (3C,) -> (B, 3C, N_pad)."""
    B, C, N_pad = x_cn.shape
    C3, C2 = w_qkv.shape
    assert C2 == C and b_qkv.shape == (C3,)
    assert N_pad % 128 == 0

    tn = min(tn_max, N_pad)
    while N_pad % tn:                 # N_pad is a multiple of 128, so this terminates
        tn -= 128
    grid = (B, N_pad // tn)

    b2 = b_qkv.astype(jnp.float32).reshape(C3, 1)

    isz_x = jnp.dtype(x_cn.dtype).itemsize
    isz_w = jnp.dtype(w_qkv.dtype).itemsize
    isz_o = jnp.dtype(out_dtype).itemsize
    cost = pl.CostEstimate(
        flops=2 * B * C3 * C * N_pad,
        transcendentals=0,
        bytes_accessed=(B * C * N_pad * isz_x + C3 * C * isz_w
                        + B * C3 * N_pad * isz_o + C3 * 4),
    )

    return pl.pallas_call(
        _qkv_proj_kernel,
        out_shape=jax.ShapeDtypeStruct((B, C3, N_pad), out_dtype),
        grid_spec=pltpu.PrefetchScalarGridSpec(
            num_scalar_prefetch=0,
            grid=grid,
            in_specs=[
                pl.BlockSpec((None, C, tn), lambda b, j: (b, 0, j)),   # x tile
                pl.BlockSpec((C3, C), lambda b, j: (0, 0)),            # resident Wqkv
                pl.BlockSpec((C3, 1), lambda b, j: (0, 0)),            # resident f32 bias
            ],
            out_specs=pl.BlockSpec((None, C3, tn), lambda b, j: (b, 0, j)),
        ),
        compiler_params=pltpu.CompilerParams(
            dimension_semantics=("parallel", "parallel")),
        cost_estimate=cost,
    )(x_cn, w_qkv, b2)


# ---------------------------------------------------------------------------
# Kernel 2: attention over HBLK heads per grid step
# ---------------------------------------------------------------------------
def _attn_kernel(q_ref, k_ref, v_ref, o_ref, *, hblk, d, n_valid):
    # q/k/v/o refs: (hblk * d, N_pad), channel-major (head-major, dim-minor).
    n_pad = q_ref.shape[-1]
    q = q_ref[...].reshape(hblk, d, n_pad)      # (h, d, n)
    k = k_ref[...].reshape(hblk, d, n_pad)      # (h, d, m)
    v = v_ref[...].reshape(hblk, d, n_pad)      # (h, d, m)

    # Only k needs a small per-head (d, n) swap to feed the MXU canonically;
    # do it through f32 (exact for bf16 values) to stay on the safest
    # transpose path, then return to the bf16 matmul operand dtype.
    kt = jnp.swapaxes(k.astype(jnp.float32), 1, 2).astype(q.dtype)   # (h, m, d)

    # Transposed scores: s[h, m, n] = sum_d k[h, d, m] * q[h, d, n].
    # Keys (m) sit in sublanes, queries (n) in lanes, so the softmax stats and
    # the deferred normalization broadcast without any relayout.
    # No 1/sqrt(d) scaling, matching the PyTorch module.
    s = jnp.einsum('hmd,hdn->hmn', kt, q,
                   preferred_element_type=jnp.float32)               # f32 scores

    if n_valid != n_pad:
        key_idx = lax.broadcasted_iota(jnp.int32, s.shape, 1)
        s = jnp.where(key_idx < n_valid, s, -jnp.inf)                # mask padded keys

    smax = jnp.max(s, axis=1, keepdims=True)                         # (h, 1, n)
    p = jnp.exp(s - smax)                                            # (h, m, n) f32
    l = jnp.sum(p, axis=1, keepdims=True)                            # (h, 1, n)

    # out[h, d, n] = sum_m v[h, d, m] * p[h, m, n]   (unnormalized, f32 acc)
    acc = jnp.einsum('hdm,hmn->hdn', v, p.astype(v.dtype),
                     preferred_element_type=jnp.float32)             # (h, d, n)

    # Deferred softmax normalization on the (d, n) result via the EUP.
    out = acc * pl.reciprocal(l, approx=True)
    o_ref[...] = out.reshape(hblk * d, n_pad).astype(o_ref.dtype)


def attention_pallas(y, *, heads, head_dim, n_valid, out_dtype,
                     vmem_budget_bytes=10 * 1024 * 1024):
    """y: (B, 3C, N_pad) packed [q; k; v] channels -> out (B, C, N_pad)."""
    B, C3, N_pad = y.shape
    d = head_dim
    C = heads * d
    assert C3 == 3 * C and N_pad % 128 == 0

    in_isz = jnp.dtype(y.dtype).itemsize
    out_isz = jnp.dtype(out_dtype).itemsize

    def step_bytes(h):
        # scores f32 + p f32 + p cast + acc f32 + q/k/v/kt/out blocks (dbl-buffered)
        return h * (N_pad * N_pad * (4 + 4 + in_isz)
                    + d * N_pad * (4 + 2 * 4 * in_isz + 2 * out_isz))

    # Largest head-group per grid step that keeps (8,128) tiling legal and the
    # working set inside a conservative VMEM budget (safe on v5e defaults too).
    cands = [h for h in range(heads, 0, -1)
             if heads % h == 0 and (h * d) % 8 == 0]
    assert cands, "heads * head_dim must be a multiple of 8"
    hblk = next((h for h in cands if step_bytes(h) <= vmem_budget_bytes),
                cands[-1])
    G = heads // hblk
    HD = hblk * d

    kernel = functools.partial(_attn_kernel, hblk=hblk, d=d, n_valid=n_valid)
    cost = pl.CostEstimate(
        flops=4 * B * heads * d * N_pad * N_pad,
        transcendentals=B * heads * N_pad * N_pad,
        bytes_accessed=B * heads * d * N_pad * (3 * in_isz + out_isz),
    )

    def block(index_map):
        return pl.BlockSpec((None, HD, N_pad), index_map)

    # q / k / v are read straight out of y (rows [0,C), [C,2C), [2C,3C)) via
    # the BlockSpec index maps -- no wrapper-side head split or transposes.
    return pl.pallas_call(
        kernel,
        out_shape=jax.ShapeDtypeStruct((B, C, N_pad), out_dtype),
        grid_spec=pltpu.PrefetchScalarGridSpec(
            num_scalar_prefetch=0,
            grid=(B, G),
            in_specs=[
                block(lambda b, g: (b, g, 0)),            # q head-group g
                block(lambda b, g: (b, G + g, 0)),        # k head-group g
                block(lambda b, g: (b, 2 * G + g, 0)),    # v head-group g
            ],
            out_specs=block(lambda b, g: (b, g, 0)),
        ),
        compiler_params=pltpu.CompilerParams(
            dimension_semantics=("parallel", "parallel")),
        cost_estimate=cost,
    )(y, y, y)


# ---------------------------------------------------------------------------
# MHSA forward (pos_emb=False)
# ---------------------------------------------------------------------------
def mhsa_forward(x, wq, bq, wk, bk, wv, bv, *, heads,
                 compute_dtype=jnp.bfloat16):
    """x: [B, C, W, H]; w*: [C, C] (1x1 conv weight, out x in); b*: [C]."""
    B, C, W, H = x.shape
    assert C % heads == 0
    D = C // heads
    N = W * H
    N_pad = _round_up(N, 128)         # lane-dense spatial axis

    # NCHW -> (B, C, N) is a free reshape (no data movement).
    x_cn = x.reshape(B, C, N)
    if N_pad != N:
        # One pad pass over x; padded key columns are masked to -inf inside the
        # attention kernel, padded query columns are sliced off at the end.
        x_cn = jnp.pad(x_cn, ((0, 0), (0, 0), (0, N_pad - N)))

    cdt = compute_dtype if compute_dtype is not None else x.dtype
    w_qkv = jnp.concatenate([wq, wk, wv], axis=0).astype(cdt)   # (3C, C)
    b_qkv = jnp.concatenate([bq, bk, bv], axis=0)               # (3C,)

    # Fused q/k/v projection; result stays channel-major so the attention
    # kernel can slice per-head q/k/v directly with its BlockSpecs.
    y = qkv_proj_pallas(x_cn, w_qkv, b_qkv, out_dtype=cdt)      # (B, 3C, N_pad)

    out = attention_pallas(y, heads=heads, head_dim=D, n_valid=N,
                           out_dtype=x.dtype)                   # (B, C, N_pad)
    if N_pad != N:
        out = out[:, :, :N]
    return out.reshape(B, C, W, H)


# ---------------------------------------------------------------------------
# Plain-JAX reference (mirrors the PyTorch module, pos_emb=False)
# ---------------------------------------------------------------------------
def mhsa_reference(x, wq, bq, wk, bk, wv, bv, heads):
    B, C, W, H = x.shape
    D, N = C // heads, W * H

    def conv1x1(w, b):
        y = jnp.einsum('bcwh,oc->bowh', x, w) + b[None, :, None, None]
        return y.reshape(B, heads, D, N)

    q = conv1x1(wq, bq)
    k = conv1x1(wk, bk)
    v = conv1x1(wv, bv)
    s = jnp.einsum('bhdn,bhdm->bhnm', q, k)          # q^T k (no scaling)
    attn = jax.nn.softmax(s, axis=-1)
    out = jnp.einsum('bhdm,bhnm->bhdn', v, attn)     # v @ attn^T
    return out.reshape(B, C, W, H)


def _run_case(B, C, W, H, heads, seed):
    key = jax.random.PRNGKey(seed)
    kx, k1, k2, k3, k4, k5, k6 = jax.random.split(key, 7)
    x = jax.random.normal(kx, (B, C, W, H), dtype=jnp.float32)

    bound = 1.0 / math.sqrt(C)   # nn.Conv2d default init bound (fan_in = C)
    wq = jax.random.uniform(k1, (C, C), jnp.float32, -bound, bound)
    wk = jax.random.uniform(k2, (C, C), jnp.float32, -bound, bound)
    wv = jax.random.uniform(k3, (C, C), jnp.float32, -bound, bound)
    bq = jax.random.uniform(k4, (C,), jnp.float32, -bound, bound)
    bk = jax.random.uniform(k5, (C,), jnp.float32, -bound, bound)
    bv = jax.random.uniform(k6, (C,), jnp.float32, -bound, bound)

    fwd = jax.jit(functools.partial(mhsa_forward, heads=heads))
    out = jax.block_until_ready(fwd(x, wq, bq, wk, bk, wv, bv))
    ref = mhsa_reference(x, wq, bq, wk, bk, wv, bv, heads)

    assert out.shape == (B, C, W, H)
    max_err = float(jnp.max(jnp.abs(out - ref)))
    # bf16 MXU operands vs an all-f32 reference -> loose tolerance.
    assert jnp.allclose(out, ref, atol=8e-2, rtol=5e-2), max_err
    return max_err


if __name__ == "__main__":
    _run_case(2, 64, 16, 16, heads=4, seed=0)   # N = 256: lane-aligned path
    _run_case(2, 32, 14, 14, heads=4, seed=1)   # N = 196: padded + masked-key path
    print("KERNEL_OK")
</pallas_src>

<mosaic_0001>
module attributes {stable_mosaic.version = 11 : i64} {
  func.func @_qkv_proj_kernel(%arg0: i32, %arg1: i32, %arg2: memref<1x64x256xf32, #tpu.memory_space<vmem>>, %arg3: memref<192x64xbf16, #tpu.memory_space<vmem>>, %arg4: memref<192x1xf32, #tpu.memory_space<vmem>>, %arg5: memref<1x192x256xbf16, #tpu.memory_space<vmem>>) attributes {dimension_semantics = [#tpu.dimension_semantics<parallel>, #tpu.dimension_semantics<parallel>], iteration_bounds = array<i64: 2, 1>, scalar_prefetch = 0 : i64, scratch_operands = 0 : i64, tpu.core_type = #tpu.core_type<tc>, window_params = [{transform_indices = @transform_0, window_bounds = array<i64: 1, 64, 256>}, {pipeline_mode = #tpu.pipeline_mode<synchronous>, transform_indices = @transform_1, window_bounds = array<i64: 192, 64>}, {pipeline_mode = #tpu.pipeline_mode<synchronous>, transform_indices = @transform_2, window_bounds = array<i64: 192, 1>}, {transform_indices = @transform_3, window_bounds = array<i64: 1, 192, 256>}]} {
    %c0 = arith.constant 0 : index
    %c0_0 = arith.constant 0 : index
    %c0_1 = arith.constant 0 : index
    %0 = vector.load %arg2[%c0, %c0_0, %c0_1] : memref<1x64x256xf32, #tpu.memory_space<vmem>>, vector<1x64x256xf32>
    %1 = vector.shape_cast %0 : vector<1x64x256xf32> to vector<64x256xf32>
    %2 = arith.truncf %1 : vector<64x256xf32> to vector<64x256xbf16>
    %c0_2 = arith.constant 0 : index
    %c0_3 = arith.constant 0 : index
    %3 = vector.load %arg3[%c0_2, %c0_3] : memref<192x64xbf16, #tpu.memory_space<vmem>>, vector<192x64xbf16>
    %cst = arith.constant dense<0.000000e+00> : vector<192x256xf32>
    %4 = tpu.matmul %3, %2, %cst {dimension_numbers = #tpu.dot_dimension_numbers<[1], [0], [0], [1], [0, 0, 1, 1], [], []>} : vector<192x64xbf16>, vector<64x256xbf16>, vector<192x256xf32> -> vector<192x256xf32>
    %c0_4 = arith.constant 0 : index
    %c0_5 = arith.constant 0 : index
    %5 = vector.load %arg4[%c0_4, %c0_5] : memref<192x1xf32, #tpu.memory_space<vmem>>, vector<192x1xf32>
    %6 = vector.broadcast %5 : vector<192x1xf32> to vector<192x256xf32>
    %7 = arith.addf %4, %6 : vector<192x256xf32>
    %8 = arith.truncf %7 : vector<192x256xf32> to vector<192x256xbf16>
    %c0_6 = arith.constant 0 : index
    %c0_7 = arith.constant 0 : index
    %c0_8 = arith.constant 0 : index
    %9 = vector.load %arg5[%c0_6, %c0_7, %c0_8] : memref<1x192x256xbf16, #tpu.memory_space<vmem>>, vector<1x192x256xbf16>
    %10 = vector.shape_cast %9 : vector<1x192x256xbf16> to vector<192x256xbf16>
    %11 = vector.shape_cast %8 : vector<192x256xbf16> to vector<1x192x256xbf16>
    tpu.vector_store %arg5[%c0_6, %c0_7, %c0_8], %11 {strides = array<i32>} : memref<1x192x256xbf16, #tpu.memory_space<vmem>>, vector<1x192x256xbf16>,
    return
  }
  func.func @transform_0(%arg0: i32, %arg1: i32) -> (i32, i32, i32) {
    %c0_i32 = arith.constant 0 : i32
    %c0_i32_0 = arith.constant 0 : i32
    return %arg0, %c0_i32, %arg1 : i32, i32, i32
  }
  func.func @transform_1(%arg0: i32, %arg1: i32) -> (i32, i32) {
    %c0_i32 = arith.constant 0 : i32
    %c0_i32_0 = arith.constant 0 : i32
    %c0_i32_1 = arith.constant 0 : i32
    return %c0_i32, %c0_i32_0 : i32, i32
  }
  func.func @transform_2(%arg0: i32, %arg1: i32) -> (i32, i32) {
    %c0_i32 = arith.constant 0 : i32
    %c0_i32_0 = arith.constant 0 : i32
    %c0_i32_1 = arith.constant 0 : i32
    return %c0_i32, %c0_i32_0 : i32, i32
  }
  func.func @transform_3(%arg0: i32, %arg1: i32) -> (i32, i32, i32) {
    %c0_i32 = arith.constant 0 : i32
    %c0_i32_0 = arith.constant 0 : i32
    return %arg0, %c0_i32, %arg1 : i32, i32, i32
  }
}

module attributes {stable_mosaic.version = 11 : i64} {
  func.func @_attn_kernel(%arg0: i32, %arg1: i32, %arg2: memref<1x64x256xbf16, #tpu.memory_space<vmem>>, %arg3: memref<1x64x256xbf16, #tpu.memory_space<vmem>>, %arg4: memref<1x64x256xbf16, #tpu.memory_space<vmem>>, %arg5: memref<1x64x256xf32, #tpu.memory_space<vmem>>) attributes {dimension_semantics = [#tpu.dimension_semantics<parallel>, #tpu.dimension_semantics<parallel>], iteration_bounds = array<i64: 2, 1>, scalar_prefetch = 0 : i64, scratch_operands = 0 : i64, tpu.core_type = #tpu.core_type<tc>, window_params = [{transform_indices = @transform_0, window_bounds = array<i64: 1, 64, 256>}, {transform_indices = @transform_1, window_bounds = array<i64: 1, 64, 256>}, {transform_indices = @transform_2, window_bounds = array<i64: 1, 64, 256>}, {transform_indices = @transform_3, window_bounds = array<i64: 1, 64, 256>}]} {
    %c0 = arith.constant 0 : index
    %c0_0 = arith.constant 0 : index
    %c0_1 = arith.constant 0 : index
    %0 = vector.load %arg2[%c0, %c0_0, %c0_1] : memref<1x64x256xbf16, #tpu.memory_space<vmem>>, vector<1x64x256xbf16>
    %1 = vector.shape_cast %0 : vector<1x64x256xbf16> to vector<64x256xbf16>
    %2 = vector.shape_cast %1 : vector<64x256xbf16> to vector<4x16x256xbf16>
    %c0_2 = arith.constant 0 : index
    %c0_3 = arith.constant 0 : index
    %c0_4 = arith.constant 0 : index
    %3 = vector.load %arg3[%c0_2, %c0_3, %c0_4] : memref<1x64x256xbf16, #tpu.memory_space<vmem>>, vector<1x64x256xbf16>
    %4 = vector.shape_cast %3 : vector<1x64x256xbf16> to vector<64x256xbf16>
    %5 = vector.shape_cast %4 : vector<64x256xbf16> to vector<4x16x256xbf16>
    %c0_5 = arith.constant 0 : index
    %c0_6 = arith.constant 0 : index
    %c0_7 = arith.constant 0 : index
    %6 = vector.load %arg4[%c0_5, %c0_6, %c0_7] : memref<1x64x256xbf16, #tpu.memory_space<vmem>>, vector<1x64x256xbf16>
    %7 = vector.shape_cast %6 : vector<1x64x256xbf16> to vector<64x256xbf16>
    %8 = vector.shape_cast %7 : vector<64x256xbf16> to vector<4x16x256xbf16>
    %9 = arith.extf %5 : vector<4x16x256xbf16> to vector<4x16x256xf32>
    %10 = tpu.transpose %9, [0, 2, 1] : vector<4x16x256xf32> -> vector<4x256x16xf32>
    %11 = arith.truncf %10 : vector<4x256x16xf32> to vector<4x256x16xbf16>
    "tpu.trace_start"() <{level = 10 : i32, message = "hmd,hdn->hmn"}> : () -> ()
    %cst = arith.constant dense<0.000000e+00> : vector<4x256x256xf32>
    %12 = tpu.matmul %11, %2, %cst {dimension_numbers = #tpu.dot_dimension_numbers<[2], [1], [1], [2], [0, 0, 0, 1, 1, 2], [0], [0]>} : vector<4x256x16xbf16>, vector<4x16x256xbf16>, vector<4x256x256xf32> -> vector<4x256x256xf32>
    "tpu.trace_stop"() : () -> ()
    %cst_8 = arith.constant dense<0xFF800000> : vector<4x256xf32>
    %13 = vector.multi_reduction <maximumf>, %12, %cst_8 [1] : vector<4x256x256xf32> to vector<4x256xf32>
    %14 = vector.shape_cast %13 : vector<4x256xf32> to vector<4x1x256xf32>
    %15 = vector.broadcast %14 : vector<4x1x256xf32> to vector<4x256x256xf32>
    %16 = arith.subf %12, %15 : vector<4x256x256xf32>
    %17 = math.exp %16 : vector<4x256x256xf32>
    %cst_9 = arith.constant dense<0.000000e+00> : vector<4x256xf32>
    %18 = vector.multi_reduction <add>, %17, %cst_9 [1] : vector<4x256x256xf32> to vector<4x256xf32>
    %19 = vector.shape_cast %18 : vector<4x256xf32> to vector<4x1x256xf32>
    %20 = arith.truncf %17 : vector<4x256x256xf32> to vector<4x256x256xbf16>
    "tpu.trace_start"() <{level = 10 : i32, message = "hdm,hmn->hdn"}> : () -> ()
    %cst_10 = arith.constant dense<0.000000e+00> : vector<4x16x256xf32>
    %21 = tpu.matmul %8, %20, %cst_10 {dimension_numbers = #tpu.dot_dimension_numbers<[2], [1], [1], [2], [0, 0, 0, 1, 1, 2], [0], [0]>} : vector<4x16x256xbf16>, vector<4x256x256xbf16>, vector<4x16x256xf32> -> vector<4x16x256xf32>
    "tpu.trace_stop"() : () -> ()
    %22 = tpu.reciprocal %19 {approx = true} : vector<4x1x256xf32> -> vector<4x1x256xf32>
    %23 = vector.broadcast %22 : vector<4x1x256xf32> to vector<4x16x256xf32>
    %24 = arith.mulf %21, %23 : vector<4x16x256xf32>
    %25 = vector.shape_cast %24 : vector<4x16x256xf32> to vector<64x256xf32>
    %c0_11 = arith.constant 0 : index
    %c0_12 = arith.constant 0 : index
    %c0_13 = arith.constant 0 : index
    %26 = vector.load %arg5[%c0_11, %c0_12, %c0_13] : memref<1x64x256xf32, #tpu.memory_space<vmem>>, vector<1x64x256xf32>
    %27 = vector.shape_cast %26 : vector<1x64x256xf32> to vector<64x256xf32>
    %28 = vector.shape_cast %25 : vector<64x256xf32> to vector<1x64x256xf32>
    tpu.vector_store %arg5[%c0_11, %c0_12, %c0_13], %28 {strides = array<i32>} : memref<1x64x256xf32, #tpu.memory_space<vmem>>, vector<1x64x256xf32>,
    return
  }
  func.func @transform_0(%arg0: i32, %arg1: i32) -> (i32, i32, i32) {
    %c0_i32 = arith.constant 0 : i32
    %c0_i32_0 = arith.constant 0 : i32
    return %arg0, %arg1, %c0_i32 : i32, i32, i32
  }
  func.func @transform_1(%arg0: i32, %arg1: i32) -> (i32, i32, i32) {
    %c1_i32 = arith.constant 1 : i32
    %0 = arith.addi %c1_i32, %arg1 : i32
    %c0_i32 = arith.constant 0 : i32
    %c0_i32_0 = arith.constant 0 : i32
    return %arg0, %0, %c0_i32 : i32, i32, i32
  }
  func.func @transform_2(%arg0: i32, %arg1: i32) -> (i32, i32, i32) {
    %c2_i32 = arith.constant 2 : i32
    %0 = arith.addi %c2_i32, %arg1 : i32
    %c0_i32 = arith.constant 0 : i32
    %c0_i32_0 = arith.constant 0 : i32
    return %arg0, %0, %c0_i32 : i32, i32, i32
  }
  func.func @transform_3(%arg0: i32, %arg1: i32) -> (i32, i32, i32) {
    %c0_i32 = arith.constant 0 : i32
    %c0_i32_0 = arith.constant 0 : i32
    return %arg0, %arg1, %c0_i32 : i32, i32, i32
  }
}

</mosaic_0001>

<bundles_post_ra>
// kernel: mhsa_forward.2
= control target key start
LH: loop header
LB: loop body
LE: loop exit
PB: predicated region body
PF: predicated region fallthrough
CT: control target
= control target key end

     0   :  { %s950_s12 = smov 0   ;;  %s952_s13 = smov 0   ;;  %s1195_s0 = inlined_call_operand.vmem [shape: f32[2,64,256], index: 0, kind: input, shape index: {}]   ;;  %s1196_s1 = inlined_call_operand.vmem [shape: bf16[192,64], index: 1, kind: input, shape index: {}]   ;;  %s1197_s2 = inlined_call_operand.vmem [shape: f32[192,1], index: 2, kind: input, shape index: {}]   ;;  %s1198_s3 = inlined_call_operand.vmem [shape: bf16[2,192,256], index: 3, kind: output, shape index: {}]  }
   0x1   :  { %s954_s14 = smov 0  }
   0x2 LB: > { %s25_s15 = sadd.s32 1, %s923_s13  ;;  %p777_p0 = scmp.ge.s32.totalorder %s927_s14, 1  ;;  %s927_s14 = sphi %s954_s14, %s13_s14   ;;  %s923_s13 = sphi %s952_s13, %s1200_s13   ;;  %s919_s12 = sphi %s950_s12, %s1199_s12  }
   0x3   : > { %p27_p1 = scmp.ge.s32.totalorder %s25_s15, 2  ;;  %p158_p2 = scmp.lt.s32.totalorder %s927_s14, 3 }
   0x5   : > { %s1202_s15 = smov (%p27_p1, %s25_s15), 0  ;;  %p159_p3 = pnand %p777_p0, %p158_p2 }
   0x6   : > { %p191_p4 = scmp.lt.s32.totalorder (!%p159_p3), %s919_s12, 1 }
   0x7   : > { %162 = sbr.rel (%p159_p3) target bundleno = 260 (0x104), region = 32 }
   0xc   : > { %v259_v0 = vld [vmem:[%s1197_s2] sm:$0xff]  ;;  %v261_v1 = vld [vmem:[%s1197_s2 + $0x10] sm:$0xff]  ;;  %v929_v2 = vmov 0   ;;  %s1204_s12 = smov (!%p191_p4, %s919_s12), 1  ;;  %v260_v6 = vld [vmem:[%s1197_s2 + $0x8] sm:$0xff]  ;;  %vm463_vm0 = vcmask 523264  }
   0xd   : > { %902 = vset.pattern.permute.xlu0 %v929_v2  ;;  %903 = vset.pattern.permute.xlu1 %v929_v2  ;;  %s855_s20 = sshll.u32 %s1204_s12, 7  ;;  %v262_v14 = vld [vmem:[%s1197_s2 + $0x18] sm:$0xff]  ;;  %v263_v21 = vld [vmem:[%s1197_s2 + $0x20] sm:$0xff]  ;;  %v265_v28 = vld [vmem:[%s1197_s2 + $0x30] sm:$0xff] }
   0xe   : > { %285 = vperm.xlu0 %902, %v259_v0   ;;  %295 = vperm.xlu1 %903, %v261_v1   ;;  %s980_s23 = scalar_lea.vmem %s1195_s0, %s855_s20  ;;  %v266_v29 = vld [vmem:[%s1197_s2 + $0x38] sm:$0xff]  ;;  %v264_v31 = vld [vmem:[%s1197_s2 + $0x28] sm:$0xff]  ;;  %v856_v33 = vld [vmem:[%s1196_s1] sm:$0xff] }
   0xf   : > { %904 = vset.pattern.permute.xlu2 %v929_v2  ;;  %v223_v3 = vld [vmem:[%s980_s23 + $0x60] sm:$0xff]  ;;  %v225_v4 = vld [vmem:[%s980_s23 + $0x70] sm:$0xff]  ;;  %v224_v5 = vld [vmem:[%s980_s23 + $0x68] sm:$0xff] }
  0x10   : > { %v233_v7 = vpack.c.bf16 %v225_v4, %v223_v3  ;;  %v226_v8 = vld [vmem:[%s980_s23 + $0x78] sm:$0xff]  ;;  %v219_v9 = vld [vmem:[%s980_s23 + $0x40] sm:$0xff]  ;;  %v221_v10 = vld [vmem:[%s980_s23 + $0x50] sm:$0xff]  ;;  %305 = vperm.xlu2 %904, %v263_v21  }
  0x11   : > { %v234_v11 = vpack.c.bf16 %v226_v8, %v224_v5  ;;  %v220_v12 = vld [vmem:[%s980_s23 + $0x48] sm:$0xff]  ;;  %v222_v13 = vld [vmem:[%s980_s23 + $0x58] sm:$0xff]  ;;  %v231_v15 = vpack.c.bf16 %v221_v10, %v219_v9  ;;  %v215_v17 = vld [vmem:[%s980_s23 + $0x20] sm:$0xff] }
  0x12   : > { %504 = vmatpush.bf16.msra.mxu0 %v233_v7  ;;  %868 = vmatpush.bf16.msra.mxu2 %v233_v7  ;;  %v232_v16 = vpack.c.bf16 %v222_v13, %v220_v12  ;;  %v217_v18 = vld [vmem:[%s980_s23 + $0x30] sm:$0xff]  ;;  %v216_v19 = vld [vmem:[%s980_s23 + $0x28] sm:$0xff]  ;;  %v218_v20 = vld [vmem:[%s980_s23 + $0x38] sm:$0xff] }
  0x13   : > { %573 = vmatpush.bf16.msra.mxu1 %v234_v11  ;;  %872 = vmatpush.bf16.msra.mxu3 %v234_v11  ;;  %v229_v22 = vpack.c.bf16 %v217_v18, %v215_v17  ;;  %v230_v23 = vpack.c.bf16 %v218_v20, %v216_v19  ;;  %v211_v24 = vld [vmem:[%s980_s23] sm:$0xff]  ;;  %v213_v25 = vld [vmem:[%s980_s23 + $0x10] sm:$0xff]  ;;  %v212_v26 = vld [vmem:[%s980_s23 + $0x8] sm:$0xff] }
  0x14   : > { %v214_v27 = vld [vmem:[%s980_s23 + $0x18] sm:$0xff]  ;;  %v227_v30 = vpack.c.bf16 %v213_v25, %v211_v24  ;;  %v862_v34 = vld [vmem:[%s1196_s1 + $0x30] sm:$0xff]  ;;  %v268_v35 = vld [vmem:[%s1197_s2 + $0x48] sm:$0xff]  ;;  %s876_s23 = smul.u32 192, %s1204_s12 }
  0x15   : > { %v228_v32 = vpack.c.bf16 %v214_v27, %v212_v26  ;;  %v269_v36 = vld [vmem:[%s1197_s2 + $0x50] sm:$0xff]  ;;  %v267_v37 = vld [vmem:[%s1197_s2 + $0x40] sm:$0xff]  ;;  %v272_v39 = vld [vmem:[%s1197_s2 + $0x68] sm:$0xff] }
  0x16   : > { %290 = vperm.xlu0 %902, %v260_v6   ;;  %300 = vperm.xlu1 %903, %v262_v14   ;;  %v271_v38 = vld [vmem:[%s1197_s2 + $0x60] sm:$0xff]  ;;  %v270_v40 = vld [vmem:[%s1197_s2 + $0x58] sm:$0xff]  ;;  %v857_v41 = vld [vmem:[%s1196_s1 + $0x8] sm:$0xff]  ;;  %s1142_s26 = scalar_lea.vmem %s1198_s3, %s876_s23 }
  0x17   : > { %505 = vmatpush.bf16.msra.mxu0 %v231_v15  ;;  %869 = vmatpush.bf16.msra.mxu2 %v231_v15  ;;  %v863_v42 = vld [vmem:[%s1196_s1 + $0x38] sm:$0xff]  ;;  %v275_v43 = vld [vmem:[%s1197_s2 + $0x80] sm:$0xff]  ;;  %v273_v45 = vld [vmem:[%s1197_s2 + $0x70] sm:$0xff] }
  0x18   : > { %574 = vmatpush.bf16.msra.mxu1 %v232_v16  ;;  %873 = vmatpush.bf16.msra.mxu3 %v232_v16  ;;  %v274_v44 = vld [vmem:[%s1197_s2 + $0x78] sm:$0xff]  ;;  %v277_v47 = vld [vmem:[%s1197_s2 + $0x90] sm:$0xff]  ;;  %v276_v48 = vld [vmem:[%s1197_s2 + $0x88] sm:$0xff] }
  0x19   : > { %310 = vperm.xlu2 %904, %v264_v31   ;;  %v278_v46 = vld [vmem:[%s1197_s2 + $0x98] sm:$0xff]  ;;  %v858_v49 = vld [vmem:[%s1196_s1 + $0x10] sm:$0xff]  ;;  %v864_v50 = vld [vmem:[%s1196_s1 + $0x40] sm:$0xff] }
  0x1a   : > { %v281_v51 = vld [vmem:[%s1197_s2 + $0xb0] sm:$0xff]  ;;  %v280_v52 = vld [vmem:[%s1197_s2 + $0xa8] sm:$0xff]  ;;  %v279_v53 = vld [vmem:[%s1197_s2 + $0xa0] sm:$0xff] }
  0x1b   : > { %506 = vmatpush.bf16.msra.mxu0 %v229_v22  ;;  %870 = vmatpush.bf16.msra.mxu2 %v229_v22  ;;  %v282_v54 = vld [vmem:[%s1197_s2 + $0xb8] sm:$0xff]  ;;  %v865_v56 = vld [vmem:[%s1196_s1 + $0x48] sm:$0xff]  ;;  %v860_v57 = vld [vmem:[%s1196_s1 + $0x20] sm:$0xff] }
  0x1c   : > { %575 = vmatpush.bf16.msra.mxu1 %v230_v23  ;;  %874 = vmatpush.bf16.msra.mxu3 %v230_v23  ;;  %v859_v55 = vld [vmem:[%s1196_s1 + $0x18] sm:$0xff]  ;;  %v866_v58 = vld [vmem:[%s1196_s1 + $0x50] sm:$0xff]  ;;  %v861_v59 = vld [vmem:[%s1196_s1 + $0x28] sm:$0xff] }
  0x1d   : > { %v867_v60 = vld [vmem:[%s1196_s1 + $0x58] sm:$0xff] }
  0x1e   : > { %315 = vperm.xlu0 %902, %v265_v28   ;;  %320 = vperm.xlu1 %903, %v266_v29  }
  0x1f   : > { %507 = vmatpush.bf16.msra.mxu0 %v227_v30  ;;  %871 = vmatpush.bf16.msra.mxu2 %v227_v30 }
  0x20   : > { %576 = vmatpush.bf16.msra.mxu1 %v228_v32  ;;  %875 = vmatpush.bf16.msra.mxu3 %v228_v32 }
  0x21   : > { %325 = vperm.xlu2 %904, %v267_v37  }
  0x22   : > { %829 = vmatmul.msk.bf16.vlgmr.msra.gmra.mxu0 %vm463_vm0, %v856_v33  ;;  %835 = vmatmul.msk.bf16.vlgmr.msra.gmra.mxu2 %vm463_vm0, %v862_v34 }
  0x23   : > { %841 = vmatmul.msk.bf16.vlgmr.msra.gmra.mxu1 %vm463_vm0, %v856_v33  ;;  %847 = vmatmul.msk.bf16.vlgmr.msra.gmra.mxu3 %vm463_vm0, %v862_v34 }
  0x26   : > { %330 = vperm.xlu0 %902, %v268_v35   ;;  %335 = vperm.xlu1 %903, %v269_v36  }
  0x29   : > { %340 = vperm.xlu2 %904, %v270_v40  }
  0x2e   : > { %345 = vperm.xlu0 %902, %v271_v38   ;;  %350 = vperm.xlu1 %903, %v272_v39  }
  0x31   : > { %355 = vperm.xlu2 %904, %v273_v45  }
  0x32   : > { %830 = vmatmul.msk.bf16.gmra.mxu0 %vm463_vm0, %v857_v41  ;;  %836 = vmatmul.msk.bf16.gmra.mxu2 %vm463_vm0, %v863_v42 }
  0x33   : > { %842 = vmatmul.msk.bf16.gmra.mxu1 %vm463_vm0, %v857_v41  ;;  %848 = vmatmul.msk.bf16.gmra.mxu3 %vm463_vm0, %v863_v42 }
  0x36   : > { %365 = vperm.xlu1 %903, %v275_v43   ;;  %360 = vperm.xlu0 %902, %v274_v44  }
  0x39   : > { %370 = vperm.xlu2 %904, %v276_v48  }
  0x3e   : > { %380 = vperm.xlu1 %903, %v278_v46   ;;  %375 = vperm.xlu0 %902, %v277_v47  }
  0x41   : > { %385 = vperm.xlu2 %904, %v279_v53  }
  0x42   : > { %831 = vmatmul.msk.bf16.gmra.mxu0 %vm463_vm0, %v858_v49  ;;  %837 = vmatmul.msk.bf16.gmra.mxu2 %vm463_vm0, %v864_v50 }
  0x43   : > { %843 = vmatmul.msk.bf16.gmra.mxu1 %vm463_vm0, %v858_v49  ;;  %849 = vmatmul.msk.bf16.gmra.mxu3 %vm463_vm0, %v864_v50 }
  0x46   : > { %395 = vperm.xlu1 %903, %v281_v51   ;;  %390 = vperm.xlu0 %902, %v280_v52  }
  0x49   : > { %400 = vperm.xlu2 %904, %v282_v54  }
  0x52   : > { %832 = vmatmul.msk.bf16.gmra.mxu0 %vm463_vm0, %v859_v55  ;;  %838 = vmatmul.msk.bf16.gmra.mxu2 %vm463_vm0, %v865_v56 }
  0x53   : > { %844 = vmatmul.msk.bf16.gmra.mxu1 %vm463_vm0, %v859_v55  ;;  %850 = vmatmul.msk.bf16.gmra.mxu3 %vm463_vm0, %v865_v56 }
  0x62   : > { %833 = vmatmul.msk.bf16.gmra.mxu0 %vm463_vm0, %v860_v57  ;;  %839 = vmatmul.msk.bf16.gmra.mxu2 %vm463_vm0, %v866_v58 }
  0x63   : > { %845 = vmatmul.msk.bf16.gmra.mxu1 %vm463_vm0, %v860_v57  ;;  %851 = vmatmul.msk.bf16.gmra.mxu3 %vm463_vm0, %v866_v58 }
  0x6a   : > { %v1124_v0 = vpop.permute.xlu2 %305 }
  0x72   : > { %834 = vmatmul.msk.bf16.gmra.mxu0 %vm463_vm0, %v861_v59  ;;  %840 = vmatmul.msk.bf16.gmra.mxu2 %vm463_vm0, %v867_v60 }
  0x73   : > { %846 = vmatmul.msk.bf16.gmra.mxu1 %vm463_vm0, %v861_v59  ;;  %852 = vmatmul.msk.bf16.gmra.mxu3 %vm463_vm0, %v867_v60  ;;  %v1128_v3 = vpop.permute.xlu2 %310 }
  0x7b   : > { %v1135_v9 = vpop.permute.xlu2 %325 }
  0x80   : > { %v286_v61 = vpop.permute.xlu0 %285  ;;  %v296_v62 = vpop.permute.xlu1 %295 }
  0x83   : > { %v1145_v23 = vpop.permute.xlu2 %340 }
  0x88   : > { %v291_v63 = vpop.permute.xlu0 %290  ;;  %v301_v1 = vpop.permute.xlu1 %300 }
  0x8b   : > { %v356_v36 = vpop.permute.xlu2 %355 }
  0x90   : > { %v1126_v2 = vpop.permute.xlu0 %315  ;;  %v1130_v4 = vpop.permute.xlu1 %320 }
  0x98   : > { %v1132_v5 = vpop.permute.xlu0 %330  ;;  %v1137_v11 = vpop.permute.xlu1 %335 }
  0x9f   : > { %v509_v6 = vpop.f32.mrf.mxu0 }
  0xa0   : > { %v510_v7 = vadd.f32 %v509_v6, %v286_v61  ;;  %v578_v8 = vpop.f32.mrf.mxu1  ;;  %v346_v13 = vpop.permute.xlu0 %345 }
  0xa1   : > { %v579_v10 = vadd.f32 %v578_v8, %v286_v61  ;;  %v351_v25 = vpop.permute.xlu1 %350 }
  0xa3   : > { %v638_v12 = vpack.c.bf16 %v579_v10, %v510_v7  ;;  %v371_v10 = vpop.permute.xlu2 %370 }
  0xa5   : > { %662 = vst [vmem:[%s1142_s26] sm:$0xff] %v638_v12  ;;  %v539_v14 = vpop.f32.mrf.mxu2 }
  0xa6   : > { %v540_v15 = vadd.f32 %v539_v14, %v346_v13  ;;  %v608_v16 = vpop.f32.mrf.mxu3 }
  0xa7   : > { %v609_v17 = vadd.f32 %v608_v16, %v346_v13  ;;  %v511_v18 = vpop.f32.mrf.mxu0 }
  0xa8   : > { %v512_v19 = vadd.f32 %v511_v18, %v291_v63  ;;  %v580_v20 = vpop.f32.mrf.mxu1  ;;  %v361_v47 = vpop.permute.xlu0 %360 }
  0xa9   : > { %v650_v21 = vpack.c.bf16 %v609_v17, %v540_v15  ;;  %v581_v22 = vadd.f32 %v580_v20, %v291_v63  ;;  %v366_v58 = vpop.permute.xlu1 %365 }
  0xab   : > { %674 = vst [vmem:[%s1142_s26 + $0x60] sm:$0xff] %v650_v21  ;;  %v639_v24 = vpack.c.bf16 %v581_v22, %v512_v19 }
  0xad   : > { %663 = vst [vmem:[%s1142_s26 + $0x8] sm:$0xff] %v639_v24  ;;  %v541_v26 = vpop.f32.mrf.mxu2 }
  0xae   : > { %v542_v27 = vadd.f32 %v541_v26, %v351_v25  ;;  %v610_v28 = vpop.f32.mrf.mxu3 }
  0xaf   : > { %v611_v29 = vadd.f32 %v610_v28, %v351_v25  ;;  %v514_v30 = vpop.f32.mrf.mxu0 }
  0xb0   : > { %v515_v31 = vadd.f32 %v514_v30, %v296_v62  ;;  %v583_v32 = vpop.f32.mrf.mxu1  ;;  %v376_v21 = vpop.permute.xlu0 %375 }
  0xb1   : > { %v651_v33 = vpack.c.bf16 %v611_v29, %v542_v27  ;;  %v584_v34 = vadd.f32 %v583_v32, %v296_v62  ;;  %v381_v32 = vpop.permute.xlu1 %380 }
  0xb3   : > { %675 = vst [vmem:[%s1142_s26 + $0x68] sm:$0xff] %v651_v33  ;;  %v640_v35 = vpack.c.bf16 %v584_v34, %v515_v31 }
  0xb5   : > { %664 = vst [vmem:[%s1142_s26 + $0x10] sm:$0xff] %v640_v35  ;;  %v544_v37 = vpop.f32.mrf.mxu2 }
  0xb6   : > { %v545_v38 = vadd.f32 %v544_v37, %v356_v36  ;;  %v613_v39 = vpop.f32.mrf.mxu3 }
  0xb7   : > { %v614_v40 = vadd.f32 %v613_v39, %v356_v36  ;;  %v516_v41 = vpop.f32.mrf.mxu0 }
  0xb8   : > { %v517_v42 = vadd.f32 %v516_v41, %v301_v1  ;;  %v585_v43 = vpop.f32.mrf.mxu1 }
  0xb9   : > { %v652_v44 = vpack.c.bf16 %v614_v40, %v545_v38  ;;  %v586_v45 = vadd.f32 %v585_v43, %v301_v1 }
  0xbb   : > { %676 = vst [vmem:[%s1142_s26 + $0x70] sm:$0xff] %v652_v44  ;;  %v641_v46 = vpack.c.bf16 %v586_v45, %v517_v42  ;;  %v386_v42 = vpop.permute.xlu2 %385 }
  0xbd   : > { %665 = vst [vmem:[%s1142_s26 + $0x18] sm:$0xff] %v641_v46  ;;  %v546_v48 = vpop.f32.mrf.mxu2 }
  0xbe   : > { %v547_v49 = vadd.f32 %v546_v48, %v361_v47  ;;  %v615_v50 = vpop.f32.mrf.mxu3 }
  0xbf   : > { %v616_v51 = vadd.f32 %v615_v50, %v361_v47  ;;  %v519_v52 = vpop.f32.mrf.mxu0 }
  0xc0   : > { %v520_v53 = vadd.f32 %v519_v52, %v1124_v0  ;;  %v588_v54 = vpop.f32.mrf.mxu1  ;;  %v391_v52 = vpop.permute.xlu0 %390 }
  0xc1   : > { %v653_v55 = vpack.c.bf16 %v616_v51, %v547_v49  ;;  %v589_v56 = vadd.f32 %v588_v54, %v1124_v0 }
  0xc3   : > { %677 = vst [vmem:[%s1142_s26 + $0x78] sm:$0xff] %v653_v55  ;;  %v642_v57 = vpack.c.bf16 %v589_v56, %v520_v53 }
  0xc5   : > { %666 = vst [vmem:[%s1142_s26 + $0x20] sm:$0xff] %v642_v57  ;;  %v549_v59 = vpop.f32.mrf.mxu2 }
  0xc6   : > { %v550_v60 = vadd.f32 %v549_v59, %v366_v58  ;;  %v618_v61 = vpop.f32.mrf.mxu3 }
  0xc7   : > { %v619_v62 = vadd.f32 %v618_v61, %v366_v58  ;;  %v521_v63 = vpop.f32.mrf.mxu0 }
  0xc8   : > { %v522_v1 = vadd.f32 %v521_v63, %v1128_v3  ;;  %v590_v6 = vpop.f32.mrf.mxu1 }
  0xc9   : > { %v654_v7 = vpack.c.bf16 %v619_v62, %v550_v60  ;;  %v591_v8 = vadd.f32 %v590_v6, %v1128_v3  ;;  %v396_v62 = vpop.permute.xlu1 %395 }
  0xcb   : > { %678 = vst [vmem:[%s1142_s26 + $0x80] sm:$0xff] %v654_v7  ;;  %v643_v0 = vpack.c.bf16 %v591_v8, %v522_v1 }
  0xcd   : > { %667 = vst [vmem:[%s1142_s26 + $0x28] sm:$0xff] %v643_v0  ;;  %v551_v12 = vpop.f32.mrf.mxu2 }
  0xce   : > { %v552_v13 = vadd.f32 %v551_v12, %v371_v10  ;;  %v620_v14 = vpop.f32.mrf.mxu3 }
  0xcf   : > { %v621_v15 = vadd.f32 %v620_v14, %v371_v10  ;;  %v524_v16 = vpop.f32.mrf.mxu0 }
  0xd0   : > { %v525_v17 = vadd.f32 %v524_v16, %v1126_v2  ;;  %v593_v18 = vpop.f32.mrf.mxu1 }
  0xd1   : > { %v655_v19 = vpack.c.bf16 %v621_v15, %v552_v13  ;;  %v594_v20 = vadd.f32 %v593_v18, %v1126_v2 }
  0xd3   : > { %679 = vst [vmem:[%s1142_s26 + $0x88] sm:$0xff] %v655_v19  ;;  %v644_v3 = vpack.c.bf16 %v594_v20, %v525_v17 }
  0xd5   : > { %668 = vst [vmem:[%s1142_s26 + $0x30] sm:$0xff] %v644_v3  ;;  %v554_v22 = vpop.f32.mrf.mxu2 }
  0xd6   : > { %v555_v24 = vadd.f32 %v554_v22, %v376_v21  ;;  %v623_v25 = vpop.f32.mrf.mxu3 }
  0xd7   : > { %v624_v26 = vadd.f32 %v623_v25, %v376_v21  ;;  %v526_v27 = vpop.f32.mrf.mxu0 }
  0xd8   : > { %v527_v28 = vadd.f32 %v526_v27, %v1130_v4  ;;  %v595_v29 = vpop.f32.mrf.mxu1 }
  0xd9   : > { %v656_v30 = vpack.c.bf16 %v624_v26, %v555_v24  ;;  %v596_v31 = vadd.f32 %v595_v29, %v1130_v4 }
  0xdb   : > { %680 = vst [vmem:[%s1142_s26 + $0x90] sm:$0xff] %v656_v30  ;;  %v645_v2 = vpack.c.bf16 %v596_v31, %v527_v28 }
  0xdd   : > { %669 = vst [vmem:[%s1142_s26 + $0x38] sm:$0xff] %v645_v2  ;;  %v556_v33 = vpop.f32.mrf.mxu2 }
  0xde   : > { %v557_v34 = vadd.f32 %v556_v33, %v381_v32  ;;  %v625_v35 = vpop.f32.mrf.mxu3 }
  0xdf   : > { %v626_v36 = vadd.f32 %v625_v35, %v381_v32  ;;  %v529_v37 = vpop.f32.mrf.mxu0 }
  0xe0   : > { %v530_v38 = vadd.f32 %v529_v37, %v1135_v9  ;;  %v598_v39 = vpop.f32.mrf.mxu1 }
  0xe1   : > { %v657_v40 = vpack.c.bf16 %v626_v36, %v557_v34  ;;  %v599_v41 = vadd.f32 %v598_v39, %v1135_v9 }
  0xe3   : > { %681 = vst [vmem:[%s1142_s26 + $0x98] sm:$0xff] %v657_v40  ;;  %v646_v4 = vpack.c.bf16 %v599_v41, %v530_v38 }
  0xe5   : > { %670 = vst [vmem:[%s1142_s26 + $0x40] sm:$0xff] %v646_v4  ;;  %v559_v43 = vpop.f32.mrf.mxu2 }
  0xe6   : > { %v560_v44 = vadd.f32 %v559_v43, %v386_v42  ;;  %v628_v45 = vpop.f32.mrf.mxu3 }
  0xe7   : > { %v629_v46 = vadd.f32 %v628_v45, %v386_v42  ;;  %v531_v47 = vpop.f32.mrf.mxu0 }
  0xe8   : > { %v532_v48 = vadd.f32 %v531_v47, %v1132_v5  ;;  %v600_v49 = vpop.f32.mrf.mxu1 }
  0xe9   : > { %v658_v50 = vpack.c.bf16 %v629_v46, %v560_v44  ;;  %v601_v51 = vadd.f32 %v600_v49, %v1132_v5 }
  0xeb   : > { %682 = vst [vmem:[%s1142_s26 + $0xa0] sm:$0xff] %v658_v50  ;;  %v647_v9 = vpack.c.bf16 %v601_v51, %v532_v48 }
  0xed   : > { %671 = vst [vmem:[%s1142_s26 + $0x48] sm:$0xff] %v647_v9  ;;  %v561_v53 = vpop.f32.mrf.mxu2 }
  0xee   : > { %v562_v54 = vadd.f32 %v561_v53, %v391_v52  ;;  %v630_v55 = vpop.f32.mrf.mxu3 }
  0xef   : > { %v631_v56 = vadd.f32 %v630_v55, %v391_v52  ;;  %v534_v57 = vpop.f32.mrf.mxu0 }
  0xf0   : > { %v535_v58 = vadd.f32 %v534_v57, %v1137_v11  ;;  %v603_v59 = vpop.f32.mrf.mxu1 }
  0xf1   : > { %v659_v60 = vpack.c.bf16 %v631_v56, %v562_v54  ;;  %v604_v61 = vadd.f32 %v603_v59, %v1137_v11  ;;  %v401_v11 = vpop.permute.xlu2 %400 }
  0xf3   : > { %683 = vst [vmem:[%s1142_s26 + $0xa8] sm:$0xff] %v659_v60  ;;  %v648_v5 = vpack.c.bf16 %v604_v61, %v535_v58 }
  0xf5   : > { %672 = vst [vmem:[%s1142_s26 + $0x50] sm:$0xff] %v648_v5  ;;  %v564_v63 = vpop.f32.mrf.mxu2 }
  0xf6   : > { %v565_v1 = vadd.f32 %v564_v63, %v396_v62  ;;  %v633_v6 = vpop.f32.mrf.mxu3 }
  0xf7   : > { %v634_v7 = vadd.f32 %v633_v6, %v396_v62  ;;  %v536_v8 = vpop.f32.mrf.mxu0 }
  0xf8   : > { %v537_v0 = vadd.f32 %v536_v8, %v1145_v23  ;;  %v605_v10 = vpop.f32.mrf.mxu1 }
  0xf9   : > { %v660_v12 = vpack.c.bf16 %v634_v7, %v565_v1  ;;  %v606_v13 = vadd.f32 %v605_v10, %v1145_v23 }
  0xfb   : > { %684 = vst [vmem:[%s1142_s26 + $0xb0] sm:$0xff] %v660_v12  ;;  %v649_v14 = vpack.c.bf16 %v606_v13, %v537_v0 }
  0xfd   : > { %673 = vst [vmem:[%s1142_s26 + $0x58] sm:$0xff] %v649_v14  ;;  %v566_v15 = vpop.f32.mrf.mxu2 }
  0xfe   : > { %v567_v16 = vadd.f32 %v566_v15, %v401_v11  ;;  %v635_v17 = vpop.f32.mrf.mxu3 }
  0xff   : > { %v636_v18 = vadd.f32 %v635_v17, %v401_v11 }
 0x101   : > { %v661_v19 = vpack.c.bf16 %v636_v18, %v567_v16 }
 0x103   : > { %685 = vst [vmem:[%s1142_s26 + $0xb8] sm:$0xff] %v661_v19 }
 0x104 PF: > { %s13_s14 = sadd.s32 1, %s927_s14   ;;  %s1199_s12 = smov %s923_s13 }
 0x105   : > { %p10_p5 = scmp.ge.s32.totalorder %s13_s14, 4   ;;  %s1200_s13 = smov %s1202_s15 }
 0x107   :  { %12 = sbr.rel (!%p10_p5) target bundleno = 2 (0x2), region = 62 }

// kernel: mhsa_forward.3
= control target key start
LH: loop header
LB: loop body
LE: loop exit
PB: predicated region body
PF: predicated region fallthrough
CT: control target
= control target key end

     0   :  { %s5728_s12 = smov 0   ;;  %s5730_s13 = smov 0   ;;  %s8916_s0 = inlined_call_operand.vmem [shape: bf16[2,192,256], index: 0, kind: input, shape index: {}, may-alias: {0,1,2}]   ;;  %s8917_s1 = inlined_call_operand.vmem [shape: bf16[2,192,256], index: 1, kind: input, shape index: {}, may-alias: {0,1,2}]   ;;  %s8918_s2 = inlined_call_operand.vmem [shape: bf16[2,192,256], index: 2, kind: input, shape index: {}, may-alias: {0,1,2}]   ;;  %s8919_s3 = inlined_call_operand.vmem [shape: f32[2,64,256], index: 3, kind: output, shape index: {}]  }
   0x1   :  { %s5732_s14 = smov 0  }
   0x2 LB: > { %s25_s15 = sadd.s32 1, %s5702_s13  ;;  %p4571_p0 = scmp.ge.s32.totalorder %s5706_s14, 1  ;;  %s5706_s14 = sphi %s5732_s14, %s13_s14   ;;  %s5702_s13 = sphi %s5730_s13, %s10200_s13   ;;  %s5698_s12 = sphi %s5728_s12, %s10199_s12  }
   0x3   : > { %p27_p1 = scmp.ge.s32.totalorder %s25_s15, 2  ;;  %p203_p2 = scmp.lt.s32.totalorder %s5706_s14, 3 }
   0x5   : > { %s10202_s15 = smov (%p27_p1, %s25_s15), 0  ;;  %p204_p3 = pnand %p4571_p0, %p203_p2 }
   0x7   : > { %207 = sbr.rel (%p204_p3) target bundleno = 1369 (0x559), region = 32 }
   0xc   : > { %p260_p4 = scmp.lt.s32.totalorder %s5698_s12, 1  ;;  %vm822_vm0 = vcmask 130048  }
   0xe   : > { %s10204_s12 = smov (!%p260_p4, %s5698_s12), 1 }
   0xf   : > { %s5749_s16 = smul.u32 192, %s10204_s12  ;;  %s4775_s28 = sshll.u32 %s10204_s12, 7 }
  0x10   : > { %s8492_s4 = scalar_lea.vmem %s8919_s3, %s4775_s28 }
  0x11   : > { %s4772_s17 = sadd.s32 64, %s5749_s16  ;;  %s5765_s23 = scalar_lea.vmem %s8916_s0, %s5749_s16 }
  0x12   : > { %s5755_s20 = scalar_lea.vmem %s8917_s1, %s4772_s17  ;;  %v4579_v16 = vld [vmem:[%s5765_s23] sm:$0xf]  ;;  %v4777_v17 = vld [vmem:[%s5765_s23 + $0x4] sm:$0xf0]  ;;  %v4776_v18 = vld [vmem:[%s5765_s23 + $0x4] sm:$0xf] }
  0x13   : > { %v316_v0 = vld [vmem:[%s5755_s20] sm:$0xff]  ;;  %v318_v1 = vld [vmem:[%s5755_s20 + $0x10] sm:$0xff]  ;;  %v317_v5 = vld [vmem:[%s5755_s20 + $0x8] sm:$0xff]  ;;  %v4580_v19 = vor.u32 %v4777_v17, %v4579_v16  ;;  %s4774_s24 = sadd.s32 128, %s5749_s16 }
  0x14   : > { %v332_v2 = vunpack.c.l.bf16 %v316_v0  ;;  %v336_v3 = vunpack.c.l.bf16 %v318_v1  ;;  %v333_v4 = vunpack.c.h.bf16 %v316_v0  ;;  %v319_v6 = vld [vmem:[%s5755_s20 + $0x18] sm:$0xff]  ;;  %v337_v7 = vunpack.c.h.bf16 %v318_v1  ;;  %v4581_v20 = vld [vmem:[%s5765_s23 + $0x8] sm:$0xf0]  ;;  %v4619_v21 = vld [vmem:[%s5765_s23 + $0x10] sm:$0xf]  ;;  %s7574_s27 = scalar_lea.vmem %s8918_s2, %s4774_s24 }
  0x15   : > { %v334_v10 = vunpack.c.l.bf16 %v317_v5  ;;  %v338_v11 = vunpack.c.l.bf16 %v319_v6  ;;  %v335_v12 = vunpack.c.h.bf16 %v317_v5  ;;  %v339_v13 = vunpack.c.h.bf16 %v319_v6  ;;  %v4779_v22 = vld [vmem:[%s5765_s23 + $0x14] sm:$0xf0]  ;;  %v4778_v25 = vld [vmem:[%s5765_s23 + $0x14] sm:$0xf]  ;;  %v4621_v26 = vld [vmem:[%s5765_s23 + $0x18] sm:$0xf0]  ;;  %878 = vmatpush.bf16.msra.mxu0 %v4580_v19 }
  0x16   : > { %v4820_v8 = vpack.i.bf16 %v336_v3, %v332_v2  ;;  %v4904_v9 = vpack.i.bf16 %v337_v7, %v333_v4  ;;  %v4584_v23 = vor.u32 %v4776_v18, %v4581_v20  ;;  %v4620_v24 = vor.u32 %v4779_v22, %v4619_v21  ;;  %v4659_v28 = vld [vmem:[%s5765_s23 + $0x20] sm:$0xf]  ;;  %v4781_v29 = vld [vmem:[%s5765_s23 + $0x24] sm:$0xf0]  ;;  %v4780_v30 = vld [vmem:[%s5765_s23 + $0x24] sm:$0xf] }
  0x17   : > { %v4822_v14 = vpack.i.bf16 %v338_v11, %v334_v10  ;;  %v4906_v15 = vpack.i.bf16 %v339_v13, %v335_v12  ;;  %v4624_v27 = vor.u32 %v4778_v25, %v4621_v26  ;;  %v4660_v31 = vor.u32 %v4781_v29, %v4659_v28  ;;  %v4661_v32 = vld [vmem:[%s5765_s23 + $0x28] sm:$0xf0]  ;;  %v4699_v44 = vld [vmem:[%s5765_s23 + $0x30] sm:$0xf]  ;;  %v4783_v45 = vld [vmem:[%s5765_s23 + $0x34] sm:$0xf0] }
  0x18   : > { %4821 = vxpose.xlu0.b32.start [1/2] (short) %v4820_v8, 128  ;;  %4905 = vxpose.xlu1.b32.start [1/2] (short) %v4904_v9, 128  ;;  %v4664_v33 = vor.u32 %v4780_v30, %v4661_v32  ;;  %v4782_v46 = vld [vmem:[%s5765_s23 + $0x34] sm:$0xf]  ;;  %v4700_v48 = vor.u32 %v4783_v45, %v4699_v44  ;;  %v4701_v49 = vld [vmem:[%s5765_s23 + $0x38] sm:$0xf0] }
  0x19   : > { %967 = vmatpush.bf16.msra.mxu1 %v4584_v23  ;;  %1194 = vmatpush.bf16.msra.mxu2 %v4620_v24  ;;  %v4704_v53 = vor.u32 %v4782_v46, %v4701_v49  ;;  %v5808_v46 = vld [vmem:[%s5755_s20 + $0x28] sm:$0xff] }
  0x1a   : > { %1283 = vmatpush.bf16.msra.mxu3 %v4624_v27  ;;  %1510 = vmatpush.bf16.msrb.mxu0 %v4660_v31 }
  0x1d   : > { %1599 = vmatpush.bf16.msrb.mxu1 %v4664_v33  ;;  %1826 = vmatpush.bf16.msrb.mxu2 %v4700_v48 }
  0x1e   : > { %1915 = vmatpush.bf16.msrb.mxu3 %v4704_v53 }
  0x20   : > { %4823 = vxpose.xlu0.b32.end [2/2] (short) %v4822_v14, 128  ;;  %4907 = vxpose.xlu1.b32.end [2/2] (short) %v4906_v15, 128 }
  0xbc   : > { %v4824_v34 = vpop.trf.xlu0 }
  0xbd   : > { %v4828_v35 = vunpack.i.h.bf16 %v4824_v34  ;;  %v4825_v36 = vunpack.i.l.bf16 %v4824_v34  ;;  %v5796_v34 = vld [vmem:[%s5755_s20 + $0x20] sm:$0xff] }
  0xbf   : > { %v636_v37 = vpack.c.bf16 %v4828_v35, %v4828_v35  ;;  %v604_v38 = vpack.c.bf16 %v4825_v36, %v4825_v36  ;;  %v5799_v35 = vld [vmem:[%s5755_s20 + $0x30] sm:$0xff]  ;;  %v340_v36 = vunpack.c.l.bf16 %v5796_v34 }
  0xc1   : > { %v764_v47 = vunpack.c.l.b16 %v604_v38  ;;  %v1081_v51 = vunpack.c.l.b16 %v636_v37  ;;  %v344_v37 = vunpack.c.l.bf16 %v5799_v35 }
  0xc4   : > { %v4829_v39 = vpop.trf.xlu0 }
  0xc5   : > { %v4833_v40 = vunpack.i.h.bf16 %v4829_v39  ;;  %v4830_v41 = vunpack.i.l.bf16 %v4829_v39 }
  0xc7   : > { %v637_v42 = vpack.c.bf16 %v4833_v40, %v4833_v40  ;;  %v605_v43 = vpack.c.bf16 %v4830_v41, %v4830_v41 }
  0xc9   : > { %v765_v50 = vunpack.c.l.b16 %v605_v43  ;;  %v1082_v52 = vunpack.c.l.b16 %v637_v42  ;;  %v4988_v42 = vpack.i.bf16 %v344_v37, %v340_v36 }
  0xcb   : > { %v796_v54 = vpack.c.b16 %v765_v50, %v764_v47  ;;  %v1113_v55 = vpack.c.b16 %v1082_v52, %v1081_v51  ;;  %4989 = vxpose.xlu2.b32.start [1/2] (short) %v4988_v42, 128  ;;  %v5811_v47 = vld [vmem:[%s5755_s20 + $0x38] sm:$0xff]  ;;  %v342_v50 = vunpack.c.l.bf16 %v5808_v46 }
  0xcc   : > { %v4834_v56 = vpop.trf.xlu0  ;;  %v346_v51 = vunpack.c.l.bf16 %v5811_v47 }
  0xcd   : > { %4585 = vmatmul.msk.bf16.vlgmr.msra.gmra.mxu0 %vm822_vm0, %v796_v54  ;;  %4601 = vmatmul.msk.bf16.vlgmr.msra.gmra.mxu1 %vm822_vm0, %v796_v54  ;;  %v4838_v57 = vunpack.i.h.bf16 %v4834_v56  ;;  %v4835_v58 = vunpack.i.l.bf16 %v4834_v56 }
  0xce   : > { %4625 = vmatmul.msk.bf16.vlgmr.msra.gmra.mxu2 %vm822_vm0, %v1113_v55  ;;  %4641 = vmatmul.msk.bf16.vlgmr.msra.gmra.mxu3 %vm822_vm0, %v1113_v55  ;;  %v4990_v52 = vpack.i.bf16 %v346_v51, %v342_v50 }
  0xcf   : > { %v638_v59 = vpack.c.bf16 %v4838_v57, %v4838_v57  ;;  %v606_v60 = vpack.c.bf16 %v4835_v58, %v4835_v58 }
  0xd1   : > { %v766_v2 = vunpack.c.l.b16 %v606_v60  ;;  %v1083_v4 = vunpack.c.l.b16 %v638_v59 }
  0xd3   : > { %4991 = vxpose.xlu2.b32.end [2/2] (short) %v4990_v52, 128 }
  0xd4   : > { %v4839_v61 = vpop.trf.xlu0 }
  0xd5   : > { %v4843_v62 = vunpack.i.h.bf16 %v4839_v61  ;;  %v4840_v63 = vunpack.i.l.bf16 %v4839_v61 }
  0xd7   : > { %v639_v0 = vpack.c.bf16 %v4843_v62, %v4843_v62  ;;  %v607_v1 = vpack.c.bf16 %v4840_v63, %v4840_v63 }
  0xd9   : > { %v767_v3 = vunpack.c.l.b16 %v607_v1  ;;  %v1084_v5 = vunpack.c.l.b16 %v639_v0 }
  0xdb   : > { %v797_v6 = vpack.c.b16 %v767_v3, %v766_v2  ;;  %v1114_v7 = vpack.c.b16 %v1084_v5, %v1083_v4  ;;  %v5819_v3 = vpop.trf.xlu1 }
  0xdc   : > { %v4844_v8 = vpop.trf.xlu0 }
  0xdd   : > { %4586 = vmatmul.msk.bf16.gmra.mxu0 %vm822_vm0, %v797_v6  ;;  %4602 = vmatmul.msk.bf16.gmra.mxu1 %vm822_vm0, %v797_v6  ;;  %v4848_v9 = vunpack.i.h.bf16 %v4844_v8  ;;  %v4845_v10 = vunpack.i.l.bf16 %v4844_v8 }
  0xde   : > { %4626 = vmatmul.msk.bf16.gmra.mxu2 %vm822_vm0, %v1114_v7  ;;  %4642 = vmatmul.msk.bf16.gmra.mxu3 %vm822_vm0, %v1114_v7 }
  0xdf   : > { %v640_v11 = vpack.c.bf16 %v4848_v9, %v4848_v9  ;;  %v608_v12 = vpack.c.bf16 %v4845_v10, %v4845_v10 }
  0xe1   : > { %v768_v18 = vunpack.c.l.b16 %v608_v12  ;;  %v1085_v20 = vunpack.c.l.b16 %v640_v11 }
  0xe4   : > { %v4849_v13 = vpop.trf.xlu0 }
  0xe5   : > { %v4853_v14 = vunpack.i.h.bf16 %v4849_v13  ;;  %v4850_v15 = vunpack.i.l.bf16 %v4849_v13  ;;  %v5821_v13 = vpop.trf.xlu1 }
  0xe7   : > { %v641_v16 = vpack.c.bf16 %v4853_v14, %v4853_v14  ;;  %v609_v17 = vpack.c.bf16 %v4850_v15, %v4850_v15 }
  0xe9   : > { %v769_v19 = vunpack.c.l.b16 %v609_v17  ;;  %v1086_v21 = vunpack.c.l.b16 %v641_v16 }
  0xeb   : > { %v798_v22 = vpack.c.b16 %v769_v19, %v768_v18  ;;  %v1115_v23 = vpack.c.b16 %v1086_v21, %v1085_v20 }
  0xec   : > { %v4854_v24 = vpop.trf.xlu0 }
  0xed   : > { %4587 = vmatmul.msk.bf16.gmra.mxu0 %vm822_vm0, %v798_v22  ;;  %4603 = vmatmul.msk.bf16.gmra.mxu1 %vm822_vm0, %v798_v22  ;;  %v4858_v25 = vunpack.i.h.bf16 %v4854_v24  ;;  %v4855_v26 = vunpack.i.l.bf16 %v4854_v24  ;;  %v5827_v21 = vpop.trf.xlu1 }
  0xee   : > { %4627 = vmatmul.msk.bf16.gmra.mxu2 %vm822_vm0, %v1115_v23  ;;  %4643 = vmatmul.msk.bf16.gmra.mxu3 %vm822_vm0, %v1115_v23 }
  0xef   : > { %v642_v27 = vpack.c.bf16 %v4858_v25, %v4858_v25  ;;  %v610_v28 = vpack.c.bf16 %v4855_v26, %v4855_v26 }
  0xf1   : > { %v770_v38 = vunpack.c.l.b16 %v610_v28  ;;  %v1087_v40 = vunpack.c.l.b16 %v642_v27 }
  0xf4   : > { %v4859_v29 = vpop.trf.xlu0 }
  0xf5   : > { %v4863_v30 = vunpack.i.h.bf16 %v4859_v29  ;;  %v4860_v31 = vunpack.i.l.bf16 %v4859_v29  ;;  %v5829_v37 = vpop.trf.xlu1 }
  0xf7   : > { %v643_v32 = vpack.c.bf16 %v4863_v30, %v4863_v30  ;;  %v611_v33 = vpack.c.bf16 %v4860_v31, %v4860_v31 }
  0xf9   : > { %v771_v39 = vunpack.c.l.b16 %v611_v33  ;;  %v1088_v41 = vunpack.c.l.b16 %v643_v32 }
  0xfb   : > { %v799_v43 = vpack.c.b16 %v771_v39, %v770_v38  ;;  %v1116_v44 = vpack.c.b16 %v1088_v41, %v1087_v40 }
  0xfc   : > { %v4864_v45 = vpop.trf.xlu0 }
  0xfd   : > { %4588 = vmatmul.msk.bf16.gmra.mxu0 %vm822_vm0, %v799_v43  ;;  %4604 = vmatmul.msk.bf16.gmra.mxu1 %vm822_vm0, %v799_v43  ;;  %v4868_v48 = vunpack.i.h.bf16 %v4864_v45  ;;  %v4865_v49 = vunpack.i.l.bf16 %v4864_v45  ;;  %v5835_v43 = vpop.trf.xlu1 }
  0xfe   : > { %4628 = vmatmul.msk.bf16.gmra.mxu2 %vm822_vm0, %v1116_v44  ;;  %4644 = vmatmul.msk.bf16.gmra.mxu3 %vm822_vm0, %v1116_v44 }
  0xff   : > { %v644_v53 = vpack.c.bf16 %v4868_v48, %v4868_v48  ;;  %v612_v54 = vpack.c.bf16 %v4865_v49, %v4865_v49 }
 0x101   : > { %v772_v60 = vunpack.c.l.b16 %v612_v54  ;;  %v1089_v62 = vunpack.c.l.b16 %v644_v53 }
 0x104   : > { %v4869_v55 = vpop.trf.xlu0 }
 0x105   : > { %v4873_v56 = vunpack.i.h.bf16 %v4869_v55  ;;  %v4870_v57 = vunpack.i.l.bf16 %v4869_v55 }
 0x107   : > { %v645_v58 = vpack.c.bf16 %v4873_v56, %v4873_v56  ;;  %v613_v59 = vpack.c.bf16 %v4870_v57, %v4870_v57 }
 0x109   : > { %v773_v61 = vunpack.c.l.b16 %v613_v59  ;;  %v1090_v63 = vunpack.c.l.b16 %v645_v58  ;;  %v5837_v59 = vpop.trf.xlu1 }
 0x10b   : > { %v800_v0 = vpack.c.b16 %v773_v61, %v772_v60  ;;  %v1117_v1 = vpack.c.b16 %v1090_v63, %v1089_v62  ;;  %v4909_v60 = vunpack.i.l.bf16 %v5819_v3  ;;  %v4914_v61 = vunpack.i.l.bf16 %v5821_v13 }
 0x10c   : > { %v4874_v2 = vpop.trf.xlu0  ;;  %v4912_v62 = vunpack.i.h.bf16 %v5819_v3  ;;  %v4917_v63 = vunpack.i.h.bf16 %v5821_v13  ;;  %v4919_v13 = vunpack.i.l.bf16 %v5827_v21 }
 0x10d   : > { %4589 = vmatmul.msk.bf16.gmra.mxu0 %vm822_vm0, %v800_v0  ;;  %4605 = vmatmul.msk.bf16.gmra.mxu1 %vm822_vm0, %v800_v0  ;;  %v4878_v4 = vunpack.i.h.bf16 %v4874_v2  ;;  %v4875_v5 = vunpack.i.l.bf16 %v4874_v2  ;;  %v620_v0 = vpack.c.bf16 %v4909_v60, %v4909_v60 }
 0x10e   : > { %4629 = vmatmul.msk.bf16.gmra.mxu2 %vm822_vm0, %v1117_v1  ;;  %4645 = vmatmul.msk.bf16.gmra.mxu3 %vm822_vm0, %v1117_v1  ;;  %v621_v1 = vpack.c.bf16 %v4914_v61, %v4914_v61 }
 0x10f   : > { %v646_v6 = vpack.c.bf16 %v4878_v4, %v4878_v4  ;;  %v614_v7 = vpack.c.bf16 %v4875_v5, %v4875_v5  ;;  %v652_v4 = vpack.c.bf16 %v4912_v62, %v4912_v62  ;;  %v653_v5 = vpack.c.bf16 %v4917_v63, %v4917_v63 }
 0x111   : > { %v774_v14 = vunpack.c.l.b16 %v614_v7  ;;  %v1091_v16 = vunpack.c.l.b16 %v646_v6  ;;  %v5847_v2 = vpop.trf.xlu1  ;;  %v780_v6 = vunpack.c.l.b16 %v620_v0  ;;  %v781_v7 = vunpack.c.l.b16 %v621_v1 }
 0x114   : > { %v4879_v8 = vpop.trf.xlu0 }
 0x115   : > { %v4883_v9 = vunpack.i.h.bf16 %v4879_v8  ;;  %v4880_v10 = vunpack.i.l.bf16 %v4879_v8  ;;  %v1097_v8 = vunpack.c.l.b16 %v652_v4  ;;  %v341_v4 = vunpack.c.h.bf16 %v5796_v34 }
 0x117   : > { %v647_v11 = vpack.c.bf16 %v4883_v9, %v4883_v9  ;;  %v615_v12 = vpack.c.bf16 %v4880_v10, %v4880_v10  ;;  %v1098_v9 = vunpack.c.l.b16 %v653_v5  ;;  %v345_v5 = vunpack.c.h.bf16 %v5799_v35 }
 0x119   : > { %v775_v15 = vunpack.c.l.b16 %v615_v12  ;;  %v1092_v17 = vunpack.c.l.b16 %v647_v11  ;;  %v804_v12 = vpack.c.b16 %v781_v7, %v780_v6  ;;  %v1121_v3 = vpack.c.b16 %v1098_v9, %v1097_v8 }
 0x11a   : > { %v343_v6 = vunpack.c.h.bf16 %v5808_v46  ;;  %v347_v7 = vunpack.c.h.bf16 %v5811_v47  ;;  %v4939_v8 = vunpack.i.l.bf16 %v5847_v2 }
 0x11b   : > { %v801_v18 = vpack.c.b16 %v775_v15, %v774_v14  ;;  %v1118_v19 = vpack.c.b16 %v1092_v17, %v1091_v16  ;;  %v5853_v14 = vpop.trf.xlu1  ;;  %v4924_v15 = vunpack.i.l.bf16 %v5829_v37  ;;  %v4922_v16 = vunpack.i.h.bf16 %v5827_v21 }
 0x11c   : > { %v4884_v20 = vpop.trf.xlu0  ;;  %v4927_v17 = vunpack.i.h.bf16 %v5829_v37  ;;  %v4944_v9 = vunpack.i.l.bf16 %v5853_v14 }
 0x11d   : > { %4590 = vmatmul.msk.bf16.gmra.mxu0 %vm822_vm0, %v801_v18  ;;  %4606 = vmatmul.msk.bf16.gmra.mxu1 %vm822_vm0, %v801_v18  ;;  %v4888_v22 = vunpack.i.h.bf16 %v4884_v20  ;;  %v4885_v23 = vunpack.i.l.bf16 %v4884_v20 }
 0x11e   : > { %4630 = vmatmul.msk.bf16.gmra.mxu2 %vm822_vm0, %v1118_v19  ;;  %4646 = vmatmul.msk.bf16.gmra.mxu3 %vm822_vm0, %v1118_v19  ;;  %v627_v47 = vpack.c.bf16 %v4944_v9, %v4944_v9 }
 0x11f   : > { %v648_v24 = vpack.c.bf16 %v4888_v22, %v4888_v22  ;;  %v616_v25 = vpack.c.bf16 %v4885_v23, %v4885_v23  ;;  %v622_v23 = vpack.c.bf16 %v4919_v13, %v4919_v13  ;;  %v4947_v13 = vunpack.i.h.bf16 %v5853_v14 }
 0x121   : > { %v776_v31 = vunpack.c.l.b16 %v616_v25  ;;  %v1093_v33 = vunpack.c.l.b16 %v648_v24  ;;  %v623_v24 = vpack.c.bf16 %v4924_v15, %v4924_v15 }
 0x123   : > { %v5871_v25 = vpop.trf.xlu1 }
 0x124   : > { %v4889_v26 = vpop.trf.xlu0 }
 0x125   : > { %v4893_v27 = vunpack.i.h.bf16 %v4889_v26  ;;  %v4890_v28 = vunpack.i.l.bf16 %v4889_v26  ;;  %v654_v26 = vpack.c.bf16 %v4922_v16, %v4922_v16  ;;  %v626_v16 = vpack.c.bf16 %v4939_v8, %v4939_v8 }
 0x127   : > { %v649_v29 = vpack.c.bf16 %v4893_v27, %v4893_v27  ;;  %v617_v30 = vpack.c.bf16 %v4890_v28, %v4890_v28  ;;  %v655_v27 = vpack.c.bf16 %v4927_v17, %v4927_v17  ;;  %v782_v28 = vunpack.c.l.b16 %v622_v23 }
 0x128   : > { %v5074_v23 = vpack.i.bf16 %v347_v7, %v343_v6 }
 0x129   : > { %v777_v32 = vunpack.c.l.b16 %v617_v30  ;;  %v1094_v36 = vunpack.c.l.b16 %v649_v29  ;;  %v783_v29 = vunpack.c.l.b16 %v623_v24  ;;  %v1099_v30 = vunpack.c.l.b16 %v654_v26 }
 0x12a   : > { %v1100_v21 = vunpack.c.l.b16 %v655_v27  ;;  %v659_v26 = vpack.c.bf16 %v4947_v13, %v4947_v13  ;;  %v786_v27 = vunpack.c.l.b16 %v626_v16 }
 0x12b   : > { %v802_v38 = vpack.c.b16 %v777_v32, %v776_v31  ;;  %v1119_v39 = vpack.c.b16 %v1094_v36, %v1093_v33  ;;  %v805_v37 = vpack.c.b16 %v783_v29, %v782_v28 }
 0x12c   : > { %v4894_v40 = vpop.trf.xlu0  ;;  %v1104_v14 = vunpack.c.l.b16 %v659_v26 }
 0x12d   : > { %4591 = vmatmul.msk.bf16.gmra.mxu0 %vm822_vm0, %v802_v38  ;;  %4607 = vmatmul.msk.bf16.gmra.mxu1 %vm822_vm0, %v802_v38  ;;  %v4898_v41 = vunpack.i.h.bf16 %v4894_v40  ;;  %v4895_v42 = vunpack.i.l.bf16 %v4894_v40  ;;  %v5881_v38 = vpop.trf.xlu1  ;;  %v4929_v40 = vunpack.i.l.bf16 %v5835_v43 }
 0x12e   : > { %4631 = vmatmul.msk.bf16.gmra.mxu2 %vm822_vm0, %v1119_v39  ;;  %4647 = vmatmul.msk.bf16.gmra.mxu3 %vm822_vm0, %v1119_v39  ;;  %v1122_v39 = vpack.c.b16 %v1100_v21, %v1099_v30 }
 0x12f   : > { %v650_v44 = vpack.c.bf16 %v4898_v41, %v4898_v41  ;;  %v618_v45 = vpack.c.bf16 %v4895_v42, %v4895_v42  ;;  %v4934_v41 = vunpack.i.l.bf16 %v5837_v59  ;;  %v4932_v42 = vunpack.i.h.bf16 %v5835_v43 }
 0x131   : > { %v778_v53 = vunpack.c.l.b16 %v618_v45  ;;  %v1095_v55 = vunpack.c.l.b16 %v650_v44  ;;  %v4937_v44 = vunpack.i.h.bf16 %v5837_v59 }
 0x134   : > { %v4899_v48 = vpop.trf.xlu0 }
 0x135   : > { %v4903_v49 = vunpack.i.h.bf16 %v4899_v48  ;;  %v4900_v50 = vunpack.i.l.bf16 %v4899_v48 }
 0x137   : > { %v651_v51 = vpack.c.bf16 %v4903_v49, %v4903_v49  ;;  %v619_v52 = vpack.c.bf16 %v4900_v50, %v4900_v50 }
 0x139   : > { %v779_v54 = vunpack.c.l.b16 %v619_v52  ;;  %v1096_v56 = vunpack.c.l.b16 %v651_v51  ;;  %v624_v51 = vpack.c.bf16 %v4929_v40, %v4929_v40  ;;  %v625_v52 = vpack.c.bf16 %v4934_v41, %v4934_v41 }
 0x13b   : > { %v803_v57 = vpack.c.b16 %v779_v54, %v778_v53  ;;  %v1120_v58 = vpack.c.b16 %v1096_v56, %v1095_v55  ;;  %v5899_v53 = vpop.trf.xlu1  ;;  %v656_v54 = vpack.c.bf16 %v4932_v42, %v4932_v42  ;;  %v657_v55 = vpack.c.bf16 %v4937_v44, %v4937_v44 }
 0x13c   : > { %v784_v56 = vunpack.c.l.b16 %v624_v51  ;;  %v4949_v42 = vunpack.i.l.bf16 %v5871_v25  ;;  %v4954_v44 = vunpack.i.l.bf16 %v5881_v38  ;;  %v4952_v51 = vunpack.i.h.bf16 %v5871_v25 }
 0x13d   : > { %4592 = vmatmul.msk.bf16.gmra.mxu0 %vm822_vm0, %v803_v57  ;;  %4608 = vmatmul.msk.bf16.gmra.mxu1 %vm822_vm0, %v803_v57  ;;  %v785_v57 = vunpack.c.l.b16 %v625_v52  ;;  %v1102_v43 = vunpack.c.l.b16 %v657_v55  ;;  %v4957_v52 = vunpack.i.h.bf16 %v5881_v38 }
 0x13e   : > { %4632 = vmatmul.msk.bf16.gmra.mxu2 %vm822_vm0, %v1120_v58  ;;  %4648 = vmatmul.msk.bf16.gmra.mxu3 %vm822_vm0, %v1120_v58  ;;  %v1101_v58 = vunpack.c.l.b16 %v656_v54 }
 0x13f   : > { %v806_v63 = vpack.c.b16 %v785_v57, %v784_v56 }
 0x140   : > { %v1123_v1 = vpack.c.b16 %v1102_v43, %v1101_v58  ;;  %v628_v58 = vpack.c.bf16 %v4949_v42, %v4949_v42  ;;  %v629_v43 = vpack.c.bf16 %v4954_v44, %v4954_v44 }
 0x142   : > { %v789_v6 = vunpack.c.l.b16 %v629_v43 }
 0x143   : > { %v5909_v0 = vpop.trf.xlu1 }
 0x144   : > { %v4967_v26 = vunpack.i.h.bf16 %v5909_v0 }
 0x146   : > { %v663_v44 = vpack.c.bf16 %v4967_v26, %v4967_v26 }
 0x14a   : > { %v5849_v10 = vpop.f32.mrf.mxu0  ;;  %v5851_v11 = vpop.f32.mrf.mxu1 }
 0x14b   : > { %9307 = vst [vmem:[#allocation2_spill] sm:$0xff] %v5851_v11  ;;  %v5931_v17 = vpop.trf.xlu1 }
 0x14d   : > { %4593 = vmatmul.msk.bf16.gmra.mxu0 %vm822_vm0, %v804_v12  ;;  %4609 = vmatmul.msk.bf16.gmra.mxu1 %vm822_vm0, %v804_v12  ;;  %v5072_v12 = vpack.i.bf16 %v345_v5, %v341_v4  ;;  %v661_v4 = vpack.c.bf16 %v4957_v52, %v4957_v52  ;;  %v788_v5 = vunpack.c.l.b16 %v628_v58 }
 0x14e   : > { %4633 = vmatmul.msk.bf16.gmra.mxu2 %vm822_vm0, %v1121_v3  ;;  %4649 = vmatmul.msk.bf16.gmra.mxu3 %vm822_vm0, %v1121_v3  ;;  %v4942_v3 = vunpack.i.h.bf16 %v5847_v2  ;;  %v787_v2 = vunpack.c.l.b16 %v627_v47  ;;  %v4959_v47 = vunpack.i.l.bf16 %v5899_v53 }
 0x14f   : > { %5073 = vxpose.xlu0.b32.start [1/2] (short) %v5072_v12, 128  ;;  %v1106_v25 = vunpack.c.l.b16 %v661_v4 }
 0x150   : > { %v658_v24 = vpack.c.bf16 %v4942_v3, %v4942_v3  ;;  %v808_v3 = vpack.c.b16 %v789_v6, %v788_v5 }
 0x151   : > { %v5863_v18 = vpop.f32.mrf.mxu2  ;;  %v5865_v19 = vpop.f32.mrf.mxu3 }
 0x152   : > { %9308 = vst [vmem:[#allocation3_spill] sm:$0xff] %v5863_v18  ;;  %v5867_v20 = vpop.f32.mrf.mxu0  ;;  %v5869_v22 = vpop.f32.mrf.mxu1  ;;  %v1103_v28 = vunpack.c.l.b16 %v658_v24  ;;  %v4962_v24 = vunpack.i.h.bf16 %v5899_v53  ;;  %v1108_v53 = vunpack.c.l.b16 %v663_v44 }
 0x153   : > { %9309 = vst [vmem:[#allocation4_spill] sm:$0xff] %v5865_v19  ;;  %v5941_v40 = vpop.trf.xlu1 }
 0x154   : > { %9310 = vst [vmem:[#allocation5_spill] sm:$0xff] %v5869_v22  ;;  %v1124_v41 = vpack.c.b16 %v1104_v14, %v1103_v28  ;;  %v662_v42 = vpack.c.bf16 %v4962_v24, %v4962_v24 }
 0x156   : > { %v1107_v43 = vunpack.c.l.b16 %v662_v42 }
 0x157   : > { %5075 = vxpose.xlu0.b32.end [2/2] (short) %v5074_v23, 128  ;;  %v4964_v23 = vunpack.i.l.bf16 %v5909_v0 }
 0x159   : > { %v5873_v31 = vpop.f32.mrf.mxu2  ;;  %v5875_v32 = vpop.f32.mrf.mxu3 }
 0x15a   : > { %9311 = vst [vmem:[#allocation6_spill] sm:$0xff] %v5873_v31  ;;  %v5877_v33 = vpop.f32.mrf.mxu0  ;;  %v5879_v36 = vpop.f32.mrf.mxu1 }
 0x15b   : > { %9312 = vst [vmem:[#allocation7_spill] sm:$0xff] %v5875_v32 }
 0x15c   : > { %9313 = vst [vmem:[#allocation8_spill] sm:$0xff] %v5879_v36 }
 0x15d   : > { %4594 = vmatmul.msk.bf16.gmra.mxu0 %vm822_vm0, %v805_v37  ;;  %4610 = vmatmul.msk.bf16.gmra.mxu1 %vm822_vm0, %v805_v37 }
 0x15e   : > { %4634 = vmatmul.msk.bf16.gmra.mxu2 %vm822_vm0, %v1122_v39  ;;  %4650 = vmatmul.msk.bf16.gmra.mxu3 %vm822_vm0, %v1122_v39  ;;  %v807_v39 = vpack.c.b16 %v787_v2, %v786_v27 }
 0x161   : > { %v5891_v45 = vpop.f32.mrf.mxu2  ;;  %v5893_v48 = vpop.f32.mrf.mxu3 }
 0x162   : > { %9314 = vst [vmem:[#allocation9_spill] sm:$0xff] %v5891_v45  ;;  %v5895_v49 = vpop.f32.mrf.mxu0  ;;  %v5897_v50 = vpop.f32.mrf.mxu1 }
 0x163   : > { %9315 = vst [vmem:[#allocation10_spill] sm:$0xff] %v5893_v48 }
 0x164   : > { %9316 = vst [vmem:[#allocation11_spill] sm:$0xff] %v5895_v49 }
 0x165   : > { %9317 = vst [vmem:[#allocation12_spill] sm:$0xff] %v5897_v50 }
 0x169   : > { %v5901_v60 = vpop.f32.mrf.mxu2  ;;  %v5903_v59 = vpop.f32.mrf.mxu3 }
 0x16a   : > { %9318 = vst [vmem:[#allocation13_spill] sm:$0xff] %v5901_v60  ;;  %v5905_v61 = vpop.f32.mrf.mxu0  ;;  %v5907_v62 = vpop.f32.mrf.mxu1 }
 0x16b   : > { %9319 = vst [vmem:[#allocation14_spill] sm:$0xff] %v5903_v59 }
 0x16c   : > { %9320 = vst [vmem:[#allocation15_spill] sm:$0xff] %v5905_v61 }
 0x16d   : > { %9321 = vst [vmem:[#allocation16_spill] sm:$0xff] %v5907_v62  ;;  %4595 = vmatmul.msk.bf16.gmra.mxu0 %vm822_vm0, %v806_v63  ;;  %4611 = vmatmul.msk.bf16.gmra.mxu1 %vm822_vm0, %v806_v63  ;;  %v5959_v63 = vpop.trf.xlu1 }
 0x16e   : > { %4635 = vmatmul.msk.bf16.gmra.mxu2 %vm822_vm0, %v1123_v1  ;;  %4651 = vmatmul.msk.bf16.gmra.mxu3 %vm822_vm0, %v1123_v1  ;;  %v660_v1 = vpack.c.bf16 %v4952_v51, %v4952_v51  ;;  %v5987_v51 = vpop.trf.xlu2 }
 0x170   : > { %v1105_v7 = vunpack.c.l.b16 %v660_v1 }
 0x171   : > { %v5923_v34 = vpop.f32.mrf.mxu2  ;;  %v5925_v35 = vpop.f32.mrf.mxu3 }
 0x172   : > { %9322 = vst [vmem:[#allocation17_spill] sm:$0xff] %v5923_v34  ;;  %v5927_v46 = vpop.f32.mrf.mxu0  ;;  %v5929_v15 = vpop.f32.mrf.mxu1  ;;  %v1125_v16 = vpack.c.b16 %v1106_v25, %v1105_v7  ;;  %v1126_v7 = vpack.c.b16 %v1108_v53, %v1107_v43 }
 0x173   : > { %9323 = vst [vmem:[#allocation18_spill] sm:$0xff] %v5925_v35 }
 0x174   : > { %9324 = vst [vmem:[#allocation19_spill] sm:$0xff] %v5927_v46 }
 0x175   : > { %9325 = vst [vmem:[#allocation20_spill] sm:$0xff] %v5929_v15  ;;  %v5969_v13 = vpop.trf.xlu1 }
 0x176   : > { %v5999_v25 = vpop.trf.xlu2 }
 0x179   : > { %v5933_v29 = vpop.f32.mrf.mxu2  ;;  %v5935_v30 = vpop.f32.mrf.mxu3 }
 0x17a   : > { %9326 = vst [vmem:[#allocation21_spill] sm:$0xff] %v5933_v29  ;;  %v5937_v21 = vpop.f32.mrf.mxu0  ;;  %v5939_v37 = vpop.f32.mrf.mxu1 }
 0x17b   : > { %9327 = vst [vmem:[#allocation22_spill] sm:$0xff] %v5935_v30 }
 0x17c   : > { %9328 = vst [vmem:[#allocation23_spill] sm:$0xff] %v5937_v21 }
 0x17d   : > { %9329 = vst [vmem:[#allocation24_spill] sm:$0xff] %v5939_v37  ;;  %4596 = vmatmul.msk.bf16.gmra.mxu0 %vm822_vm0, %v807_v39  ;;  %4612 = vmatmul.msk.bf16.gmra.mxu1 %vm822_vm0, %v807_v39  ;;  %v630_v39 = vpack.c.bf16 %v4959_v47, %v4959_v47  ;;  %v4972_v47 = vunpack.i.h.bf16 %v5931_v17 }
 0x17e   : > { %4636 = vmatmul.msk.bf16.gmra.mxu2 %vm822_vm0, %v1124_v41  ;;  %4652 = vmatmul.msk.bf16.gmra.mxu3 %vm822_vm0, %v1124_v41  ;;  %v631_v41 = vpack.c.bf16 %v4964_v23, %v4964_v23  ;;  %v4977_v23 = vunpack.i.h.bf16 %v5941_v40  ;;  %v6015_v43 = vpop.trf.xlu2 }
 0x17f   : > { %v790_v52 = vunpack.c.l.b16 %v630_v39  ;;  %v664_v44 = vpack.c.bf16 %v4972_v47, %v4972_v47  ;;  %v4979_v47 = vunpack.i.l.bf16 %v5959_v63 }
 0x180   : > { %v791_v58 = vunpack.c.l.b16 %v631_v41 }
 0x181   : > { %v5951_v54 = vpop.f32.mrf.mxu2  ;;  %v5953_v55 = vpop.f32.mrf.mxu3 }
 0x182   : > { %9330 = vst [vmem:[#allocation25_spill] sm:$0xff] %v5951_v54  ;;  %v5955_v56 = vpop.f32.mrf.mxu0  ;;  %v5957_v57 = vpop.f32.mrf.mxu1  ;;  %v809_v6 = vpack.c.b16 %v791_v58, %v790_v52  ;;  %v665_v52 = vpack.c.bf16 %v4977_v23, %v4977_v23 }
 0x183   : > { %9331 = vst [vmem:[#allocation26_spill] sm:$0xff] %v5953_v55 }
 0x184   : > { %9332 = vst [vmem:[#allocation27_spill] sm:$0xff] %v5955_v56 }
 0x185   : > { %9333 = vst [vmem:[#allocation28_spill] sm:$0xff] %v5957_v57 }
 0x189   : > { %v5961_v8 = vpop.f32.mrf.mxu2  ;;  %v5963_v38 = vpop.f32.mrf.mxu3 }
 0x18a   : > { %9334 = vst [vmem:[#allocation29_spill] sm:$0xff] %v5961_v8  ;;  %v5965_v9 = vpop.f32.mrf.mxu0  ;;  %v5967_v12 = vpop.f32.mrf.mxu1 }
 0x18b   : > { %9335 = vst [vmem:[#allocation30_spill] sm:$0xff] %v5963_v38 }
 0x18c   : > { %9336 = vst [vmem:[#allocation31_spill] sm:$0xff] %v5967_v12 }
 0x18d   : > { %4597 = vmatmul.msk.bf16.gmra.mxu0 %vm822_vm0, %v808_v3  ;;  %4613 = vmatmul.msk.bf16.gmra.mxu1 %vm822_vm0, %v808_v3  ;;  %v4969_v3 = vunpack.i.l.bf16 %v5931_v17  ;;  %v1110_v17 = vunpack.c.l.b16 %v665_v52 }
 0x18e   : > { %4637 = vmatmul.msk.bf16.gmra.mxu2 %vm822_vm0, %v1125_v16  ;;  %4653 = vmatmul.msk.bf16.gmra.mxu3 %vm822_vm0, %v1125_v16  ;;  %v4974_v16 = vunpack.i.l.bf16 %v5941_v40 }
 0x18f   : > { %v632_v39 = vpack.c.bf16 %v4969_v3, %v4969_v3 }
 0x190   : > { %v633_v41 = vpack.c.bf16 %v4974_v16, %v4974_v16  ;;  %v6025_v16 = vpop.trf.xlu2 }
 0x191   : > { %v5979_v27 = vpop.f32.mrf.mxu2  ;;  %v5981_v2 = vpop.f32.mrf.mxu3  ;;  %v792_v53 = vunpack.c.l.b16 %v632_v39  ;;  %v4984_v39 = vunpack.i.l.bf16 %v5969_v13 }
 0x192   : > { %9337 = vst [vmem:[#allocation32_spill] sm:$0xff] %v5979_v27  ;;  %v5983_v28 = vpop.f32.mrf.mxu0  ;;  %v5985_v14 = vpop.f32.mrf.mxu1 }
 0x193   : > { %9338 = vst [vmem:[#allocation33_spill] sm:$0xff] %v5981_v2 }
 0x194   : > { %9339 = vst [vmem:[#allocation34_spill] sm:$0xff] %v5985_v14 }
 0x199   : > { %v5989_v1 = vpop.f32.mrf.mxu2  ;;  %v5995_v5 = vpop.f32.mrf.mxu3 }
 0x19a   : > { %9340 = vst [vmem:[#allocation35_spill] sm:$0xff] %v5989_v1  ;;  %v5991_v0 = vpop.f32.mrf.mxu0  ;;  %v5993_v4 = vpop.f32.mrf.mxu1 }
 0x19b   : > { %9341 = vst [vmem:[#allocation36_spill] sm:$0xff] %v5993_v4 }
 0x19c   : > { %9342 = vst [vmem:[#allocation37_spill] sm:$0xff] %v5995_v5 }
 0x19d   : > { %4598 = vmatmul.msk.bf16.gmra.mxu0 %vm822_vm0, %v809_v6  ;;  %4614 = vmatmul.msk.bf16.gmra.mxu1 %vm822_vm0, %v809_v6  ;;  %v793_v6 = vunpack.c.l.b16 %v633_v41  ;;  %v4982_v41 = vunpack.i.h.bf16 %v5959_v63 }
 0x19e   : > { %4638 = vmatmul.msk.bf16.gmra.mxu2 %vm822_vm0, %v1126_v7  ;;  %4654 = vmatmul.msk.bf16.gmra.mxu3 %vm822_vm0, %v1126_v7  ;;  %v1109_v7 = vunpack.c.l.b16 %v664_v44  ;;  %v4987_v44 = vunpack.i.h.bf16 %v5969_v13 }
 0x19f   : > { %v810_v1 = vpack.c.b16 %v793_v6, %v792_v53  ;;  %v635_v6 = vpack.c.bf16 %v4984_v39, %v4984_v39  ;;  %v4993_v39 = vunpack.i.l.bf16 %v5987_v51 }
 0x1a0   : > { %v1127_v2 = vpack.c.b16 %v1110_v17, %v1109_v7  ;;  %v666_v7 = vpack.c.bf16 %v4982_v41, %v4982_v41  ;;  %v667_v17 = vpack.c.bf16 %v4987_v44, %v4987_v44  ;;  %v4998_v41 = vunpack.i.l.bf16 %v5999_v25 }
 0x1a1   : > { %v6011_v42 = vpop.f32.mrf.mxu2  ;;  %v6013_v58 = vpop.f32.mrf.mxu3  ;;  %v4996_v44 = vunpack.i.h.bf16 %v5987_v51 }
 0x1a2   : > { %v6007_v24 = vpop.f32.mrf.mxu0  ;;  %v6009_v26 = vpop.f32.mrf.mxu1  ;;  %9344 = vst [vmem:[#allocation39_spill] sm:$0xff] %v6011_v42  ;;  %v1112_v27 = vunpack.c.l.b16 %v667_v17 }
 0x1a3   : > { %9343 = vst [vmem:[#allocation38_spill] sm:$0xff] %v6009_v26  ;;  %v700_v17 = vpack.c.bf16 %v4996_v44, %v4996_v44  ;;  %v5003_v44 = vunpack.i.l.bf16 %v6015_v43 }
 0x1a4   : > { %9345 = vst [vmem:[#allocation40_spill] sm:$0xff] %v6013_v58  ;;  %v795_v58 = vunpack.c.l.b16 %v635_v6 }
 0x1a5   : > { %v1713_v54 = vunpack.c.l.b16 %v700_v17 }
 0x1a9   : > { %v6021_v3 = vpop.f32.mrf.mxu2  ;;  %v6030_v23 = vpop.f32.mrf.mxu3 }
 0x1aa   : > { %v6017_v5 = vpop.f32.mrf.mxu0  ;;  %v6019_v40 = vpop.f32.mrf.mxu1  ;;  %9347 = vst [vmem:[#allocation42_spill] sm:$0xff] %v6021_v3 }
 0x1ab   : > { %9346 = vst [vmem:[#allocation41_spill] sm:$0xff] %v6019_v40  ;;  %v6039_v3 = vpop.trf.xlu2 }
 0x1ac   : > { %9348 = vst [vmem:[#allocation43_spill] sm:$0xff] %v6030_v23  ;;  %v1111_v23 = vunpack.c.l.b16 %v666_v7  ;;  %v669_v7 = vpack.c.bf16 %v4998_v41, %v4998_v41 }
 0x1ad   : > { %4599 = vmatmul.msk.bf16.gmra.mxu0 %vm822_vm0, %v810_v1  ;;  %4615 = vmatmul.msk.bf16.gmra.mxu1 %vm822_vm0, %v810_v1  ;;  %v634_v1 = vpack.c.bf16 %v4979_v47, %v4979_v47 }
 0x1ae   : > { %4639 = vmatmul.msk.bf16.gmra.mxu2 %vm822_vm0, %v1127_v2  ;;  %4655 = vmatmul.msk.bf16.gmra.mxu3 %vm822_vm0, %v1127_v2  ;;  %v1128_v55 = vpack.c.b16 %v1112_v27, %v1111_v23 }
 0x1af   : > { %v794_v2 = vunpack.c.l.b16 %v634_v1  ;;  %v5001_v1 = vunpack.i.h.bf16 %v5999_v25 }
 0x1b1   : > { %v6041_v42 = vpop.f32.mrf.mxu2  ;;  %v6043_v38 = vpop.f32.mrf.mxu3  ;;  %v811_v8 = vpack.c.b16 %v795_v58, %v794_v2 }
 0x1b2   : > { %v6035_v52 = vpop.f32.mrf.mxu0  ;;  %v6037_v53 = vpop.f32.mrf.mxu1  ;;  %9350 = vst [vmem:[#allocation45_spill] sm:$0xff] %v6041_v42  ;;  %v1398_v42 = vunpack.c.l.b16 %v669_v7  ;;  %v670_v7 = vpack.c.bf16 %v5003_v44, %v5003_v44 }
 0x1b3   : > { %9349 = vst [vmem:[#allocation44_spill] sm:$0xff] %v6037_v53  ;;  %v6051_v47 = vpop.trf.xlu2 }
 0x1b4   : > { %9351 = vst [vmem:[#allocation46_spill] sm:$0xff] %v6043_v38 }
 0x1b9   : > { %v6059_v58 = vpop.f32.mrf.mxu2  ;;  %v6065_v6 = vpop.f32.mrf.mxu3 }
 0x1ba   : > { %v6045_v63 = vpop.f32.mrf.mxu0  ;;  %v6047_v13 = vpop.f32.mrf.mxu1  ;;  %9354 = vst [vmem:[#allocation49_spill] sm:$0xff] %v6059_v58 }
 0x1bb   : > { %9352 = vst [vmem:[#allocation47_spill] sm:$0xff] %v6045_v63  ;;  %v6067_v2 = vpop.trf.xlu2 }
 0x1bc   : > { %9353 = vst [vmem:[#allocation48_spill] sm:$0xff] %v6047_v13 }
 0x1bd   : > { %4600 = vmatmul.msk.bf16.gmra.mxu0 %vm822_vm0, %v811_v8  ;;  %4616 = vmatmul.msk.bf16.gmra.mxu1 %vm822_vm0, %v811_v8  ;;  %v668_v8 = vpack.c.bf16 %v4993_v39, %v4993_v39  ;;  %9356 = vst [vmem:[#allocation51_spill] sm:$0xff] %v6065_v6 }
 0x1be   : > { %4640 = vmatmul.msk.bf16.gmra.mxu2 %vm822_vm0, %v1128_v55  ;;  %4656 = vmatmul.msk.bf16.gmra.mxu3 %vm822_vm0, %v1128_v55  ;;  %v701_v55 = vpack.c.bf16 %v5001_v1, %v5001_v1  ;;  %v5008_v1 = vunpack.i.l.bf16 %v6025_v16 }
 0x1bf   : > { %v1397_v38 = vunpack.c.l.b16 %v668_v8 }
 0x1c0   : > { %v1714_v51 = vunpack.c.l.b16 %v701_v55 }
 0x1c1   : > { %v1429_v58 = vpack.c.b16 %v1398_v42, %v1397_v38  ;;  %v6073_v29 = vpop.f32.mrf.mxu2  ;;  %v6075_v39 = vpop.f32.mrf.mxu3  ;;  %v5006_v38 = vunpack.i.h.bf16 %v6015_v43 }
 0x1c2   : > { %v6061_v27 = vpop.f32.mrf.mxu0  ;;  %v6063_v23 = vpop.f32.mrf.mxu1  ;;  %9358 = vst [vmem:[#allocation53_spill] sm:$0xff] %v6073_v29  ;;  %v1745_v35 = vpack.c.b16 %v1714_v51, %v1713_v54  ;;  %v5011_v54 = vunpack.i.h.bf16 %v6025_v16 }
 0x1c3   : > { %9355 = vst [vmem:[#allocation50_spill] sm:$0xff] %v6063_v23  ;;  %v6079_v41 = vpop.trf.xlu2  ;;  %v702_v17 = vpack.c.bf16 %v5006_v38, %v5006_v38  ;;  %v5013_v38 = vunpack.i.l.bf16 %v6039_v3 }
 0x1c4   : > { %9359 = vst [vmem:[#allocation54_spill] sm:$0xff] %v6075_v39  ;;  %v703_v55 = vpack.c.bf16 %v5011_v54, %v5011_v54  ;;  %v5018_v54 = vunpack.i.l.bf16 %v6051_v47 }
 0x1c6   : > { %v1716_v43 = vunpack.c.l.b16 %v703_v55  ;;  %v673_v55 = vpack.c.bf16 %v5018_v54, %v5018_v54  ;;  %v5023_v54 = vunpack.i.l.bf16 %v6067_v2 }
 0x1c9   : > { %v6091_v51 = vpop.f32.mrf.mxu2  ;;  %v6095_v29 = vpop.f32.mrf.mxu3 }
 0x1ca   : > { %v6069_v30 = vpop.f32.mrf.mxu0  ;;  %v6071_v25 = vpop.f32.mrf.mxu1  ;;  %9361 = vst [vmem:[#allocation56_spill] sm:$0xff] %v6091_v51 }
 0x1cb   : > { %9357 = vst [vmem:[#allocation52_spill] sm:$0xff] %v6071_v25  ;;  %v6093_v39 = vpop.trf.xlu2  ;;  %v1715_v25 = vunpack.c.l.b16 %v702_v17  ;;  %v672_v17 = vpack.c.bf16 %v5013_v38, %v5013_v38 }
 0x1cc   : > { %9362 = vst [vmem:[#allocation57_spill] sm:$0xff] %v6095_v29  ;;  %v1402_v29 = vunpack.c.l.b16 %v673_v55 }
 0x1cd   : > { %4665 = vmatmul.msk.bf16.vlgmr.msrb.gmra.mxu0 %vm822_vm0, %v1429_v58  ;;  %4681 = vmatmul.msk.bf16.vlgmr.msrb.gmra.mxu1 %vm822_vm0, %v1429_v58  ;;  %v671_v58 = vpack.c.bf16 %v5008_v1, %v5008_v1 }
 0x1ce   : > { %4705 = vmatmul.msk.bf16.vlgmr.msrb.gmra.mxu2 %vm822_vm0, %v1745_v35  ;;  %4721 = vmatmul.msk.bf16.vlgmr.msrb.gmra.mxu3 %vm822_vm0, %v1745_v35  ;;  %v1399_v35 = vunpack.c.l.b16 %v670_v7  ;;  %v5016_v7 = vunpack.i.h.bf16 %v6039_v3 }
 0x1cf   : > { %v1400_v6 = vunpack.c.l.b16 %v671_v58 }
 0x1d1   : > { %v1430_v59 = vpack.c.b16 %v1400_v6, %v1399_v35  ;;  %v6107_v1 = vpop.f32.mrf.mxu2  ;;  %v5021_v6 = vunpack.i.h.bf16 %v6051_v47  ;;  %v704_v35 = vpack.c.bf16 %v5016_v7, %v5016_v7  ;;  %v5028_v7 = vunpack.i.l.bf16 %v6079_v41 }
 0x1d2   : > { %v6087_v42 = vpop.f32.mrf.mxu0  ;;  %v6089_v8 = vpop.f32.mrf.mxu1  ;;  %9364 = vst [vmem:[#allocation59_spill] sm:$0xff] %v6107_v1  ;;  %v1401_v1 = vunpack.c.l.b16 %v672_v17  ;;  %v5031_v17 = vunpack.i.h.bf16 %v6079_v41 }
 0x1d3   : > { %9360 = vst [vmem:[#allocation55_spill] sm:$0xff] %v6089_v8  ;;  %v1746_v8 = vpack.c.b16 %v1716_v43, %v1715_v25  ;;  %v6103_v44 = vpop.trf.xlu2  ;;  %v6113_v25 = vpop.f32.mrf.mxu3  ;;  %v1717_v51 = vunpack.c.l.b16 %v704_v35 }
 0x1d4   : > { %9365 = vst [vmem:[#allocation60_spill] sm:$0xff] %v6113_v25  ;;  %v1431_v60 = vpack.c.b16 %v1402_v29, %v1401_v1  ;;  %v707_v35 = vpack.c.bf16 %v5031_v17, %v5031_v17  ;;  %v5033_v17 = vunpack.i.l.bf16 %v6093_v39 }
 0x1d9   : > { %v6121_v23 = vpop.f32.mrf.mxu2 }
 0x1da   : > { %v6097_v34 = vpop.f32.mrf.mxu0  ;;  %v6099_v16 = vpop.f32.mrf.mxu1  ;;  %9367 = vst [vmem:[#allocation62_spill] sm:$0xff] %v6121_v23 }
 0x1db   : > { %9363 = vst [vmem:[#allocation58_spill] sm:$0xff] %v6099_v16  ;;  %v6119_v43 = vpop.trf.xlu2  ;;  %v6127_v25 = vpop.f32.mrf.mxu3 }
 0x1dc   : > { %9369 = vst [vmem:[#allocation64_spill] sm:$0xff] %v6127_v25 }
 0x1dd   : > { %4666 = vmatmul.msk.bf16.gmra.mxu0 %vm822_vm0, %v1430_v59  ;;  %4682 = vmatmul.msk.bf16.gmra.mxu1 %vm822_vm0, %v1430_v59 }
 0x1de   : > { %4706 = vmatmul.msk.bf16.gmra.mxu2 %vm822_vm0, %v1746_v8  ;;  %4722 = vmatmul.msk.bf16.gmra.mxu3 %vm822_vm0, %v1746_v8  ;;  %v705_v8 = vpack.c.bf16 %v5021_v6, %v5021_v6  ;;  %v5026_v6 = vunpack.i.h.bf16 %v6067_v2  ;;  %v1720_v2 = vunpack.c.l.b16 %v707_v35 }
 0x1e0   : > { %v1718_v16 = vunpack.c.l.b16 %v705_v8  ;;  %v706_v55 = vpack.c.bf16 %v5026_v6, %v5026_v6 }
 0x1e1   : > { %v6143_v1 = vpop.f32.mrf.mxu2 }
 0x1e2   : > { %v6115_v58 = vpop.f32.mrf.mxu0  ;;  %v6117_v59 = vpop.f32.mrf.mxu1  ;;  %9371 = vst [vmem:[#allocation66_spill] sm:$0xff] %v6143_v1 }
 0x1e3   : > { %9366 = vst [vmem:[#allocation61_spill] sm:$0xff] %v6117_v59  ;;  %v1747_v59 = vpack.c.b16 %v1718_v16, %v1717_v51  ;;  %v6131_v38 = vpop.trf.xlu2  ;;  %v674_v16 = vpack.c.bf16 %v5023_v54, %v5023_v54  ;;  %v6145_v8 = vpop.f32.mrf.mxu3 }
 0x1e4   : > { %9372 = vst [vmem:[#allocation67_spill] sm:$0xff] %v6145_v8 }
 0x1e5   : > { %v1403_v25 = vunpack.c.l.b16 %v674_v16  ;;  %v5038_v16 = vunpack.i.l.bf16 %v6103_v44 }
 0x1ea   : > { %v6123_v3 = vpop.f32.mrf.mxu0  ;;  %v6125_v47 = vpop.f32.mrf.mxu1 }
 0x1eb   : > { %9368 = vst [vmem:[#allocation63_spill] sm:$0xff] %v6125_v47  ;;  %v1719_v47 = vunpack.c.l.b16 %v706_v55  ;;  %v6161_v6 = vpop.f32.mrf.mxu3 }
 0x1ec   : > { %9375 = vst [vmem:[#allocation70_spill] sm:$0xff] %v6161_v6 }
 0x1ed   : > { %4667 = vmatmul.msk.bf16.gmra.mxu0 %vm822_vm0, %v1431_v60  ;;  %4683 = vmatmul.msk.bf16.gmra.mxu1 %vm822_vm0, %v1431_v60  ;;  %v675_v60 = vpack.c.bf16 %v5028_v7, %v5028_v7  ;;  %v6157_v7 = vpop.f32.mrf.mxu2 }
 0x1ee   : > { %4707 = vmatmul.msk.bf16.gmra.mxu2 %vm822_vm0, %v1747_v59  ;;  %4723 = vmatmul.msk.bf16.gmra.mxu3 %vm822_vm0, %v1747_v59  ;;  %v6147_v59 = vpop.trf.xlu2  ;;  %9374 = vst [vmem:[#allocation69_spill] sm:$0xff] %v6157_v7 }
 0x1ef   : > { %v1404_v23 = vunpack.c.l.b16 %v675_v60  ;;  %v677_v60 = vpack.c.bf16 %v5038_v16, %v5038_v16 }
 0x1f1   : > { %v1432_v13 = vpack.c.b16 %v1404_v23, %v1403_v25  ;;  %v5036_v23 = vunpack.i.h.bf16 %v6093_v39  ;;  %v5041_v25 = vunpack.i.h.bf16 %v6103_v44  ;;  %v1406_v8 = vunpack.c.l.b16 %v677_v60 }
 0x1f2   : > { %v6139_v29 = vpop.f32.mrf.mxu0  ;;  %v6141_v51 = vpop.f32.mrf.mxu1 }
 0x1f3   : > { %9370 = vst [vmem:[#allocation65_spill] sm:$0xff] %v6141_v51  ;;  %v1748_v51 = vpack.c.b16 %v1720_v2, %v1719_v47  ;;  %v708_v55 = vpack.c.bf16 %v5036_v23, %v5036_v23  ;;  %v709_v35 = vpack.c.bf16 %v5041_v25, %v5041_v25  ;;  %v6178_v45 = vpop.f32.mrf.mxu3 }
 0x1f4   : > { %9378 = vst [vmem:[#allocation73_spill] sm:$0xff] %v6178_v45 }
 0x1f5   : > { %v6175_v1 = vpop.f32.mrf.mxu2  ;;  %v1721_v39 = vunpack.c.l.b16 %v708_v55 }
 0x1f6   : > { %v6155_v54 = vpop.trf.xlu2  ;;  %9377 = vst [vmem:[#allocation72_spill] sm:$0xff] %v6175_v1  ;;  %v6206_v1 = vpop.trf.xlu0 }
 0x1fa   : > { %v6149_v48 = vpop.f32.mrf.mxu0  ;;  %v6151_v41 = vpop.f32.mrf.mxu1 }
 0x1fb   : > { %9373 = vst [vmem:[#allocation68_spill] sm:$0xff] %v6151_v41  ;;  %v1722_v41 = vunpack.c.l.b16 %v709_v35  ;;  %v5043_v35 = vunpack.i.l.bf16 %v6119_v43 }
 0x1fd   : > { %4668 = vmatmul.msk.bf16.gmra.mxu0 %vm822_vm0, %v1432_v13  ;;  %4684 = vmatmul.msk.bf16.gmra.mxu1 %vm822_vm0, %v1432_v13  ;;  %v676_v13 = vpack.c.bf16 %v5033_v17, %v5033_v17  ;;  %v1749_v25 = vpack.c.b16 %v1722_v41, %v1721_v39  ;;  %v5046_v41 = vunpack.i.h.bf16 %v6119_v43  ;;  %v6198_v39 = vpop.f32.mrf.mxu2 }
 0x1fe   : > { %4708 = vmatmul.msk.bf16.gmra.mxu2 %vm822_vm0, %v1748_v51  ;;  %4724 = vmatmul.msk.bf16.gmra.mxu3 %vm822_vm0, %v1748_v51  ;;  %v6171_v7 = vpop.trf.xlu2  ;;  %v1997_v51 = vmax.f32 %v5849_v10, %v5867_v20  ;;  %9380 = vst [vmem:[#allocation75_spill] sm:$0xff] %v6198_v39 }
 0x1ff   : > { %v1405_v6 = vunpack.c.l.b16 %v676_v13 }
 0x200   : > { %v1998_v44 = vmax.f32 %v1997_v51, %v5877_v33 }
 0x201   : > { %v1433_v23 = vpack.c.b16 %v1406_v8, %v1405_v6  ;;  %v5048_v8 = vunpack.i.l.bf16 %v6131_v38  ;;  %v5051_v6 = vunpack.i.h.bf16 %v6131_v38 }
 0x202   : > { %v6167_v47 = vpop.f32.mrf.mxu0  ;;  %v6169_v2 = vpop.f32.mrf.mxu1  ;;  %v1999_v16 = vmax.f32 %v1998_v44, %v5895_v49 }
 0x203   : > { %9376 = vst [vmem:[#allocation71_spill] sm:$0xff] %v6169_v2  ;;  %v711_v45 = vpack.c.bf16 %v5051_v6, %v5051_v6 }
 0x204   : > { %v2000_v2 = vmax.f32 %v1999_v16, %v5905_v61 }
 0x205   : > { %v1724_v39 = vunpack.c.l.b16 %v711_v45  ;;  %v6217_v6 = vpop.f32.mrf.mxu2 }
 0x206   : > { %v6186_v13 = vpop.trf.xlu2  ;;  %v2001_v55 = vmax.f32 %v2000_v2, %v5927_v46  ;;  %v679_v2 = vpack.c.bf16 %v5048_v8, %v5048_v8  ;;  %v710_v46 = vpack.c.bf16 %v5046_v41, %v5046_v41 }
 0x208   : > { %v2002_v51 = vmax.f32 %v2001_v55, %v5937_v21  ;;  %v1408_v55 = vunpack.c.l.b16 %v679_v2  ;;  %v1723_v21 = vunpack.c.l.b16 %v710_v46 }
 0x20a   : > { %v6180_v17 = vpop.f32.mrf.mxu0  ;;  %v6188_v60 = vpop.f32.mrf.mxu1  ;;  %v2003_v16 = vmax.f32 %v2002_v51, %v5955_v56 }
 0x20b   : > { %9379 = vst [vmem:[#allocation74_spill] sm:$0xff] %v6188_v60 }
 0x20c   : > { %v2004_v61 = vmax.f32 %v2003_v16, %v5965_v9  ;;  %v1750_v16 = vpack.c.b16 %v1724_v39, %v1723_v21  ;;  %v5053_v39 = vunpack.i.l.bf16 %v6147_v59 }
 0x20d   : > { %4669 = vmatmul.msk.bf16.gmra.mxu0 %vm822_vm0, %v1433_v23  ;;  %4685 = vmatmul.msk.bf16.gmra.mxu1 %vm822_vm0, %v1433_v23  ;;  %v6203_v23 = vpop.f32.mrf.mxu3 }
 0x20e   : > { %4709 = vmatmul.msk.bf16.gmra.mxu2 %vm822_vm0, %v1749_v25  ;;  %4725 = vmatmul.msk.bf16.gmra.mxu3 %vm822_vm0, %v1749_v25  ;;  %9381 = vst [vmem:[#allocation76_spill] sm:$0xff] %v6203_v23  ;;  %v678_v25 = vpack.c.bf16 %v5043_v35, %v5043_v35  ;;  %v2005_v43 = vmax.f32 %v2004_v61, %v5983_v28 }
 0x20f   : > { %v2034_v35 = vmax.f32 %v5851_v11, %v5869_v22  ;;  %v6245_v11 = vpop.f32.mrf.mxu2 }
 0x210   : > { %v1407_v38 = vunpack.c.l.b16 %v678_v25  ;;  %v2006_v51 = vmax.f32 %v2005_v43, %v5991_v0  ;;  %v6225_v25 = vpop.trf.xlu0  ;;  %v5058_v43 = vunpack.i.l.bf16 %v6155_v54 }
 0x211   : > { %v2035_v61 = vmax.f32 %v2034_v35, %v5879_v36 }
 0x212   : > { %v6200_v44 = vpop.f32.mrf.mxu0  ;;  %v6209_v49 = vpop.f32.mrf.mxu1  ;;  %v2007_v8 = vmax.f32 %v2006_v51, %v6007_v24  ;;  %v1434_v41 = vpack.c.b16 %v1408_v55, %v1407_v38  ;;  %v5056_v38 = vunpack.i.h.bf16 %v6147_v59  ;;  %v5061_v55 = vunpack.i.h.bf16 %v6155_v54 }
 0x213   : > { %v2036_v2 = vmax.f32 %v2035_v61, %v5897_v50  ;;  %v681_v50 = vpack.c.bf16 %v5058_v43, %v5058_v43 }
 0x214   : > { %v2008_v46 = vmax.f32 %v2007_v8, %v6017_v5  ;;  %v712_v36 = vpack.c.bf16 %v5056_v38, %v5056_v38  ;;  %v713_v22 = vpack.c.bf16 %v5061_v55, %v5061_v55 }
 0x215   : > { %v6221_v45 = vpop.f32.mrf.mxu3  ;;  %v2037_v51 = vmax.f32 %v2036_v2, %v5907_v62 }
 0x216   : > { %v2009_v21 = vmax.f32 %v2008_v46, %v6035_v52  ;;  %v680_v46 = vpack.c.bf16 %v5053_v39, %v5053_v39 }
 0x218   : > { %v2010_v35 = vmax.f32 %v2009_v21, %v6045_v63  ;;  %v1409_v63 = vunpack.c.l.b16 %v680_v46  ;;  %v6269_v46 = vpop.f32.mrf.mxu2 }
 0x21a   : > { %v6212_v56 = vpop.f32.mrf.mxu0  ;;  %v6237_v8 = vpop.f32.mrf.mxu1  ;;  %v2011_v61 = vmax.f32 %v2010_v35, %v6061_v27  ;;  %v1726_v35 = vunpack.c.l.b16 %v713_v22 }
 0x21c   : > { %v2012_v54 = vmax.f32 %v2011_v61, %v6069_v30 }
 0x21d   : > { %4670 = vmatmul.msk.bf16.gmra.mxu0 %vm822_vm0, %v1434_v41  ;;  %4686 = vmatmul.msk.bf16.gmra.mxu1 %vm822_vm0, %v1434_v41  ;;  %v6249_v62 = vpop.f32.mrf.mxu3 }
 0x21e   : > { %4710 = vmatmul.msk.bf16.gmra.mxu2 %vm822_vm0, %v1750_v16  ;;  %4726 = vmatmul.msk.bf16.gmra.mxu3 %vm822_vm0, %v1750_v16  ;;  %v2038_v16 = vmax.f32 %v2037_v51, %v5929_v15  ;;  %v2013_v21 = vmax.f32 %v2012_v54, %v6087_v42  ;;  %9382 = vst [vmem:[#allocation77_spill] sm:$0xff] %v6249_v62  ;;  %v1410_v51 = vunpack.c.l.b16 %v681_v50  ;;  %v1725_v15 = vunpack.c.l.b16 %v712_v36 }
 0x220   : > { %v2039_v59 = vmax.f32 %v2038_v16, %v5939_v37  ;;  %v2014_v43 = vmax.f32 %v2013_v21, %v6097_v34  ;;  %v1435_v61 = vpack.c.b16 %v1410_v51, %v1409_v63  ;;  %v1751_v54 = vpack.c.b16 %v1726_v35, %v1725_v15 }
 0x221   : > { %v5063_v63 = vunpack.i.l.bf16 %v6171_v7  ;;  %v5068_v15 = vunpack.i.l.bf16 %v6186_v13  ;;  %v5071_v21 = vunpack.i.h.bf16 %v6186_v13  ;;  %v9387_v13 = vld [vmem:[#allocation9_spill] sm:$0xff] }
 0x222   : > { %v6239_v41 = vpop.f32.mrf.mxu0  ;;  %v2040_v2 = vmax.f32 %v2039_v59, %v5957_v57  ;;  %v2015_v16 = vmax.f32 %v2014_v43, %v6115_v58  ;;  %v6257_v59 = vpop.f32.mrf.mxu1 }
 0x223   : > { %9384 = vst [vmem:[#allocation79_spill] sm:$0xff] %v6257_v59 }
 0x224   : > { %v2041_v39 = vmax.f32 %v2040_v2, %v5967_v12  ;;  %v2016_v50 = vmax.f32 %v2015_v16, %v6123_v3  ;;  %v5066_v2 = vunpack.i.h.bf16 %v6171_v7  ;;  %v2108_v7 = vmax.f32 %v5865_v19, %v5875_v32  ;;  %v9392_v19 = vld [vmem:[#allocation14_spill] sm:$0xff] }
 0x226   : > { %v2042_v55 = vmax.f32 %v2041_v39, %v5985_v14  ;;  %v2017_v36 = vmax.f32 %v2016_v50, %v6139_v29  ;;  %v6275_v39 = vpop.f32.mrf.mxu3  ;;  %v9390_v14 = vld [vmem:[#allocation13_spill] sm:$0xff] }
 0x227   : > { %9385 = vst [vmem:[#allocation80_spill] sm:$0xff] %v6275_v39 }
 0x228   : > { %v2043_v57 = vmax.f32 %v2042_v55, %v5993_v4  ;;  %v2018_v35 = vmax.f32 %v2017_v36, %v6149_v48  ;;  %v715_v36 = vpack.c.bf16 %v5071_v21, %v5071_v21 }
 0x22a   : > { %v6253_v38 = vpop.f32.mrf.mxu0  ;;  %v2044_v22 = vmax.f32 %v2043_v57, %v6009_v26  ;;  %v2071_v57 = vmax.f32 %v5863_v18, %v5873_v31  ;;  %v2019_v16 = vmax.f32 %v2018_v35, %v6167_v47  ;;  %v9389_v31 = vld [vmem:[#allocation10_spill] sm:$0xff]  ;;  %v1728_v21 = vunpack.c.l.b16 %v715_v36 }
 0x22b   : > { %9383 = vst [vmem:[#allocation78_spill] sm:$0xff] %v6253_v38  ;;  %v2109_v18 = vmax.f32 %v2108_v7, %v9389_v31  ;;  %v9391_v35 = vld [vmem:[#allocation50_spill] sm:$0xff] }
 0x22c   : > { %v2045_v51 = vmax.f32 %v2044_v22, %v6019_v40  ;;  %v2072_v50 = vmax.f32 %v2071_v57, %v9387_v13  ;;  %v714_v22 = vpack.c.bf16 %v5066_v2, %v5066_v2  ;;  %v9388_v40 = vld [vmem:[#allocation48_spill] sm:$0xff]  ;;  %v2020_v4 = vmax.f32 %v2019_v16, %v6180_v17  ;;  %v9393_v13 = vld [vmem:[#allocation17_spill] sm:$0xff]  ;;  %v9395_v31 = vld [vmem:[#allocation18_spill] sm:$0xff] }
 0x22d   : > { %4671 = vmatmul.msk.bf16.gmra.mxu0 %vm822_vm0, %v1435_v61  ;;  %4687 = vmatmul.msk.bf16.gmra.mxu1 %vm822_vm0, %v1435_v61  ;;  %v682_v61 = vpack.c.bf16 %v5063_v63, %v5063_v63  ;;  %v2110_v57 = vmax.f32 %v2109_v18, %v9392_v19  ;;  %v9400_v19 = vld [vmem:[#allocation25_spill] sm:$0xff] }
 0x22e   : > { %4711 = vmatmul.msk.bf16.gmra.mxu2 %vm822_vm0, %v1751_v54  ;;  %4727 = vmatmul.msk.bf16.gmra.mxu3 %vm822_vm0, %v1751_v54  ;;  %v2046_v55 = vmax.f32 %v2045_v51, %v6037_v53  ;;  %v683_v54 = vpack.c.bf16 %v5068_v15, %v5068_v15  ;;  %v2073_v12 = vmax.f32 %v2072_v50, %v9390_v14  ;;  %v6290_v51 = vpop.f32.mrf.mxu1  ;;  %v1727_v2 = vunpack.c.l.b16 %v714_v22  ;;  %v6299_v14 = vpop.f32.mrf.mxu2 }
 0x22f   : > { %v2021_v15 = vmax.f32 %v2020_v4, %v6200_v44  ;;  %v1411_v53 = vunpack.c.l.b16 %v682_v61  ;;  %v2111_v50 = vmax.f32 %v2110_v57, %v9395_v31  ;;  %v9398_v61 = vld [vmem:[#allocation55_spill] sm:$0xff] }
 0x230   : > { %v2047_v26 = vmax.f32 %v2046_v55, %v9388_v40  ;;  %v1412_v32 = vunpack.c.l.b16 %v683_v54  ;;  %v2074_v55 = vmax.f32 %v2073_v12, %v9393_v13  ;;  %v9394_v40 = vld [vmem:[#allocation52_spill] sm:$0xff]  ;;  %v9399_v12 = vld [vmem:[#allocation22_spill] sm:$0xff] }
 0x231   : > { %v2022_v7 = vmax.f32 %v2021_v15, %v6212_v56  ;;  %v2112_v36 = vmax.f32 %v2111_v50, %v9399_v12  ;;  %v9401_v13 = vld [vmem:[#allocation58_spill] sm:$0xff] }
 0x232   : > { %v6279_v43 = vpop.f32.mrf.mxu0  ;;  %v2048_v63 = vmax.f32 %v2047_v26, %v9391_v35  ;;  %v9397_v26 = vld [vmem:[#allocation21_spill] sm:$0xff]  ;;  %v6305_v35 = vpop.f32.mrf.mxu3  ;;  %v1436_v22 = vpack.c.b16 %v1412_v32, %v1411_v53  ;;  %v9405_v50 = vld [vmem:[#allocation30_spill] sm:$0xff] }
 0x233   : > { %9386 = vst [vmem:[#allocation81_spill] sm:$0xff] %v6279_v43  ;;  %v2075_v4 = vmax.f32 %v2074_v55, %v9397_v26  ;;  %v2023_v18 = vmax.f32 %v2022_v7, %v6239_v41  ;;  %v9402_v55 = vld [vmem:[#allocation26_spill] sm:$0xff]  ;;  %v9403_v32 = vld [vmem:[#allocation29_spill] sm:$0xff] }
 0x234   : > { %v2049_v16 = vmax.f32 %v2048_v63, %v9394_v40  ;;  %v1752_v63 = vpack.c.b16 %v1728_v21, %v1727_v2  ;;  %v9404_v7 = vld [vmem:[#allocation61_spill] sm:$0xff]  ;;  %v9417_v40 = vld [vmem:[#allocation42_spill] sm:$0xff] }
 0x235   : > { %v2076_v15 = vmax.f32 %v2075_v4, %v9400_v19  ;;  %v2024_v31 = vmax.f32 %v2023_v18, %v6253_v38  ;;  %v9407_v18 = vld [vmem:[#allocation32_spill] sm:$0xff]  ;;  %v9408_v19 = vld [vmem:[#allocation63_spill] sm:$0xff] }
 0x236   : > { %v2050_v54 = vmax.f32 %v2049_v16, %v9398_v61  ;;  %v2113_v16 = vmax.f32 %v2112_v36, %v9402_v55  ;;  %v9409_v55 = vld [vmem:[#allocation33_spill] sm:$0xff]  ;;  %v9414_v61 = vld [vmem:[#allocation39_spill] sm:$0xff] }
 0x237   : > { %v2077_v53 = vmax.f32 %v2076_v15, %v9403_v32  ;;  %v2025_v21 = vmax.f32 %v2024_v31, %v6279_v43  ;;  %v9412_v32 = vld [vmem:[#allocation65_spill] sm:$0xff] }
 0x238   : > { %v2051_v57 = vmax.f32 %v2050_v54, %v9401_v13  ;;  %v2114_v4 = vmax.f32 %v2113_v16, %v9405_v50  ;;  %v6321_v54 = vpop.f32.mrf.mxu1  ;;  %v6333_v50 = vpop.f32.mrf.mxu2 }
 0x239   : > { %9406 = vst [vmem:[#allocation83_spill] sm:$0xff] %v6321_v54  ;;  %v2078_v12 = vmax.f32 %v2077_v53, %v9407_v18  ;;  %v9415_v18 = vld [vmem:[#allocation68_spill] sm:$0xff] }
 0x23a   : > { %v6301_v37 = vpop.f32.mrf.mxu0  ;;  %v2052_v2 = vmax.f32 %v2051_v57, %v9404_v7  ;;  %v2115_v26 = vmax.f32 %v2114_v4, %v9409_v55  ;;  %v9413_v7 = vld [vmem:[#allocation37_spill] sm:$0xff]  ;;  %v9416_v4 = vld [vmem:[#allocation40_spill] sm:$0xff] }
 0x23b   : > { %9396 = vst [vmem:[#allocation82_spill] sm:$0xff] %v6301_v37  ;;  %v2026_v36 = vmax.f32 %v2025_v21, %v6301_v37 }
 0x23c   : > { %v2116_v16 = vmax.f32 %v2115_v26, %v9413_v7 }
 0x23d   : > { %4672 = vmatmul.msk.bf16.gmra.mxu0 %vm822_vm0, %v1436_v22  ;;  %4688 = vmatmul.msk.bf16.gmra.mxu1 %vm822_vm0, %v1436_v22  ;;  %v2053_v22 = vmax.f32 %v2052_v2, %v9408_v19  ;;  %v6337_v19 = vpop.f32.mrf.mxu3 }
 0x23e   : > { %4712 = vmatmul.msk.bf16.gmra.mxu2 %vm822_vm0, %v1752_v63  ;;  %4728 = vmatmul.msk.bf16.gmra.mxu3 %vm822_vm0, %v1752_v63  ;;  %v9411_v63 = vld [vmem:[#allocation35_spill] sm:$0xff]  ;;  %v2117_v55 = vmax.f32 %v2116_v16, %v9416_v4 }
 0x23f   : > { %v2079_v15 = vmax.f32 %v2078_v12, %v9411_v63  ;;  %v2054_v57 = vmax.f32 %v2053_v22, %v9412_v32  ;;  %v9418_v12 = vld [vmem:[#allocation71_spill] sm:$0xff] }
 0x240   : > { %v9419_v32 = vld [vmem:[#allocation43_spill] sm:$0xff] }
 0x241   : > { %v2080_v53 = vmax.f32 %v2079_v15, %v9414_v61  ;;  %v2055_v2 = vmax.f32 %v2054_v57, %v9415_v18  ;;  %v9421_v15 = vld [vmem:[#allocation46_spill] sm:$0xff]  ;;  %v6346_v57 = vpop.f32.mrf.mxu1  ;;  %v9423_v18 = vld [vmem:[#allocation49_spill] sm:$0xff] }
 0x242   : > { %v6327_v13 = vpop.f32.mrf.mxu0  ;;  %9422 = vst [vmem:[#allocation71_spill] sm:$0xff] %v6346_v57 }
 0x243   : > { %9410 = vst [vmem:[#allocation84_spill] sm:$0xff] %v6327_v13  ;;  %v2027_v31 = vmax.f32 %v2026_v36, %v6327_v13  ;;  %v2081_v37 = vmax.f32 %v2080_v53, %v9417_v40  ;;  %v2056_v63 = vmax.f32 %v2055_v2, %v9418_v12  ;;  %v2118_v36 = vmax.f32 %v2117_v55, %v9419_v32  ;;  %v9420_v13 = vld [vmem:[#allocation45_spill] sm:$0xff]  ;;  %v9424_v53 = vld [vmem:[#allocation51_spill] sm:$0xff] }
 0x244   : > { %v9425_v2 = vld [vmem:[#allocation53_spill] sm:$0xff] }
 0x245   : > { %v2028_v21 = vrot.slane %v2027_v31, 4  ;;  %v2082_v26 = vmax.f32 %v2081_v37, %v9420_v13  ;;  %v2057_v7 = vmax.f32 %v2056_v63, %v6188_v60  ;;  %v2119_v61 = vmax.f32 %v2118_v36, %v9421_v15  ;;  %v9426_v37 = vld [vmem:[#allocation54_spill] sm:$0xff]  ;;  %v6354_v63 = vpop.f32.mrf.mxu2  ;;  %v9427_v13 = vld [vmem:[#allocation56_spill] sm:$0xff]  ;;  %v6358_v60 = vpop.f32.mrf.mxu3 }
 0x247   : > { %v2029_v22 = vmax.f32 %v2027_v31, %v2028_v21  ;;  %v2083_v38 = vmax.f32 %v2082_v26, %v9423_v18  ;;  %v2058_v16 = vmax.f32 %v2057_v7, %v6209_v49  ;;  %v2120_v40 = vmax.f32 %v2119_v61, %v9424_v53  ;;  %v9428_v26 = vld [vmem:[#allocation57_spill] sm:$0xff]  ;;  %v9432_v18 = vld [vmem:[#allocation64_spill] sm:$0xff] }
 0x249   : > { %v2030_v43 = vrot.slane %v2029_v22, 2  ;;  %v2084_v31 = vmax.f32 %v2083_v38, %v9425_v2  ;;  %v2059_v55 = vmax.f32 %v2058_v16, %v6237_v8  ;;  %v2121_v32 = vmax.f32 %v2120_v40, %v9426_v37  ;;  %v9430_v16 = vld [vmem:[#allocation60_spill] sm:$0xff]  ;;  %v9431_v2 = vld [vmem:[#allocation62_spill] sm:$0xff] }
 0x24b   : > { %v2031_v4 = vmax.f32 %v2029_v22, %v2030_v43  ;;  %v2085_v36 = vmax.f32 %v2084_v31, %v9427_v13  ;;  %v2060_v15 = vmax.f32 %v2059_v55, %v6257_v59  ;;  %v2122_v7 = vmax.f32 %v2121_v32, %v9428_v26  ;;  %v9429_v43 = vld [vmem:[#allocation59_spill] sm:$0xff]  ;;  %v6369_v13 = vpop.f32.mrf.mxu1  ;;  %v9434_v55 = vld [vmem:[#allocation66_spill] sm:$0xff] }
 0x24c   : > { %9433 = vst [vmem:[#allocation85_spill] sm:$0xff] %v6369_v13 }
 0x24d   : > { %v2032_v21 = vrot.slane %v2031_v4, 1  ;;  %v2086_v22 = vmax.f32 %v2085_v36, %v9429_v43  ;;  %v2061_v61 = vmax.f32 %v2060_v15, %v6290_v51  ;;  %v2123_v53 = vmax.f32 %v2122_v7, %v9430_v16  ;;  %v9438_v16 = vld [vmem:[#allocation70_spill] sm:$0xff] }
 0x24f   : > { %v6363_v38 = vmax.f32 %v2031_v4, %v2032_v21  ;;  %v2087_v40 = vmax.f32 %v2086_v22, %v9431_v2  ;;  %v2062_v37 = vmax.f32 %v2061_v61, %v6321_v54  ;;  %v2124_v31 = vmax.f32 %v2123_v53, %v9432_v18  ;;  %v9435_v21 = vld [vmem:[#allocation67_spill] sm:$0xff]  ;;  %v9436_v22 = vld [vmem:[#allocation69_spill] sm:$0xff]  ;;  %v6382_v18 = vpop.f32.mrf.mxu2  ;;  %v6388_v2 = vpop.f32.mrf.mxu3 }
 0x251   : > { %v2088_v59 = vmax.f32 %v2087_v40, %v9434_v55  ;;  %v2063_v32 = vmax.f32 %v2062_v37, %v6346_v57  ;;  %v2293_v36 = vsub.f32 %v5849_v10, %v6363_v38  ;;  %v2295_v4 = vsub.f32 %v5867_v20, %v6363_v38  ;;  %v9437_v40 = vld [vmem:[#allocation11_spill] sm:$0xff]  ;;  %v9439_v10 = vld [vmem:[#allocation72_spill] sm:$0xff] }
 0x252   : > { %v2297_v15 = vsub.f32 %v5877_v33, %v6363_v38  ;;  %v2125_v7 = vmax.f32 %v2124_v31, %v9435_v21  ;;  %v2299_v37 = vsub.f32 %v9437_v40, %v6363_v38  ;;  %9440 = vst [vmem:[#allocation11_spill] sm:$0xff] %v6388_v2  ;;  %v9441_v33 = vld [vmem:[#allocation15_spill] sm:$0xff] }
 0x253   : > { %v2089_v61 = vmax.f32 %v2088_v59, %v9436_v22  ;;  %v2064_v53 = vmax.f32 %v2063_v32, %v6369_v13  ;;  %v2549_v20 = vmul.f32 1.442695, %v2293_v36  ;;  %v2553_v43 = vmul.f32 1.442695, %v2295_v4  ;;  %v9442_v59 = vld [vmem:[#allocation73_spill] sm:$0xff]  ;;  %v9443_v32 = vld [vmem:[#allocation75_spill] sm:$0xff] }
 0x254   : > { %v2126_v26 = vmax.f32 %v2125_v7, %v9438_v16  ;;  %v2301_v31 = vsub.f32 %v9441_v33, %v6363_v38  ;;  %v2557_v21 = vmul.f32 1.442695, %v2297_v15  ;;  %v9444_v40 = vld [vmem:[#allocation19_spill] sm:$0xff]  ;;  %v2561_v7 = vmul.f32 1.442695, %v2299_v37 }
 0x255   : > { %v2090_v55 = vmax.f32 %v2089_v61, %v9439_v10  ;;  %5156 = vpow2.f32 %v2549_v20  ;;  %v2065_v57 = vrot.slane %v2064_v53, 4  ;;  %v2303_v54 = vsub.f32 %v9444_v40, %v6363_v38  ;;  %v9445_v33 = vld [vmem:[#allocation23_spill] sm:$0xff] }
 0x256   : > { %v2127_v22 = vmax.f32 %v2126_v26, %v9442_v59  ;;  %5158 = vpow2.f32 %v2553_v43  ;;  %v5080_v4 = vunpack.i.h.bf16 %v6206_v1  ;;  %v2305_v15 = vsub.f32 %v9445_v33, %v6363_v38  ;;  %v9446_v43 = vld [vmem:[#allocation27_spill] sm:$0xff] }
 0x257   : > { %v2091_v13 = vmax.f32 %v2090_v55, %v9443_v32  ;;  %5160 = vpow2.f32 %v2557_v21  ;;  %v2565_v26 = vmul.f32 1.442695, %v2301_v31  ;;  %v2066_v59 = vmax.f32 %v2064_v53, %v2065_v57 }
 0x258   : > { %v2128_v61 = vmax.f32 %v2127_v22, %v6203_v23  ;;  %v5077_v40 = vunpack.i.l.bf16 %v6206_v1  ;;  %v2307_v37 = vsub.f32 %v9446_v43, %v6363_v38  ;;  %5162 = vpow2.f32 %v2561_v7 }
 0x259   : > { %v2092_v36 = vmax.f32 %v2091_v13, %v6217_v6  ;;  %v2569_v22 = vmul.f32 1.442695, %v2303_v54  ;;  %v6412_v31 = vpack.c.bf16 %v5080_v4, %v5080_v4  ;;  %v2309_v1 = vsub.f32 %v5965_v9, %v6363_v38  ;;  %v6419_v54 = vpop.f32.mrf.mxu3 }
 0x25a   : > { %v2129_v55 = vmax.f32 %v2128_v61, %v6221_v45  ;;  %v6414_v61 = vpop.f32.mrf.mxu2  ;;  %5164 = vpow2.f32 %v2565_v26  ;;  %v2573_v57 = vmul.f32 1.442695, %v2305_v15  ;;  %9449 = vst [vmem:[#allocation15_spill] sm:$0xff] %v6419_v54  ;;  %v5085_v7 = vunpack.i.h.bf16 %v6225_v25 }
 0x25b   : > { %v2093_v20 = vmax.f32 %v2092_v36, %v6245_v11  ;;  %v6406_v13 = vpop.eup %5156  ;;  %v6426_v4 = vpack.c.bf16 %v5077_v40, %v5077_v40  ;;  %v2311_v43 = vsub.f32 %v5983_v28, %v6363_v38  ;;  %5166 = vpow2.f32 %v2569_v22 }
 0x25c   : > { %9447 = vst [vmem:[#allocation70_spill] sm:$0xff] %v6406_v13  ;;  %v2130_v23 = vmax.f32 %v2129_v55, %v6249_v62  ;;  %v6410_v21 = vpop.eup %5158  ;;  %v2067_v55 = vrot.slane %v2066_v59, 2  ;;  %v2577_v9 = vmul.f32 1.442695, %v2307_v37  ;;  %v5082_v26 = vunpack.i.l.bf16 %v6225_v25 }
 0x25d   : > { %v2094_v33 = vmax.f32 %v2093_v20, %v6269_v46  ;;  %9448 = vst [vmem:[#allocation72_spill] sm:$0xff] %v6410_v21  ;;  %v3061_v36 = vadd.f32 %v6410_v21, %v6406_v13  ;;  %v6424_v20 = vpop.eup %5160  ;;  %v2313_v40 = vsub.f32 %v5991_v0, %v6363_v38  ;;  %5168 = vpow2.f32 %v2573_v57 }
 0x25e   : > { %v2131_v53 = vmax.f32 %v2130_v23, %v6275_v39  ;;  %9450 = vst [vmem:[#allocation75_spill] sm:$0xff] %v6424_v20  ;;  %v6434_v62 = vpop.eup %5162  ;;  %v2581_v13 = vmul.f32 1.442695, %v2309_v1  ;;  %v6440_v37 = vpack.c.bf16 %v5085_v7, %v5085_v7  ;;  %5170 = vpow2.f32 %v2577_v9 }
 0x25f   : > { %v2095_v15 = vmax.f32 %v2094_v33, %v6299_v14  ;;  %v3062_v39 = vadd.f32 %v6424_v20, %v3061_v36  ;;  %9451 = vst [vmem:[#allocation19_spill] sm:$0xff] %v6434_v62  ;;  %v2068_v33 = vmax.f32 %v2066_v59, %v2067_v55  ;;  %v2315_v36 = vsub.f32 %v6007_v24, %v6363_v38 }
 0x260   : > { %v2132_v23 = vmax.f32 %v2131_v53, %v6305_v35  ;;  %v6443_v53 = vpop.eup %5164  ;;  %v2585_v21 = vmul.f32 1.442695, %v2311_v43  ;;  %v6450_v57 = vpack.c.bf16 %v5082_v26, %v5082_v26  ;;  %v2317_v59 = vsub.f32 %v6017_v5, %v6363_v38 }
 0x261   : > { %v2096_v28 = vmax.f32 %v2095_v15, %v6333_v50  ;;  %v3063_v22 = vadd.f32 %v6434_v62, %v3062_v39  ;;  %9452 = vst [vmem:[#allocation23_spill] sm:$0xff] %v6443_v53  ;;  %v6453_v15 = vpop.eup %5166  ;;  %5172 = vpow2.f32 %v2581_v13  ;;  %v2589_v55 = vmul.f32 1.442695, %v2313_v40 }
 0x262   : > { %v2133_v25 = vmax.f32 %v2132_v23, %v6337_v19  ;;  %9453 = vst [vmem:[#allocation27_spill] sm:$0xff] %v6453_v15  ;;  %v2069_v23 = vrot.slane %v2068_v33, 1  ;;  %5174 = vpow2.f32 %v2585_v21  ;;  %v2593_v5 = vmul.f32 1.442695, %v2315_v36 }
 0x263   : > { %v2097_v0 = vmax.f32 %v2096_v28, %v6354_v63  ;;  %v3064_v7 = vadd.f32 %v6443_v53, %v3063_v22  ;;  %v6461_v26 = vpop.eup %5168  ;;  %v6464_v22 = vpop.f32.mrf.mxu2  ;;  %5176 = vpow2.f32 %v2589_v55  ;;  %v2597_v21 = vmul.f32 1.442695, %v2317_v59 }
 0x264   : > { %v2134_v39 = vmax.f32 %v2133_v25, %v6358_v60  ;;  %9454 = vst [vmem:[#allocation86_spill] sm:$0xff] %v6461_v26  ;;  %v2319_v25 = vsub.f32 %v6035_v52, %v6363_v38  ;;  %v6475_v62 = vpop.eup %5170  ;;  %v2323_v52 = vsub.f32 %v6061_v27, %v6363_v38  ;;  %v2327_v27 = vsub.f32 %v6087_v42, %v6363_v38 }
 0x265   : > { %v2098_v24 = vmax.f32 %v2097_v0, %v6382_v18  ;;  %v3065_v9 = vadd.f32 %v6453_v15, %v3064_v7  ;;  %v6470_v0 = vpop.f32.mrf.mxu3  ;;  %v9456_v7 = vld [vmem:[#allocation47_spill] sm:$0xff]  ;;  %5178 = vpow2.f32 %v2593_v5  ;;  %v2329_v55 = vsub.f32 %v6097_v34, %v6363_v38 }
 0x266   : > { %v2135_v28 = vmax.f32 %v2134_v39, %v6388_v2  ;;  %9455 = vst [vmem:[#allocation87_spill] sm:$0xff] %v6470_v0  ;;  %v2321_v43 = vsub.f32 %v9456_v7, %v6363_v38  ;;  %v6486_v7 = vmax.f32 %v2068_v33, %v2069_v23  ;;  %v2601_v59 = vmul.f32 1.442695, %v2319_v25 }
 0x267   : > { %v2099_v13 = vmax.f32 %v2098_v24, %v6414_v61  ;;  %v3066_v1 = vadd.f32 %v6461_v26, %v3065_v9  ;;  %9457 = vst [vmem:[#allocation47_spill] sm:$0xff] %v6475_v62  ;;  %v2325_v24 = vsub.f32 %v6069_v30, %v6363_v38  ;;  %v6488_v9 = vpop.eup %5172  ;;  %v2331_v30 = vsub.f32 %v6115_v58, %v6363_v38  ;;  %v9460_v58 = vld [vmem:[#allocation2_spill] sm:$0xff] }
 0x268   : > { %v2136_v39 = vmax.f32 %v2135_v28, %v6419_v54  ;;  %9458 = vst [vmem:[#allocation88_spill] sm:$0xff] %v6488_v9  ;;  %v2605_v28 = vmul.f32 1.442695, %v2321_v43  ;;  %v2333_v23 = vsub.f32 %v6123_v3, %v6363_v38  ;;  %5180 = vpow2.f32 %v2597_v21 }
 0x269   : > { %v6481_v36 = vmax.f32 %v2099_v13, %v6464_v22  ;;  %v3067_v40 = vadd.f32 %v6475_v62, %v3066_v1  ;;  %v6500_v1 = vpop.eup %5174  ;;  %v2335_v13 = vsub.f32 %v6139_v29, %v6363_v38  ;;  %v2609_v42 = vmul.f32 1.442695, %v2323_v52  ;;  %v9462_v29 = vld [vmem:[#allocation5_spill] sm:$0xff] }
 0x26a   : > { %v6491_v20 = vmax.f32 %v2136_v39, %v6470_v0  ;;  %9459 = vst [vmem:[#allocation89_spill] sm:$0xff] %v6500_v1  ;;  %v2337_v25 = vsub.f32 %v6149_v48, %v6363_v38  ;;  %v2613_v34 = vmul.f32 1.442695, %v2325_v24  ;;  %v2294_v43 = vsub.f32 %v9460_v58, %v6486_v7  ;;  %v9561_v0 = vld [vmem:[#allocation69_spill] sm:$0xff] }
 0x26b   : > { %v3068_v33 = vadd.f32 %v6488_v9, %v3067_v40  ;;  %v6511_v40 = vpop.eup %5176  ;;  %v2339_v39 = vsub.f32 %v6167_v47, %v6363_v38  ;;  %5182 = vpow2.f32 %v2601_v59  ;;  %v2617_v3 = vmul.f32 1.442695, %v2327_v27  ;;  %v9464_v47 = vld [vmem:[#allocation8_spill] sm:$0xff] }
 0x26c   : > { %9461 = vst [vmem:[#allocation2_spill] sm:$0xff] %v6511_v40  ;;  %v2296_v21 = vsub.f32 %v9462_v29, %v6486_v7  ;;  %v2341_v52 = vsub.f32 %v6180_v17, %v6363_v38  ;;  %5184 = vpow2.f32 %v2605_v28  ;;  %v2621_v48 = vmul.f32 1.442695, %v2329_v55  ;;  %v9467_v29 = vld [vmem:[#allocation78_spill] sm:$0xff] }
 0x26d   : > { %v3069_v5 = vadd.f32 %v6500_v1, %v3068_v33  ;;  %v6520_v33 = vpop.eup %5178  ;;  %v2343_v58 = vsub.f32 %v6200_v44, %v6363_v38  ;;  %5186 = vpow2.f32 %v2609_v42  ;;  %v2625_v15 = vmul.f32 1.442695, %v2331_v30  ;;  %v9466_v44 = vld [vmem:[#allocation12_spill] sm:$0xff] }
 0x26e   : > { %9463 = vst [vmem:[#allocation5_spill] sm:$0xff] %v6520_v33  ;;  %v2298_v27 = vsub.f32 %v9464_v47, %v6486_v7  ;;  %v2345_v59 = vsub.f32 %v6212_v56, %v6363_v38  ;;  %5188 = vpow2.f32 %v2613_v34  ;;  %v2551_v28 = vmul.f32 1.442695, %v2294_v43  ;;  %v6529_v55 = vpop.eup %5180  ;;  %v9469_v43 = vld [vmem:[#allocation81_spill] sm:$0xff] }
 0x26f   : > { %v3070_v24 = vadd.f32 %v6511_v40, %v3069_v5  ;;  %9465 = vst [vmem:[#allocation8_spill] sm:$0xff] %v6529_v55  ;;  %v2347_v5 = vsub.f32 %v6239_v41, %v6363_v38  ;;  %5190 = vpow2.f32 %v2617_v3  ;;  %v2300_v42 = vsub.f32 %v9466_v44, %v6486_v7  ;;  %v9470_v41 = vld [vmem:[#allocation16_spill] sm:$0xff] }
 0x270   : > { %v2555_v30 = vmul.f32 1.442695, %v2296_v21  ;;  %v2349_v47 = vsub.f32 %v9467_v29, %v6363_v38  ;;  %5192 = vpow2.f32 %v2621_v48  ;;  %v2629_v53 = vmul.f32 1.442695, %v2333_v23  ;;  %v9471_v21 = vld [vmem:[#allocation82_spill] sm:$0xff] }
 0x271   : > { %v3071_v17 = vadd.f32 %v6520_v33, %v3070_v24  ;;  %v6538_v34 = vpop.eup %5182  ;;  %v2351_v24 = vsub.f32 %v9469_v43, %v6363_v38  ;;  %5194 = vpow2.f32 %v2625_v15  ;;  %v2302_v3 = vsub.f32 %v9470_v41, %v6486_v7  ;;  %v9474_v15 = vld [vmem:[#allocation20_spill] sm:$0xff] }
 0x272   : > { %9468 = vst [vmem:[#allocation12_spill] sm:$0xff] %v6538_v34  ;;  %v2559_v62 = vmul.f32 1.442695, %v2298_v27  ;;  %v6544_v26 = vpop.eup %5184  ;;  %v2353_v44 = vsub.f32 %v9471_v21, %v6363_v38  ;;  %v2633_v29 = vmul.f32 1.442695, %v2335_v13  ;;  %5196 = vpow2.f32 %v2551_v28 }
 0x273   : > { %v3072_v56 = vadd.f32 %v6529_v55, %v3071_v17  ;;  %v6549_v48 = vpop.eup %5186  ;;  %v9473_v17 = vld [vmem:[#allocation84_spill] sm:$0xff]  ;;  %v2304_v43 = vsub.f32 %v9474_v15, %v6486_v7  ;;  %5198 = vpow2.f32 %v2555_v30  ;;  %v2563_v41 = vmul.f32 1.442695, %v2300_v42  ;;  %v9506_v55 = vld [vmem:[#allocation61_spill] sm:$0xff] }
 0x274   : > { %9472 = vst [vmem:[#allocation78_spill] sm:$0xff] %v6549_v48  ;;  %v2355_v1 = vsub.f32 %v9473_v17, %v6363_v38  ;;  %v6555_v27 = vpop.eup %5188  ;;  %5200 = vpow2.f32 %v2629_v53  ;;  %v2637_v9 = vmul.f32 1.442695, %v2337_v25  ;;  %v2641_v33 = vmul.f32 1.442695, %v2339_v39  ;;  %v9480_v39 = vld [vmem:[#allocation28_spill] sm:$0xff] }
 0x275   : > { %v3073_v23 = vadd.f32 %v6538_v34, %v3072_v56  ;;  %9475 = vst [vmem:[#allocation81_spill] sm:$0xff] %v6555_v27  ;;  %v6558_v21 = vpop.eup %5190  ;;  %v2645_v28 = vmul.f32 1.442695, %v2341_v52  ;;  %v9477_v56 = vld [vmem:[#allocation24_spill] sm:$0xff]  ;;  %5202 = vpow2.f32 %v2559_v62  ;;  %v2567_v38 = vmul.f32 1.442695, %v2302_v3 }
 0x276   : > { %9476 = vst [vmem:[#allocation16_spill] sm:$0xff] %v6558_v21  ;;  %v2306_v40 = vsub.f32 %v9477_v56, %v6486_v7  ;;  %v6562_v17 = vpop.eup %5192  ;;  %5204 = vpow2.f32 %v2633_v29  ;;  %v2649_v30 = vmul.f32 1.442695, %v2343_v58  ;;  %v2653_v42 = vmul.f32 1.442695, %v2345_v59  ;;  %v9482_v29 = vld [vmem:[#allocation31_spill] sm:$0xff]  ;;  %v6574_v59 = vpop.trf.xlu0 }
 0x277   : > { %v3074_v13 = vadd.f32 %v6544_v26, %v3073_v23  ;;  %9478 = vst [vmem:[#allocation82_spill] sm:$0xff] %v6562_v17  ;;  %v6565_v53 = vpop.eup %5194  ;;  %v2657_v25 = vmul.f32 1.442695, %v2347_v5  ;;  %v2308_v23 = vsub.f32 %v9480_v39, %v6486_v7  ;;  %5206 = vpow2.f32 %v2563_v41 }
 0x278   : > { %9479 = vst [vmem:[#allocation84_spill] sm:$0xff] %v6565_v53  ;;  %v2571_v52 = vmul.f32 1.442695, %v2304_v43  ;;  %v6569_v34 = vpop.eup %5196  ;;  %5208 = vpow2.f32 %v2637_v9  ;;  %v2661_v62 = vmul.f32 1.442695, %v2349_v47  ;;  %v2310_v58 = vsub.f32 %v9482_v29, %v6486_v7 }
 0x279   : > { %v3075_v15 = vadd.f32 %v6549_v48, %v3074_v13  ;;  %9481 = vst [vmem:[#allocation20_spill] sm:$0xff] %v6569_v34  ;;  %v6576_v13 = vpop.f32.mrf.mxu2  ;;  %v6578_v56 = vpop.eup %5198  ;;  %5210 = vpow2.f32 %v2567_v38  ;;  %v2575_v5 = vmul.f32 1.442695, %v2306_v40  ;;  %v2665_v43 = vmul.f32 1.442695, %v2351_v24 }
 0x27a   : > { %9483 = vst [vmem:[#allocation24_spill] sm:$0xff] %v6578_v56  ;;  %v6580_v39 = vpop.eup %5200  ;;  %5212 = vpow2.f32 %v2641_v33  ;;  %v3098_v47 = vadd.f32 %v6578_v56, %v6569_v34  ;;  %v2101_v38 = vmax.f32 %v6481_v36, %v6576_v13  ;;  %v2669_v33 = vmul.f32 1.442695, %v2353_v44  ;;  %v9489_v56 = vld [vmem:[#allocation36_spill] sm:$0xff] }
 0x27b   : > { %v3076_v3 = vadd.f32 %v6555_v27, %v3075_v15  ;;  %9484 = vst [vmem:[#allocation28_spill] sm:$0xff] %v6580_v39  ;;  %v6585_v41 = vpop.eup %5202  ;;  %v9486_v15 = vld [vmem:[#allocation34_spill] sm:$0xff]  ;;  %5214 = vpow2.f32 %v2571_v52  ;;  %v2579_v27 = vmul.f32 1.442695, %v2308_v23  ;;  %v2314_v34 = vsub.f32 %v9489_v56, %v6486_v7 }
 0x27c   : > { %9485 = vst [vmem:[#allocation31_spill] sm:$0xff] %v6585_v41  ;;  %v2312_v29 = vsub.f32 %v9486_v15, %v6486_v7  ;;  %v6591_v40 = vpop.eup %5204  ;;  %5216 = vpow2.f32 %v2645_v28  ;;  %v2583_v15 = vmul.f32 1.442695, %v2310_v58  ;;  %v2102_v52 = vrot.slane %v2101_v38, 4 }
 0x27d   : > { %v3077_v9 = vadd.f32 %v6558_v21, %v3076_v3  ;;  %9487 = vst [vmem:[#allocation34_spill] sm:$0xff] %v6591_v40  ;;  %v3099_v3 = vadd.f32 %v6585_v41, %v3098_v47  ;;  %v6595_v21 = vpop.eup %5206  ;;  %5218 = vpow2.f32 %v2575_v5  ;;  %v6601_v36 = vmul.f32 1.442695, %v2355_v1  ;;  %v9492_v47 = vld [vmem:[#allocation38_spill] sm:$0xff]  ;;  %v9494_v1 = vld [vmem:[#allocation41_spill] sm:$0xff] }
 0x27e   : > { %9488 = vst [vmem:[#allocation90_spill] sm:$0xff] %v6595_v21  ;;  %v6599_v23 = vpop.eup %5208  ;;  %5220 = vpow2.f32 %v2649_v30  ;;  %v2587_v41 = vmul.f32 1.442695, %v2312_v29  ;;  %v2103_v56 = vmax.f32 %v2101_v38, %v2102_v52  ;;  %v2318_v30 = vsub.f32 %v9494_v1, %v6486_v7 }
 0x27f   : > { %v3078_v24 = vadd.f32 %v6562_v17, %v3077_v9  ;;  %9490 = vst [vmem:[#allocation36_spill] sm:$0xff] %v6599_v23  ;;  %v3100_v44 = vadd.f32 %v6595_v21, %v3099_v3  ;;  %v6605_v9 = vpop.eup %5210  ;;  %v2316_v17 = vsub.f32 %v9492_v47, %v6486_v7  ;;  %5222 = vpow2.f32 %v2579_v27  ;;  %v9496_v3 = vld [vmem:[#allocation44_spill] sm:$0xff] }
 0x280   : > { %9491 = vst [vmem:[#allocation91_spill] sm:$0xff] %v6605_v9  ;;  %v6609_v5 = vpop.eup %5212  ;;  %5224 = vpow2.f32 %v2653_v42  ;;  %v2320_v21 = vsub.f32 %v9496_v3, %v6486_v7  ;;  %v9497_v47 = vld [vmem:[#allocation48_spill] sm:$0xff]  ;;  %v2591_v29 = vmul.f32 1.442695, %v2314_v34 }
 0x281   : > { %v3079_v28 = vadd.f32 %v6565_v53, %v3078_v24  ;;  %9493 = vst [vmem:[#allocation38_spill] sm:$0xff] %v6609_v5  ;;  %v3101_v24 = vadd.f32 %v6605_v9, %v3100_v44  ;;  %v6615_v53 = vpop.eup %5214  ;;  %v2322_v27 = vsub.f32 %v9497_v47, %v6486_v7  ;;  %5226 = vpow2.f32 %v2583_v15  ;;  %v9500_v44 = vld [vmem:[#allocation50_spill] sm:$0xff]  ;;  %v9501_v3 = vld [vmem:[#allocation52_spill] sm:$0xff] }
 0x282   : > { %9495 = vst [vmem:[#allocation41_spill] sm:$0xff] %v6615_v53  ;;  %v6621_v38 = vpop.eup %5216  ;;  %5228 = vpow2.f32 %v2657_v25  ;;  %v2326_v9 = vsub.f32 %v9501_v3, %v6486_v7  ;;  %v2595_v47 = vmul.f32 1.442695, %v2316_v17  ;;  %v9503_v25 = vld [vmem:[#allocation55_spill] sm:$0xff]  ;;  %v2332_v3 = vsub.f32 %v9506_v55, %v6486_v7 }
 0x283   : > { %v3080_v58 = vadd.f32 %v6580_v39, %v3079_v28  ;;  %9498 = vst [vmem:[#allocation44_spill] sm:$0xff] %v6621_v38  ;;  %v3102_v52 = vadd.f32 %v6615_v53, %v3101_v24  ;;  %v2104_v28 = vrot.slane %v2103_v56, 2  ;;  %v6625_v1 = vpop.eup %5218  ;;  %v2324_v39 = vsub.f32 %v9500_v44, %v6486_v7  ;;  %v9505_v53 = vld [vmem:[#allocation58_spill] sm:$0xff] }
 0x284   : > { %9499 = vst [vmem:[#allocation48_spill] sm:$0xff] %v6625_v1  ;;  %5230 = vpow2.f32 %v2587_v41  ;;  %v6631_v15 = vpop.eup %5220  ;;  %v2330_v44 = vsub.f32 %v9505_v53, %v6486_v7  ;;  %v2599_v17 = vmul.f32 1.442695, %v2318_v30  ;;  %v9510_v53 = vld [vmem:[#allocation65_spill] sm:$0xff]  ;;  %v2603_v55 = vmul.f32 1.442695, %v2320_v21 }
 0x285   : > { %v3081_v42 = vadd.f32 %v6591_v40, %v3080_v58  ;;  %9502 = vst [vmem:[#allocation50_spill] sm:$0xff] %v6631_v15  ;;  %5232 = vpow2.f32 %v2661_v62  ;;  %v2328_v58 = vsub.f32 %v9503_v25, %v6486_v7  ;;  %v3103_v24 = vadd.f32 %v6625_v1, %v3102_v52  ;;  %v6637_v40 = vpop.eup %5222  ;;  %v9509_v52 = vld [vmem:[#allocation63_spill] sm:$0xff]  ;;  %v9512_v30 = vld [vmem:[#allocation68_spill] sm:$0xff] }
 0x286   : > { %9504 = vst [vmem:[#allocation52_spill] sm:$0xff] %v6637_v40  ;;  %5234 = vpow2.f32 %v2591_v29  ;;  %v6643_v41 = vpop.eup %5224  ;;  %v2105_v25 = vmax.f32 %v2103_v56, %v2104_v28  ;;  %v2334_v1 = vsub.f32 %v9509_v52, %v6486_v7  ;;  %v2336_v48 = vsub.f32 %v9510_v53, %v6486_v7  ;;  %v9514_v52 = vld [vmem:[#allocation74_spill] sm:$0xff] }
 0x287   : > { %v3082_v34 = vadd.f32 %v6599_v23, %v3081_v42  ;;  %9507 = vst [vmem:[#allocation55_spill] sm:$0xff] %v6643_v41  ;;  %5236 = vpow2.f32 %v2665_v43  ;;  %v3104_v42 = vadd.f32 %v6637_v40, %v3103_v24  ;;  %v6647_v23 = vpop.eup %5226  ;;  %v2340_v24 = vsub.f32 %v9418_v12, %v6486_v7 }
 0x288   : > { %9508 = vst [vmem:[#allocation58_spill] sm:$0xff] %v6647_v23  ;;  %5238 = vpow2.f32 %v2595_v47  ;;  %v6653_v29 = vpop.eup %5228  ;;  %v2342_v53 = vsub.f32 %v9514_v52, %v6486_v7  ;;  %v2607_v21 = vmul.f32 1.442695, %v2322_v27  ;;  %v2346_v12 = vsub.f32 %v6237_v8, %v6486_v7 }
 0x289   : > { %v3083_v62 = vadd.f32 %v6609_v5, %v3082_v34  ;;  %9511 = vst [vmem:[#allocation61_spill] sm:$0xff] %v6653_v29  ;;  %5240 = vpow2.f32 %v2669_v33  ;;  %v2338_v34 = vsub.f32 %v9512_v30, %v6486_v7  ;;  %v3105_v56 = vadd.f32 %v6647_v23, %v3104_v42 }
 0x28a   : > { %v6659_v28 = vpop.eup %5230  ;;  %5242 = vpow2.f32 %v2599_v17  ;;  %v2106_v30 = vrot.slane %v2105_v25, 1  ;;  %v2344_v42 = vsub.f32 %v6209_v49, %v6486_v7  ;;  %v2615_v52 = vmul.f32 1.442695, %v2326_v9 }
 0x28b   : > { %v3084_v43 = vadd.f32 %v6621_v38, %v3083_v62  ;;  %9513 = vst [vmem:[#allocation63_spill] sm:$0xff] %v6659_v28  ;;  %v6665_v47 = vpop.eup %5232  ;;  %v2611_v62 = vmul.f32 1.442695, %v2324_v39  ;;  %v3106_v5 = vadd.f32 %v6659_v28, %v3105_v56  ;;  %5244 = vpow2.f32 %v2603_v55 }
 0x28c   : > { %9515 = vst [vmem:[#allocation65_spill] sm:$0xff] %v6665_v47  ;;  %v6669_v40 = vpop.eup %5234  ;;  %5246 = vpow2.f32 %v6601_v36  ;;  %v2619_v39 = vmul.f32 1.442695, %v2328_v58  ;;  %v2623_v49 = vmul.f32 1.442695, %v2330_v44  ;;  %v6688_v55 = vmax.f32 %v2105_v25, %v2106_v30 }
 0x28d   : > { %v3085_v33 = vadd.f32 %v6631_v15, %v3084_v43  ;;  %9516 = vst [vmem:[#allocation68_spill] sm:$0xff] %v6669_v40  ;;  %v6675_v17 = vpop.eup %5236  ;;  %v3107_v43 = vadd.f32 %v6669_v40, %v3106_v5  ;;  %v9519_v15 = vld [vmem:[#allocation79_spill] sm:$0xff]  ;;  %5248 = vpow2.f32 %v2607_v21  ;;  %v2627_v28 = vmul.f32 1.442695, %v2332_v3 }
 0x28e   : > { %9517 = vst [vmem:[#allocation74_spill] sm:$0xff] %v6675_v17  ;;  %v6680_v56 = vpop.eup %5238  ;;  %v2348_v38 = vsub.f32 %v9519_v15, %v6486_v7  ;;  %5250 = vpow2.f32 %v2611_v62  ;;  %v2350_v5 = vsub.f32 %v6290_v51, %v6486_v7  ;;  %v2631_v44 = vmul.f32 1.442695, %v2334_v1  ;;  %v9524_v1 = vld [vmem:[#allocation3_spill] sm:$0xff] }
 0x28f   : > { %v3086_v27 = vadd.f32 %v6643_v41, %v3085_v33  ;;  %9518 = vst [vmem:[#allocation92_spill] sm:$0xff] %v6680_v56  ;;  %v6684_v8 = vpop.eup %5240  ;;  %v3108_v36 = vadd.f32 %v6680_v56, %v3107_v43  ;;  %v9521_v33 = vld [vmem:[#allocation83_spill] sm:$0xff]  ;;  %5252 = vpow2.f32 %v2615_v52  ;;  %v2635_v21 = vmul.f32 1.442695, %v2336_v48 }
 0x290   : > { %v6690_v58 = vpop.eup %5242  ;;  %v2352_v15 = vsub.f32 %v9521_v33, %v6486_v7  ;;  %5254 = vpow2.f32 %v2619_v39  ;;  %v2639_v25 = vmul.f32 1.442695, %v2338_v34  ;;  %v2643_v30 = vmul.f32 1.442695, %v2340_v24  ;;  %v9525_v34 = vld [vmem:[#allocation6_spill] sm:$0xff] }
 0x291   : > { %v3087_v9 = vadd.f32 %v6653_v29, %v3086_v27  ;;  %9520 = vst [vmem:[#allocation79_spill] sm:$0xff] %v6690_v58  ;;  %v3109_v62 = vadd.f32 %v6690_v58, %v3108_v36  ;;  %v6698_v27 = vpop.eup %5244  ;;  %5256 = vpow2.f32 %v2623_v49  ;;  %v2647_v43 = vmul.f32 1.442695, %v2342_v53  ;;  %v6724_v29 = vpop.f32.mrf.mxu3 }
 0x292   : > { %9522 = vst [vmem:[#allocation83_spill] sm:$0xff] %v6698_v27  ;;  %v6700_v23 = vpop.eup %5246  ;;  %5258 = vpow2.f32 %v2627_v28  ;;  %v2651_v48 = vmul.f32 1.442695, %v2344_v42  ;;  %v5090_v36 = vunpack.i.h.bf16 %v6574_v59  ;;  %v2359_v24 = vsub.f32 %v9525_v34, %v6688_v55 }
 0x293   : > { %v3088_v3 = vadd.f32 %v6665_v47, %v3087_v9  ;;  %9523 = vst [vmem:[#allocation93_spill] sm:$0xff] %v6700_v23  ;;  %v3110_v52 = vadd.f32 %v6698_v27, %v3109_v62  ;;  %v2357_v9 = vsub.f32 %v9524_v1, %v6688_v55  ;;  %v6706_v39 = vpop.eup %5248  ;;  %5260 = vpow2.f32 %v2631_v44  ;;  %v9529_v44 = vld [vmem:[#allocation71_spill] sm:$0xff]  ;;  %v9530_v62 = vld [vmem:[#allocation85_spill] sm:$0xff] }
 0x294   : > { %v6711_v53 = vpop.eup %5250  ;;  %5262 = vpow2.f32 %v2635_v21  ;;  %v5087_v33 = vunpack.i.l.bf16 %v6574_v59  ;;  %v2354_v42 = vsub.f32 %v9529_v44, %v6486_v7  ;;  %v2356_v1 = vsub.f32 %v9530_v62, %v6486_v7  ;;  %9531 = vst [vmem:[#allocation71_spill] sm:$0xff] %v6724_v29  ;;  %v9535_v44 = vld [vmem:[#allocation9_spill] sm:$0xff]  ;;  %v9549_v47 = vld [vmem:[#allocation39_spill] sm:$0xff] }
 0x295   : > { %v3089_v51 = vadd.f32 %v6675_v17, %v3088_v3  ;;  %9526 = vst [vmem:[#allocation3_spill] sm:$0xff] %v6711_v53  ;;  %v3111_v28 = vadd.f32 %v6706_v39, %v3110_v52  ;;  %v6718_v3 = vpop.eup %5252  ;;  %5264 = vpow2.f32 %v2639_v25  ;;  %v2655_v34 = vmul.f32 1.442695, %v2346_v12 }
 0x296   : > { %9528 = vst [vmem:[#allocation94_spill] sm:$0xff] %v6718_v3  ;;  %v6726_v41 = vpop.eup %5254  ;;  %5266 = vpow2.f32 %v2643_v30  ;;  %v2659_v21 = vmul.f32 1.442695, %v2348_v38  ;;  %v2677_v52 = vmul.f32 1.442695, %v2357_v9  ;;  %v2361_v56 = vsub.f32 %v9535_v44, %v6688_v55 }
 0x297   : > { %v6714_v49 = vadd.f32 %v6684_v8, %v3089_v51  ;;  %9532 = vst [vmem:[#allocation85_spill] sm:$0xff] %v6726_v41  ;;  %v3112_v51 = vadd.f32 %v6711_v53, %v3111_v28  ;;  %v6729_v59 = vpop.eup %5256  ;;  %5268 = vpow2.f32 %v2647_v43  ;;  %v2681_v7 = vmul.f32 1.442695, %v2359_v24 }
 0x298   : > { %9533 = vst [vmem:[#allocation95_spill] sm:$0xff] %v6729_v59  ;;  %v6735_v25 = vpop.eup %5258  ;;  %5270 = vpow2.f32 %v2651_v48  ;;  %v6738_v62 = vpack.c.bf16 %v5087_v33, %v5087_v33  ;;  %v2138_v38 = vmax.f32 %v6491_v20, %v6724_v29  ;;  %v2663_v43 = vmul.f32 1.442695, %v2350_v5  ;;  %v9542_v20 = vld [vmem:[#allocation17_spill] sm:$0xff] }
 0x299   : > { %9527 = vst [vmem:[#allocation6_spill] sm:$0xff] %v6714_v49  ;;  %v6731_v49 = vpack.c.bf16 %v5090_v36, %v5090_v36  ;;  %v3113_v12 = vadd.f32 %v6718_v3, %v3112_v51  ;;  %v6742_v30 = vpop.eup %5260  ;;  %5272 = vpow2.f32 %v2655_v34  ;;  %v2667_v9 = vmul.f32 1.442695, %v2352_v15  ;;  %v9539_v36 = vld [vmem:[#allocation13_spill] sm:$0xff] }
 0x29a   : > { %9536 = vst [vmem:[#allocation9_spill] sm:$0xff] %v6735_v25  ;;  %v2363_v28 = vsub.f32 %v9539_v36, %v6688_v55  ;;  %v6746_v44 = vpop.eup %5262  ;;  %v2671_v24 = vmul.f32 1.442695, %v2354_v42  ;;  %v2675_v40 = vmul.f32 1.442695, %v2356_v1  ;;  %5274 = vpow2.f32 %v2677_v52  ;;  %v9544_v52 = vld [vmem:[#allocation21_spill] sm:$0xff] }
 0x29b   : > { %9534 = vst [vmem:[#allocation96_spill] sm:$0xff] %v6731_v49  ;;  %v3114_v48 = vadd.f32 %v6726_v41, %v3113_v12  ;;  %v6749_v33 = vpop.eup %5264  ;;  %v2365_v3 = vsub.f32 %v9542_v20, %v6688_v55  ;;  %5276 = vpow2.f32 %v2681_v7  ;;  %v2685_v5 = vmul.f32 1.442695, %v2361_v56  ;;  %v9545_v51 = vld [vmem:[#allocation25_spill] sm:$0xff]  ;;  %v9547_v42 = vld [vmem:[#allocation32_spill] sm:$0xff] }
 0x29c   : > { %9537 = vst [vmem:[#allocation97_spill] sm:$0xff] %v6738_v62  ;;  %v6754_v15 = vpop.eup %5266  ;;  %5278 = vpow2.f32 %v2659_v21  ;;  %v2139_v1 = vrot.slane %v2138_v38, 4  ;;  %v2367_v12 = vsub.f32 %v9544_v52, %v6688_v55  ;;  %v2369_v41 = vsub.f32 %v9545_v51, %v6688_v55  ;;  %v9546_v21 = vld [vmem:[#allocation29_spill] sm:$0xff] }
 0x29d   : > { %9538 = vst [vmem:[#allocation98_spill] sm:$0xff] %v6742_v30  ;;  %v3115_v34 = vadd.f32 %v6729_v59, %v3114_v48  ;;  %v6758_v36 = vpop.eup %5268  ;;  %5280 = vpow2.f32 %v2663_v43  ;;  %v2689_v20 = vmul.f32 1.442695, %v2363_v28  ;;  %v2371_v48 = vsub.f32 %v9546_v21, %v6688_v55  ;;  %v9548_v43 = vld [vmem:[#allocation35_spill] sm:$0xff] }
 0x29e   : > { %9540 = vst [vmem:[#allocation13_spill] sm:$0xff] %v6746_v44  ;;  %v6764_v7 = vpop.eup %5270  ;;  %5282 = vpow2.f32 %v2667_v9  ;;  %v2373_v59 = vsub.f32 %v9547_v42, %v6688_v55  ;;  %v2375_v52 = vsub.f32 %v9548_v43, %v6688_v55  ;;  %v2377_v51 = vsub.f32 %v9549_v47, %v6688_v55  ;;  %v9552_v42 = vld [vmem:[#allocation45_spill] sm:$0xff] }
 0x29f   : > { %9541 = vst [vmem:[#allocation99_spill] sm:$0xff] %v6749_v33  ;;  %v3116_v56 = vadd.f32 %v6735_v25, %v3115_v34  ;;  %v6771_v17 = vpop.eup %5272  ;;  %5284 = vpow2.f32 %v2685_v5  ;;  %v2693_v28 = vmul.f32 1.442695, %v2365_v3  ;;  %v9551_v34 = vld [vmem:[#allocation42_spill] sm:$0xff]  ;;  %v2381_v25 = vsub.f32 %v9552_v42, %v6688_v55  ;;  %v9554_v43 = vld [vmem:[#allocation49_spill] sm:$0xff]  ;;  %v9557_v42 = vld [vmem:[#allocation59_spill] sm:$0xff] }
 0x2a0   : > { %9543 = vst [vmem:[#allocation17_spill] sm:$0xff] %v6754_v15  ;;  %v6777_v27 = vpop.eup %5274  ;;  %5286 = vpow2.f32 %v2671_v24  ;;  %v2379_v21 = vsub.f32 %v9551_v34, %v6688_v55  ;;  %v2383_v23 = vsub.f32 %v9554_v43, %v6688_v55  ;;  %v9555_v47 = vld [vmem:[#allocation53_spill] sm:$0xff]  ;;  %v2697_v3 = vmul.f32 1.442695, %v2367_v12  ;;  %v9558_v43 = vld [vmem:[#allocation62_spill] sm:$0xff] }
 0x2a1   : > { %9550 = vst [vmem:[#allocation21_spill] sm:$0xff] %v6777_v27  ;;  %v3117_v9 = vadd.f32 %v6742_v30, %v3116_v56  ;;  %v6784_v58 = vpop.eup %5276  ;;  %v2385_v5 = vsub.f32 %v9555_v47, %v6688_v55  ;;  %5288 = vpow2.f32 %v2689_v20  ;;  %v9556_v56 = vld [vmem:[#allocation56_spill] sm:$0xff]  ;;  %v2389_v30 = vsub.f32 %v9557_v42, %v6688_v55  ;;  %v9559_v47 = vld [vmem:[#allocation66_spill] sm:$0xff] }
 0x2a2   : > { %9553 = vst [vmem:[#allocation25_spill] sm:$0xff] %v6784_v58  ;;  %v6790_v53 = vpop.eup %5278  ;;  %5290 = vpow2.f32 %v2675_v40  ;;  %v2387_v34 = vsub.f32 %v9556_v56, %v6688_v55  ;;  %v2391_v62 = vsub.f32 %v9558_v43, %v6688_v55  ;;  %v2393_v20 = vsub.f32 %v9559_v47, %v6688_v55 }
 0x2a3   : > { %v3118_v24 = vadd.f32 %v6746_v44, %v3117_v9  ;;  %v6797_v49 = vpop.eup %5280  ;;  %5292 = vpow2.f32 %v2693_v28  ;;  %v2701_v12 = vmul.f32 1.442695, %v2369_v41  ;;  %v2705_v9 = vmul.f32 1.442695, %v2371_v48 }
 0x2a4   : > { %v6803_v29 = vpop.eup %5282  ;;  %v3135_v56 = vadd.f32 %v6784_v58, %v6777_v27  ;;  %v2140_v44 = vmax.f32 %v2138_v38, %v2139_v1  ;;  %v2395_v54 = vsub.f32 %v9561_v0, %v6688_v55  ;;  %5294 = vpow2.f32 %v2697_v3 }
 0x2a5   : > { %v3119_v40 = vadd.f32 %v6749_v33, %v3118_v24  ;;  %v6808_v42 = vpop.eup %5284  ;;  %v2709_v43 = vmul.f32 1.442695, %v2373_v59  ;;  %v9562_v47 = vunpack.c.l.b16 %v6426_v4  ;;  %v9563_v41 = vunpack.c.l.b16 %v6450_v57 }
 0x2a6   : > { %9560 = vst [vmem:[#allocation29_spill] sm:$0xff] %v6808_v42  ;;  %v6816_v2 = vpop.eup %5286  ;;  %v2713_v24 = vmul.f32 1.442695, %v2375_v52  ;;  %v3136_v58 = vadd.f32 %v6808_v42, %v3135_v56  ;;  %v9564_v38 = vunpack.c.l.b16 %v6412_v31  ;;  %v9565_v1 = vunpack.c.l.b16 %v6440_v37 }
 0x2a7   : > { %v1437_v28 = vpack.c.b16 %v9563_v41, %v9562_v47  ;;  %v3120_v48 = vadd.f32 %v6754_v15, %v3119_v40  ;;  %v6824_v0 = vpop.eup %5288  ;;  %v2397_v4 = vsub.f32 %v9439_v10, %v6688_v55  ;;  %5296 = vpow2.f32 %v2701_v12 }
 0x2a8   : > { %v1753_v27 = vpack.c.b16 %v9565_v1, %v9564_v38  ;;  %9566 = vst [vmem:[#allocation32_spill] sm:$0xff] %v6824_v0  ;;  %v2717_v57 = vmul.f32 1.442695, %v2377_v51  ;;  %v2721_v59 = vmul.f32 1.442695, %v2379_v21  ;;  %v6830_v52 = vpop.eup %5290  ;;  %5298 = vpow2.f32 %v2705_v9 }
 0x2a9   : > { %4673 = vmatmul.msk.bf16.gmra.mxu0 %vm822_vm0, %v1437_v28  ;;  %4689 = vmatmul.msk.bf16.gmra.mxu1 %vm822_vm0, %v1437_v28  ;;  %v3121_v3 = vadd.f32 %v6758_v36, %v3120_v48  ;;  %v3137_v31 = vadd.f32 %v6824_v0, %v3136_v58  ;;  %v2141_v37 = vrot.slane %v2140_v44, 2  ;;  %v6836_v10 = vpop.eup %5292  ;;  %v2399_v51 = vsub.f32 %v9443_v32, %v6688_v55 }
 0x2aa   : > { %4713 = vmatmul.msk.bf16.gmra.mxu2 %vm822_vm0, %v1753_v27  ;;  %4729 = vmatmul.msk.bf16.gmra.mxu3 %vm822_vm0, %v1753_v27  ;;  %9567 = vst [vmem:[#allocation35_spill] sm:$0xff] %v6836_v10  ;;  %v2401_v21 = vsub.f32 %v6217_v6, %v6688_v55  ;;  %5300 = vpow2.f32 %v2709_v43  ;;  %v2725_v12 = vmul.f32 1.442695, %v2381_v25  ;;  %v2729_v9 = vmul.f32 1.442695, %v2383_v23  ;;  %v6844_v56 = vpop.eup %5294 }
 0x2ab   : > { %v3122_v40 = vadd.f32 %v6764_v7, %v3121_v3  ;;  %5302 = vpow2.f32 %v2713_v24  ;;  %v3138_v58 = vadd.f32 %v6836_v10, %v3137_v31  ;;  %9568 = vst [vmem:[#allocation39_spill] sm:$0xff] %v6844_v56  ;;  %v2403_v27 = vsub.f32 %v6245_v11, %v6688_v55 }
 0x2ac   : > { %5304 = vpow2.f32 %v2717_v57  ;;  %v2733_v47 = vmul.f32 1.442695, %v2385_v5  ;;  %v2737_v41 = vmul.f32 1.442695, %v2387_v34  ;;  %v2142_v25 = vmax.f32 %v2140_v44, %v2141_v37 }
 0x2ad   : > { %v3123_v32 = vadd.f32 %v6771_v17, %v3122_v40  ;;  %5306 = vpow2.f32 %v2721_v59  ;;  %v3139_v6 = vadd.f32 %v6844_v56, %v3138_v58  ;;  %v6850_v43 = vpop.eup %5296  ;;  %v2405_v23 = vsub.f32 %v6269_v46, %v6688_v55 }
 0x2ae   : > { %9569 = vst [vmem:[#allocation42_spill] sm:$0xff] %v6850_v43  ;;  %v2407_v28 = vsub.f32 %v6299_v14, %v6688_v55  ;;  %5308 = vpow2.f32 %v2725_v12  ;;  %v2741_v48 = vmul.f32 1.442695, %v2389_v30  ;;  %v6856_v11 = vpop.eup %5298  ;;  %v2745_v34 = vmul.f32 1.442695, %v2391_v62 }
 0x2af   : > { %9570 = vst [vmem:[#allocation45_spill] sm:$0xff] %v6856_v11  ;;  %v3124_v5 = vadd.f32 %v6790_v53, %v3123_v32  ;;  %5310 = vpow2.f32 %v2729_v9  ;;  %v3140_v24 = vadd.f32 %v6850_v43, %v3139_v6  ;;  %v2409_v44 = vsub.f32 %v6333_v50, %v6688_v55 }
 0x2b0   : > { %v6860_v38 = vpop.eup %5300  ;;  %5312 = vpow2.f32 %v2733_v47  ;;  %v2749_v46 = vmul.f32 1.442695, %v2393_v20  ;;  %v2753_v1 = vmul.f32 1.442695, %v2395_v54  ;;  %v2143_v59 = vrot.slane %v2142_v25, 1 }
 0x2b1   : > { %9571 = vst [vmem:[#allocation49_spill] sm:$0xff] %v6860_v38  ;;  %v6864_v57 = vpop.eup %5302  ;;  %v3125_v14 = vadd.f32 %v6797_v49, %v3124_v5  ;;  %5314 = vpow2.f32 %v2737_v41  ;;  %v3141_v30 = vadd.f32 %v6856_v11, %v3140_v24  ;;  %v2411_v62 = vsub.f32 %v6354_v63, %v6688_v55  ;;  %v6900_v5 = vpop.f32.mrf.mxu0 }
 0x2b2   : > { %9572 = vst [vmem:[#allocation53_spill] sm:$0xff] %v6864_v57  ;;  %v6868_v3 = vpop.eup %5304  ;;  %v2413_v31 = vsub.f32 %v6382_v18, %v6688_v55  ;;  %5316 = vpow2.f32 %v2741_v48  ;;  %v2757_v50 = vmul.f32 1.442695, %v2397_v4  ;;  %v2761_v37 = vmul.f32 1.442695, %v2399_v51 }
 0x2b3   : > { %9573 = vst [vmem:[#allocation56_spill] sm:$0xff] %v6868_v3  ;;  %v6874_v20 = vpop.eup %5306  ;;  %v3126_v54 = vadd.f32 %v6803_v29, %v3125_v14  ;;  %5318 = vpow2.f32 %v2745_v34  ;;  %v3142_v12 = vadd.f32 %v6860_v38, %v3141_v30  ;;  %v2415_v9 = vsub.f32 %v6414_v61, %v6688_v55  ;;  %v9616_v38 = vld [vmem:[#allocation87_spill] sm:$0xff] }
 0x2b4   : > { %9574 = vst [vmem:[#allocation59_spill] sm:$0xff] %v6874_v20  ;;  %v6878_v40 = vpop.eup %5308  ;;  %5320 = vpow2.f32 %v2749_v46  ;;  %v2765_v63 = vmul.f32 1.442695, %v2401_v21  ;;  %v2769_v58 = vmul.f32 1.442695, %v2403_v27  ;;  %v6886_v41 = vmax.f32 %v2142_v25, %v2143_v59 }
 0x2b5   : > { %9575 = vst [vmem:[#allocation62_spill] sm:$0xff] %v6878_v40  ;;  %v6882_v47 = vpop.eup %5310  ;;  %v3127_v18 = vadd.f32 %v6816_v2, %v3126_v54  ;;  %5322 = vpow2.f32 %v2753_v1  ;;  %v3143_v4 = vadd.f32 %v6864_v57, %v3142_v12  ;;  %v2417_v32 = vsub.f32 %v6464_v22, %v6688_v55  ;;  %v9584_v1 = vld [vmem:[#allocation7_spill] sm:$0xff]  ;;  %v9588_v12 = vld [vmem:[#allocation10_spill] sm:$0xff] }
 0x2b6   : > { %9576 = vst [vmem:[#allocation66_spill] sm:$0xff] %v6882_v47  ;;  %v6888_v51 = vpop.eup %5312  ;;  %v2419_v61 = vsub.f32 %v6576_v13, %v6688_v55  ;;  %5324 = vpow2.f32 %v2757_v50  ;;  %v2773_v21 = vmul.f32 1.442695, %v2405_v23  ;;  %v2777_v48 = vmul.f32 1.442695, %v2407_v28  ;;  %v9583_v28 = vld [vmem:[#allocation4_spill] sm:$0xff] }
 0x2b7   : > { %9577 = vst [vmem:[#allocation69_spill] sm:$0xff] %v6888_v51  ;;  %v6894_v27 = vpop.eup %5314  ;;  %v6897_v6 = vadd.f32 %v6830_v52, %v3127_v18  ;;  %5326 = vpow2.f32 %v2761_v37  ;;  %v3144_v25 = vadd.f32 %v6868_v3, %v3143_v4  ;;  %v6906_v22 = vpack.c.bf16 %v6706_v39, %v6544_v26 }
 0x2b8   : > { %9578 = vst [vmem:[#allocation100_spill] sm:$0xff] %v6894_v27  ;;  %v6902_v34 = vpop.eup %5316  ;;  %5328 = vpow2.f32 %v2765_v63  ;;  %v2781_v13 = vmul.f32 1.442695, %v2409_v44  ;;  %v2785_v55 = vmul.f32 1.442695, %v2411_v62  ;;  %v2358_v46 = vsub.f32 %v9583_v28, %v6886_v41 }
 0x2b9   : > { %9579 = vst [vmem:[#allocation101_spill] sm:$0xff] %v6897_v6  ;;  %v6908_v23 = vpop.eup %5318  ;;  %5330 = vpow2.f32 %v2769_v58  ;;  %v3145_v24 = vadd.f32 %v6874_v20, %v3144_v25  ;;  %v2360_v14 = vsub.f32 %v9584_v1, %v6886_v41  ;;  %v6919_v26 = vpack.c.bf16 %v6816_v2, %v6684_v8  ;;  %v9589_v58 = vld [vmem:[#allocation14_spill] sm:$0xff]  ;;  %v6956_v6 = vpop.trf.xlu0 }
 0x2ba   : > { %9580 = vst [vmem:[#allocation102_spill] sm:$0xff] %v6900_v5  ;;  %v6915_v30 = vpop.eup %5320  ;;  %5332 = vpow2.f32 %v2773_v21  ;;  %v2789_v39 = vmul.f32 1.442695, %v2413_v31  ;;  %v2793_v44 = vmul.f32 1.442695, %v2415_v9  ;;  %v2362_v63 = vsub.f32 %v9588_v12, %v6886_v41  ;;  %v9590_v8 = vld [vmem:[#allocation18_spill] sm:$0xff]  ;;  %v6965_v42 = vpop.f32.mrf.mxu0 }
 0x2bb   : > { %9581 = vst [vmem:[#allocation103_spill] sm:$0xff] %v6902_v34  ;;  %v6921_v59 = vpop.eup %5322  ;;  %5334 = vpow2.f32 %v2777_v48  ;;  %v2797_v62 = vmul.f32 1.442695, %v2417_v32  ;;  %v2801_v50 = vmul.f32 1.442695, %v2419_v61  ;;  %v3146_v54 = vadd.f32 %v6878_v40, %v3145_v24  ;;  %v9592_v21 = vld [vmem:[#allocation22_spill] sm:$0xff] }
 0x2bc   : > { %9582 = vst [vmem:[#allocation104_spill] sm:$0xff] %v6908_v23  ;;  %v6924_v37 = vpop.eup %5324  ;;  %5336 = vpow2.f32 %v2781_v13  ;;  %v2364_v2 = vsub.f32 %v9589_v58, %v6886_v41  ;;  %v2366_v31 = vsub.f32 %v9590_v8, %v6886_v41  ;;  %v2679_v4 = vmul.f32 1.442695, %v2358_v46  ;;  %v9593_v25 = vld [vmem:[#allocation26_spill] sm:$0xff]  ;;  %v9597_v58 = vld [vmem:[#allocation40_spill] sm:$0xff]  ;;  %v9600_v5 = vld [vmem:[#allocation51_spill] sm:$0xff] }
 0x2bd   : > { %9585 = vst [vmem:[#allocation4_spill] sm:$0xff] %v6915_v30  ;;  %v6932_v9 = vpop.eup %5326  ;;  %5338 = vpow2.f32 %v2785_v55  ;;  %v3147_v18 = vadd.f32 %v6882_v47, %v3146_v54  ;;  %v2683_v32 = vmul.f32 1.442695, %v2360_v14  ;;  %v2368_v48 = vsub.f32 %v9592_v21, %v6886_v41  ;;  %v9594_v24 = vld [vmem:[#allocation30_spill] sm:$0xff]  ;;  %v9595_v54 = vld [vmem:[#allocation33_spill] sm:$0xff]  ;;  %v9598_v21 = vld [vmem:[#allocation43_spill] sm:$0xff]  ;;  %v7010_v47 = vpop.f32.mrf.mxu1 }
 0x2be   : > { %9586 = vst [vmem:[#allocation7_spill] sm:$0xff] %v6921_v59  ;;  %v6935_v61 = vpop.eup %5328  ;;  %5340 = vpow2.f32 %v2789_v39  ;;  %v2370_v13 = vsub.f32 %v9593_v25, %v6886_v41  ;;  %v2372_v28 = vsub.f32 %v9594_v24, %v6886_v41  ;;  %v9596_v14 = vld [vmem:[#allocation37_spill] sm:$0xff]  ;;  %v2687_v24 = vmul.f32 1.442695, %v2362_v63  ;;  %v9599_v12 = vld [vmem:[#allocation46_spill] sm:$0xff] }
 0x2bf   : > { %9587 = vst [vmem:[#allocation105_spill] sm:$0xff] %v6924_v37  ;;  %v6943_v1 = vpop.eup %5330  ;;  %v3148_v55 = vadd.f32 %v6888_v51, %v3147_v18  ;;  %5342 = vpow2.f32 %v2679_v4  ;;  %v2382_v4 = vsub.f32 %v9599_v12, %v6886_v41  ;;  %v2384_v0 = vsub.f32 %v9600_v5, %v6886_v41  ;;  %v9602_v63 = vld [vmem:[#allocation54_spill] sm:$0xff]  ;;  %v9603_v25 = vld [vmem:[#allocation57_spill] sm:$0xff]  ;;  %v9604_v12 = vld [vmem:[#allocation60_spill] sm:$0xff] }
 0x2c0   : > { %9591 = vst [vmem:[#allocation10_spill] sm:$0xff] %v6932_v9  ;;  %v6950_v39 = vpop.eup %5332  ;;  %5344 = vpow2.f32 %v2683_v32  ;;  %v2386_v32 = vsub.f32 %v9602_v63, %v6886_v41  ;;  %v2390_v5 = vsub.f32 %v9604_v12, %v6886_v41  ;;  %v9611_v63 = vld [vmem:[#allocation77_spill] sm:$0xff]  ;;  %v2699_v3 = vmul.f32 1.442695, %v2368_v48 }
 0x2c1   : > { %v6958_v18 = vpop.eup %5334  ;;  %5346 = vpow2.f32 %v2793_v44  ;;  %v3149_v46 = vadd.f32 %v6894_v27, %v3148_v55  ;;  %9601 = vst [vmem:[#allocation14_spill] sm:$0xff] %v6965_v42  ;;  %v2691_v44 = vmul.f32 1.442695, %v2364_v2  ;;  %v9605_v42 = vld [vmem:[#allocation64_spill] sm:$0xff]  ;;  %v2695_v2 = vmul.f32 1.442695, %v2366_v31  ;;  %v7029_v40 = vpop.trf.xlu0 }
 0x2c2   : > { %v6967_v8 = vpop.eup %5336  ;;  %5348 = vpow2.f32 %v2797_v62  ;;  %v9606_v62 = vld [vmem:[#allocation67_spill] sm:$0xff]  ;;  %v9612_v31 = vld [vmem:[#allocation80_spill] sm:$0xff]  ;;  %9613 = vst [vmem:[#allocation26_spill] sm:$0xff] %v7010_v47  ;;  %v2707_v48 = vmul.f32 1.442695, %v2372_v28  ;;  %v5092_v27 = vunpack.i.l.bf16 %v6956_v6  ;;  %v9622_v28 = vsub.f32 %v9596_v14, %v6886_v41 }
 0x2c3   : > { %v6973_v10 = vpop.eup %5338  ;;  %5350 = vpow2.f32 %v2801_v50  ;;  %v3150_v55 = vadd.f32 %v6902_v34, %v3149_v46  ;;  %v9608_v46 = vld [vmem:[#allocation73_spill] sm:$0xff]  ;;  %v9609_v34 = vld [vmem:[#allocation76_spill] sm:$0xff]  ;;  %v2735_v14 = vmul.f32 1.442695, %v2386_v32 }
 0x2c4   : > { %v6980_v43 = vpop.eup %5340  ;;  %5352 = vpow2.f32 %v2687_v24  ;;  %v2398_v12 = vsub.f32 %v9608_v46, %v6886_v41  ;;  %v9615_v24 = vld [vmem:[#allocation15_spill] sm:$0xff] }
 0x2c5   : > { %v6986_v57 = vpop.eup %5342  ;;  %v3151_v50 = vadd.f32 %v6908_v23, %v3150_v55  ;;  %5354 = vpow2.f32 %v2691_v44  ;;  %v9614_v44 = vld [vmem:[#allocation11_spill] sm:$0xff] }
 0x2c6   : > { %9607 = vst [vmem:[#allocation18_spill] sm:$0xff] %v6986_v57  ;;  %v6995_v20 = vpop.eup %5344  ;;  %5356 = vpow2.f32 %v2695_v2  ;;  %v9617_v23 = vld [vmem:[#allocation71_spill] sm:$0xff] }
 0x2c7   : > { %9610 = vst [vmem:[#allocation22_spill] sm:$0xff] %v6995_v20  ;;  %v7001_v55 = vpop.eup %5346  ;;  %v3152_v46 = vadd.f32 %v6915_v30, %v3151_v50  ;;  %v2703_v50 = vmul.f32 1.442695, %v2370_v13  ;;  %v3172_v51 = vadd.f32 %v6995_v20, %v6986_v57  ;;  %5358 = vpow2.f32 %v2699_v3 }
 0x2c8   : > { %v7012_v56 = vpop.eup %5348  ;;  %v9621_v20 = vsub.f32 %v9595_v54, %v6886_v41  ;;  %v2715_v57 = vmul.f32 1.442695, %v9622_v28 }
 0x2c9   : > { %v7018_v30 = vpop.eup %5350  ;;  %v3153_v11 = vadd.f32 %v6921_v59, %v3152_v46  ;;  %v5095_v46 = vunpack.i.h.bf16 %v6956_v6  ;;  %v7035_v59 = vpop.f32.mrf.mxu0  ;;  %5360 = vpow2.f32 %v2703_v50  ;;  %v9624_v6 = vsub.f32 %v9598_v21, %v6886_v41 }
 0x2ca   : > { %v7027_v15 = vpop.eup %5352  ;;  %9619 = vst [vmem:[#allocation33_spill] sm:$0xff] %v7035_v59  ;;  %v2711_v3 = vmul.f32 1.442695, %v9621_v20  ;;  %5362 = vpow2.f32 %v2707_v48  ;;  %v2731_v20 = vmul.f32 1.442695, %v2384_v0  ;;  %v9627_v21 = vsub.f32 %v9603_v25, %v6886_v41  ;;  %v7067_v48 = vpop.f32.mrf.mxu1 }
 0x2cb   : > { %9618 = vst [vmem:[#allocation30_spill] sm:$0xff] %v7027_v15  ;;  %v3154_v13 = vadd.f32 %v6924_v37, %v3153_v11  ;;  %v3173_v2 = vadd.f32 %v7027_v15, %v3172_v51  ;;  %v7037_v47 = vpop.eup %5354  ;;  %v9623_v11 = vsub.f32 %v9597_v58, %v6886_v41  ;;  %v2723_v59 = vmul.f32 1.442695, %v9624_v6 }
 0x2cc   : > { %9620 = vst [vmem:[#allocation37_spill] sm:$0xff] %v7037_v47  ;;  %v2727_v37 = vmul.f32 1.442695, %v2382_v4  ;;  %v7053_v33 = vpop.eup %5356  ;;  %v687_v58 = vpack.c.bf16 %v5092_v27, %v5092_v27  ;;  %5364 = vpow2.f32 %v2711_v3  ;;  %v2743_v4 = vmul.f32 1.442695, %v2390_v5 }
 0x2cd   : > { %v2719_v51 = vmul.f32 1.442695, %v9623_v11  ;;  %v3155_v15 = vadd.f32 %v6932_v9, %v3154_v13  ;;  %v3174_v50 = vadd.f32 %v7037_v47, %v3173_v2  ;;  %9625 = vst [vmem:[#allocation40_spill] sm:$0xff] %v7053_v33  ;;  %v7057_v11 = vpop.eup %5358  ;;  %v2739_v13 = vmul.f32 1.442695, %v9627_v21 }
 0x2ce   : > { %9626 = vst [vmem:[#allocation43_spill] sm:$0xff] %v7057_v11  ;;  %v719_v6 = vpack.c.bf16 %v5095_v46, %v5095_v46  ;;  %5366 = vpow2.f32 %v2715_v57  ;;  %v9628_v0 = vsub.f32 %v9605_v42, %v6886_v41  ;;  %v9630_v25 = vsub.f32 %v9606_v62, %v6886_v41 }
 0x2cf   : > { %v3156_v54 = vadd.f32 %v6935_v61, %v3155_v15  ;;  %v3175_v28 = vadd.f32 %v7053_v33, %v3174_v50  ;;  %9629 = vst [vmem:[#allocation46_spill] sm:$0xff] %v7067_v48  ;;  %v7069_v27 = vpop.eup %5360  ;;  %5368 = vpow2.f32 %v2719_v51  ;;  %v9631_v5 = vsub.f32 %v9438_v16, %v6886_v41 }
 0x2d0   : > { %v2747_v15 = vmul.f32 1.442695, %v9628_v0  ;;  %v2751_v3 = vmul.f32 1.442695, %v9630_v25  ;;  %v2759_v57 = vmul.f32 1.442695, %v2398_v12  ;;  %5370 = vpow2.f32 %v2723_v59  ;;  %v7091_v0 = vpop.trf.xlu0 }
 0x2d1   : > { %v3157_v2 = vadd.f32 %v6943_v1, %v3156_v54  ;;  %v3176_v32 = vadd.f32 %v7057_v11, %v3175_v28  ;;  %v2755_v46 = vmul.f32 1.442695, %v9631_v5  ;;  %v1416_v54 = vunpack.c.l.b16 %v687_v58  ;;  %v7079_v28 = vpop.eup %5362 }
 0x2d2   : > { %5372 = vpow2.f32 %v2727_v37  ;;  %v9632_v51 = vsub.f32 %v9609_v34, %v6886_v41  ;;  %v9633_v62 = vsub.f32 %v6221_v45, %v6886_v41  ;;  %v1732_v12 = vunpack.c.l.b16 %v719_v6  ;;  %v7096_v37 = vpop.f32.mrf.mxu0 }
 0x2d3   : > { %v3158_v50 = vadd.f32 %v6950_v39, %v3157_v2  ;;  %v3177_v42 = vadd.f32 %v7069_v27, %v3176_v32  ;;  %v5100_v2 = vunpack.i.h.bf16 %v7029_v40  ;;  %9634 = vst [vmem:[#allocation51_spill] sm:$0xff] %v7096_v37  ;;  %v7098_v32 = vpop.eup %5364  ;;  %5374 = vpow2.f32 %v2731_v20 }
 0x2d4   : > { %v7084_v21 = vmul.f32 1.442695, %v9632_v51  ;;  %v7089_v16 = vmul.f32 1.442695, %v9633_v62  ;;  %v9635_v34 = vsub.f32 %v9611_v63, %v6886_v41  ;;  %v9636_v6 = vsub.f32 %v9612_v31, %v6886_v41  ;;  %v7110_v5 = vpop.eup %5366  ;;  %v9637_v51 = vld [vmem:[#allocation97_spill] sm:$0xff] }
 0x2d5   : > { %v3159_v59 = vadd.f32 %v6958_v18, %v3158_v50  ;;  %v3178_v58 = vadd.f32 %v7079_v28, %v3177_v42  ;;  %5376 = vpow2.f32 %v2735_v14  ;;  %v9638_v62 = vunpack.c.l.b16 %v9637_v51  ;;  %v7116_v48 = vpop.eup %5368 }
 0x2d6   : > { %v7103_v45 = vmul.f32 1.442695, %v9635_v34  ;;  %v7108_v25 = vmul.f32 1.442695, %v9636_v6  ;;  %5378 = vpow2.f32 %v2739_v13  ;;  %v9639_v63 = vsub.f32 %v6305_v35, %v6886_v41 }
 0x2d7   : > { %v3160_v50 = vadd.f32 %v6967_v8, %v3159_v59  ;;  %v3179_v42 = vadd.f32 %v7098_v32, %v3178_v58  ;;  %v1438_v20 = vpack.c.b16 %v1416_v54, %v9638_v62  ;;  %v9640_v31 = vsub.f32 %v6337_v19, %v6886_v41  ;;  %v9641_v59 = vld [vmem:[#allocation96_spill] sm:$0xff]  ;;  %v7130_v58 = vpop.eup %5370 }
 0x2d8   : > { %v7121_v34 = vmul.f32 1.442695, %v9639_v63  ;;  %v9642_v14 = vunpack.c.l.b16 %v9641_v59  ;;  %5380 = vpow2.f32 %v2743_v4  ;;  %v7134_v51 = vpack.c.bf16 %v5100_v2, %v5100_v2  ;;  %v7138_v35 = vpop.eup %5372  ;;  %v7164_v63 = vpop.f32.mrf.mxu2 }
 0x2d9   : > { %v7126_v6 = vmul.f32 1.442695, %v9640_v31  ;;  %v3161_v54 = vadd.f32 %v6973_v10, %v3160_v50  ;;  %v3180_v13 = vadd.f32 %v7110_v5, %v3179_v42  ;;  %4674 = vmatmul.msk.bf16.gmra.mxu0 %vm822_vm0, %v1438_v20  ;;  %4690 = vmatmul.msk.bf16.gmra.mxu1 %vm822_vm0, %v1438_v20  ;;  %5382 = vpow2.f32 %v2747_v15  ;;  %v7160_v20 = vpop.f32.mrf.mxu1  ;;  %9647 = vst [vmem:[#allocation57_spill] sm:$0xff] %v7164_v63  ;;  %v9649_v31 = vld [vmem:[#allocation3_spill] sm:$0xff]  ;;  %v7192_v33 = vpop.trf.xlu0 }
 0x2da   : > { %v1754_v37 = vpack.c.b16 %v1732_v12, %v9642_v14  ;;  %v9643_v19 = vsub.f32 %v6358_v60, %v6886_v41  ;;  %v9644_v50 = vsub.f32 %v9614_v44, %v6886_v41  ;;  %v9645_v2 = vsub.f32 %v9615_v24, %v6886_v41  ;;  %9646 = vst [vmem:[#allocation54_spill] sm:$0xff] %v7160_v20  ;;  %v7162_v44 = vpop.eup %5374  ;;  %v9648_v24 = vld [vmem:[#allocation78_spill] sm:$0xff]  ;;  %v7187_v20 = vpop.f32.mrf.mxu0 }
 0x2db   : > { %v3162_v15 = vadd.f32 %v6980_v43, %v3161_v54  ;;  %5384 = vpow2.f32 %v2751_v3  ;;  %v3181_v60 = vadd.f32 %v7116_v48, %v3180_v13  ;;  %v5097_v62 = vunpack.i.l.bf16 %v7029_v40  ;;  %v7171_v3 = vpop.eup %5376  ;;  %9653 = vst [vmem:[#allocation67_spill] sm:$0xff] %v7187_v20 }
 0x2dc   : > { %v7143_v12 = vmul.f32 1.442695, %v9643_v19  ;;  %v7148_v4 = vmul.f32 1.442695, %v9644_v50  ;;  %v7153_v42 = vmul.f32 1.442695, %v9645_v2  ;;  %4714 = vmatmul.msk.bf16.gmra.mxu2 %vm822_vm0, %v1754_v37  ;;  %4730 = vmatmul.msk.bf16.gmra.mxu3 %vm822_vm0, %v1754_v37  ;;  %5386 = vpow2.f32 %v2755_v46  ;;  %v7177_v50 = vpop.eup %5378  ;;  %v7179_v2 = vpop.f32.mrf.mxu3 }
 0x2dd   : > { %v3372_v59 = vpack.c.bf16 %v9649_v31, %v9648_v24  ;;  %v3555_v14 = vunpack.c.l.b16 %v6906_v22  ;;  %v9650_v37 = vld [vmem:[#allocation93_spill] sm:$0xff]  ;;  %v3163_v13 = vadd.f32 %v7001_v55, %v3162_v15  ;;  %v3182_v40 = vadd.f32 %v7130_v58, %v3181_v60  ;;  %9651 = vst [vmem:[#allocation60_spill] sm:$0xff] %v7179_v2 }
 0x2de   : > { %v3388_v54 = vpack.c.bf16 %v6830_v52, %v9650_v37  ;;  %v3587_v46 = vunpack.c.l.b16 %v6919_v26  ;;  %5388 = vpow2.f32 %v2759_v57  ;;  %v3556_v63 = vunpack.c.h.b16 %v6906_v22  ;;  %v7182_v52 = vpop.eup %5380 }
 0x2df   : > { %v3557_v24 = vunpack.c.l.b16 %v3372_v59  ;;  %9652 = vst [vmem:[#allocation64_spill] sm:$0xff] %v7182_v52  ;;  %v3164_v37 = vadd.f32 %v7012_v56, %v3163_v13  ;;  %v3183_v15 = vadd.f32 %v7138_v35, %v3182_v40  ;;  %v3558_v60 = vunpack.c.h.b16 %v3372_v59  ;;  %v7189_v47 = vpop.eup %5382 }
 0x2e0   : > { %v3589_v31 = vunpack.c.l.b16 %v3388_v54  ;;  %v3588_v19 = vunpack.c.h.b16 %v6919_v26  ;;  %v5105_v57 = vunpack.i.h.bf16 %v7091_v0  ;;  %v3590_v11 = vunpack.c.h.b16 %v3388_v54 }
 0x2e1   : > { %v3605_v2 = vpack.c.b16 %v3557_v24, %v3555_v14  ;;  %v7194_v22 = vpop.eup %5384  ;;  %v7197_v13 = vadd.f32 %v7018_v30, %v3164_v37  ;;  %v3184_v59 = vadd.f32 %v7162_v44, %v3183_v15  ;;  %v3606_v40 = vpack.c.b16 %v3558_v60, %v3556_v63  ;;  %v9656_v37 = vld [vmem:[#allocation79_spill] sm:$0xff] }
 0x2e2   : > { %v3621_v9 = vpack.c.b16 %v3589_v31, %v3587_v46  ;;  %v7200_v26 = vpop.eup %5386  ;;  %5390 = vpow2.f32 %v7084_v21  ;;  %v5102_v20 = vunpack.i.l.bf16 %v7091_v0  ;;  %v3622_v14 = vpack.c.b16 %v3590_v11, %v3588_v19  ;;  %v9655_v46 = vld [vmem:[#allocation8_spill] sm:$0xff]  ;;  %v9658_v15 = vld [vmem:[#allocation83_spill] sm:$0xff]  ;;  %v7221_v19 = vpop.f32.mrf.mxu1 }
 0x2e3   : > { %9654 = vst [vmem:[#allocation73_spill] sm:$0xff] %v7197_v13  ;;  %3655 = vmatpush.bf16.msra.mxu0 %v3605_v2  ;;  %5392 = vpow2.f32 %v7089_v16  ;;  %v3185_v54 = vadd.f32 %v7171_v3, %v3184_v59  ;;  %3683 = vmatpush.bf16.msra.mxu2 %v3606_v40  ;;  %v3369_v24 = vpack.c.bf16 %v9656_v37, %v9655_v46  ;;  %v9657_v31 = vld [vmem:[#allocation12_spill] sm:$0xff]  ;;  %v7223_v40 = vpop.f32.mrf.mxu2 }
 0x2e4   : > { %3669 = vmatpush.bf16.msra.mxu1 %v3621_v9  ;;  %v3370_v63 = vpack.c.bf16 %v9658_v15, %v9657_v31  ;;  %v7210_v60 = vpop.eup %5388  ;;  %5394 = vpow2.f32 %v7103_v45  ;;  %v7213_v21 = vpack.c.bf16 %v5097_v62, %v5097_v62  ;;  %v7215_v0 = vpack.c.bf16 %v5105_v57, %v5105_v57  ;;  %3697 = vmatpush.bf16.msra.mxu3 %v3622_v14  ;;  %v9659_v9 = vld [vmem:[#allocation65_spill] sm:$0xff]  ;;  %v9662_v45 = vld [vmem:[#allocation74_spill] sm:$0xff] }
 0x2e5   : > { %v3385_v11 = vpack.c.bf16 %v6797_v49, %v9659_v9  ;;  %5396 = vpow2.f32 %v7108_v25  ;;  %v3186_v16 = vadd.f32 %v7177_v50, %v3185_v54  ;;  %9660 = vst [vmem:[#allocation76_spill] sm:$0xff] %v7221_v19  ;;  %v3551_v2 = vunpack.c.l.b16 %v3369_v24  ;;  %v7232_v9 = vpop.f32.mrf.mxu3 }
 0x2e6   : > { %v3553_v59 = vunpack.c.l.b16 %v3370_v63  ;;  %9661 = vst [vmem:[#allocation77_spill] sm:$0xff] %v7223_v40  ;;  %v689_v46 = vpack.c.bf16 %v5102_v20, %v5102_v20  ;;  %v3386_v62 = vpack.c.bf16 %v6803_v29, %v9662_v45  ;;  %v3552_v37 = vunpack.c.h.b16 %v3369_v24 }
 0x2e7   : > { %v3583_v57 = vunpack.c.l.b16 %v3385_v11  ;;  %v3187_v14 = vadd.f32 %v7182_v52, %v3186_v16  ;;  %v3554_v49 = vunpack.c.h.b16 %v3370_v63  ;;  %v3584_v15 = vunpack.c.h.b16 %v3385_v11  ;;  %9663 = vst [vmem:[#allocation80_spill] sm:$0xff] %v7232_v9  ;;  %v7239_v11 = vpop.f32.mrf.mxu0  ;;  %v9668_v9 = vld [vmem:[#allocation92_spill] sm:$0xff] }
 0x2e8   : > { %v3603_v31 = vpack.c.b16 %v3553_v59, %v3551_v2  ;;  %v7228_v25 = vpop.eup %5390  ;;  %5398 = vpow2.f32 %v7121_v34  ;;  %v1417_v54 = vunpack.c.l.b16 %v7213_v21  ;;  %v3585_v13 = vunpack.c.l.b16 %v3386_v62  ;;  %9664 = vst [vmem:[#allocation11_spill] sm:$0xff] %v7239_v11  ;;  %v9665_v2 = vld [vmem:[#allocation2_spill] sm:$0xff]  ;;  %v9666_v59 = vld [vmem:[#allocation68_spill] sm:$0xff] }
 0x2e9   : > { %v3586_v20 = vunpack.c.h.b16 %v3386_v62  ;;  %v7234_v40 = vpop.eup %5392  ;;  %5400 = vpow2.f32 %v7126_v6  ;;  %v3188_v29 = vadd.f32 %v7189_v47, %v3187_v14  ;;  %v1734_v24 = vunpack.c.l.b16 %v7215_v0  ;;  %v9667_v62 = vld [vmem:[#allocation5_spill] sm:$0xff]  ;;  %v9669_v0 = vld [vmem:[#allocation55_spill] sm:$0xff] }
 0x2ea   : > { %3656 = vmatpush.bf16.msra.mxu0 %v3603_v31  ;;  %v3604_v63 = vpack.c.b16 %v3554_v49, %v3552_v37  ;;  %v7241_v16 = vpop.eup %5394  ;;  %v3619_v34 = vpack.c.b16 %v3585_v13, %v3583_v57  ;;  %v3367_v45 = vpack.c.bf16 %v9666_v59, %v9665_v2  ;;  %v3368_v19 = vpack.c.bf16 %v9668_v9, %v9667_v62  ;;  %v9670_v31 = vld [vmem:[#allocation61_spill] sm:$0xff] }
 0x2eb   : > { %v3620_v21 = vpack.c.b16 %v3586_v20, %v3584_v15  ;;  %v7247_v52 = vpop.eup %5396  ;;  %v3189_v6 = vadd.f32 %v7194_v22, %v3188_v29  ;;  %v1418_v14 = vunpack.c.l.b16 %v689_v46  ;;  %v3383_v37 = vpack.c.bf16 %v6771_v17, %v9669_v0  ;;  %v7255_v29 = vpop.trf.xlu0 }
 0x2ec   : > { %3684 = vmatpush.bf16.msra.mxu2 %v3604_v63  ;;  %v3384_v49 = vpack.c.bf16 %v6790_v53, %v9670_v31  ;;  %3670 = vmatpush.bf16.msra.mxu1 %v3619_v34  ;;  %v3547_v13 = vunpack.c.l.b16 %v3367_v45  ;;  %v3549_v57 = vunpack.c.l.b16 %v3368_v19  ;;  %v3548_v15 = vunpack.c.h.b16 %v3367_v45  ;;  %v7263_v45 = vpop.f32.mrf.mxu1 }
 0x2ed   : > { %3698 = vmatpush.bf16.msra.mxu3 %v3620_v21  ;;  %v3550_v20 = vunpack.c.h.b16 %v3368_v19  ;;  %v3190_v9 = vadd.f32 %v7200_v26, %v3189_v6  ;;  %v3579_v2 = vunpack.c.l.b16 %v3383_v37  ;;  %v3580_v62 = vunpack.c.h.b16 %v3383_v37  ;;  %9671 = vst [vmem:[#allocation15_spill] sm:$0xff] %v7263_v45  ;;  %v7269_v37 = vpop.f32.mrf.mxu2  ;;  %v9699_v45 = vld [vmem:[#allocation41_spill] sm:$0xff] }
 0x2ee   : > { %v3581_v59 = vunpack.c.l.b16 %v3384_v49  ;;  %v7257_v46 = vpop.eup %5398  ;;  %5402 = vpow2.f32 %v7143_v12  ;;  %v3601_v17 = vpack.c.b16 %v3549_v57, %v3547_v13  ;;  %v3582_v53 = vunpack.c.h.b16 %v3384_v49  ;;  %9673 = vst [vmem:[#allocation87_spill] sm:$0xff] %v7269_v37 }
 0x2ef   : > { %v3602_v63 = vpack.c.b16 %v3550_v20, %v3548_v15  ;;  %v7260_v34 = vpop.eup %5400  ;;  %v3191_v21 = vadd.f32 %v7210_v60, %v3190_v9  ;;  %5404 = vpow2.f32 %v7148_v4  ;;  %v9672_v6 = vsub.f32 %v9616_v38, %v6886_v41  ;;  %v9675_v15 = vld [vmem:[#allocation88_spill] sm:$0xff]  ;;  %v9676_v20 = vld [vmem:[#allocation58_spill] sm:$0xff]  ;;  %v9677_v4 = vld [vmem:[#allocation89_spill] sm:$0xff] }
 0x2f0   : > { %v3617_v19 = vpack.c.b16 %v3581_v59, %v3579_v2  ;;  %3657 = vmatpush.bf16.msra.mxu0 %v3601_v17  ;;  %v3618_v12 = vpack.c.b16 %v3582_v53, %v3580_v62  ;;  %v1439_v31 = vpack.c.b16 %v1418_v14, %v1417_v54  ;;  %v9674_v13 = vunpack.c.l.b16 %v7134_v51  ;;  %v9678_v2 = vld [vmem:[#allocation63_spill] sm:$0xff]  ;;  %v7282_v62 = vpop.f32.mrf.mxu3  ;;  %v9681_v54 = vld [vmem:[#allocation44_spill] sm:$0xff] }
 0x2f1   : > { %v2799_v0 = vmul.f32 1.442695, %v9672_v6  ;;  %3685 = vmatpush.bf16.msra.mxu2 %v3602_v63  ;;  %v3192_v49 = vadd.f32 %v7228_v25, %v3191_v21  ;;  %v3365_v9 = vpack.c.bf16 %v9676_v20, %v9675_v15  ;;  %v3366_v59 = vpack.c.bf16 %v9678_v2, %v9677_v4  ;;  %9680 = vst [vmem:[#allocation71_spill] sm:$0xff] %v7282_v62  ;;  %v7289_v63 = vpop.f32.mrf.mxu0 }
 0x2f2   : > { %3671 = vmatpush.bf16.msra.mxu1 %v3617_v19  ;;  %v1755_v57 = vpack.c.b16 %v1734_v24, %v9674_v13  ;;  %5406 = vpow2.f32 %v7153_v42  ;;  %v9679_v38 = vsub.f32 %v9617_v23, %v6886_v41  ;;  %3699 = vmatpush.bf16.msra.mxu3 %v3618_v12  ;;  %v3381_v51 = vpack.c.bf16 %v6758_v36, %v9681_v54  ;;  %v9682_v24 = vld [vmem:[#allocation50_spill] sm:$0xff] }
 0x2f3   : > { %4675 = vmatmul.msk.bf16.gmra.mxu0 %vm822_vm0, %v1439_v31  ;;  %v3382_v14 = vpack.c.bf16 %v6764_v7, %v9682_v24  ;;  %9683 = vst [vmem:[#allocation97_spill] sm:$0xff] %v7289_v63  ;;  %v3193_v53 = vadd.f32 %v7234_v40, %v3192_v49  ;;  %4691 = vmatmul.msk.bf16.gmra.mxu1 %vm822_vm0, %v1439_v31  ;;  %v3543_v41 = vunpack.c.l.b16 %v3365_v9  ;;  %v3545_v23 = vunpack.c.l.b16 %v3366_v59  ;;  %v9684_v54 = vld [vmem:[#allocation86_spill] sm:$0xff] }
 0x2f4   : > { %v2803_v17 = vmul.f32 1.442695, %v9679_v38  ;;  %4715 = vmatmul.msk.bf16.gmra.mxu2 %vm822_vm0, %v1755_v57  ;;  %v3544_v42 = vunpack.c.h.b16 %v3365_v9  ;;  %v7294_v21 = vpop.eup %5402  ;;  %v5110_v19 = vunpack.i.h.bf16 %v7192_v33  ;;  %4731 = vmatmul.msk.bf16.gmra.mxu3 %vm822_vm0, %v1755_v57  ;;  %v3575_v36 = vunpack.c.l.b16 %v3381_v51  ;;  %v7303_v38 = vpop.trf.xlu0 }
 0x2f5   : > { %v3577_v6 = vunpack.c.l.b16 %v3382_v14  ;;  %v3546_v7 = vunpack.c.h.b16 %v3366_v59  ;;  %v3194_v12 = vadd.f32 %v7241_v16, %v3193_v53  ;;  %v3599_v13 = vpack.c.b16 %v3545_v23, %v3543_v41  ;;  %v7299_v31 = vpop.eup %5404  ;;  %v9688_v41 = vld [vmem:[#allocation36_spill] sm:$0xff] }
 0x2f6   : > { %v3576_v49 = vunpack.c.h.b16 %v3381_v51  ;;  %v3578_v15 = vunpack.c.h.b16 %v3382_v14  ;;  %5408 = vpow2.f32 %v2799_v0  ;;  %v5107_v2 = vunpack.i.l.bf16 %v7192_v33  ;;  %v9685_v51 = vld [vmem:[#allocation48_spill] sm:$0xff]  ;;  %v9686_v14 = vld [vmem:[#allocation47_spill] sm:$0xff] }
 0x2f7   : > { %v3615_v20 = vpack.c.b16 %v3577_v6, %v3575_v36  ;;  %v3600_v4 = vpack.c.b16 %v3546_v7, %v3544_v42  ;;  %5410 = vpow2.f32 %v2803_v17  ;;  %v3195_v9 = vadd.f32 %v7247_v52, %v3194_v12  ;;  %3658 = vmatpush.bf16.msra.mxu0 %v3599_v13  ;;  %v9687_v0 = vld [vmem:[#allocation52_spill] sm:$0xff]  ;;  %v9689_v17 = vld [vmem:[#allocation99_spill] sm:$0xff]  ;;  %v7316_v36 = vpop.f32.mrf.mxu1  ;;  %v9691_v6 = vld [vmem:[#allocation38_spill] sm:$0xff]  ;;  %v7320_v13 = vpop.f32.mrf.mxu2 }
 0x2f8   : > { %v3616_v57 = vpack.c.b16 %v3578_v15, %v3576_v49  ;;  %v7305_v59 = vpop.eup %5406  ;;  %v3363_v24 = vpack.c.bf16 %v9685_v51, %v9684_v54  ;;  %v3364_v53 = vpack.c.bf16 %v9687_v0, %v9686_v14  ;;  %v3379_v23 = vpack.c.bf16 %v9689_v17, %v9688_v41  ;;  %9690 = vst [vmem:[#allocation96_spill] sm:$0xff] %v7316_v36  ;;  %v9692_v7 = vld [vmem:[#allocation17_spill] sm:$0xff] }
 0x2f9   : > { %3672 = vmatpush.bf16.msra.mxu1 %v3615_v20  ;;  %3686 = vmatpush.bf16.msra.mxu2 %v3600_v4  ;;  %v3196_v42 = vadd.f32 %v7257_v46, %v3195_v9  ;;  %v7314_v33 = vpack.c.bf16 %v5110_v19, %v5110_v19  ;;  %v3380_v12 = vpack.c.bf16 %v9692_v7, %v9691_v6  ;;  %v5112_v41 = vunpack.i.l.bf16 %v7255_v29  ;;  %v7330_v7 = vpop.f32.mrf.mxu0 }
 0x2fa   : > { %3700 = vmatpush.bf16.msra.mxu3 %v3616_v57  ;;  %9693 = vst [vmem:[#allocation78_spill] sm:$0xff] %v7320_v13  ;;  %v3539_v49 = vunpack.c.l.b16 %v3363_v24  ;;  %v3541_v15 = vunpack.c.l.b16 %v3364_v53  ;;  %v3571_v20 = vunpack.c.l.b16 %v3379_v23  ;;  %v3540_v4 = vunpack.c.h.b16 %v3363_v24  ;;  %v7327_v57 = vpop.f32.mrf.mxu3 }
 0x2fb   : > { %v3197_v54 = vadd.f32 %v7260_v34, %v3196_v42  ;;  %v3573_v51 = vunpack.c.l.b16 %v3380_v12  ;;  %v3542_v14 = vunpack.c.h.b16 %v3364_v53  ;;  %v3572_v0 = vunpack.c.h.b16 %v3379_v23  ;;  %9694 = vst [vmem:[#allocation3_spill] sm:$0xff] %v7327_v57  ;;  %v9696_v53 = vld [vmem:[#allocation23_spill] sm:$0xff] }
 0x2fc   : > { %v7323_v9 = vpop.eup %5408  ;;  %v7325_v19 = vpack.c.bf16 %v5107_v2, %v5107_v2  ;;  %v3597_v17 = vpack.c.b16 %v3541_v15, %v3539_v49  ;;  %v3574_v6 = vunpack.c.h.b16 %v3380_v12  ;;  %9695 = vst [vmem:[#allocation8_spill] sm:$0xff] %v7330_v7  ;;  %v9697_v23 = vld [vmem:[#allocation91_spill] sm:$0xff]  ;;  %v5115_v2 = vunpack.i.h.bf16 %v7255_v29  ;;  %v9700_v49 = vld [vmem:[#allocation28_spill] sm:$0xff]  ;;  %v9701_v12 = vld [vmem:[#allocation98_spill] sm:$0xff] }
 0x2fd   : > { %v7332_v13 = vpop.eup %5410  ;;  %v3198_v24 = vadd.f32 %v7294_v21, %v3197_v54  ;;  %v3613_v42 = vpack.c.b16 %v3573_v51, %v3571_v20  ;;  %v3598_v62 = vpack.c.b16 %v3542_v14, %v3540_v4  ;;  %v3361_v37 = vpack.c.bf16 %v9697_v23, %v9696_v53  ;;  %v9698_v57 = vld [vmem:[#allocation27_spill] sm:$0xff]  ;;  %v9702_v20 = vld [vmem:[#allocation34_spill] sm:$0xff]  ;;  %v9703_v4 = vld [vmem:[#allocation13_spill] sm:$0xff] }
 0x2fe   : > { %3659 = vmatpush.bf16.msra.mxu0 %v3597_v17  ;;  %v3614_v36 = vpack.c.b16 %v3574_v6, %v3572_v0  ;;  %v3362_v63 = vpack.c.bf16 %v9699_v45, %v9698_v57  ;;  %v3377_v15 = vpack.c.bf16 %v9701_v12, %v9700_v49  ;;  %v3378_v51 = vpack.c.bf16 %v9703_v4, %v9702_v20 }
 0x2ff   : > { %v3199_v7 = vadd.f32 %v7299_v31, %v3198_v24  ;;  %3673 = vmatpush.bf16.msra.mxu1 %v3613_v42  ;;  %3687 = vmatpush.bf16.msra.mxu2 %v3598_v62  ;;  %v3535_v54 = vunpack.c.l.b16 %v3361_v37  ;;  %v3536_v14 = vunpack.c.h.b16 %v3361_v37  ;;  %v691_v53 = vpack.c.bf16 %v5112_v41, %v5112_v41  ;;  %v7347_v62 = vpop.trf.xlu0 }
 0x300   : > { %3701 = vmatpush.bf16.msra.mxu3 %v3614_v36  ;;  %v3537_v29 = vunpack.c.l.b16 %v3362_v63  ;;  %v3567_v17 = vunpack.c.l.b16 %v3377_v15  ;;  %v3538_v0 = vunpack.c.h.b16 %v3362_v63  ;;  %v3569_v45 = vunpack.c.l.b16 %v3378_v51  ;;  %v7350_v36 = vpop.f32.mrf.mxu1 }
 0x301   : > { %v3200_v6 = vadd.f32 %v7305_v59, %v3199_v7  ;;  %v3568_v57 = vunpack.c.h.b16 %v3377_v15  ;;  %v3570_v23 = vunpack.c.h.b16 %v3378_v51  ;;  %v1735_v49 = vunpack.c.l.b16 %v7314_v33  ;;  %9704 = vst [vmem:[#allocation79_spill] sm:$0xff] %v7350_v36  ;;  %v7353_v7 = vpop.f32.mrf.mxu2  ;;  %v9706_v15 = vld [vmem:[#allocation75_spill] sm:$0xff]  ;;  %v9717_v36 = vld [vmem:[#allocation69_spill] sm:$0xff] }
 0x302   : > { %v3595_v24 = vpack.c.b16 %v3537_v29, %v3535_v54  ;;  %v3596_v42 = vpack.c.b16 %v3538_v0, %v3536_v14  ;;  %v723_v20 = vpack.c.bf16 %v5115_v2, %v5115_v2  ;;  %v3611_v37 = vpack.c.b16 %v3569_v45, %v3567_v17  ;;  %9705 = vst [vmem:[#allocation12_spill] sm:$0xff] %v7353_v7  ;;  %v9707_v33 = vld [vmem:[#allocation31_spill] sm:$0xff]  ;;  %v9709_v14 = vld [vmem:[#allocation90_spill] sm:$0xff] }
 0x303   : > { %v3201_v12 = vadd.f32 %v7323_v9, %v3200_v6  ;;  %v3612_v41 = vpack.c.b16 %v3570_v23, %v3568_v57  ;;  %v1419_v63 = vunpack.c.l.b16 %v7325_v19  ;;  %v1420_v4 = vunpack.c.l.b16 %v691_v53  ;;  %v9708_v51 = vld [vmem:[#allocation19_spill] sm:$0xff]  ;;  %v9711_v2 = vld [vmem:[#allocation82_spill] sm:$0xff]  ;;  %v9713_v19 = vld [vmem:[#allocation84_spill] sm:$0xff]  ;;  %v7366_v57 = vpop.f32.mrf.mxu3 }
 0x304   : > { %3660 = vmatpush.bf16.msra.mxu0 %v3595_v24  ;;  %3688 = vmatpush.bf16.msra.mxu2 %v3596_v42  ;;  %v3359_v54 = vpack.c.bf16 %v9707_v33, %v9706_v15  ;;  %v3360_v29 = vpack.c.bf16 %v9709_v14, %v9708_v51  ;;  %v9712_v17 = vld [vmem:[#allocation95_spill] sm:$0xff]  ;;  %v9714_v53 = vld [vmem:[#allocation9_spill] sm:$0xff]  ;;  %9715 = vst [vmem:[#allocation65_spill] sm:$0xff] %v7366_v57  ;;  %v7368_v33 = vpop.f32.mrf.mxu0  ;;  %v1736_v51 = vunpack.c.l.b16 %v723_v20  ;;  %v9718_v20 = vld [vmem:[#allocation70_spill] sm:$0xff] }
 0x305   : > { %v7360_v0 = vadd.f32 %v7332_v13, %v3201_v12  ;;  %3674 = vmatpush.bf16.msra.mxu1 %v3611_v37  ;;  %3702 = vmatpush.bf16.msra.mxu3 %v3612_v41  ;;  %v3375_v6 = vpack.c.bf16 %v9712_v17, %v9711_v2  ;;  %v3376_v45 = vpack.c.bf16 %v9714_v53, %v9713_v19  ;;  %v9719_v57 = vld [vmem:[#allocation20_spill] sm:$0xff] }
 0x306   : > { %v3531_v23 = vunpack.c.l.b16 %v3359_v54  ;;  %v3533_v24 = vunpack.c.l.b16 %v3360_v29  ;;  %v3532_v42 = vunpack.c.h.b16 %v3359_v54  ;;  %v3534_v15 = vunpack.c.h.b16 %v3360_v29  ;;  %9716 = vst [vmem:[#allocation74_spill] sm:$0xff] %v7368_v33 }
 0x307   : > { %9710 = vst [vmem:[#allocation83_spill] sm:$0xff] %v7360_v0  ;;  %v3563_v14 = vunpack.c.l.b16 %v3375_v6  ;;  %v3565_v12 = vunpack.c.l.b16 %v3376_v45  ;;  %v3564_v0 = vunpack.c.h.b16 %v3375_v6  ;;  %v3566_v7 = vunpack.c.h.b16 %v3376_v45  ;;  %v9720_v6 = vld [vmem:[#allocation72_spill] sm:$0xff]  ;;  %v9722_v45 = vld [vmem:[#allocation81_spill] sm:$0xff] }
 0x308   : > { %v3593_v37 = vpack.c.b16 %v3533_v24, %v3531_v23  ;;  %v3594_v41 = vpack.c.b16 %v3534_v15, %v3532_v42  ;;  %v3403_v2 = vpack.c.bf16 %v7171_v3, %v9717_v36  ;;  %v3419_v19 = vpack.c.bf16 %v7323_v9, %v7012_v56  ;;  %v9721_v23 = vld [vmem:[#allocation24_spill] sm:$0xff]  ;;  %v9723_v42 = vld [vmem:[#allocation94_spill] sm:$0xff]  ;;  %v9725_v56 = vld [vmem:[#allocation85_spill] sm:$0xff] }
 0x309   : > { %v3609_v17 = vpack.c.b16 %v3565_v12, %v3563_v14  ;;  %v3610_v54 = vpack.c.b16 %v3566_v7, %v3564_v0  ;;  %v1440_v29 = vpack.c.b16 %v1420_v4, %v1419_v63  ;;  %v1756_v53 = vpack.c.b16 %v1736_v51, %v1735_v49  ;;  %v9724_v3 = vld [vmem:[#allocation16_spill] sm:$0xff]  ;;  %v7387_v4 = vpop.trf.xlu0  ;;  %v7391_v14 = vpop.f32.mrf.mxu1 }
 0x30a   : > { %3661 = vmatpush.bf16.msra.mxu0 %v3593_v37  ;;  %3689 = vmatpush.bf16.msra.mxu2 %v3594_v41  ;;  %v3357_v33 = vpack.c.bf16 %v9719_v57, %v9718_v20  ;;  %v3358_v24 = vpack.c.bf16 %v9721_v23, %v9720_v6  ;;  %v3373_v15 = vpack.c.bf16 %v9723_v42, %v9722_v45  ;;  %v9726_v36 = vld [vmem:[#allocation100_spill] sm:$0xff]  ;;  %v3781_v51 = vunpack.c.l.b16 %v3403_v2  ;;  %v7393_v12 = vpop.f32.mrf.mxu2 }
 0x30b   : > { %3675 = vmatpush.bf16.msra.mxu1 %v3609_v17  ;;  %3703 = vmatpush.bf16.msra.mxu3 %v3610_v54  ;;  %v3374_v9 = vpack.c.bf16 %v9725_v56, %v9724_v3  ;;  %v3404_v63 = vpack.c.bf16 %v7177_v50, %v9726_v36  ;;  %v3420_v49 = vpack.c.bf16 %v7332_v13, %v7018_v30  ;;  %v7396_v20 = vpop.f32.mrf.mxu3  ;;  %v3782_v42 = vunpack.c.h.b16 %v3403_v2 }
 0x30c   : > { %4676 = vmatmul.msk.bf16.gmra.mxu0 %vm822_vm0, %v1440_v29  ;;  %4692 = vmatmul.msk.bf16.gmra.mxu1 %vm822_vm0, %v1440_v29  ;;  %v3527_v7 = vunpack.c.l.b16 %v3357_v33  ;;  %v3529_v0 = vunpack.c.l.b16 %v3358_v24  ;;  %v3559_v57 = vunpack.c.l.b16 %v3373_v15  ;;  %9727 = vst [vmem:[#allocation2_spill] sm:$0xff] %v7393_v12  ;;  %v3528_v37 = vunpack.c.h.b16 %v3357_v33  ;;  %v7398_v3 = vpop.f32.mrf.mxu0 }
 0x30d   : > { %4716 = vmatmul.msk.bf16.gmra.mxu2 %vm822_vm0, %v1756_v53  ;;  %4732 = vmatmul.msk.bf16.gmra.mxu3 %vm822_vm0, %v1756_v53  ;;  %v3561_v50 = vunpack.c.l.b16 %v3374_v9  ;;  %v3530_v41 = vunpack.c.h.b16 %v3358_v24  ;;  %v3560_v30 = vunpack.c.h.b16 %v3373_v15  ;;  %v3562_v17 = vunpack.c.h.b16 %v3374_v9  ;;  %9728 = vst [vmem:[#allocation68_spill] sm:$0xff] %v7396_v20 }
 0x30e   : > { %v3591_v13 = vpack.c.b16 %v3529_v0, %v3527_v7  ;;  %v3783_v54 = vunpack.c.l.b16 %v3404_v63  ;;  %v3813_v29 = vunpack.c.l.b16 %v3419_v19  ;;  %v3815_v45 = vunpack.c.l.b16 %v3420_v49  ;;  %9729 = vst [vmem:[#allocation5_spill] sm:$0xff] %v7398_v3  ;;  %v9730_v0 = vld [vmem:[#allocation62_spill] sm:$0xff] }
 0x30f   : > { %v3607_v6 = vpack.c.b16 %v3561_v50, %v3559_v57  ;;  %v3592_v23 = vpack.c.b16 %v3530_v41, %v3528_v37  ;;  %v3608_v56 = vpack.c.b16 %v3562_v17, %v3560_v30  ;;  %v3784_v53 = vunpack.c.h.b16 %v3404_v63  ;;  %v9731_v50 = vld [vmem:[#allocation66_spill] sm:$0xff] }
 0x310   : > { %3662 = vmatpush.bf16.msra.mxu0 %v3591_v13  ;;  %v3831_v36 = vpack.c.b16 %v3783_v54, %v3781_v51  ;;  %v3814_v12 = vunpack.c.h.b16 %v3419_v19  ;;  %v3847_v33 = vpack.c.b16 %v3815_v45, %v3813_v29  ;;  %v3816_v24 = vunpack.c.h.b16 %v3420_v49 }
 0x311   : > { %3676 = vmatpush.bf16.msra.mxu1 %v3607_v6  ;;  %3690 = vmatpush.bf16.msra.mxu2 %v3592_v23  ;;  %v5120_v15 = vunpack.i.h.bf16 %v7303_v38  ;;  %v5117_v9 = vunpack.i.l.bf16 %v7303_v38  ;;  %v3832_v7 = vpack.c.b16 %v3784_v53, %v3782_v42  ;;  %v3401_v57 = vpack.c.bf16 %v7138_v35, %v9730_v0  ;;  %v7411_v30 = vpop.trf.xlu0  ;;  %v7413_v54 = vpop.f32.mrf.mxu1 }
 0x312   : > { %3704 = vmatpush.bf16.msra.mxu3 %v3608_v56  ;;  %v3848_v2 = vpack.c.b16 %v3816_v24, %v3814_v12  ;;  %v3402_v63 = vpack.c.bf16 %v7162_v44, %v9731_v50  ;;  %v3417_v19 = vpack.c.bf16 %v7299_v31, %v6980_v43  ;;  %v5122_v49 = vunpack.i.l.bf16 %v7347_v62  ;;  %9732 = vst [vmem:[#allocation92_spill] sm:$0xff] %v7413_v54  ;;  %v7419_v29 = vpop.f32.mrf.mxu2  ;;  %v9735_v56 = vld [vmem:[#allocation59_spill] sm:$0xff] }
 0x313   : > { %v3418_v38 = vpack.c.bf16 %v7305_v59, %v7001_v55  ;;  %v3777_v51 = vunpack.c.l.b16 %v3401_v57  ;;  %v3778_v12 = vunpack.c.h.b16 %v3401_v57  ;;  %v7415_v43 = vpack.c.bf16 %v5120_v15, %v5120_v15  ;;  %9733 = vst [vmem:[#allocation55_spill] sm:$0xff] %v7419_v29  ;;  %v9734_v59 = vld [vmem:[#allocation56_spill] sm:$0xff]  ;;  %v7426_v53 = vpop.f32.mrf.mxu3 }
 0x314   : > { %3881 = vmatpush.bf16.msrb.mxu0 %v3831_v36  ;;  %v3779_v37 = vunpack.c.l.b16 %v3402_v63  ;;  %v3809_v41 = vunpack.c.l.b16 %v3417_v19  ;;  %v3780_v13 = vunpack.c.h.b16 %v3402_v63  ;;  %v3810_v17 = vunpack.c.h.b16 %v3417_v19  ;;  %9736 = vst [vmem:[#allocation61_spill] sm:$0xff] %v7426_v53 }
 0x315   : > { %3895 = vmatpush.bf16.msrb.mxu1 %v3847_v33  ;;  %3909 = vmatpush.bf16.msrb.mxu2 %v3832_v7  ;;  %v3811_v35 = vunpack.c.l.b16 %v3418_v38  ;;  %v3812_v44 = vunpack.c.h.b16 %v3418_v38  ;;  %v7417_v31 = vpack.c.bf16 %v5117_v9, %v5117_v9  ;;  %v3399_v6 = vpack.c.bf16 %v7116_v48, %v9734_v59  ;;  %v7432_v7 = vpop.f32.mrf.mxu0 }
 0x316   : > { %3923 = vmatpush.bf16.msrb.mxu3 %v3848_v2  ;;  %v3829_v55 = vpack.c.b16 %v3779_v37, %v3777_v51  ;;  %v5125_v23 = vunpack.i.h.bf16 %v7347_v62  ;;  %v3830_v42 = vpack.c.b16 %v3780_v13, %v3778_v12  ;;  %v3400_v36 = vpack.c.bf16 %v7130_v58, %v9735_v56  ;;  %9737 = vst [vmem:[#allocation88_spill] sm:$0xff] %v7432_v7  ;;  %v9738_v51 = vld [vmem:[#allocation49_spill] sm:$0xff] }
 0x317   : > { %v3845_v45 = vpack.c.b16 %v3811_v35, %v3809_v41  ;;  %v3846_v33 = vpack.c.b16 %v3812_v44, %v3810_v17  ;;  %v3773_v24 = vunpack.c.l.b16 %v3399_v6  ;;  %v3415_v15 = vpack.c.bf16 %v7260_v34, %v6967_v8  ;;  %v9739_v12 = vld [vmem:[#allocation53_spill] sm:$0xff] }
 0x318   : > { %3882 = vmatpush.bf16.msrb.mxu0 %v3829_v55  ;;  %v3416_v9 = vpack.c.bf16 %v7294_v21, %v6973_v10  ;;  %v693_v48 = vpack.c.bf16 %v5122_v49, %v5122_v49  ;;  %v3775_v62 = vunpack.c.l.b16 %v3400_v36  ;;  %v3774_v2 = vunpack.c.h.b16 %v3399_v6 }
 0x319   : > { %3896 = vmatpush.bf16.msrb.mxu1 %v3845_v45  ;;  %3910 = vmatpush.bf16.msrb.mxu2 %v3830_v42  ;;  %v3776_v0 = vunpack.c.h.b16 %v3400_v36  ;;  %v3805_v58 = vunpack.c.l.b16 %v3415_v15  ;;  %v3806_v50 = vunpack.c.h.b16 %v3415_v15  ;;  %v1737_v63 = vunpack.c.l.b16 %v7415_v43  ;;  %v9743_v15 = vld [vmem:[#allocation42_spill] sm:$0xff] }
 0x31a   : > { %3924 = vmatpush.bf16.msrb.mxu3 %v3846_v33  ;;  %v3807_v57 = vunpack.c.l.b16 %v3416_v9  ;;  %v3827_v19 = vpack.c.b16 %v3775_v62, %v3773_v24  ;;  %v3808_v8 = vunpack.c.h.b16 %v3416_v9  ;;  %v1421_v34 = vunpack.c.l.b16 %v7417_v31  ;;  %v7444_v31 = vpop.trf.xlu0 }
 0x31b   : > { %v3828_v38 = vpack.c.b16 %v3776_v0, %v3774_v2  ;;  %v725_v10 = vpack.c.bf16 %v5125_v23, %v5125_v23  ;;  %v3397_v49 = vpack.c.bf16 %v7098_v32, %v9738_v51  ;;  %v1422_v37 = vunpack.c.l.b16 %v693_v48  ;;  %v7446_v23 = vpop.f32.mrf.mxu1  ;;  %v7450_v36 = vpop.f32.mrf.mxu3  ;;  %v9744_v48 = vld [vmem:[#allocation45_spill] sm:$0xff]  ;;  %v9746_v51 = vld [vmem:[#allocation40_spill] sm:$0xff] }
 0x31c   : > { %v3843_v21 = vpack.c.b16 %v3807_v57, %v3805_v58  ;;  %3883 = vmatpush.bf16.msrb.mxu0 %v3827_v19  ;;  %v3844_v41 = vpack.c.b16 %v3808_v8, %v3806_v50  ;;  %v3398_v35 = vpack.c.bf16 %v7110_v5, %v9739_v12  ;;  %v3413_v13 = vpack.c.bf16 %v7247_v52, %v6950_v39  ;;  %v7448_v5 = vpop.f32.mrf.mxu2  ;;  %v9747_v12 = vld [vmem:[#allocation39_spill] sm:$0xff] }
 0x31d   : > { %3911 = vmatpush.bf16.msrb.mxu2 %v3828_v38  ;;  %v3769_v17 = vunpack.c.l.b16 %v3397_v49  ;;  %v3414_v44 = vpack.c.bf16 %v7257_v46, %v6958_v18  ;;  %v3770_v43 = vunpack.c.h.b16 %v3397_v49  ;;  %v1738_v45 = vunpack.c.l.b16 %v725_v10  ;;  %9740 = vst [vmem:[#allocation58_spill] sm:$0xff] %v7448_v5  ;;  %v7452_v33 = vpop.f32.mrf.mxu0 }
 0x31e   : > { %3897 = vmatpush.bf16.msrb.mxu1 %v3843_v21  ;;  %3925 = vmatpush.bf16.msrb.mxu3 %v3844_v41  ;;  %v3771_v32 = vunpack.c.l.b16 %v3398_v35  ;;  %v3801_v55 = vunpack.c.l.b16 %v3413_v13  ;;  %v3772_v59 = vunpack.c.h.b16 %v3398_v35  ;;  %v3802_v6 = vunpack.c.h.b16 %v3413_v13  ;;  %9741 = vst [vmem:[#allocation89_spill] sm:$0xff] %v7450_v36  ;;  %v9745_v21 = vld [vmem:[#allocation35_spill] sm:$0xff] }
 0x31f   : > { %v3803_v42 = vunpack.c.l.b16 %v3414_v44  ;;  %v3804_v39 = vunpack.c.h.b16 %v3414_v44  ;;  %9742 = vst [vmem:[#allocation63_spill] sm:$0xff] %v7452_v33  ;;  %v1441_v24 = vpack.c.b16 %v1422_v37, %v1421_v34  ;;  %v3395_v9 = vpack.c.bf16 %v7069_v27, %v9743_v15  ;;  %v9748_v35 = vld [vmem:[#allocation43_spill] sm:$0xff] }
 0x320   : > { %v3825_v52 = vpack.c.b16 %v3771_v32, %v3769_v17  ;;  %v3826_v56 = vpack.c.b16 %v3772_v59, %v3770_v43  ;;  %v3396_v62 = vpack.c.bf16 %v7079_v28, %v9744_v48  ;;  %v1757_v2 = vpack.c.b16 %v1738_v45, %v1737_v63  ;;  %v9749_v17 = vld [vmem:[#allocation105_spill] sm:$0xff] }
 0x321   : > { %v3841_v18 = vpack.c.b16 %v3803_v42, %v3801_v55  ;;  %v3842_v46 = vpack.c.b16 %v3804_v39, %v3802_v6  ;;  %v3411_v0 = vpack.c.bf16 %v7234_v40, %v6935_v61  ;;  %v3412_v58 = vpack.c.bf16 %v7241_v16, %v6943_v1  ;;  %4677 = vmatmul.msk.bf16.gmra.mxu0 %vm822_vm0, %v1441_v24 }
 0x322   : > { %3884 = vmatpush.bf16.msrb.mxu0 %v3825_v52  ;;  %3912 = vmatpush.bf16.msrb.mxu2 %v3826_v56  ;;  %v5130_v57 = vunpack.i.h.bf16 %v7387_v4  ;;  %v3765_v50 = vunpack.c.l.b16 %v3395_v9  ;;  %v3767_v27 = vunpack.c.l.b16 %v3396_v62  ;;  %v3766_v19 = vunpack.c.h.b16 %v3395_v9  ;;  %v7471_v37 = vpop.trf.xlu0 }
 0x323   : > { %3898 = vmatpush.bf16.msrb.mxu1 %v3841_v18  ;;  %3926 = vmatpush.bf16.msrb.mxu3 %v3842_v46  ;;  %v3797_v28 = vunpack.c.l.b16 %v3411_v0  ;;  %v3799_v63 = vunpack.c.l.b16 %v3412_v58  ;;  %v3768_v38 = vunpack.c.h.b16 %v3396_v62  ;;  %v3798_v61 = vunpack.c.h.b16 %v3411_v0  ;;  %v7479_v32 = vpop.f32.mrf.mxu1  ;;  %v9755_v0 = vld [vmem:[#allocation30_spill] sm:$0xff] }
 0x324   : > { %4693 = vmatmul.msk.bf16.gmra.mxu1 %vm822_vm0, %v1441_v24  ;;  %4717 = vmatmul.msk.bf16.gmra.mxu2 %vm822_vm0, %v1757_v2  ;;  %v5127_v40 = vunpack.i.l.bf16 %v7387_v4  ;;  %v3823_v1 = vpack.c.b16 %v3767_v27, %v3765_v50  ;;  %v3800_v16 = vunpack.c.h.b16 %v3412_v58  ;;  %v5135_v8 = vunpack.i.h.bf16 %v7411_v30  ;;  %v9750_v4 = vld [vmem:[#allocation10_spill] sm:$0xff]  ;;  %v7483_v59 = vpop.f32.mrf.mxu2  ;;  %v9756_v27 = vld [vmem:[#allocation32_spill] sm:$0xff] }
 0x325   : > { %4733 = vmatmul.msk.bf16.gmra.mxu3 %vm822_vm0, %v1757_v2  ;;  %v3839_v34 = vpack.c.b16 %v3799_v63, %v3797_v28  ;;  %v3824_v10 = vpack.c.b16 %v3768_v38, %v3766_v19  ;;  %v3393_v49 = vpack.c.bf16 %v9746_v51, %v9745_v21  ;;  %v3394_v13 = vpack.c.bf16 %v9748_v35, %v9747_v12  ;;  %v7490_v15 = vpop.f32.mrf.mxu0  ;;  %v9754_v2 = vld [vmem:[#allocation29_spill] sm:$0xff]  ;;  %v9758_v63 = vld [vmem:[#allocation4_spill] sm:$0xff] }
 0x326   : > { %3885 = vmatpush.bf16.msrb.mxu0 %v3823_v1  ;;  %v3840_v41 = vpack.c.b16 %v3800_v16, %v3798_v61  ;;  %v3409_v44 = vpack.c.bf16 %v7210_v60, %v9749_v17  ;;  %v3410_v43 = vpack.c.bf16 %v7228_v25, %v9750_v4  ;;  %v7481_v55 = vpack.c.bf16 %v5130_v57, %v5130_v57  ;;  %v7488_v25 = vpop.f32.mrf.mxu3  ;;  %v9757_v19 = vld [vmem:[#allocation37_spill] sm:$0xff]  ;;  %v9759_v61 = vld [vmem:[#allocation7_spill] sm:$0xff] }
 0x327   : > { %3899 = vmatpush.bf16.msrb.mxu1 %v3839_v34  ;;  %3913 = vmatpush.bf16.msrb.mxu2 %v3824_v10  ;;  %9751 = vst [vmem:[#allocation44_spill] sm:$0xff] %v7483_v59  ;;  %v3761_v6 = vunpack.c.l.b16 %v3393_v49  ;;  %v3762_v45 = vunpack.c.h.b16 %v3393_v49  ;;  %v3763_v42 = vunpack.c.l.b16 %v3394_v13  ;;  %v3764_v56 = vunpack.c.h.b16 %v3394_v13  ;;  %v9760_v4 = vld [vmem:[#allocation21_spill] sm:$0xff] }
 0x328   : > { %3927 = vmatpush.bf16.msrb.mxu3 %v3840_v41  ;;  %v3793_v39 = vunpack.c.l.b16 %v3409_v44  ;;  %v3795_v52 = vunpack.c.l.b16 %v3410_v43  ;;  %v7485_v18 = vpack.c.bf16 %v5127_v40, %v5127_v40  ;;  %v5132_v60 = vunpack.i.l.bf16 %v7411_v30  ;;  %9752 = vst [vmem:[#allocation50_spill] sm:$0xff] %v7488_v25 }
 0x329   : > { %v3794_v46 = vunpack.c.h.b16 %v3409_v44  ;;  %v3796_v24 = vunpack.c.h.b16 %v3410_v43  ;;  %9753 = vst [vmem:[#allocation86_spill] sm:$0xff] %v7490_v15  ;;  %v727_v9 = vpack.c.bf16 %v5135_v8, %v5135_v8  ;;  %v3821_v48 = vpack.c.b16 %v3763_v42, %v3761_v6  ;;  %v9761_v43 = vld [vmem:[#allocation18_spill] sm:$0xff] }
 0x32a   : > { %v3837_v62 = vpack.c.b16 %v3795_v52, %v3793_v39  ;;  %v3391_v58 = vpack.c.bf16 %v9755_v0, %v9754_v2  ;;  %v3822_v57 = vpack.c.b16 %v3764_v56, %v3762_v45  ;;  %v3392_v28 = vpack.c.bf16 %v9757_v19, %v9756_v27  ;;  %v7502_v17 = vpop.trf.xlu0  ;;  %v9762_v45 = vld [vmem:[#allocation25_spill] sm:$0xff]  ;;  %v9763_v42 = vld [vmem:[#allocation22_spill] sm:$0xff] }
 0x32b   : > { %v3838_v50 = vpack.c.b16 %v3796_v24, %v3794_v46  ;;  %v3407_v30 = vpack.c.bf16 %v7194_v22, %v9758_v63  ;;  %3886 = vmatpush.bf16.msrb.mxu0 %v3821_v48  ;;  %v3408_v40 = vpack.c.bf16 %v7200_v26, %v9759_v61  ;;  %v695_v16 = vpack.c.bf16 %v5132_v60, %v5132_v60  ;;  %v7508_v52 = vpop.f32.mrf.mxu1  ;;  %v9766_v60 = vld [vmem:[#allocation64_spill] sm:$0xff] }
 0x32c   : > { %3900 = vmatpush.bf16.msrb.mxu1 %v3837_v62  ;;  %v3757_v38 = vunpack.c.l.b16 %v3391_v58  ;;  %v3758_v1 = vunpack.c.h.b16 %v3391_v58  ;;  %3914 = vmatpush.bf16.msrb.mxu2 %v3822_v57  ;;  %v3759_v8 = vunpack.c.l.b16 %v3392_v28  ;;  %v3760_v10 = vunpack.c.h.b16 %v3392_v28  ;;  %v7510_v56 = vpop.f32.mrf.mxu2  ;;  %v9767_v24 = vld [vmem:[#allocation104_spill] sm:$0xff] }
 0x32d   : > { %3928 = vmatpush.bf16.msrb.mxu3 %v3838_v50  ;;  %v3789_v34 = vunpack.c.l.b16 %v3407_v30  ;;  %v1739_v21 = vunpack.c.l.b16 %v7481_v55  ;;  %v3791_v51 = vunpack.c.l.b16 %v3408_v40  ;;  %v3790_v49 = vunpack.c.h.b16 %v3407_v30  ;;  %9764 = vst [vmem:[#allocation48_spill] sm:$0xff] %v7510_v56  ;;  %v7518_v28 = vpop.f32.mrf.mxu0 }
 0x32e   : > { %v3792_v41 = vunpack.c.h.b16 %v3408_v40  ;;  %v1423_v22 = vunpack.c.l.b16 %v7485_v18  ;;  %v1740_v12 = vunpack.c.l.b16 %v727_v9  ;;  %v3819_v35 = vpack.c.b16 %v3759_v8, %v3757_v38  ;;  %v9765_v18 = vld [vmem:[#allocation103_spill] sm:$0xff]  ;;  %v7516_v58 = vpop.f32.mrf.mxu3  ;;  %9769 = vst [vmem:[#allocation52_spill] sm:$0xff] %v7518_v28 }
 0x32f   : > { %v3820_v13 = vpack.c.b16 %v3760_v10, %v3758_v1  ;;  %v3835_v26 = vpack.c.b16 %v3791_v51, %v3789_v34  ;;  %v3389_v6 = vpack.c.bf16 %v9761_v43, %v9760_v4  ;;  %v3390_v39 = vpack.c.bf16 %v9763_v42, %v9762_v45  ;;  %9768 = vst [vmem:[#allocation47_spill] sm:$0xff] %v7516_v58 }
 0x330   : > { %v3836_v44 = vpack.c.b16 %v3792_v41, %v3790_v49  ;;  %v1424_v55 = vunpack.c.l.b16 %v695_v16  ;;  %3887 = vmatpush.bf16.msrb.mxu0 %v3819_v35  ;;  %v3405_v46 = vpack.c.bf16 %v9766_v60, %v9765_v18  ;;  %v3406_v9 = vpack.c.bf16 %v7189_v47, %v9767_v24 }
 0x331   : > { %3915 = vmatpush.bf16.msrb.mxu2 %v3820_v13  ;;  %3901 = vmatpush.bf16.msrb.mxu1 %v3835_v26  ;;  %v3753_v48 = vunpack.c.l.b16 %v3389_v6  ;;  %v3755_v62 = vunpack.c.l.b16 %v3390_v39  ;;  %v3754_v2 = vunpack.c.h.b16 %v3389_v6  ;;  %v3756_v0 = vunpack.c.h.b16 %v3390_v39 }
 0x332   : > { %3929 = vmatpush.bf16.msrb.mxu3 %v3836_v44  ;;  %v3785_v57 = vunpack.c.l.b16 %v3405_v46  ;;  %v3787_v50 = vunpack.c.l.b16 %v3406_v9  ;;  %v3786_v27 = vunpack.c.h.b16 %v3405_v46  ;;  %v3788_v19 = vunpack.c.h.b16 %v3406_v9  ;;  %v5151_v1 = vpop.trf.xlu0 }
 0x333   : > { %v3817_v63 = vpack.c.b16 %v3755_v62, %v3753_v48  ;;  %v3818_v30 = vpack.c.b16 %v3756_v0, %v3754_v2  ;;  %v1442_v47 = vpack.c.b16 %v1424_v55, %v1423_v22  ;;  %v1758_v40 = vpack.c.b16 %v1740_v12, %v1739_v21  ;;  %v7526_v34 = vpop.f32.mrf.mxu1 }
 0x334   : > { %v3833_v38 = vpack.c.b16 %v3787_v50, %v3785_v57  ;;  %v3834_v61 = vpack.c.b16 %v3788_v19, %v3786_v27  ;;  %v5137_v16 = vunpack.i.l.bf16 %v7444_v31  ;;  %v5142_v8 = vunpack.i.l.bf16 %v7471_v37  ;;  %v7530_v21 = vpop.f32.mrf.mxu2 }
 0x335   : > { %3888 = vmatpush.bf16.msrb.mxu0 %v3817_v63  ;;  %3916 = vmatpush.bf16.msrb.mxu2 %v3818_v30  ;;  %v5140_v10 = vunpack.i.h.bf16 %v7444_v31  ;;  %v5145_v51 = vunpack.i.h.bf16 %v7471_v37  ;;  %9770 = vst [vmem:[#allocation36_spill] sm:$0xff] %v7530_v21  ;;  %v7534_v41 = vpop.f32.mrf.mxu0  ;;  %v5147_v55 = vunpack.i.l.bf16 %v7502_v17  ;;  %v5152_v18 = vunpack.i.l.bf16 %v5151_v1 }
 0x336   : > { %3902 = vmatpush.bf16.msrb.mxu1 %v3833_v38  ;;  %3930 = vmatpush.bf16.msrb.mxu3 %v3834_v61  ;;  %v7532_v49 = vpop.f32.mrf.mxu3  ;;  %9772 = vst [vmem:[#allocation38_spill] sm:$0xff] %v7534_v41  ;;  %v696_v22 = vpack.c.bf16 %v5137_v16, %v5137_v16  ;;  %v697_v12 = vpack.c.bf16 %v5142_v8, %v5142_v8  ;;  %v5150_v60 = vunpack.i.h.bf16 %v7502_v17  ;;  %v5155_v46 = vunpack.i.h.bf16 %v5151_v1  ;;  %v4739_v16 = vld [vmem:[%s7574_s27] sm:$0xf]  ;;  %v4785_v8 = vld [vmem:[%s7574_s27 + $0x4] sm:$0xf0] }
 0x337   : > { %4678 = vmatmul.msk.bf16.gmra.mxu0 %vm822_vm0, %v1442_v47  ;;  %4694 = vmatmul.msk.bf16.gmra.mxu1 %vm822_vm0, %v1442_v47  ;;  %9771 = vst [vmem:[#allocation99_spill] sm:$0xff] %v7532_v49  ;;  %v728_v35 = vpack.c.bf16 %v5140_v10, %v5140_v10  ;;  %v729_v13 = vpack.c.bf16 %v5145_v51, %v5145_v51  ;;  %v4784_v10 = vld [vmem:[%s7574_s27 + $0x4] sm:$0xf]  ;;  %v4741_v51 = vld [vmem:[%s7574_s27 + $0x8] sm:$0xf0] }
 0x338   : > { %4718 = vmatmul.msk.bf16.gmra.mxu2 %vm822_vm0, %v1758_v40  ;;  %4734 = vmatmul.msk.bf16.gmra.mxu3 %vm822_vm0, %v1758_v40  ;;  %v1425_v26 = vunpack.c.l.b16 %v696_v22  ;;  %v1426_v44 = vunpack.c.l.b16 %v697_v12  ;;  %v698_v24 = vpack.c.bf16 %v5147_v55, %v5147_v55  ;;  %v699_v9 = vpack.c.bf16 %v5152_v18, %v5152_v18  ;;  %v4747_v55 = vld [vmem:[%s7574_s27 + $0x10] sm:$0xf]  ;;  %v4787_v18 = vld [vmem:[%s7574_s27 + $0x14] sm:$0xf0] }
 0x339   : > { %v1741_v4 = vunpack.c.l.b16 %v728_v35  ;;  %v1742_v43 = vunpack.c.l.b16 %v729_v13  ;;  %v730_v62 = vpack.c.bf16 %v5150_v60, %v5150_v60  ;;  %v731_v2 = vpack.c.bf16 %v5155_v46, %v5155_v46  ;;  %v4786_v60 = vld [vmem:[%s7574_s27 + $0x14] sm:$0xf]  ;;  %v4749_v46 = vld [vmem:[%s7574_s27 + $0x18] sm:$0xf0] }
 0x33a   : > { %v1443_v31 = vpack.c.b16 %v1426_v44, %v1425_v26  ;;  %v1427_v27 = vunpack.c.l.b16 %v698_v24  ;;  %v1428_v19 = vunpack.c.l.b16 %v699_v9  ;;  %v4740_v35 = vor.u32 %v4785_v8, %v4739_v16 }
 0x33b   : > { %v7536_v6 = vpop.f32.mrf.mxu1  ;;  %v1759_v42 = vpack.c.b16 %v1742_v43, %v1741_v4  ;;  %v1743_v63 = vunpack.c.l.b16 %v730_v62  ;;  %v1744_v30 = vunpack.c.l.b16 %v731_v2  ;;  %v4744_v13 = vor.u32 %v4784_v10, %v4741_v51 }
 0x33c   : > { %v7538_v45 = vpop.f32.mrf.mxu2  ;;  %v1444_v38 = vpack.c.b16 %v1428_v19, %v1427_v27  ;;  %v4748_v24 = vor.u32 %v4787_v18, %v4747_v55  ;;  %v4752_v9 = vor.u32 %v4786_v60, %v4749_v46 }
 0x33d   : > { %9773 = vst [vmem:[#allocation17_spill] sm:$0xff] %v7538_v45  ;;  %v7542_v39 = vpop.f32.mrf.mxu0  ;;  %v1760_v17 = vpack.c.b16 %v1744_v30, %v1743_v63 }
 0x33e   : > { %v7540_v37 = vpop.f32.mrf.mxu3  ;;  %9775 = vst [vmem:[#allocation91_spill] sm:$0xff] %v7542_v39 }
 0x33f   : > { %9774 = vst [vmem:[#allocation23_spill] sm:$0xff] %v7540_v37 }
 0x343   : > { %v7550_v48 = vpop.f32.mrf.mxu1 }
 0x344   : > { %v7552_v0 = vpop.f32.mrf.mxu2 }
 0x345   : > { %9776 = vst [vmem:[#allocation27_spill] sm:$0xff] %v7552_v0  ;;  %v7556_v50 = vpop.f32.mrf.mxu0 }
 0x346   : > { %v7554_v57 = vpop.f32.mrf.mxu3  ;;  %9778 = vst [vmem:[#allocation28_spill] sm:$0xff] %v7556_v50 }
 0x347   : > { %4679 = vmatmul.msk.bf16.gmra.mxu0 %vm822_vm0, %v1443_v31  ;;  %4695 = vmatmul.msk.bf16.gmra.mxu1 %vm822_vm0, %v1443_v31  ;;  %9777 = vst [vmem:[#allocation41_spill] sm:$0xff] %v7554_v57 }
 0x348   : > { %4719 = vmatmul.msk.bf16.gmra.mxu2 %vm822_vm0, %v1759_v42  ;;  %4735 = vmatmul.msk.bf16.gmra.mxu3 %vm822_vm0, %v1759_v42 }
 0x34b   : > { %v7560_v61 = vpop.f32.mrf.mxu1 }
 0x34c   : > { %v7562_v47 = vpop.f32.mrf.mxu2 }
 0x34d   : > { %9779 = vst [vmem:[#allocation98_spill] sm:$0xff] %v7562_v47  ;;  %v7569_v1 = vpop.f32.mrf.mxu0 }
 0x34e   : > { %v7567_v40 = vpop.f32.mrf.mxu3  ;;  %9781 = vst [vmem:[#allocation13_spill] sm:$0xff] %v7569_v1 }
 0x34f   : > { %9780 = vst [vmem:[#allocation34_spill] sm:$0xff] %v7567_v40 }
 0x353   : > { %v7580_v22 = vpop.f32.mrf.mxu1 }
 0x354   : > { %v7582_v12 = vpop.f32.mrf.mxu2 }
 0x355   : > { %9782 = vst [vmem:[#allocation75_spill] sm:$0xff] %v7582_v12  ;;  %v9814_v12 = vld [vmem:[#allocation8_spill] sm:$0xff] }
 0x356   : > { %v7584_v26 = vpop.f32.mrf.mxu3  ;;  %v7586_v44 = vpop.f32.mrf.mxu0 }
 0x357   : > { %4680 = vmatmul.msk.bf16.gmra.mxu0 %vm822_vm0, %v1444_v38  ;;  %4696 = vmatmul.msk.bf16.gmra.mxu1 %vm822_vm0, %v1444_v38  ;;  %9783 = vst [vmem:[#allocation31_spill] sm:$0xff] %v7584_v26 }
 0x358   : > { %4720 = vmatmul.msk.bf16.gmra.mxu2 %vm822_vm0, %v1760_v17  ;;  %4736 = vmatmul.msk.bf16.gmra.mxu3 %vm822_vm0, %v1760_v17  ;;  %9784 = vst [vmem:[#allocation19_spill] sm:$0xff] %v7586_v44 }
 0x35b   : > { %v7588_v4 = vpop.f32.mrf.mxu1 }
 0x35c   : > { %v7590_v43 = vpop.f32.mrf.mxu2 }
 0x35d   : > { %9785 = vst [vmem:[#allocation90_spill] sm:$0xff] %v7590_v43 }
 0x35e   : > { %v7592_v31 = vpop.f32.mrf.mxu3  ;;  %v7594_v42 = vpop.f32.mrf.mxu0 }
 0x35f   : > { %9786 = vst [vmem:[#allocation82_spill] sm:$0xff] %v7592_v31 }
 0x360   : > { %9787 = vst [vmem:[#allocation95_spill] sm:$0xff] %v7594_v42 }
 0x363   : > { %v7600_v62 = vpop.f32.mrf.mxu1 }
 0x364   : > { %9788 = vst [vmem:[#allocation84_spill] sm:$0xff] %v7600_v62  ;;  %v7602_v2 = vpop.f32.mrf.mxu2 }
 0x365   : > { %9789 = vst [vmem:[#allocation9_spill] sm:$0xff] %v7602_v2  ;;  %v9808_v2 = vld [vmem:[#allocation51_spill] sm:$0xff] }
 0x366   : > { %v7604_v27 = vpop.f32.mrf.mxu3 }
 0x367   : > { %3663 = vmatmul.bf16.vlgmr.msra.gmra.mxu0 %v4740_v35  ;;  %3677 = vmatmul.bf16.vlgmr.msra.gmra.mxu1 %v4744_v13  ;;  %9790 = vst [vmem:[#allocation69_spill] sm:$0xff] %v7604_v27 }
 0x368   : > { %3691 = vmatmul.bf16.vlgmr.msra.gmra.mxu2 %v4740_v35  ;;  %3705 = vmatmul.bf16.vlgmr.msra.gmra.mxu3 %v4744_v13 }
 0x36b   : > { %v7608_v63 = vpop.f32.mrf.mxu1 }
 0x36c   : > { %9792 = vst [vmem:[#allocation20_spill] sm:$0xff] %v7608_v63  ;;  %v7610_v30 = vpop.f32.mrf.mxu2 }
 0x36d   : > { %9793 = vst [vmem:[#allocation72_spill] sm:$0xff] %v7610_v30  ;;  %v9807_v30 = vld [vmem:[#allocation33_spill] sm:$0xff] }
 0x36e   : > { %v7612_v38 = vpop.f32.mrf.mxu3 }
 0x36f   : > { %9794 = vst [vmem:[#allocation24_spill] sm:$0xff] %v7612_v38 }
 0x370   : > { %v7606_v19 = vpop.f32.mrf.mxu0 }
 0x371   : > { %9791 = vst [vmem:[#allocation70_spill] sm:$0xff] %v7606_v19 }
 0x373   : > { %v7616_v16 = vpop.f32.mrf.mxu1 }
 0x374   : > { %9796 = vst [vmem:[#allocation94_spill] sm:$0xff] %v7616_v16  ;;  %v7618_v8 = vpop.f32.mrf.mxu2  ;;  %v9813_v16 = vld [vmem:[#allocation97_spill] sm:$0xff] }
 0x375   : > { %9797 = vst [vmem:[#allocation16_spill] sm:$0xff] %v7618_v8  ;;  %v9805_v8 = vld [vmem:[#allocation14_spill] sm:$0xff] }
 0x376   : > { %v7620_v10 = vpop.f32.mrf.mxu3 }
 0x377   : > { %3889 = vmatmul.bf16.vlgmr.msrb.gmra.mxu0 %v4748_v24  ;;  %3903 = vmatmul.bf16.vlgmr.msrb.gmra.mxu1 %v4752_v9  ;;  %9798 = vst [vmem:[#allocation85_spill] sm:$0xff] %v7620_v10  ;;  %v9806_v10 = vld [vmem:[#allocation102_spill] sm:$0xff] }
 0x378   : > { %3917 = vmatmul.bf16.vlgmr.msrb.gmra.mxu2 %v4748_v24  ;;  %3931 = vmatmul.bf16.vlgmr.msrb.gmra.mxu3 %v4752_v9  ;;  %v7614_v17 = vpop.f32.mrf.mxu0  ;;  %v2145_v38 = vmax.f32 %v9806_v10, %v9805_v8  ;;  %v9815_v10 = vld [vmem:[#allocation74_spill] sm:$0xff] }
 0x379   : > { %9795 = vst [vmem:[#allocation81_spill] sm:$0xff] %v7614_v17 }
 0x37a   : > { %v2146_v27 = vmax.f32 %v2145_v38, %v9807_v30 }
 0x37b   : > { %v7624_v35 = vpop.f32.mrf.mxu1 }
 0x37c   : > { %9799 = vst [vmem:[#allocation100_spill] sm:$0xff] %v7624_v35  ;;  %v7626_v13 = vpop.f32.mrf.mxu2  ;;  %v2147_v35 = vmax.f32 %v2146_v27, %v9808_v2 }
 0x37d   : > { %9800 = vst [vmem:[#allocation62_spill] sm:$0xff] %v7626_v13  ;;  %v9809_v13 = vld [vmem:[#allocation67_spill] sm:$0xff] }
 0x37e   : > { %v7628_v55 = vpop.f32.mrf.mxu3  ;;  %v2148_v31 = vmax.f32 %v2147_v35, %v9809_v13 }
 0x37f   : > { %9801 = vst [vmem:[#allocation66_spill] sm:$0xff] %v7628_v55 }
 0x384   : > { %v7634_v46 = vpop.f32.mrf.mxu2 }
 0x385   : > { %9803 = vst [vmem:[#allocation59_spill] sm:$0xff] %v7634_v46 }
 0x386   : > { %v7636_v24 = vpop.f32.mrf.mxu3 }
 0x387   : > { %9804 = vst [vmem:[#allocation49_spill] sm:$0xff] %v7636_v24 }
 0x389   : > { %v7622_v51 = vpop.f32.mrf.mxu0  ;;  %v7632_v60 = vpop.f32.mrf.mxu1 }
 0x38a   : > { %9802 = vst [vmem:[#allocation56_spill] sm:$0xff] %v7632_v60  ;;  %v2149_v60 = vmax.f32 %v2148_v31, %v7239_v11 }
 0x38c   : > { %v7647_v43 = vpop.f32.mrf.mxu2  ;;  %v2150_v26 = vmax.f32 %v2149_v60, %v9813_v16 }
 0x38d   : > { %9811 = vst [vmem:[#allocation42_spill] sm:$0xff] %v7647_v43 }
 0x38e   : > { %v7650_v46 = vpop.f32.mrf.mxu3  ;;  %v2151_v8 = vmax.f32 %v2150_v26, %v9814_v12  ;;  %v9822_v12 = vld [vmem:[#allocation26_spill] sm:$0xff] }
 0x38f   : > { %9812 = vst [vmem:[#allocation45_spill] sm:$0xff] %v7650_v46 }
 0x390   : > { %v2152_v38 = vmax.f32 %v2151_v8, %v9815_v10 }
 0x391   : > { %v7630_v18 = vpop.f32.mrf.mxu0  ;;  %v7645_v55 = vpop.f32.mrf.mxu1 }
 0x392   : > { %9810 = vst [vmem:[#allocation53_spill] sm:$0xff] %v7645_v55  ;;  %v2153_v27 = vmax.f32 %v2152_v38, %v7398_v3 }
 0x394   : > { %v7660_v35 = vpop.f32.mrf.mxu2  ;;  %v2154_v13 = vmax.f32 %v2153_v27, %v7432_v7  ;;  %v9821_v7 = vld [vmem:[#allocation46_spill] sm:$0xff] }
 0x395   : > { %9817 = vst [vmem:[#allocation40_spill] sm:$0xff] %v7660_v35  ;;  %v2182_v16 = vmax.f32 %v9822_v12, %v9821_v7  ;;  %v9828_v7 = vld [vmem:[#allocation96_spill] sm:$0xff] }
 0x396   : > { %v7663_v43 = vpop.f32.mrf.mxu3  ;;  %v2155_v11 = vmax.f32 %v2154_v13, %v7452_v33  ;;  %v9826_v33 = vld [vmem:[#allocation15_spill] sm:$0xff] }
 0x397   : > { %9818 = vst [vmem:[#allocation39_spill] sm:$0xff] %v7663_v43 }
 0x398   : > { %v2156_v60 = vmax.f32 %v2155_v11, %v7490_v15  ;;  %v9824_v11 = vld [vmem:[#allocation54_spill] sm:$0xff] }
 0x399   : > { %v2183_v15 = vmax.f32 %v2182_v16, %v9824_v11 }
 0x39a   : > { %v2157_v26 = vmax.f32 %v2156_v60, %v7518_v28 }
 0x39c   : > { %v2158_v8 = vmax.f32 %v2157_v26, %v7534_v41  ;;  %v7673_v38 = vpop.f32.mrf.mxu2  ;;  %v9825_v26 = vld [vmem:[#allocation76_spill] sm:$0xff] }
 0x39d   : > { %9820 = vst [vmem:[#allocation105_spill] sm:$0xff] %v7673_v38  ;;  %v2184_v41 = vmax.f32 %v2183_v15, %v9825_v26  ;;  %v9832_v26 = vld [vmem:[#allocation80_spill] sm:$0xff] }
 0x39e   : > { %v7638_v9 = vpop.f32.mrf.mxu0  ;;  %v2159_v27 = vmax.f32 %v2158_v8, %v7542_v39  ;;  %v7680_v43 = vpop.f32.mrf.mxu3 }
 0x39f   : > { %9823 = vst [vmem:[#allocation10_spill] sm:$0xff] %v7680_v43  ;;  %v2185_v38 = vmax.f32 %v2184_v41, %v9826_v33  ;;  %v9831_v41 = vld [vmem:[#allocation57_spill] sm:$0xff] }
 0x3a0   : > { %v2160_v13 = vmax.f32 %v2159_v27, %v7556_v50  ;;  %v9829_v27 = vld [vmem:[#allocation79_spill] sm:$0xff] }
 0x3a1   : > { %v7658_v2 = vpop.f32.mrf.mxu1  ;;  %v2186_v12 = vmax.f32 %v2185_v38, %v9828_v7  ;;  %v9834_v7 = vld [vmem:[#allocation87_spill] sm:$0xff] }
 0x3a2   : > { %9816 = vst [vmem:[#allocation35_spill] sm:$0xff] %v7658_v2  ;;  %v2161_v60 = vmax.f32 %v2160_v13, %v7569_v1  ;;  %v9835_v50 = vld [vmem:[#allocation71_spill] sm:$0xff] }
 0x3a3   : > { %v2187_v13 = vmax.f32 %v2186_v12, %v9829_v27 }
 0x3a4   : > { %v2162_v28 = vmax.f32 %v2161_v60, %v7586_v44  ;;  %v9830_v60 = vld [vmem:[#allocation77_spill] sm:$0xff]  ;;  %v9833_v44 = vld [vmem:[#allocation60_spill] sm:$0xff] }
 0x3a5   : > { %v2219_v33 = vmax.f32 %v9831_v41, %v9830_v60  ;;  %v9837_v60 = vld [vmem:[#allocation3_spill] sm:$0xff] }
 0x3a6   : > { %v7652_v24 = vpop.f32.mrf.mxu0  ;;  %v2163_v8 = vmax.f32 %v2162_v28, %v7594_v42  ;;  %v2256_v28 = vmax.f32 %v9833_v44, %v9832_v26  ;;  %v2188_v42 = vmax.f32 %v2187_v13, %v7391_v14 }
 0x3a7   : > { %v7694_v43 = vpop.f32.mrf.mxu2  ;;  %v2220_v1 = vmax.f32 %v2219_v33, %v9834_v7  ;;  %v9839_v7 = vld [vmem:[#allocation65_spill] sm:$0xff] }
 0x3a8   : > { %v2164_v16 = vmax.f32 %v2163_v8, %v7606_v19  ;;  %v7698_v11 = vpop.f32.mrf.mxu3  ;;  %v2257_v8 = vmax.f32 %v2256_v28, %v9835_v50  ;;  %v2189_v12 = vmax.f32 %v2188_v42, %v7413_v54  ;;  %v9840_v54 = vld [vmem:[#allocation2_spill] sm:$0xff] }
 0x3a9   : > { %v7671_v10 = vpop.f32.mrf.mxu1 }
 0x3aa   : > { %9819 = vst [vmem:[#allocation43_spill] sm:$0xff] %v7671_v10  ;;  %v2165_v15 = vmax.f32 %v2164_v16, %v7614_v17  ;;  %v9836_v17 = vld [vmem:[#allocation78_spill] sm:$0xff]  ;;  %v2258_v41 = vmax.f32 %v2257_v8, %v9837_v60  ;;  %v2190_v26 = vmax.f32 %v2189_v12, %v7446_v23 }
 0x3ab   : > { %v2221_v19 = vmax.f32 %v2220_v1, %v9836_v17 }
 0x3ac   : > { %v2166_v38 = vmax.f32 %v2165_v15, %v7622_v51  ;;  %v9838_v15 = vld [vmem:[#allocation12_spill] sm:$0xff]  ;;  %v2259_v28 = vmax.f32 %v2258_v41, %v9839_v7  ;;  %v2191_v42 = vmax.f32 %v2190_v26, %v7479_v32 }
 0x3ad   : > { %v2222_v33 = vmax.f32 %v2221_v19, %v9838_v15  ;;  %v9852_v15 = vld [vmem:[#allocation73_spill] sm:$0xff] }
 0x3ae   : > { %v2167_v16 = vmax.f32 %v2166_v38, %v7630_v18  ;;  %v2260_v8 = vmax.f32 %v2259_v28, %v7396_v20  ;;  %v2192_v12 = vmax.f32 %v2191_v42, %v7508_v52 }
 0x3af   : > { %v7722_v50 = vpop.f32.mrf.mxu2  ;;  %v2223_v1 = vmax.f32 %v2222_v33, %v9840_v54 }
 0x3b0   : > { %v2168_v13 = vmax.f32 %v2167_v16, %v7638_v9  ;;  %v7728_v60 = vpop.f32.mrf.mxu3  ;;  %v2261_v41 = vmax.f32 %v2260_v8, %v7426_v53  ;;  %v2193_v26 = vmax.f32 %v2192_v12, %v7526_v34 }
 0x3b1   : > { %v2224_v19 = vmax.f32 %v2223_v1, %v7419_v29 }
 0x3b2   : > { %v2169_v38 = vmax.f32 %v2168_v13, %v7652_v24  ;;  %v2262_v28 = vmax.f32 %v2261_v41, %v7450_v36  ;;  %v2194_v42 = vmax.f32 %v2193_v26, %v7536_v6 }
 0x3b3   : > { %v2225_v33 = vmax.f32 %v2224_v19, %v7448_v5 }
 0x3b4   : > { %v7665_v31 = vpop.f32.mrf.mxu0  ;;  %v7691_v39 = vpop.f32.mrf.mxu1  ;;  %v2263_v1 = vmax.f32 %v2262_v28, %v7488_v25  ;;  %v2195_v8 = vmax.f32 %v2194_v42, %v7550_v48 }
 0x3b5   : > { %9827 = vst [vmem:[#allocation29_spill] sm:$0xff] %v7691_v39  ;;  %v2170_v16 = vmax.f32 %v2169_v38, %v7665_v31  ;;  %v2226_v38 = vmax.f32 %v2225_v33, %v7483_v59 }
 0x3b6   : > { %v2264_v19 = vmax.f32 %v2263_v1, %v7516_v58  ;;  %v2196_v41 = vmax.f32 %v2195_v8, %v7560_v61  ;;  %v9842_v58 = vld [vmem:[#allocation6_spill] sm:$0xff] }
 0x3b8   : > { %v2265_v33 = vmax.f32 %v2264_v19, %v7532_v49  ;;  %v2197_v28 = vmax.f32 %v2196_v41, %v7580_v22 }
 0x3ba   : > { %v2266_v1 = vmax.f32 %v2265_v33, %v7540_v37  ;;  %v2198_v8 = vmax.f32 %v2197_v28, %v7588_v4 }
 0x3bb   : > { %v7750_v36 = vpop.f32.mrf.mxu2  ;;  %v7756_v42 = vpop.f32.mrf.mxu3 }
 0x3bc   : > { %v7675_v3 = vpop.f32.mrf.mxu0  ;;  %v7717_v44 = vpop.f32.mrf.mxu1  ;;  %v2267_v41 = vmax.f32 %v2266_v1, %v7554_v57  ;;  %v2199_v49 = vmax.f32 %v2198_v8, %v7600_v62  ;;  %v9847_v8 = vld [vmem:[#allocation101_spill] sm:$0xff] }
 0x3bd   : > { %v2171_v13 = vmax.f32 %v2170_v16, %v7675_v3  ;;  %v2227_v16 = vmax.f32 %v2226_v38, %v7510_v56 }
 0x3c3   : > { %v7777_v1 = vpop.f32.mrf.mxu2  ;;  %v7783_v29 = vpop.f32.mrf.mxu3 }
 0x3c4   : > { %v7688_v35 = vpop.f32.mrf.mxu0  ;;  %v7744_v53 = vpop.f32.mrf.mxu1  ;;  %9851 = vst [vmem:[#allocation32_spill] sm:$0xff] %v7783_v29 }
 0x3c5   : > { %v2172_v20 = vmax.f32 %v2171_v13, %v7688_v35  ;;  %9841 = vst [vmem:[#allocation30_spill] sm:$0xff] %v7744_v53  ;;  %v2228_v13 = vmax.f32 %v2227_v16, %v7530_v21 }
 0x3c7   : > { %v2229_v38 = vmax.f32 %v2228_v13, %v7538_v45  ;;  %v2200_v13 = vmax.f32 %v2199_v49, %v7608_v63  ;;  %v9844_v45 = vld [vmem:[#allocation75_spill] sm:$0xff]  ;;  %v9850_v49 = vld [vmem:[#allocation100_spill] sm:$0xff] }
 0x3c9   : > { %v2230_v19 = vmax.f32 %v2229_v38, %v7552_v0  ;;  %v9846_v38 = vld [vmem:[#allocation94_spill] sm:$0xff] }
 0x3ca   : > { %v2201_v0 = vmax.f32 %v2200_v13, %v9846_v38  ;;  %v9854_v13 = vld [vmem:[#allocation69_spill] sm:$0xff]  ;;  %v9855_v38 = vld [vmem:[#allocation56_spill] sm:$0xff] }
 0x3cb   : > { %v2231_v59 = vmax.f32 %v2230_v19, %v7562_v47  ;;  %v9848_v19 = vld [vmem:[#allocation90_spill] sm:$0xff] }
 0x3cc   : > { %v7710_v27 = vpop.f32.mrf.mxu0  ;;  %v7772_v37 = vpop.f32.mrf.mxu1  ;;  %v2202_v47 = vmax.f32 %v2201_v0, %v9850_v49 }
 0x3cd   : > { %v2173_v12 = vmax.f32 %v2172_v20, %v7710_v27 }
 0x3ce   : > { %v2203_v63 = vmax.f32 %v2202_v47, %v9855_v38 }
 0x3d0   : > { %v2204_v49 = vmax.f32 %v2203_v63, %v7645_v55 }
 0x3d2   : > { %v2205_v47 = vmax.f32 %v2204_v49, %v7658_v2 }
 0x3d4   : > { %v7734_v7 = vpop.f32.mrf.mxu0 }
 0x3d5   : > { %v2174_v26 = vmax.f32 %v2173_v12, %v7734_v7  ;;  %v9843_v12 = vld [vmem:[#allocation93_spill] sm:$0xff] }
 0x3d6   : > { %v3091_v56 = vadd.f32 %v9843_v12, %v9842_v58  ;;  %v2232_v58 = vmax.f32 %v2231_v59, %v9844_v45  ;;  %v9845_v12 = vld [vmem:[#allocation31_spill] sm:$0xff]  ;;  %v3166_v59 = vrot.slane %v9852_v15, 4 }
 0x3d8   : > { %v3092_v33 = vrot.slane %v3091_v56, 4  ;;  %v2233_v57 = vmax.f32 %v2232_v58, %v9848_v19  ;;  %v9857_v19 = vld [vmem:[#allocation72_spill] sm:$0xff] }
 0x3da   : > { %v3093_v54 = vadd.f32 %v3092_v33, %v3091_v56  ;;  %v3167_v56 = vadd.f32 %v3166_v59, %v9852_v15  ;;  %v2206_v15 = vmax.f32 %v2205_v47, %v7671_v10  ;;  %v9868_v10 = vld [vmem:[#allocation42_spill] sm:$0xff] }
 0x3dc   : > { %v7758_v25 = vpop.f32.mrf.mxu0  ;;  %v3094_v62 = vrot.slane %v3093_v54, 2 }
 0x3dd   : > { %v2175_v20 = vmax.f32 %v2174_v26, %v7758_v25  ;;  %v2268_v26 = vmax.f32 %v2267_v41, %v7567_v40  ;;  %v9849_v41 = vld [vmem:[#allocation82_spill] sm:$0xff] }
 0x3de   : > { %v3095_v49 = vadd.f32 %v3094_v62, %v3093_v54  ;;  %v9869_v62 = vld [vmem:[#allocation51_spill] sm:$0xff] }
 0x3df   : > { %v2176_v16 = vrot.slane %v2175_v20, 4  ;;  %v2269_v5 = vmax.f32 %v2268_v26, %v9845_v12  ;;  %v9853_v26 = vld [vmem:[#allocation9_spill] sm:$0xff] }
 0x3e0   : > { %v2234_v12 = vmax.f32 %v2233_v57, %v9853_v26  ;;  %v9859_v57 = vld [vmem:[#allocation16_spill] sm:$0xff] }
 0x3e1   : > { %v2177_v21 = vmax.f32 %v2175_v20, %v2176_v16  ;;  %v3129_v20 = vrot.slane %v9847_v8, 4  ;;  %v2270_v40 = vmax.f32 %v2269_v5, %v9849_v41  ;;  %v9858_v41 = vld [vmem:[#allocation24_spill] sm:$0xff] }
 0x3e2   : > { %v2235_v5 = vmax.f32 %v2234_v12, %v9857_v19  ;;  %v9861_v19 = vld [vmem:[#allocation62_spill] sm:$0xff] }
 0x3e3   : > { %v2178_v28 = vrot.slane %v2177_v21, 2  ;;  %v2271_v17 = vmax.f32 %v2270_v40, %v9854_v13  ;;  %v9860_v40 = vld [vmem:[#allocation85_spill] sm:$0xff] }
 0x3e4   : > { %v2236_v26 = vmax.f32 %v2235_v5, %v9859_v57  ;;  %v9864_v5 = vld [vmem:[#allocation14_spill] sm:$0xff]  ;;  %v9866_v57 = vld [vmem:[#allocation49_spill] sm:$0xff] }
 0x3e5   : > { %v2179_v16 = vmax.f32 %v2177_v21, %v2178_v28  ;;  %v3130_v21 = vadd.f32 %v3129_v20, %v9847_v8  ;;  %v9856_v28 = vld [vmem:[#allocation83_spill] sm:$0xff]  ;;  %v2272_v0 = vmax.f32 %v2271_v17, %v9858_v41  ;;  %v7801_v20 = vpop.f32.mrf.mxu1  ;;  %v9862_v41 = vld [vmem:[#allocation66_spill] sm:$0xff] }
 0x3e6   : > { %v3203_v58 = vrot.slane %v9856_v28, 4  ;;  %v2237_v17 = vmax.f32 %v2236_v26, %v9861_v19  ;;  %v2207_v26 = vmax.f32 %v2206_v15, %v7691_v39  ;;  %v7815_v19 = vpop.f32.mrf.mxu3 }
 0x3e7   : > { %v2180_v45 = vrot.slane %v2179_v16, 1  ;;  %v2273_v13 = vmax.f32 %v2272_v0, %v9860_v40  ;;  %v3131_v12 = vrot.slane %v3130_v21, 2  ;;  %v3168_v40 = vrot.slane %v3167_v56, 2  ;;  %9867 = vst [vmem:[#allocation37_spill] sm:$0xff] %v7815_v19 }
 0x3e8   : > { %v3204_v8 = vadd.f32 %v3203_v58, %v9856_v28  ;;  %v9865_v28 = vld [vmem:[#allocation59_spill] sm:$0xff]  ;;  %v2208_v54 = vmax.f32 %v2207_v26, %v7717_v44 }
 0x3e9   : > { %v7795_v33 = vmax.f32 %v2179_v16, %v2180_v45  ;;  %v2274_v63 = vmax.f32 %v2273_v13, %v9862_v41  ;;  %v7806_v45 = vpop.f32.mrf.mxu2  ;;  %v9863_v16 = vld [vmem:[#allocation102_spill] sm:$0xff]  ;;  %v2238_v58 = vmax.f32 %v2237_v17, %v9865_v28  ;;  %v3132_v47 = vadd.f32 %v3131_v12, %v3130_v21  ;;  %v9870_v28 = vld [vmem:[#allocation40_spill] sm:$0xff] }
 0x3ea   : > { %v3205_v41 = vrot.slane %v3204_v8, 2  ;;  %v3169_v15 = vadd.f32 %v3168_v40, %v3167_v56  ;;  %v2209_v38 = vmax.f32 %v2208_v54, %v7744_v53  ;;  %v9874_v40 = vld [vmem:[#allocation105_spill] sm:$0xff] }
 0x3eb   : > { %v2421_v59 = vsub.f32 %v9863_v16, %v7795_v33  ;;  %v2423_v0 = vsub.f32 %v9864_v5, %v7795_v33  ;;  %v2275_v2 = vmax.f32 %v2274_v63, %v9866_v57  ;;  %v2425_v13 = vsub.f32 %v9807_v30, %v7795_v33  ;;  %v9871_v30 = vld [vmem:[#allocation67_spill] sm:$0xff] }
 0x3ec   : > { %v2239_v16 = vmax.f32 %v2238_v58, %v9868_v10  ;;  %v2427_v17 = vsub.f32 %v9869_v62, %v7795_v33  ;;  %v3096_v57 = vrot.slane %v3095_v49, 1  ;;  %v2429_v21 = vsub.f32 %v9871_v30, %v7795_v33  ;;  %v9872_v58 = vld [vmem:[#allocation39_spill] sm:$0xff]  ;;  %v9875_v62 = vld [vmem:[#allocation10_spill] sm:$0xff] }
 0x3ed   : > { %v2276_v55 = vmax.f32 %v2275_v2, %v7650_v46  ;;  %v2805_v5 = vmul.f32 1.442695, %v2421_v59  ;;  %v2809_v63 = vmul.f32 1.442695, %v2423_v0  ;;  %v2813_v12 = vmul.f32 1.442695, %v2425_v13 }
 0x3ee   : > { %v2240_v39 = vmax.f32 %v2239_v16, %v9870_v28  ;;  %v3133_v2 = vrot.slane %v3132_v47, 1  ;;  %v3206_v26 = vadd.f32 %v3205_v41, %v3204_v8  ;;  %v2210_v46 = vmax.f32 %v2209_v38, %v7772_v37  ;;  %v9873_v59 = vld [vmem:[#allocation11_spill] sm:$0xff]  ;;  %v7834_v28 = vpop.f32.mrf.mxu1  ;;  %v9876_v41 = vld [vmem:[#allocation97_spill] sm:$0xff] }
 0x3ef   : > { %v2277_v10 = vmax.f32 %v2276_v55, %v9872_v58  ;;  %5412 = vpow2.f32 %v2805_v5  ;;  %v2431_v0 = vsub.f32 %v9873_v59, %v7795_v33  ;;  %v2817_v56 = vmul.f32 1.442695, %v2427_v17 }
 0x3f0   : > { %5414 = vpow2.f32 %v2809_v63  ;;  %v2241_v16 = vmax.f32 %v2240_v39, %v9874_v40  ;;  %v3097_v30 = vadd.f32 %v3096_v57, %v3095_v49  ;;  %v3170_v13 = vrot.slane %v3169_v15, 1  ;;  %v9878_v57 = vld [vmem:[#allocation8_spill] sm:$0xff] }
 0x3f1   : > { %v2278_v54 = vmax.f32 %v2277_v10, %v9875_v62  ;;  %v7836_v53 = vpop.f32.mrf.mxu2  ;;  %v2211_v55 = vmax.f32 %v2210_v46, %v7801_v20  ;;  %v2433_v38 = vsub.f32 %v9876_v41, %v7795_v33  ;;  %5416 = vpow2.f32 %v2813_v12  ;;  %v7843_v10 = vpop.f32.mrf.mxu3 }
 0x3f2   : > { %v2821_v8 = vmul.f32 1.442695, %v2429_v21  ;;  %v2242_v5 = vmax.f32 %v2241_v16, %v7694_v43  ;;  %v3134_v39 = vadd.f32 %v3133_v2, %v3132_v47  ;;  %v3207_v63 = vrot.slane %v3206_v26, 1  ;;  %9877 = vst [vmem:[#allocation4_spill] sm:$0xff] %v7843_v10  ;;  %v9881_v2 = vld [vmem:[#allocation74_spill] sm:$0xff] }
 0x3f3   : > { %v2279_v17 = vmax.f32 %v2278_v54, %v7698_v11  ;;  %v2435_v49 = vsub.f32 %v9878_v57, %v7795_v33  ;;  %5418 = vpow2.f32 %v2817_v56  ;;  %v2825_v59 = vmul.f32 1.442695, %v2431_v0 }
 0x3f4   : > { %v2212_v46 = vmax.f32 %v2211_v55, %v7834_v28  ;;  %v2243_v12 = vmax.f32 %v2242_v5, %v7722_v50  ;;  %5420 = vrcp.f32 %v3097_v30  ;;  %v3171_v21 = vadd.f32 %v3170_v13, %v3169_v15  ;;  %v9883_v15 = vld [vmem:[#allocation5_spill] sm:$0xff] }
 0x3f5   : > { %v7848_v62 = vpop.eup %5412  ;;  %v2280_v47 = vmax.f32 %v2279_v17, %v7728_v60  ;;  %v2437_v54 = vsub.f32 %v9881_v2, %v7795_v33  ;;  %5422 = vpow2.f32 %v2821_v8  ;;  %v2829_v41 = vmul.f32 1.442695, %v2433_v38 }
 0x3f6   : > { %9879 = vst [vmem:[#allocation7_spill] sm:$0xff] %v7848_v62  ;;  %v7851_v16 = vpop.eup %5414  ;;  %v2244_v56 = vmax.f32 %v2243_v12, %v7750_v36  ;;  %5424 = vrcp.f32 %v3134_v39  ;;  %v3208_v55 = vadd.f32 %v3207_v63, %v3206_v26  ;;  %v2439_v30 = vsub.f32 %v9883_v15, %v7795_v33  ;;  %v9885_v39 = vld [vmem:[#allocation88_spill] sm:$0xff] }
 0x3f7   : > { %9880 = vst [vmem:[#allocation21_spill] sm:$0xff] %v7851_v16  ;;  %v3209_v0 = vadd.f32 %v7851_v16, %v7848_v62  ;;  %v7859_v57 = vpop.eup %5416  ;;  %5426 = vpow2.f32 %v2825_v59  ;;  %v2833_v13 = vmul.f32 1.442695, %v2435_v49  ;;  %v2213_v5 = vrot.slane %v2212_v46, 4 }
 0x3f8   : > { %9882 = vst [vmem:[#allocation18_spill] sm:$0xff] %v7859_v57  ;;  %v2281_v17 = vmax.f32 %v2280_v47, %v7756_v42  ;;  %v2245_v8 = vmax.f32 %v2244_v56, %v7777_v1  ;;  %5428 = vrcp.f32 %v3171_v21  ;;  %v2441_v26 = vsub.f32 %v9885_v39, %v7795_v33 }
 0x3f9   : > { %v3210_v38 = vadd.f32 %v7859_v57, %v3209_v0  ;;  %v7866_v12 = vpop.eup %5418  ;;  %5430 = vpow2.f32 %v2829_v41  ;;  %v2837_v63 = vmul.f32 1.442695, %v2437_v54  ;;  %v2214_v2 = vmax.f32 %v2212_v46, %v2213_v5  ;;  %v7877_v21 = vpop.f32.mrf.mxu2  ;;  %v9888_v0 = vld [vmem:[#allocation63_spill] sm:$0xff] }
 0x3fa   : > { %9884 = vst [vmem:[#allocation25_spill] sm:$0xff] %v7866_v12  ;;  %v7870_v16 = vpop.eup %5420  ;;  %v2282_v49 = vmax.f32 %v2281_v17, %v7783_v29  ;;  %v2246_v59 = vmax.f32 %v2245_v8, %v7806_v45  ;;  %5432 = vrcp.f32 %v3208_v55  ;;  %v2443_v15 = vsub.f32 %v9888_v0, %v7795_v33  ;;  %v9890_v8 = vld [vmem:[#allocation86_spill] sm:$0xff]  ;;  %v7890_v62 = vpop.f32.mrf.mxu3  ;;  %v9893_v0 = vld [vmem:[#allocation52_spill] sm:$0xff] }
 0x3fb   : > { %9886 = vst [vmem:[#allocation22_spill] sm:$0xff] %v7870_v16  ;;  %v3211_v47 = vadd.f32 %v7866_v12, %v3210_v38  ;;  %v7875_v56 = vpop.eup %5422  ;;  %5434 = vpow2.f32 %v2833_v13  ;;  %v2841_v41 = vmul.f32 1.442695, %v2439_v30  ;;  %v2215_v54 = vrot.slane %v2214_v2, 2 }
 0x3fc   : > { %9887 = vst [vmem:[#allocation103_spill] sm:$0xff] %v7875_v56  ;;  %v7881_v46 = vpop.eup %5424  ;;  %v2283_v5 = vmax.f32 %v2282_v49, %v7815_v19  ;;  %v2247_v17 = vmax.f32 %v2246_v59, %v7836_v53  ;;  %v2445_v38 = vsub.f32 %v9890_v8, %v7795_v33  ;;  %v2447_v13 = vsub.f32 %v9893_v0, %v7795_v33  ;;  %v9895_v8 = vld [vmem:[#allocation38_spill] sm:$0xff] }
 0x3fd   : > { %9889 = vst [vmem:[#allocation64_spill] sm:$0xff] %v7881_v46  ;;  %v3212_v55 = vadd.f32 %v7875_v56, %v3211_v47  ;;  %v7888_v39 = vpop.eup %5426  ;;  %5436 = vpow2.f32 %v2837_v63  ;;  %v2845_v30 = vmul.f32 1.442695, %v2441_v26  ;;  %v2449_v57 = vsub.f32 %v9895_v8, %v7795_v33  ;;  %v9897_v46 = vld [vmem:[#allocation91_spill] sm:$0xff] }
 0x3fe   : > { %9891 = vst [vmem:[#allocation104_spill] sm:$0xff] %v7888_v39  ;;  %v7894_v12 = vpop.eup %5428  ;;  %v2284_v49 = vmax.f32 %v2283_v5, %v7843_v10  ;;  %v7898_v59 = vmax.f32 %v2247_v17, %v7877_v21  ;;  %v2451_v16 = vsub.f32 %v9897_v46, %v7795_v33  ;;  %5438 = vpow2.f32 %v2841_v41  ;;  %v9899_v17 = vld [vmem:[#allocation28_spill] sm:$0xff]  ;;  %v9902_v41 = vld [vmem:[#allocation19_spill] sm:$0xff] }
 0x3ff   : > { %9892 = vst [vmem:[#allocation33_spill] sm:$0xff] %v7890_v62  ;;  %v3213_v47 = vadd.f32 %v7888_v39, %v3212_v55  ;;  %v7903_v56 = vpop.eup %5430  ;;  %v2849_v63 = vmul.f32 1.442695, %v2443_v15  ;;  %v2216_v26 = vmax.f32 %v2214_v2, %v2215_v54  ;;  %v2853_v10 = vmul.f32 1.442695, %v2445_v38  ;;  %v9901_v39 = vld [vmem:[#allocation13_spill] sm:$0xff] }
 0x400   : > { %9894 = vst [vmem:[#allocation6_spill] sm:$0xff] %v7894_v12  ;;  %v7907_v0 = vpop.eup %5432  ;;  %v7910_v5 = vmax.f32 %v2284_v49, %v7890_v62  ;;  %v2453_v12 = vsub.f32 %v9899_v17, %v7795_v33  ;;  %v2455_v19 = vsub.f32 %v9901_v39, %v7795_v33  ;;  %v2457_v15 = vsub.f32 %v9902_v41, %v7795_v33  ;;  %v9903_v54 = vld [vmem:[#allocation95_spill] sm:$0xff]  ;;  %v9904_v49 = vld [vmem:[#allocation70_spill] sm:$0xff] }
 0x401   : > { %9896 = vst [vmem:[#allocation93_spill] sm:$0xff] %v7903_v56  ;;  %v3214_v8 = vadd.f32 %v7903_v56, %v3213_v47  ;;  %v7915_v55 = vpop.eup %5434  ;;  %5440 = vpow2.f32 %v2845_v30  ;;  %v2857_v2 = vmul.f32 1.442695, %v2447_v13  ;;  %v2459_v46 = vsub.f32 %v9903_v54, %v7795_v33  ;;  %v9906_v56 = vld [vmem:[#allocation81_spill] sm:$0xff] }
 0x402   : > { %9898 = vst [vmem:[#allocation101_spill] sm:$0xff] %v7907_v0  ;;  %v2461_v0 = vsub.f32 %v9904_v49, %v7795_v33  ;;  %v2861_v17 = vmul.f32 1.442695, %v2449_v57  ;;  %v2463_v62 = vsub.f32 %v9906_v56, %v7795_v33  ;;  %5442 = vpow2.f32 %v2849_v63 }
 0x403   : > { %9900 = vst [vmem:[#allocation73_spill] sm:$0xff] %v7915_v55  ;;  %v3215_v38 = vadd.f32 %v7915_v55, %v3214_v8  ;;  %v7926_v47 = vpop.eup %5436  ;;  %v2865_v39 = vmul.f32 1.442695, %v2451_v16  ;;  %v2217_v29 = vrot.slane %v2216_v26, 1  ;;  %v2465_v13 = vsub.f32 %v7622_v51, %v7795_v33 }
 0x404   : > { %9905 = vst [vmem:[#allocation83_spill] sm:$0xff] %v7926_v47  ;;  %5444 = vpow2.f32 %v2853_v10  ;;  %v2869_v30 = vmul.f32 1.442695, %v2453_v12  ;;  %v7933_v54 = vpop.eup %5438  ;;  %v2467_v57 = vsub.f32 %v7630_v18, %v7795_v33  ;;  %v2469_v8 = vsub.f32 %v7638_v9, %v7795_v33 }
 0x405   : > { %v3216_v41 = vadd.f32 %v7926_v47, %v3215_v38  ;;  %9907 = vst [vmem:[#allocation102_spill] sm:$0xff] %v7933_v54  ;;  %5446 = vpow2.f32 %v2857_v2  ;;  %v2873_v56 = vmul.f32 1.442695, %v2455_v19  ;;  %v2471_v16 = vsub.f32 %v7652_v24, %v7795_v33  ;;  %v9935_v47 = vld [vmem:[#allocation100_spill] sm:$0xff] }
 0x406   : > { %5448 = vpow2.f32 %v2861_v17  ;;  %v2877_v63 = vmul.f32 1.442695, %v2457_v15  ;;  %v2473_v12 = vsub.f32 %v7665_v31, %v7795_v33  ;;  %v2881_v49 = vmul.f32 1.442695, %v2459_v46 }
 0x407   : > { %v3217_v51 = vadd.f32 %v7933_v54, %v3216_v41  ;;  %v7942_v10 = vpop.eup %5440  ;;  %5450 = vpow2.f32 %v2865_v39  ;;  %v7946_v18 = vmax.f32 %v2216_v26, %v2217_v29  ;;  %v2475_v9 = vsub.f32 %v7675_v3, %v7795_v33 }
 0x408   : > { %9908 = vst [vmem:[#allocation14_spill] sm:$0xff] %v7942_v10  ;;  %5452 = vpow2.f32 %v2869_v30  ;;  %v2885_v19 = vmul.f32 1.442695, %v2461_v0  ;;  %v7951_v2 = vpop.eup %5442  ;;  %v2477_v15 = vsub.f32 %v7688_v35, %v7795_v33  ;;  %v2479_v17 = vsub.f32 %v7710_v27, %v7795_v33  ;;  %v9912_v35 = vld [vmem:[#allocation26_spill] sm:$0xff] }
 0x409   : > { %v3218_v24 = vadd.f32 %v7942_v10, %v3217_v51  ;;  %9909 = vst [vmem:[#allocation51_spill] sm:$0xff] %v7951_v2  ;;  %5454 = vpow2.f32 %v2873_v56  ;;  %v2889_v31 = vmul.f32 1.442695, %v2463_v62  ;;  %v2481_v29 = vsub.f32 %v7734_v7, %v7795_v33  ;;  %v9913_v27 = vld [vmem:[#allocation46_spill] sm:$0xff] }
 0x40a   : > { %v7957_v46 = vpop.eup %5444  ;;  %5456 = vpow2.f32 %v2877_v63  ;;  %v2893_v3 = vmul.f32 1.442695, %v2465_v13  ;;  %v2897_v38 = vmul.f32 1.442695, %v2467_v57  ;;  %v2422_v39 = vsub.f32 %v9912_v35, %v7946_v18 }
 0x40b   : > { %9910 = vst [vmem:[#allocation67_spill] sm:$0xff] %v7957_v46  ;;  %v3219_v26 = vadd.f32 %v7951_v2, %v3218_v24  ;;  %v7962_v0 = vpop.eup %5446  ;;  %5458 = vpow2.f32 %v2881_v49  ;;  %v2424_v30 = vsub.f32 %v9913_v27, %v7946_v18  ;;  %v2483_v41 = vsub.f32 %v7758_v25, %v7795_v33  ;;  %v9915_v27 = vld [vmem:[#allocation54_spill] sm:$0xff] }
 0x40c   : > { %9911 = vst [vmem:[#allocation39_spill] sm:$0xff] %v7962_v0  ;;  %v7968_v62 = vpop.eup %5448  ;;  %5460 = vpow2.f32 %v2885_v19  ;;  %v2901_v7 = vmul.f32 1.442695, %v2469_v8  ;;  %v2905_v63 = vmul.f32 1.442695, %v2471_v16  ;;  %v2426_v55 = vsub.f32 %v9915_v27, %v7946_v18 }
 0x40d   : > { %v3220_v13 = vadd.f32 %v7957_v46, %v3219_v26  ;;  %v7973_v56 = vpop.eup %5450  ;;  %5462 = vpow2.f32 %v2889_v31  ;;  %v2909_v57 = vmul.f32 1.442695, %v2473_v12  ;;  %v2913_v51 = vmul.f32 1.442695, %v2475_v9  ;;  %v9918_v9 = vld [vmem:[#allocation76_spill] sm:$0xff] }
 0x40e   : > { %v7975_v49 = vpop.eup %5452  ;;  %5464 = vpow2.f32 %v2893_v3  ;;  %v2917_v24 = vmul.f32 1.442695, %v2477_v15  ;;  %v2921_v33 = vmul.f32 1.442695, %v2479_v17  ;;  %v2807_v8 = vmul.f32 1.442695, %v2422_v39 }
 0x40f   : > { %9914 = vst [vmem:[#allocation11_spill] sm:$0xff] %v7975_v49  ;;  %v3221_v35 = vadd.f32 %v7962_v0, %v3220_v13  ;;  %v7980_v25 = vpop.eup %5454  ;;  %5466 = vpow2.f32 %v2897_v38  ;;  %v2811_v19 = vmul.f32 1.442695, %v2424_v30  ;;  %v2925_v16 = vmul.f32 1.442695, %v2481_v29  ;;  %v9920_v13 = vld [vmem:[#allocation15_spill] sm:$0xff] }
 0x410   : > { %9916 = vst [vmem:[#allocation105_spill] sm:$0xff] %v7980_v25  ;;  %v7982_v26 = vpop.eup %5456  ;;  %5468 = vpow2.f32 %v2901_v7  ;;  %v2428_v15 = vsub.f32 %v9918_v9, %v7946_v18  ;;  %v2929_v3 = vmul.f32 1.442695, %v2483_v41  ;;  %v2430_v27 = vsub.f32 %v9920_v13, %v7946_v18  ;;  %v9921_v38 = vld [vmem:[#allocation96_spill] sm:$0xff]  ;;  %v9923_v29 = vld [vmem:[#allocation79_spill] sm:$0xff] }
 0x411   : > { %9917 = vst [vmem:[#allocation97_spill] sm:$0xff] %v7982_v26  ;;  %v3222_v12 = vadd.f32 %v7968_v62, %v3221_v35  ;;  %v7987_v31 = vpop.eup %5458  ;;  %v2432_v17 = vsub.f32 %v9921_v38, %v7946_v18  ;;  %5470 = vpow2.f32 %v2807_v8  ;;  %v2434_v7 = vsub.f32 %v9923_v29, %v7946_v18  ;;  %v9925_v13 = vld [vmem:[#allocation92_spill] sm:$0xff] }
 0x412   : > { %9919 = vst [vmem:[#allocation8_spill] sm:$0xff] %v7987_v31  ;;  %v7993_v39 = vpop.eup %5460  ;;  %5472 = vpow2.f32 %v2811_v19  ;;  %v2815_v35 = vmul.f32 1.442695, %v2426_v55  ;;  %v2436_v41 = vsub.f32 %v7391_v14, %v7946_v18  ;;  %v2438_v54 = vsub.f32 %v9925_v13, %v7946_v18 }
 0x413   : > { %9922 = vst [vmem:[#allocation74_spill] sm:$0xff] %v7993_v39  ;;  %v3223_v30 = vadd.f32 %v7973_v56, %v3222_v12  ;;  %v7998_v9 = vpop.eup %5462  ;;  %5474 = vpow2.f32 %v2905_v63  ;;  %v2440_v8 = vsub.f32 %v7446_v23, %v7946_v18  ;;  %v2442_v55 = vsub.f32 %v7479_v32, %v7946_v18 }
 0x414   : > { %9924 = vst [vmem:[#allocation5_spill] sm:$0xff] %v7998_v9  ;;  %v8006_v38 = vpop.eup %5464  ;;  %5476 = vpow2.f32 %v2909_v57  ;;  %v2819_v19 = vmul.f32 1.442695, %v2428_v15  ;;  %v2444_v14 = vsub.f32 %v7508_v52, %v7946_v18  ;;  %v2446_v63 = vsub.f32 %v7526_v34, %v7946_v18 }
 0x415   : > { %9926 = vst [vmem:[#allocation88_spill] sm:$0xff] %v8006_v38  ;;  %v3224_v12 = vadd.f32 %v7975_v49, %v3223_v30  ;;  %v8011_v29 = vpop.eup %5466  ;;  %5478 = vpow2.f32 %v2913_v51  ;;  %v2448_v23 = vsub.f32 %v7536_v6, %v7946_v18  ;;  %v2450_v32 = vsub.f32 %v7550_v48, %v7946_v18  ;;  %v9931_v48 = vld [vmem:[#allocation84_spill] sm:$0xff]  ;;  %v9934_v49 = vld [vmem:[#allocation94_spill] sm:$0xff] }
 0x416   : > { %9927 = vst [vmem:[#allocation63_spill] sm:$0xff] %v8011_v29  ;;  %v8019_v13 = vpop.eup %5468  ;;  %5480 = vpow2.f32 %v2815_v35  ;;  %v2823_v15 = vmul.f32 1.442695, %v2430_v27  ;;  %v2452_v52 = vsub.f32 %v7560_v61, %v7946_v18  ;;  %v2827_v27 = vmul.f32 1.442695, %v2432_v17  ;;  %v9933_v61 = vld [vmem:[#allocation20_spill] sm:$0xff] }
 0x417   : > { %9928 = vst [vmem:[#allocation86_spill] sm:$0xff] %v8019_v13  ;;  %v3225_v57 = vadd.f32 %v7980_v25, %v3224_v12  ;;  %v8024_v30 = vpop.eup %5470  ;;  %5482 = vpow2.f32 %v2917_v24  ;;  %v8037_v25 = vpop.f32.mrf.mxu2  ;;  %v9937_v17 = vld [vmem:[#allocation56_spill] sm:$0xff] }
 0x418   : > { %9929 = vst [vmem:[#allocation52_spill] sm:$0xff] %v8024_v30  ;;  %v8032_v51 = vpop.eup %5472  ;;  %5484 = vpow2.f32 %v2819_v19  ;;  %v2249_v6 = vmax.f32 %v7898_v59, %v8037_v25 }
 0x419   : > { %9930 = vst [vmem:[#allocation38_spill] sm:$0xff] %v8032_v51  ;;  %v3226_v12 = vadd.f32 %v7982_v26, %v3225_v57  ;;  %v8039_v24 = vpop.eup %5474  ;;  %5486 = vpow2.f32 %v2921_v33  ;;  %v2831_v26 = vmul.f32 1.442695, %v2434_v7  ;;  %v2835_v33 = vmul.f32 1.442695, %v2436_v41 }
 0x41a   : > { %9932 = vst [vmem:[#allocation91_spill] sm:$0xff] %v8039_v24  ;;  %v8047_v57 = vpop.eup %5476  ;;  %5488 = vpow2.f32 %v2823_v15  ;;  %v3246_v34 = vadd.f32 %v8032_v51, %v8024_v30  ;;  %v2839_v15 = vmul.f32 1.442695, %v2438_v54  ;;  %v2250_v19 = vrot.slane %v2249_v6, 4  ;;  %v9943_v30 = vld [vmem:[#allocation35_spill] sm:$0xff] }
 0x41b   : > { %9936 = vst [vmem:[#allocation28_spill] sm:$0xff] %v8047_v57  ;;  %v3227_v35 = vadd.f32 %v7987_v31, %v3226_v12  ;;  %v8052_v10 = vpop.eup %5478  ;;  %5490 = vpow2.f32 %v2925_v16  ;;  %v9940_v12 = vld [vmem:[#allocation53_spill] sm:$0xff]  ;;  %v2843_v16 = vmul.f32 1.442695, %v2440_v8  ;;  %v2851_v54 = vmul.f32 1.442695, %v2444_v14 }
 0x41c   : > { %9938 = vst [vmem:[#allocation13_spill] sm:$0xff] %v8052_v10  ;;  %v8058_v2 = vpop.eup %5480  ;;  %5492 = vpow2.f32 %v2827_v27  ;;  %v9946_v31 = vld [vmem:[#allocation43_spill] sm:$0xff] }
 0x41d   : > { %9939 = vst [vmem:[#allocation19_spill] sm:$0xff] %v8058_v2  ;;  %v3228_v0 = vadd.f32 %v7993_v39, %v3227_v35  ;;  %v8063_v7 = vpop.eup %5482  ;;  %5494 = vpow2.f32 %v2929_v3  ;;  %v3247_v41 = vadd.f32 %v8058_v2, %v3246_v34  ;;  %v2847_v35 = vmul.f32 1.442695, %v2442_v55 }
 0x41e   : > { %9941 = vst [vmem:[#allocation95_spill] sm:$0xff] %v8063_v7  ;;  %v8066_v51 = vpop.eup %5484  ;;  %5496 = vpow2.f32 %v2831_v26  ;;  %v2251_v3 = vmax.f32 %v2249_v6, %v2250_v19  ;;  %v2472_v2 = vsub.f32 %v9946_v31, %v7946_v18  ;;  %v2859_v26 = vmul.f32 1.442695, %v2448_v23  ;;  %v9948_v19 = vld [vmem:[#allocation29_spill] sm:$0xff] }
 0x41f   : > { %9942 = vst [vmem:[#allocation70_spill] sm:$0xff] %v8066_v51  ;;  %v3229_v59 = vadd.f32 %v7998_v9, %v3228_v0  ;;  %v8071_v39 = vpop.eup %5486  ;;  %5498 = vpow2.f32 %v2835_v33  ;;  %v3248_v27 = vadd.f32 %v8066_v51, %v3247_v41  ;;  %v2855_v0 = vmul.f32 1.442695, %v2446_v63 }
 0x420   : > { %9944 = vst [vmem:[#allocation81_spill] sm:$0xff] %v8071_v39  ;;  %v8074_v8 = vpop.eup %5488  ;;  %5500 = vpow2.f32 %v2839_v15  ;;  %v2252_v33 = vrot.slane %v2251_v3, 2  ;;  %v2474_v41 = vsub.f32 %v9948_v19, %v7946_v18  ;;  %v2476_v31 = vsub.f32 %v7717_v44, %v7946_v18 }
 0x421   : > { %9945 = vst [vmem:[#allocation26_spill] sm:$0xff] %v8074_v8  ;;  %v3230_v34 = vadd.f32 %v8006_v38, %v3229_v59  ;;  %v8079_v9 = vpop.eup %5490  ;;  %5502 = vpow2.f32 %v2843_v16  ;;  %v3249_v55 = vadd.f32 %v8074_v8, %v3248_v27  ;;  %v2863_v59 = vmul.f32 1.442695, %v2450_v32  ;;  %v9950_v27 = vld [vmem:[#allocation30_spill] sm:$0xff] }
 0x422   : > { %v8082_v14 = vpop.eup %5492  ;;  %5504 = vpow2.f32 %v2847_v35  ;;  %v2867_v63 = vmul.f32 1.442695, %v2452_v52  ;;  %v9951_v32 = vsub.f32 %v7580_v22, %v7946_v18  ;;  %v9953_v44 = vsub.f32 %v7588_v4, %v7946_v18 }
 0x423   : > { %9947 = vst [vmem:[#allocation46_spill] sm:$0xff] %v8082_v14  ;;  %v3231_v6 = vadd.f32 %v8011_v29, %v3230_v34  ;;  %v8087_v46 = vpop.eup %5494  ;;  %5506 = vpow2.f32 %v2851_v54  ;;  %v3250_v23 = vadd.f32 %v8082_v14, %v3249_v55  ;;  %v2478_v34 = vsub.f32 %v9950_v27, %v7946_v18  ;;  %v9985_v29 = vld [vmem:[#allocation44_spill] sm:$0xff] }
 0x424   : > { %v8092_v15 = vpop.eup %5496  ;;  %5508 = vpow2.f32 %v2855_v0  ;;  %v2871_v35 = vmul.f32 1.442695, %v9951_v32  ;;  %v2875_v52 = vmul.f32 1.442695, %v9953_v44  ;;  %v2253_v55 = vmax.f32 %v2251_v3, %v2252_v33 }
 0x425   : > { %9949 = vst [vmem:[#allocation54_spill] sm:$0xff] %v8092_v15  ;;  %v3232_v16 = vadd.f32 %v8019_v13, %v3231_v6  ;;  %v8100_v19 = vpop.eup %5498  ;;  %5510 = vpow2.f32 %v2859_v26  ;;  %v3251_v54 = vadd.f32 %v8092_v15, %v3250_v23  ;;  %v2480_v0 = vsub.f32 %v7772_v37, %v7946_v18 }
 0x426   : > { %9952 = vst [vmem:[#allocation76_spill] sm:$0xff] %v8100_v19  ;;  %v8106_v51 = vpop.eup %5500  ;;  %5512 = vpow2.f32 %v2863_v59  ;;  %v9955_v22 = vsub.f32 %v9931_v48, %v7946_v18  ;;  %v2482_v4 = vsub.f32 %v7801_v20, %v7946_v18  ;;  %v9957_v3 = vsub.f32 %v9933_v61, %v7946_v18 }
 0x427   : > { %9954 = vst [vmem:[#allocation15_spill] sm:$0xff] %v8106_v51  ;;  %v3233_v6 = vadd.f32 %v8039_v24, %v3232_v16  ;;  %v8114_v26 = vpop.eup %5502  ;;  %5514 = vpow2.f32 %v2867_v63  ;;  %v3252_v23 = vadd.f32 %v8100_v19, %v3251_v54  ;;  %v2484_v48 = vsub.f32 %v7834_v28, %v7946_v18 }
 0x428   : > { %v2879_v27 = vmul.f32 1.442695, %v9955_v22  ;;  %9956 = vst [vmem:[#allocation96_spill] sm:$0xff] %v8114_v26  ;;  %v2883_v33 = vmul.f32 1.442695, %v9957_v3  ;;  %v8122_v16 = vpop.eup %5504  ;;  %5516 = vpow2.f32 %v2871_v35  ;;  %v9959_v59 = vsub.f32 %v9934_v49, %v7946_v18  ;;  %v8136_v22 = vpop.f32.mrf.mxu3 }
 0x429   : > { %9958 = vst [vmem:[#allocation79_spill] sm:$0xff] %v8122_v16  ;;  %v3234_v37 = vadd.f32 %v8047_v57, %v3233_v6  ;;  %v8130_v20 = vpop.eup %5506  ;;  %5518 = vpow2.f32 %v2875_v52  ;;  %v9961_v61 = vsub.f32 %v9935_v47, %v7946_v18  ;;  %v3253_v44 = vadd.f32 %v8106_v51, %v3252_v23 }
 0x42a   : > { %v2887_v32 = vmul.f32 1.442695, %v9959_v59  ;;  %9960 = vst [vmem:[#allocation92_spill] sm:$0xff] %v8130_v20  ;;  %v2254_v54 = vrot.slane %v2253_v55, 1  ;;  %v8138_v6 = vpop.eup %5508  ;;  %5520 = vpow2.f32 %v2879_v27  ;;  %v9963_v49 = vsub.f32 %v9937_v17, %v7946_v18 }
 0x42b   : > { %v2891_v63 = vmul.f32 1.442695, %v9961_v61  ;;  %9962 = vst [vmem:[#allocation84_spill] sm:$0xff] %v8138_v6  ;;  %v3235_v28 = vadd.f32 %v8052_v10, %v3234_v37  ;;  %v9964_v52 = vsub.f32 %v9940_v12, %v7946_v18  ;;  %v8147_v47 = vpop.eup %5510  ;;  %5522 = vpow2.f32 %v2883_v33 }
 0x42c   : > { %v2895_v35 = vmul.f32 1.442695, %v9963_v49  ;;  %9965 = vst [vmem:[#allocation20_spill] sm:$0xff] %v8147_v47  ;;  %v9966_v23 = vsub.f32 %v9943_v30, %v7946_v18  ;;  %v2907_v61 = vmul.f32 1.442695, %v2472_v2  ;;  %v3254_v14 = vadd.f32 %v8114_v26, %v3253_v44  ;;  %v5513_v37 = vpop.eup %5512 }
 0x42d   : > { %v2899_v3 = vmul.f32 1.442695, %v9964_v52  ;;  %v3236_v27 = vadd.f32 %v8063_v7, %v3235_v28  ;;  %5524 = vpow2.f32 %v2887_v32  ;;  %v2911_v17 = vmul.f32 1.442695, %v2474_v41  ;;  %v8158_v12 = vpop.eup %5514 }
 0x42e   : > { %v2903_v59 = vmul.f32 1.442695, %v9966_v23  ;;  %v8156_v49 = vmax.f32 %v7910_v5, %v8136_v22  ;;  %9967 = vst [vmem:[#allocation94_spill] sm:$0xff] %v8158_v12  ;;  %5526 = vpow2.f32 %v2891_v63  ;;  %v2915_v33 = vmul.f32 1.442695, %v2476_v31  ;;  %v8163_v2 = vpop.eup %5516 }
 0x42f   : > { %v3255_v52 = vadd.f32 %v8122_v16, %v3254_v14  ;;  %v8161_v18 = vmax.f32 %v2253_v55, %v2254_v54  ;;  %9968 = vst [vmem:[#allocation100_spill] sm:$0xff] %v8163_v2  ;;  %v3237_v30 = vadd.f32 %v8071_v39, %v3236_v27  ;;  %5528 = vpow2.f32 %v2895_v35  ;;  %v8166_v41 = vpop.eup %5518  ;;  %v9981_v55 = vld [vmem:[#allocation2_spill] sm:$0xff] }
 0x430   : > { %v2919_v44 = vmul.f32 1.442695, %v2478_v34  ;;  %v2923_v32 = vmul.f32 1.442695, %v2480_v0  ;;  %9969 = vst [vmem:[#allocation56_spill] sm:$0xff] %v8166_v41  ;;  %5530 = vpow2.f32 %v2899_v3  ;;  %v8169_v63 = vpop.eup %5520  ;;  %v8173_v31 = vpack.c.bf16 %v5513_v37, %v7968_v62  ;;  %v9973_v0 = vld [vmem:[#allocation57_spill] sm:$0xff] }
 0x431   : > { %v2927_v5 = vmul.f32 1.442695, %v2482_v4  ;;  %v2931_v28 = vmul.f32 1.442695, %v2484_v48  ;;  %v3256_v23 = vadd.f32 %v8130_v20, %v3255_v52  ;;  %9970 = vst [vmem:[#allocation53_spill] sm:$0xff] %v8169_v63  ;;  %v3238_v14 = vadd.f32 %v8079_v9, %v3237_v30  ;;  %v8176_v54 = vpop.eup %5522  ;;  %v9974_v48 = vld [vmem:[#allocation77_spill] sm:$0xff] }
 0x432   : > { %5532 = vpow2.f32 %v2903_v59  ;;  %9971 = vst [vmem:[#allocation35_spill] sm:$0xff] %v8173_v31  ;;  %v2485_v4 = vsub.f32 %v9973_v0, %v8161_v18  ;;  %v2487_v35 = vsub.f32 %v9974_v48, %v8161_v18  ;;  %v9977_v62 = vld [vmem:[#allocation87_spill] sm:$0xff]  ;;  %v9978_v52 = vld [vmem:[#allocation78_spill] sm:$0xff]  ;;  %v9980_v0 = vld [vmem:[#allocation12_spill] sm:$0xff]  ;;  %v2495_v8 = vsub.f32 %v9981_v55, %v8161_v18 }
 0x433   : > { %9972 = vst [vmem:[#allocation43_spill] sm:$0xff] %v8176_v54  ;;  %5534 = vpow2.f32 %v2907_v61  ;;  %v3257_v34 = vadd.f32 %v8138_v6, %v3256_v23  ;;  %v8183_v3 = vpop.eup %5524  ;;  %v8186_v59 = vadd.f32 %v8087_v46, %v3238_v14  ;;  %v2489_v27 = vsub.f32 %v9977_v62, %v8161_v18  ;;  %v9988_v55 = vld [vmem:[#allocation36_spill] sm:$0xff] }
 0x434   : > { %9975 = vst [vmem:[#allocation29_spill] sm:$0xff] %v8183_v3  ;;  %5536 = vpow2.f32 %v2911_v17  ;;  %v2491_v61 = vsub.f32 %v9978_v52, %v8161_v18  ;;  %v8192_v30 = vpop.eup %5526  ;;  %v2493_v48 = vsub.f32 %v9980_v0, %v8161_v18  ;;  %v9983_v17 = vld [vmem:[#allocation55_spill] sm:$0xff]  ;;  %v9987_v0 = vld [vmem:[#allocation48_spill] sm:$0xff]  ;;  %v2505_v15 = vsub.f32 %v9988_v55, %v8161_v18 }
 0x435   : > { %9976 = vst [vmem:[#allocation30_spill] sm:$0xff] %v8186_v59  ;;  %5538 = vpow2.f32 %v2915_v33  ;;  %v3258_v23 = vadd.f32 %v8147_v47, %v3257_v34  ;;  %v8199_v14 = vpop.eup %5528  ;;  %v2497_v62 = vsub.f32 %v9983_v17, %v8161_v18  ;;  %v9984_v59 = vld [vmem:[#allocation58_spill] sm:$0xff]  ;;  %v2501_v33 = vsub.f32 %v9985_v29, %v8161_v18  ;;  %v9990_v17 = vld [vmem:[#allocation17_spill] sm:$0xff]  ;;  %v10003_v47 = vld [vmem:[#allocation59_spill] sm:$0xff] }
 0x436   : > { %9979 = vst [vmem:[#allocation57_spill] sm:$0xff] %v8192_v30  ;;  %5540 = vpow2.f32 %v2919_v44  ;;  %v2499_v52 = vsub.f32 %v9984_v59, %v8161_v18  ;;  %v8207_v38 = vpop.eup %5530  ;;  %v2503_v19 = vsub.f32 %v9987_v0, %v8161_v18  ;;  %v2507_v24 = vsub.f32 %v9990_v17, %v8161_v18  ;;  %v9991_v59 = vld [vmem:[#allocation27_spill] sm:$0xff]  ;;  %v9996_v17 = vld [vmem:[#allocation90_spill] sm:$0xff]  ;;  %v10006_v31 = vld [vmem:[#allocation40_spill] sm:$0xff] }
 0x437   : > { %9982 = vst [vmem:[#allocation77_spill] sm:$0xff] %v8199_v14  ;;  %5542 = vpow2.f32 %v2923_v32  ;;  %v3259_v34 = vadd.f32 %v5513_v37, %v3258_v23  ;;  %v2509_v13 = vsub.f32 %v9991_v59, %v8161_v18  ;;  %v2933_v29 = vmul.f32 1.442695, %v2485_v4  ;;  %v9993_v32 = vld [vmem:[#allocation98_spill] sm:$0xff]  ;;  %v9997_v59 = vld [vmem:[#allocation9_spill] sm:$0xff] }
 0x438   : > { %9986 = vst [vmem:[#allocation87_spill] sm:$0xff] %v8207_v38  ;;  %v8213_v44 = vpop.eup %5532  ;;  %5544 = vpow2.f32 %v2927_v5  ;;  %v2511_v23 = vsub.f32 %v9993_v32, %v8161_v18  ;;  %v2937_v0 = vmul.f32 1.442695, %v2487_v35  ;;  %v9995_v5 = vld [vmem:[#allocation75_spill] sm:$0xff]  ;;  %v2941_v57 = vmul.f32 1.442695, %v2489_v27 }
 0x439   : > { %9989 = vst [vmem:[#allocation78_spill] sm:$0xff] %v8213_v44  ;;  %v8219_v26 = vpop.eup %5534  ;;  %5546 = vpow2.f32 %v2931_v28  ;;  %v3260_v37 = vadd.f32 %v8158_v12, %v3259_v34  ;;  %v2513_v51 = vsub.f32 %v9995_v5, %v8161_v18  ;;  %v9999_v34 = vld [vmem:[#allocation72_spill] sm:$0xff]  ;;  %v2945_v39 = vmul.f32 1.442695, %v2491_v61  ;;  %v10002_v5 = vld [vmem:[#allocation62_spill] sm:$0xff] }
 0x43a   : > { %9992 = vst [vmem:[#allocation12_spill] sm:$0xff] %v8219_v26  ;;  %v8224_v55 = vpop.eup %5536  ;;  %v2519_v32 = vsub.f32 %v9999_v34, %v8161_v18  ;;  %v10000_v35 = vld [vmem:[#allocation16_spill] sm:$0xff]  ;;  %5548 = vpow2.f32 %v2933_v29  ;;  %v2949_v27 = vmul.f32 1.442695, %v2493_v48  ;;  %v10005_v34 = vld [vmem:[#allocation42_spill] sm:$0xff] }
 0x43b   : > { %9994 = vst [vmem:[#allocation2_spill] sm:$0xff] %v8224_v55  ;;  %v8232_v20 = vpop.eup %5538  ;;  %v3261_v28 = vadd.f32 %v8163_v2, %v3260_v37  ;;  %5550 = vpow2.f32 %v2937_v0  ;;  %v2953_v16 = vmul.f32 1.442695, %v2495_v8  ;;  %v2957_v29 = vmul.f32 1.442695, %v2497_v62 }
 0x43c   : > { %9998 = vst [vmem:[#allocation55_spill] sm:$0xff] %v8232_v20  ;;  %v8239_v7 = vpop.eup %5540  ;;  %5552 = vpow2.f32 %v2941_v57  ;;  %v2961_v0 = vmul.f32 1.442695, %v2499_v52  ;;  %v2965_v2 = vmul.f32 1.442695, %v2501_v33 }
 0x43d   : > { %10001 = vst [vmem:[#allocation58_spill] sm:$0xff] %v8239_v7  ;;  %v8245_v6 = vpop.eup %5542  ;;  %v3262_v37 = vadd.f32 %v8166_v41, %v3261_v28  ;;  %5554 = vpow2.f32 %v2945_v39  ;;  %v2973_v8 = vmul.f32 1.442695, %v2505_v15  ;;  %v2981_v15 = vmul.f32 1.442695, %v2509_v13 }
 0x43e   : > { %10004 = vst [vmem:[#allocation44_spill] sm:$0xff] %v8245_v6  ;;  %v8250_v61 = vpop.eup %5544  ;;  %5556 = vpow2.f32 %v2949_v27  ;;  %v3001_v62 = vmul.f32 1.442695, %v2519_v32  ;;  %v10021_v32 = vsub.f32 %v10003_v47, %v8161_v18  ;;  %v10026_v47 = vsub.f32 %v9874_v40, %v8161_v18 }
 0x43f   : > { %v8256_v48 = vpop.eup %5546  ;;  %v3263_v4 = vadd.f32 %v8169_v63, %v3262_v37  ;;  %5558 = vpow2.f32 %v2953_v16  ;;  %v2969_v37 = vmul.f32 1.442695, %v2503_v19  ;;  %v2977_v16 = vmul.f32 1.442695, %v2507_v24 }
 0x440   : > { %v8268_v10 = vpop.eup %5548  ;;  %5560 = vpow2.f32 %v2957_v29  ;;  %v8283_v27 = vpack.c.bf16 %v8250_v61, %v8079_v9  ;;  %v2985_v24 = vmul.f32 1.442695, %v2511_v23  ;;  %v2989_v9 = vmul.f32 1.442695, %v2513_v51 }
 0x441   : > { %v3264_v57 = vadd.f32 %v8176_v54, %v3263_v4  ;;  %10007 = vst [vmem:[#allocation48_spill] sm:$0xff] %v8268_v10  ;;  %v8274_v12 = vpop.eup %5550  ;;  %5562 = vpow2.f32 %v2961_v0  ;;  %v8292_v4 = vpack.c.bf16 %v8256_v48, %v8087_v46  ;;  %v10014_v46 = vsub.f32 %v9996_v17, %v8161_v18 }
 0x442   : > { %10008 = vst [vmem:[#allocation36_spill] sm:$0xff] %v8274_v12  ;;  %v8279_v19 = vpop.eup %5552  ;;  %5564 = vpow2.f32 %v2965_v2  ;;  %v3283_v39 = vadd.f32 %v8274_v12, %v8268_v10  ;;  %v10012_v2 = vrot.slane %v8156_v49, 4  ;;  %v10018_v17 = vsub.f32 %v10000_v35, %v8161_v18 }
 0x443   : > { %v3265_v33 = vadd.f32 %v8183_v3, %v3264_v57  ;;  %10009 = vst [vmem:[#allocation17_spill] sm:$0xff] %v8279_v19  ;;  %v8287_v29 = vpop.eup %5554  ;;  %5566 = vpow2.f32 %v2969_v37  ;;  %v2993_v23 = vmul.f32 1.442695, %v10014_v46  ;;  %v10023_v35 = vsub.f32 %v10005_v34, %v8161_v18 }
 0x444   : > { %10010 = vst [vmem:[#allocation27_spill] sm:$0xff] %v8287_v29  ;;  %v8294_v0 = vpop.eup %5556  ;;  %5568 = vpow2.f32 %v2973_v8  ;;  %v2288_v13 = vmax.f32 %v8156_v49, %v10012_v2  ;;  %v10015_v8 = vsub.f32 %v9997_v59, %v8161_v18  ;;  %v3284_v28 = vadd.f32 %v8279_v19, %v3283_v39 }
 0x445   : > { %v3266_v57 = vadd.f32 %v8192_v30, %v3265_v33  ;;  %10011 = vst [vmem:[#allocation98_spill] sm:$0xff] %v8294_v0  ;;  %v8301_v52 = vpop.eup %5558  ;;  %5570 = vpow2.f32 %v2977_v16  ;;  %v3005_v16 = vmul.f32 1.442695, %v10018_v17  ;;  %v10019_v59 = vsub.f32 %v10002_v5, %v8161_v18  ;;  %v10060_v30 = vld [vmem:[#allocation69_spill] sm:$0xff] }
 0x446   : > { %10013 = vst [vmem:[#allocation75_spill] sm:$0xff] %v8301_v52  ;;  %v2997_v51 = vmul.f32 1.442695, %v10015_v8  ;;  %v8310_v37 = vpop.eup %5560  ;;  %5572 = vpow2.f32 %v2981_v15  ;;  %v2289_v49 = vrot.slane %v2288_v13, 2  ;;  %v3013_v39 = vmul.f32 1.442695, %v10021_v32 }
 0x447   : > { %v3267_v33 = vadd.f32 %v8199_v14, %v3266_v57  ;;  %10016 = vst [vmem:[#allocation90_spill] sm:$0xff] %v8310_v37  ;;  %v8313_v2 = vpop.eup %5562  ;;  %5574 = vpow2.f32 %v2985_v24  ;;  %v3009_v46 = vmul.f32 1.442695, %v10019_v59  ;;  %v3285_v15 = vadd.f32 %v8287_v29, %v3284_v28 }
 0x448   : > { %10017 = vst [vmem:[#allocation9_spill] sm:$0xff] %v8313_v2  ;;  %v8322_v8 = vpop.eup %5564  ;;  %5576 = vpow2.f32 %v2989_v9  ;;  %v2290_v12 = vmax.f32 %v2288_v13, %v2289_v49  ;;  %v3017_v5 = vmul.f32 1.442695, %v10023_v35  ;;  %v10024_v17 = vsub.f32 %v10006_v31, %v8161_v18 }
 0x449   : > { %v3268_v57 = vadd.f32 %v8207_v38, %v3267_v33  ;;  %10020 = vst [vmem:[#allocation72_spill] sm:$0xff] %v8322_v8  ;;  %v8328_v33 = vpop.eup %5566  ;;  %5578 = vpow2.f32 %v2993_v23  ;;  %v3025_v28 = vmul.f32 1.442695, %v10026_v47  ;;  %v3286_v13 = vadd.f32 %v8294_v0, %v3285_v15  ;;  %v10055_v0 = vld [vmem:[#allocation41_spill] sm:$0xff]  ;;  %v10061_v38 = vld [vmem:[#allocation24_spill] sm:$0xff] }
 0x44a   : > { %10022 = vst [vmem:[#allocation16_spill] sm:$0xff] %v8328_v33  ;;  %v3021_v9 = vmul.f32 1.442695, %v10024_v17  ;;  %v8337_v59 = vpop.eup %5568  ;;  %5580 = vpow2.f32 %v2997_v51  ;;  %v2291_v49 = vrot.slane %v2290_v12, 1  ;;  %v10028_v34 = vsub.f32 %v7694_v43, %v8161_v18 }
 0x44b   : > { %v3269_v24 = vadd.f32 %v8213_v44, %v3268_v57  ;;  %10025 = vst [vmem:[#allocation62_spill] sm:$0xff] %v8337_v59  ;;  %v8343_v57 = vpop.eup %5570  ;;  %5582 = vpow2.f32 %v3001_v62  ;;  %v10029_v32 = vsub.f32 %v7722_v50, %v8161_v18  ;;  %v10031_v40 = vsub.f32 %v7750_v36, %v8161_v18  ;;  %v3664_v62 = vpop.f32.mrf.mxu0 }
 0x44c   : > { %10027 = vst [vmem:[#allocation59_spill] sm:$0xff] %v8343_v57  ;;  %v3029_v31 = vmul.f32 1.442695, %v10028_v34  ;;  %v8352_v35 = vpop.eup %5572  ;;  %5584 = vpow2.f32 %v3005_v16  ;;  %v3287_v17 = vadd.f32 %v8301_v52, %v3286_v13  ;;  %v8358_v47 = vmax.f32 %v2290_v12, %v2291_v49  ;;  %v10054_v52 = vld [vmem:[#allocation23_spill] sm:$0xff] }
 0x44d   : > { %v3270_v23 = vadd.f32 %v8219_v26, %v3269_v24  ;;  %v3033_v51 = vmul.f32 1.442695, %v10029_v32  ;;  %10030 = vst [vmem:[#allocation42_spill] sm:$0xff] %v8352_v35  ;;  %v3037_v15 = vmul.f32 1.442695, %v10031_v40  ;;  %v3678_v24 = vpop.f32.mrf.mxu1  ;;  %v8360_v10 = vpop.eup %5574  ;;  %5586 = vpow2.f32 %v3009_v46 }
 0x44e   : > { %10032 = vst [vmem:[#allocation40_spill] sm:$0xff] %v8360_v10  ;;  %v10033_v50 = vsub.f32 %v7777_v1, %v8161_v18  ;;  %v10034_v16 = vsub.f32 %v7806_v45, %v8161_v18  ;;  %v8369_v32 = vpop.eup %5576  ;;  %5588 = vpow2.f32 %v3013_v39  ;;  %v10035_v12 = vsub.f32 %v7836_v53, %v8161_v18 }
 0x44f   : > { %v3271_v43 = vadd.f32 %v8224_v55, %v3270_v23  ;;  %v10036_v49 = vsub.f32 %v7877_v21, %v8161_v18  ;;  %v3288_v46 = vadd.f32 %v8310_v37, %v3287_v17  ;;  %v8378_v40 = vpop.eup %5578  ;;  %5590 = vpow2.f32 %v3017_v5  ;;  %v10040_v21 = vld [vmem:[#allocation60_spill] sm:$0xff] }
 0x450   : > { %v3041_v34 = vmul.f32 1.442695, %v10033_v50  ;;  %v3045_v36 = vmul.f32 1.442695, %v10034_v16  ;;  %v3049_v13 = vmul.f32 1.442695, %v10035_v12  ;;  %v10038_v45 = vsub.f32 %v8037_v25, %v8161_v18  ;;  %v8386_v16 = vpop.eup %5580 }
 0x451   : > { %v3053_v23 = vmul.f32 1.442695, %v10036_v49  ;;  %10037 = vst [vmem:[#allocation106_spill] sm:$0xff] %v8378_v40  ;;  %v3272_v1 = vadd.f32 %v8232_v20, %v3271_v43  ;;  %v8384_v39 = vadd.f32 %v3678_v24, %v3664_v62  ;;  %5592 = vpow2.f32 %v3021_v9  ;;  %v10041_v17 = vld [vmem:[#allocation80_spill] sm:$0xff]  ;;  %v8393_v29 = vpop.eup %5582  ;;  %v10043_v25 = vld [vmem:[#allocation71_spill] sm:$0xff]  ;;  %v10050_v24 = vld [vmem:[#allocation89_spill] sm:$0xff] }
 0x452   : > { %v3057_v50 = vmul.f32 1.442695, %v10038_v45  ;;  %10039 = vst [vmem:[#allocation107_spill] sm:$0xff] %v8386_v16  ;;  %v3289_v53 = vadd.f32 %v8313_v2, %v3288_v46  ;;  %5594 = vpow2.f32 %v3025_v28  ;;  %v2490_v18 = vsub.f32 %v10043_v25, %v8358_v47  ;;  %v10044_v62 = vld [vmem:[#allocation3_spill] sm:$0xff]  ;;  %v8400_v9 = vpop.eup %5584  ;;  %v10046_v46 = vld [vmem:[#allocation65_spill] sm:$0xff]  ;;  %v10047_v49 = vld [vmem:[#allocation68_spill] sm:$0xff] }
 0x453   : > { %10042 = vst [vmem:[#allocation60_spill] sm:$0xff] %v8393_v29  ;;  %v3273_v5 = vadd.f32 %v8239_v7, %v3272_v1  ;;  %5596 = vpow2.f32 %v3029_v31  ;;  %v8407_v19 = vpop.eup %5586  ;;  %v10049_v1 = vld [vmem:[#allocation61_spill] sm:$0xff]  ;;  %v10051_v45 = vld [vmem:[#allocation50_spill] sm:$0xff]  ;;  %v10052_v12 = vld [vmem:[#allocation47_spill] sm:$0xff]  ;;  %v8439_v25 = vpop.f32.mrf.mxu0  ;;  %v2518_v3 = vsub.f32 %v10060_v30, %v8358_v47  ;;  %v2520_v14 = vsub.f32 %v10061_v38, %v8358_v47 }
 0x454   : > { %10045 = vst [vmem:[#allocation80_spill] sm:$0xff] %v8400_v9  ;;  %v3290_v43 = vadd.f32 %v8322_v8, %v3289_v53  ;;  %5598 = vpow2.f32 %v3033_v51  ;;  %v8414_v31 = vpop.eup %5588  ;;  %v2530_v26 = vsub.f32 %v9872_v58, %v8358_v47  ;;  %v2943_v55 = vmul.f32 1.442695, %v2490_v18  ;;  %v10079_v18 = vld [vmem:[#allocation33_spill] sm:$0xff] }
 0x455   : > { %10048 = vst [vmem:[#allocation71_spill] sm:$0xff] %v8407_v19  ;;  %v3274_v28 = vadd.f32 %v8245_v6, %v3273_v5  ;;  %5600 = vpow2.f32 %v3037_v15  ;;  %v8421_v37 = vpop.eup %5590  ;;  %v10053_v5 = vld [vmem:[#allocation99_spill] sm:$0xff]  ;;  %v8428_v15 = vpop.f32.mrf.mxu2 }
 0x456   : > { %v3291_v53 = vadd.f32 %v8328_v33, %v3290_v43  ;;  %5602 = vpow2.f32 %v3041_v34  ;;  %v8430_v43 = vpop.f32.mrf.mxu3  ;;  %v10056_v34 = vld [vmem:[#allocation34_spill] sm:$0xff]  ;;  %v8441_v41 = vpop.f32.mrf.mxu1 }
 0x457   : > { %v3275_v51 = vadd.f32 %v8250_v61, %v3274_v28  ;;  %v8432_v33 = vpop.eup %5592  ;;  %5604 = vpow2.f32 %v3045_v36  ;;  %v10058_v36 = vld [vmem:[#allocation31_spill] sm:$0xff] }
 0x458   : > { %v3292_v2 = vadd.f32 %v8337_v59, %v3291_v53  ;;  %v8443_v8 = vpop.eup %5594  ;;  %5606 = vpow2.f32 %v3049_v13  ;;  %v2514_v53 = vsub.f32 %v10058_v36, %v8358_v47  ;;  %v10059_v59 = vld [vmem:[#allocation82_spill] sm:$0xff]  ;;  %v10062_v13 = vld [vmem:[#allocation85_spill] sm:$0xff] }
 0x459   : > { %v8446_v54 = vadd.f32 %v8256_v48, %v3275_v51  ;;  %v2516_v63 = vsub.f32 %v10059_v59, %v8358_v47  ;;  %v8452_v61 = vpop.eup %5596  ;;  %5608 = vpow2.f32 %v3053_v23  ;;  %v2522_v51 = vsub.f32 %v10062_v13, %v8358_v47  ;;  %v10063_v59 = vld [vmem:[#allocation66_spill] sm:$0xff]  ;;  %v10064_v23 = vld [vmem:[#allocation49_spill] sm:$0xff] }
 0x45a   : > { %v3293_v28 = vadd.f32 %v8343_v57, %v3292_v2  ;;  %v8459_v48 = vpop.eup %5598  ;;  %5610 = vpow2.f32 %v3057_v50  ;;  %v2524_v36 = vsub.f32 %v10063_v59, %v8358_v47  ;;  %v10066_v57 = vld [vmem:[#allocation45_spill] sm:$0xff]  ;;  %v10067_v50 = vld [vmem:[#allocation10_spill] sm:$0xff]  ;;  %v2534_v59 = vsub.f32 %v7698_v11, %v8358_v47 }
 0x45b   : > { %10057 = vst [vmem:[#allocation3_spill] sm:$0xff] %v8446_v54  ;;  %v2526_v54 = vsub.f32 %v10064_v23, %v8358_v47  ;;  %v8468_v2 = vpop.eup %5600  ;;  %v2528_v38 = vsub.f32 %v10066_v57, %v8358_v47  ;;  %v2532_v44 = vsub.f32 %v10067_v50, %v8358_v47  ;;  %v2536_v23 = vsub.f32 %v7728_v60, %v8358_v47 }
 0x45c   : > { %10065 = vst [vmem:[#allocation65_spill] sm:$0xff] %v8468_v2  ;;  %v3294_v30 = vadd.f32 %v8352_v35, %v3293_v28  ;;  %v8477_v13 = vpop.eup %5602  ;;  %v2538_v28 = vsub.f32 %v7756_v42, %v8358_v47  ;;  %v10069_v35 = vld [vmem:[#allocation32_spill] sm:$0xff]  ;;  %v10071_v11 = vsub.f32 %v10040_v21, %v8358_v47  ;;  %v10072_v60 = vsub.f32 %v10041_v17, %v8358_v47  ;;  %v10077_v21 = vld [vmem:[#allocation22_spill] sm:$0xff] }
 0x45d   : > { %10068 = vst [vmem:[#allocation68_spill] sm:$0xff] %v8477_v13  ;;  %v8487_v20 = vpop.eup %5604  ;;  %v10075_v13 = vld [vmem:[#allocation4_spill] sm:$0xff] }
 0x45e   : > { %10070 = vst [vmem:[#allocation61_spill] sm:$0xff] %v8487_v20  ;;  %v3295_v58 = vadd.f32 %v8360_v10, %v3294_v30  ;;  %v2935_v50 = vmul.f32 1.442695, %v10071_v11  ;;  %v2939_v42 = vmul.f32 1.442695, %v10072_v60  ;;  %v8501_v57 = vpop.eup %5606  ;;  %v10074_v20 = vld [vmem:[#allocation37_spill] sm:$0xff]  ;;  %v2544_v7 = vsub.f32 %v10075_v13, %v8358_v47  ;;  %v3708_v60 = vpop.f32.mrf.mxu3 }
 0x45f   : > { %10073 = vst [vmem:[#allocation89_spill] sm:$0xff] %v8501_v57  ;;  %v2542_v6 = vsub.f32 %v10074_v20, %v8358_v47  ;;  %v10076_v30 = vsub.f32 %v10044_v62, %v8358_v47  ;;  %v4397_v11 = vmul.f32 %v10077_v21, %v8384_v39  ;;  %v8512_v2 = vpop.eup %5608  ;;  %v10080_v20 = vsub.f32 %v10046_v46, %v8358_v47 }
 0x460   : > { %10078 = vst [vmem:[#allocation50_spill] sm:$0xff] %v8512_v2  ;;  %v3296_v17 = vadd.f32 %v8369_v32, %v3295_v58  ;;  %5612 = vpow2.f32 %v2935_v50  ;;  %v8520_v13 = vpop.eup %5610  ;;  %v10082_v39 = vsub.f32 %v10047_v49, %v8358_v47  ;;  %v10083_v58 = vsub.f32 %v10049_v1, %v8358_v47  ;;  %v3694_v50 = vpop.f32.mrf.mxu2 }
 0x461   : > { %v2947_v10 = vmul.f32 1.442695, %v10076_v30  ;;  %v2951_v57 = vmul.f32 1.442695, %v10080_v20  ;;  %10081 = vst [vmem:[#allocation47_spill] sm:$0xff] %v8520_v13  ;;  %5614 = vpow2.f32 %v2939_v42  ;;  %v10084_v20 = vsub.f32 %v10050_v24, %v8358_v47  ;;  %v3890_v49 = vpop.f32.mrf.mxu0 }
 0x462   : > { %v2955_v30 = vmul.f32 1.442695, %v10082_v39  ;;  %v2959_v2 = vmul.f32 1.442695, %v10083_v58  ;;  %4413 = vst [vmem:[%s8492_s4] sm:$0xff] %v4397_v11  ;;  %v3297_v46 = vadd.f32 %v8378_v40, %v3296_v17  ;;  %5616 = vpow2.f32 %v2943_v55  ;;  %v3904_v39 = vpop.f32.mrf.mxu1 }
 0x463   : > { %v2963_v13 = vmul.f32 1.442695, %v10084_v20  ;;  %v10085_v42 = vsub.f32 %v10051_v45, %v8358_v47  ;;  %5618 = vpow2.f32 %v2947_v10  ;;  %v10086_v1 = vsub.f32 %v10052_v12, %v8358_v47 }
 0x464   : > { %v10087_v58 = vsub.f32 %v10053_v5, %v8358_v47  ;;  %v10088_v55 = vsub.f32 %v10054_v52, %v8358_v47  ;;  %v3298_v20 = vadd.f32 %v8386_v16, %v3297_v46  ;;  %5620 = vpow2.f32 %v2951_v57 }
 0x465   : > { %v2967_v62 = vmul.f32 1.442695, %v10085_v42  ;;  %v2971_v11 = vmul.f32 1.442695, %v10086_v1  ;;  %v10089_v45 = vsub.f32 %v10055_v0, %v8358_v47  ;;  %v10090_v10 = vsub.f32 %v10056_v34, %v8358_v47 }
 0x466   : > { %v2975_v17 = vmul.f32 1.442695, %v10087_v58  ;;  %v2979_v24 = vmul.f32 1.442695, %v10088_v55  ;;  %5622 = vpow2.f32 %v2955_v30  ;;  %v2991_v1 = vmul.f32 1.442695, %v2514_v53  ;;  %v8556_v58 = vpop.eup %5612 }
 0x467   : > { %v2983_v42 = vmul.f32 1.442695, %v10089_v45  ;;  %v2987_v12 = vmul.f32 1.442695, %v10090_v10  ;;  %v2995_v40 = vmul.f32 1.442695, %v2516_v63  ;;  %v3299_v52 = vadd.f32 %v8393_v29, %v3298_v20  ;;  %v8563_v0 = vpop.eup %5614 }
 0x468   : > { %v8554_v5 = vmul.f32 1.442695, %v2518_v3  ;;  %10091 = vst [vmem:[#allocation99_spill] sm:$0xff] %v8556_v58  ;;  %5624 = vpow2.f32 %v2959_v2  ;;  %v8559_v46 = vmul.f32 1.442695, %v2520_v14  ;;  %v8571_v63 = vpop.eup %5616  ;;  %v3918_v45 = vpop.f32.mrf.mxu2 }
 0x469   : > { %v8561_v57 = vmul.f32 1.442695, %v2522_v51  ;;  %10092 = vst [vmem:[#allocation23_spill] sm:$0xff] %v8563_v0  ;;  %5626 = vpow2.f32 %v2963_v13  ;;  %v8565_v55 = vmul.f32 1.442695, %v2524_v36  ;;  %v3300_v3 = vadd.f32 %v8400_v9, %v3299_v52  ;;  %v8578_v51 = vpop.eup %5618  ;;  %v10141_v9 = vld [vmem:[#allocation88_spill] sm:$0xff] }
 0x46a   : > { %v8567_v34 = vmul.f32 1.442695, %v2526_v54  ;;  %v8569_v53 = vmul.f32 1.442695, %v2528_v38  ;;  %10093 = vst [vmem:[#allocation41_spill] sm:$0xff] %v8571_v63  ;;  %5628 = vpow2.f32 %v2967_v62  ;;  %v8586_v38 = vpop.eup %5620  ;;  %v10095_v62 = vsub.f32 %v10069_v35, %v8358_v47  ;;  %v3932_v35 = vpop.f32.mrf.mxu3 }
 0x46b   : > { %v8574_v30 = vmul.f32 1.442695, %v2530_v26  ;;  %v8576_v14 = vmul.f32 1.442695, %v2532_v44  ;;  %10094 = vst [vmem:[#allocation34_spill] sm:$0xff] %v8578_v51  ;;  %5630 = vpow2.f32 %v2971_v11  ;;  %v3301_v13 = vadd.f32 %v8407_v19, %v3300_v3  ;;  %v3906_v29 = vpop.f32.mrf.mxu1 }
 0x46c   : > { %v8580_v2 = vmul.f32 1.442695, %v2534_v59  ;;  %v8582_v36 = vmul.f32 1.442695, %v2536_v23  ;;  %v8584_v54 = vmul.f32 1.442695, %v2538_v28  ;;  %v8598_v11 = vpop.eup %5622  ;;  %5632 = vpow2.f32 %v2975_v17 }
 0x46d   : > { %v8592_v26 = vmul.f32 1.442695, %v10095_v62  ;;  %v8594_v44 = vmul.f32 1.442695, %v2542_v6  ;;  %v8596_v20 = vmul.f32 1.442695, %v2544_v7  ;;  %v3320_v59 = vadd.f32 %v8563_v0, %v8556_v58  ;;  %v3892_v62 = vpop.f32.mrf.mxu0 }
 0x46e   : > { %v3707_v23 = vadd.f32 %v8430_v43, %v8428_v15  ;;  %v3681_v28 = vadd.f32 %v8441_v41, %v8439_v25  ;;  %v8606_v10 = vpop.eup %5624  ;;  %v3302_v6 = vadd.f32 %v8414_v31, %v3301_v13  ;;  %v10096_v7 = vsub.f32 %v10079_v18, %v8358_v47  ;;  %v10097_v25 = vld [vmem:[#allocation64_spill] sm:$0xff] }
 0x46f   : > { %v3709_v17 = vadd.f32 %v3708_v60, %v3694_v50  ;;  %v3905_v3 = vadd.f32 %v3904_v39, %v3890_v49  ;;  %v8614_v15 = vpop.eup %5626  ;;  %5634 = vpow2.f32 %v2979_v24  ;;  %v3321_v41 = vadd.f32 %v8571_v63, %v3320_v59  ;;  %v10098_v50 = vld [vmem:[#allocation6_spill] sm:$0xff] }
 0x470   : > { %v8612_v52 = vmul.f32 1.442695, %v10096_v7  ;;  %v4398_v43 = vmul.f32 %v10097_v25, %v3707_v23  ;;  %v4399_v13 = vmul.f32 %v10077_v21, %v3681_v28  ;;  %v8619_v16 = vpop.eup %5628  ;;  %v3303_v18 = vadd.f32 %v8421_v37, %v3302_v6  ;;  %v10100_v6 = vld [vmem:[#allocation35_spill] sm:$0xff] }
 0x471   : > { %5636 = vpow2.f32 %v2983_v42  ;;  %v4400_v60 = vmul.f32 %v10097_v25, %v3709_v17  ;;  %v4401_v49 = vmul.f32 %v10098_v50, %v3905_v3  ;;  %v8624_v39 = vpop.eup %5630  ;;  %v3322_v24 = vadd.f32 %v8578_v51, %v3321_v41  ;;  %v10099_v42 = vld [vmem:[#allocation94_spill] sm:$0xff]  ;;  %v10101_v3 = vld [vmem:[#allocation101_spill] sm:$0xff] }
 0x472   : > { %5638 = vpow2.f32 %v2991_v1  ;;  %4414 = vst [vmem:[%s8492_s4 + $0x8] sm:$0xff] %v4398_v43  ;;  %v3933_v59 = vadd.f32 %v3932_v35, %v3918_v45  ;;  %v3907_v23 = vadd.f32 %v3906_v29, %v3892_v62  ;;  %v3304_v21 = vadd.f32 %v8432_v33, %v3303_v18  ;;  %v8633_v17 = vpop.eup %5632  ;;  %v10142_v51 = vld [vmem:[#allocation77_spill] sm:$0xff] }
 0x473   : > { %5640 = vpow2.f32 %v2987_v12  ;;  %4415 = vst [vmem:[%s8492_s4 + $0x10] sm:$0xff] %v4399_v13  ;;  %v3436_v28 = vpack.c.bf16 %v10099_v42, %v7973_v56  ;;  %v4007_v7 = vunpack.c.l.b16 %v10100_v6  ;;  %v3323_v1 = vadd.f32 %v8586_v38, %v3322_v24 }
 0x474   : > { %5642 = vpow2.f32 %v2995_v40  ;;  %4416 = vst [vmem:[%s8492_s4 + $0x18] sm:$0xff] %v4400_v60  ;;  %v4402_v41 = vmul.f32 %v10101_v3, %v3933_v59  ;;  %v4403_v29 = vmul.f32 %v10098_v50, %v3907_v23  ;;  %v3305_v12 = vadd.f32 %v8443_v8, %v3304_v21 }
 0x475   : > { %5644 = vpow2.f32 %v8554_v5  ;;  %4417 = vst [vmem:[%s8492_s4 + $0x20] sm:$0xff] %v4401_v49  ;;  %v4009_v56 = vunpack.c.l.b16 %v3436_v28  ;;  %v4039_v45 = vunpack.c.l.b16 %v8283_v27  ;;  %v8643_v35 = vpop.eup %5634  ;;  %v3324_v40 = vadd.f32 %v8598_v11, %v3323_v1  ;;  %v10106_v1 = vld [vmem:[#allocation65_spill] sm:$0xff] }
 0x476   : > { %5646 = vpow2.f32 %v8559_v46  ;;  %4418 = vst [vmem:[%s8492_s4 + $0x28] sm:$0xff] %v4402_v41  ;;  %v4041_v62 = vunpack.c.l.b16 %v8292_v4  ;;  %v4008_v25 = vunpack.c.h.b16 %v10100_v6  ;;  %v3306_v13 = vadd.f32 %v8452_v61, %v3305_v12  ;;  %v10109_v12 = vld [vmem:[#allocation95_spill] sm:$0xff] }
 0x477   : > { %v8650_v43 = vpop.eup %5636  ;;  %5648 = vpow2.f32 %v8561_v57  ;;  %4419 = vst [vmem:[%s8492_s4 + $0x30] sm:$0xff] %v4403_v29  ;;  %v4057_v5 = vpack.c.b16 %v4009_v56, %v4007_v7  ;;  %v4010_v18 = vunpack.c.h.b16 %v3436_v28  ;;  %v10102_v46 = vsub.f32 %v8136_v22, %v8358_v47  ;;  %v10104_v28 = vld [vmem:[#allocation84_spill] sm:$0xff]  ;;  %v10110_v56 = vld [vmem:[#allocation58_spill] sm:$0xff] }
 0x478   : > { %v8655_v60 = vpop.eup %5638  ;;  %5650 = vpow2.f32 %v8565_v55  ;;  %v3325_v49 = vadd.f32 %v8606_v10, %v3324_v40  ;;  %v4073_v24 = vpack.c.b16 %v4041_v62, %v4039_v45  ;;  %v3307_v23 = vadd.f32 %v8459_v48, %v3306_v13  ;;  %v10103_v55 = vld [vmem:[#allocation67_spill] sm:$0xff]  ;;  %v10108_v29 = vld [vmem:[#allocation20_spill] sm:$0xff] }
 0x479   : > { %v3059_v50 = vmul.f32 1.442695, %v10102_v46  ;;  %v8662_v59 = vpop.eup %5640  ;;  %5652 = vpow2.f32 %v8567_v34  ;;  %4107 = vmatpush.bf16.msra.mxu0 %v4057_v5  ;;  %v4058_v57 = vpack.c.b16 %v4010_v18, %v4008_v25  ;;  %v4040_v21 = vunpack.c.h.b16 %v8283_v27  ;;  %v10107_v27 = vld [vmem:[#allocation39_spill] sm:$0xff]  ;;  %v10113_v5 = vld [vmem:[#allocation68_spill] sm:$0xff]  ;;  %v10114_v46 = vld [vmem:[#allocation81_spill] sm:$0xff] }
 0x47a   : > { %v8667_v42 = vpop.eup %5642  ;;  %5654 = vpow2.f32 %v8569_v53  ;;  %v3326_v22 = vadd.f32 %v8614_v15, %v3325_v49  ;;  %4121 = vmatpush.bf16.msra.mxu1 %v4073_v24  ;;  %v4042_v47 = vunpack.c.h.b16 %v8292_v4  ;;  %v3433_v6 = vpack.c.bf16 %v10104_v28, %v10103_v55  ;;  %v10115_v49 = vld [vmem:[#allocation44_spill] sm:$0xff] }
 0x47b   : > { %v8674_v7 = vpop.eup %5644  ;;  %v3308_v34 = vadd.f32 %v10106_v1, %v3307_v23  ;;  %v8679_v41 = vpack.c.bf16 %v8655_v60, %v8369_v32  ;;  %4135 = vmatpush.bf16.msra.mxu2 %v4058_v57  ;;  %v3434_v53 = vpack.c.bf16 %v10108_v29, %v10107_v27  ;;  %v3449_v45 = vpack.c.bf16 %v10110_v56, %v10109_v12  ;;  %v3934_v27 = vpop.f32.mrf.mxu3 }
 0x47c   : > { %10105 = vst [vmem:[#allocation31_spill] sm:$0xff] %v8674_v7  ;;  %v8685_v40 = vpop.eup %5646  ;;  %5656 = vpow2.f32 %v8574_v30  ;;  %v3327_v4 = vadd.f32 %v8619_v16, %v3326_v22  ;;  %v4074_v62 = vpack.c.b16 %v4042_v47, %v4040_v21  ;;  %v4003_v25 = vunpack.c.l.b16 %v3433_v6  ;;  %v10116_v47 = vld [vmem:[#allocation61_spill] sm:$0xff] }
 0x47d   : > { %10111 = vst [vmem:[#allocation82_spill] sm:$0xff] %v8685_v40  ;;  %v8689_v13 = vpop.eup %5648  ;;  %v3309_v32 = vadd.f32 %v10113_v5, %v3308_v34  ;;  %5658 = vpow2.f32 %v8576_v14  ;;  %v4005_v18 = vunpack.c.l.b16 %v3434_v53  ;;  %v3450_v24 = vpack.c.bf16 %v10115_v49, %v10114_v46  ;;  %v3920_v34 = vpop.f32.mrf.mxu2 }
 0x47e   : > { %10112 = vst [vmem:[#allocation69_spill] sm:$0xff] %v8689_v13  ;;  %v8695_v23 = vpop.eup %5650  ;;  %5660 = vpow2.f32 %v8580_v2  ;;  %v3328_v30 = vadd.f32 %v8624_v39, %v3327_v4  ;;  %4149 = vmatpush.bf16.msra.mxu3 %v4074_v62  ;;  %v4035_v57 = vunpack.c.l.b16 %v3449_v45  ;;  %v4004_v21 = vunpack.c.h.b16 %v3433_v6  ;;  %v10117_v4 = vld [vmem:[#allocation89_spill] sm:$0xff] }
 0x47f   : > { %v8699_v22 = vpop.eup %5652  ;;  %v3310_v55 = vadd.f32 %v10116_v47, %v3309_v32  ;;  %5662 = vpow2.f32 %v8582_v36  ;;  %v4055_v14 = vpack.c.b16 %v4005_v18, %v4003_v25  ;;  %v4037_v28 = vunpack.c.l.b16 %v3450_v24 }
 0x480   : > { %v8703_v29 = vpop.eup %5654  ;;  %5664 = vpow2.f32 %v8584_v54  ;;  %v3329_v2 = vadd.f32 %v8633_v17, %v3328_v30  ;;  %v4006_v12 = vunpack.c.h.b16 %v3434_v53  ;;  %v4036_v56 = vunpack.c.h.b16 %v3449_v45  ;;  %v10118_v54 = vld [vmem:[#allocation50_spill] sm:$0xff] }
 0x481   : > { %v3311_v6 = vadd.f32 %v10117_v4, %v3310_v55  ;;  %5666 = vpow2.f32 %v8612_v52  ;;  %4108 = vmatpush.bf16.msra.mxu0 %v4055_v14  ;;  %v4071_v62 = vpack.c.b16 %v4037_v28, %v4035_v57  ;;  %v4038_v32 = vunpack.c.h.b16 %v3450_v24  ;;  %v10119_v45 = vld [vmem:[#allocation14_spill] sm:$0xff]  ;;  %v10120_v55 = vld [vmem:[#allocation79_spill] sm:$0xff]  ;;  %v10122_v14 = vld [vmem:[#allocation92_spill] sm:$0xff] }
 0x482   : > { %v8709_v36 = vpop.eup %5656  ;;  %5668 = vpow2.f32 %v3059_v50  ;;  %v3330_v25 = vadd.f32 %v8643_v35, %v3329_v2  ;;  %v4056_v18 = vpack.c.b16 %v4006_v12, %v4004_v21  ;;  %v3935_v46 = vadd.f32 %v3934_v27, %v3920_v34  ;;  %v10121_v52 = vld [vmem:[#allocation51_spill] sm:$0xff]  ;;  %v10123_v28 = vld [vmem:[#allocation28_spill] sm:$0xff]  ;;  %v10124_v34 = vld [vmem:[#allocation2_spill] sm:$0xff] }
 0x483   : > { %v8712_v49 = vpop.eup %5658  ;;  %v3312_v30 = vadd.f32 %v10118_v54, %v3311_v6  ;;  %4122 = vmatpush.bf16.msra.mxu1 %v4071_v62  ;;  %v4072_v53 = vpack.c.b16 %v4038_v32, %v4036_v56  ;;  %v3431_v0 = vpack.c.bf16 %v10120_v55, %v10119_v45  ;;  %v3432_v24 = vpack.c.bf16 %v10122_v14, %v10121_v52  ;;  %v10125_v2 = vld [vmem:[#allocation13_spill] sm:$0xff]  ;;  %v10126_v12 = vld [vmem:[#allocation55_spill] sm:$0xff] }
 0x484   : > { %v8719_v57 = vpop.eup %5660  ;;  %v3331_v50 = vadd.f32 %v8650_v43, %v3330_v25  ;;  %4136 = vmatpush.bf16.msra.mxu2 %v4056_v18  ;;  %v4404_v21 = vmul.f32 %v10101_v3, %v3935_v46  ;;  %v3447_v27 = vpack.c.bf16 %v10124_v34, %v10123_v28  ;;  %v3448_v56 = vpack.c.bf16 %v10126_v12, %v10125_v2  ;;  %v10127_v62 = vld [vmem:[#allocation47_spill] sm:$0xff] }
 0x485   : > { %v8727_v6 = vpop.eup %5662  ;;  %v8730_v32 = vadd.f32 %v10127_v62, %v3312_v30  ;;  %4150 = vmatpush.bf16.msra.mxu3 %v4072_v53  ;;  %v3999_v45 = vunpack.c.l.b16 %v3431_v0  ;;  %v4001_v55 = vunpack.c.l.b16 %v3432_v24  ;;  %v4000_v52 = vunpack.c.h.b16 %v3431_v0 }
 0x486   : > { %v8732_v14 = vpop.eup %5664  ;;  %v3332_v25 = vadd.f32 %v8662_v59, %v3331_v50  ;;  %4420 = vst [vmem:[%s8492_s4 + $0x38] sm:$0xff] %v4404_v21  ;;  %v4031_v3 = vunpack.c.l.b16 %v3447_v27  ;;  %v4033_v18 = vunpack.c.l.b16 %v3448_v56  ;;  %v4002_v46 = vunpack.c.h.b16 %v3432_v24 }
 0x487   : > { %10128 = vst [vmem:[#allocation24_spill] sm:$0xff] %v8730_v32  ;;  %v8736_v28 = vpop.eup %5666  ;;  %5670 = vpow2.f32 %v8592_v26  ;;  %v4053_v34 = vpack.c.b16 %v4001_v55, %v3999_v45  ;;  %v4032_v2 = vunpack.c.h.b16 %v3447_v27  ;;  %v4034_v30 = vunpack.c.h.b16 %v3448_v56  ;;  %v10129_v27 = vld [vmem:[#allocation83_spill] sm:$0xff]  ;;  %v10132_v55 = vld [vmem:[#allocation96_spill] sm:$0xff]  ;;  %v10137_v32 = vld [vmem:[#allocation93_spill] sm:$0xff] }
 0x488   : > { %v8739_v12 = vpop.eup %5668  ;;  %v3333_v53 = vadd.f32 %v8655_v60, %v3332_v25  ;;  %v8744_v0 = vpack.c.bf16 %v8736_v28, %v10118_v54  ;;  %v4069_v50 = vpack.c.b16 %v4033_v18, %v4031_v3  ;;  %v4054_v21 = vpack.c.b16 %v4002_v46, %v4000_v52  ;;  %v10130_v56 = vld [vmem:[#allocation15_spill] sm:$0xff]  ;;  %v10131_v54 = vld [vmem:[#allocation102_spill] sm:$0xff]  ;;  %v10136_v46 = vld [vmem:[#allocation12_spill] sm:$0xff] }
 0x489   : > { %5672 = vpow2.f32 %v8594_v44  ;;  %v8749_v24 = vpack.c.bf16 %v8739_v12, %v10127_v62  ;;  %4109 = vmatpush.bf16.msra.mxu0 %v4053_v34  ;;  %v4070_v26 = vpack.c.b16 %v4034_v30, %v4032_v2  ;;  %v3429_v45 = vpack.c.bf16 %v10130_v56, %v10129_v27  ;;  %v10133_v25 = vld [vmem:[#allocation86_spill] sm:$0xff]  ;;  %v10135_v18 = vld [vmem:[#allocation91_spill] sm:$0xff] }
 0x48a   : > { %5674 = vpow2.f32 %v8596_v20  ;;  %v3334_v60 = vadd.f32 %v8667_v42, %v3333_v53  ;;  %4123 = vmatpush.bf16.msra.mxu1 %v4069_v50  ;;  %4137 = vmatpush.bf16.msra.mxu2 %v4054_v21  ;;  %v3430_v52 = vpack.c.bf16 %v10132_v55, %v10131_v54  ;;  %v10134_v44 = vld [vmem:[#allocation78_spill] sm:$0xff]  ;;  %v3446_v34 = vpack.c.bf16 %v10136_v46, %v10135_v18  ;;  %v10140_v46 = vld [vmem:[#allocation76_spill] sm:$0xff] }
 0x48b   : > { %v3445_v3 = vpack.c.bf16 %v10134_v44, %v10133_v25  ;;  %4151 = vmatpush.bf16.msra.mxu3 %v4070_v26  ;;  %v3995_v62 = vunpack.c.l.b16 %v3429_v45  ;;  %v3996_v2 = vunpack.c.h.b16 %v3429_v45  ;;  %v10138_v25 = vld [vmem:[#allocation54_spill] sm:$0xff]  ;;  %v10139_v45 = vld [vmem:[#allocation73_spill] sm:$0xff]  ;;  %v3443_v63 = vpack.c.bf16 %v10142_v51, %v10141_v9 }
 0x48c   : > { %v3335_v20 = vadd.f32 %v8674_v7, %v3334_v60  ;;  %v3997_v27 = vunpack.c.l.b16 %v3430_v52  ;;  %v3998_v50 = vunpack.c.h.b16 %v3430_v52  ;;  %v4029_v56 = vunpack.c.l.b16 %v3446_v34 }
 0x48d   : > { %v4027_v53 = vunpack.c.l.b16 %v3445_v3  ;;  %v8763_v21 = vpop.eup %5670  ;;  %v4028_v54 = vunpack.c.h.b16 %v3445_v3  ;;  %v4030_v55 = vunpack.c.h.b16 %v3446_v34  ;;  %v3427_v26 = vpack.c.bf16 %v10138_v25, %v10137_v32 }
 0x48e   : > { %v3336_v44 = vadd.f32 %v8685_v40, %v3335_v20  ;;  %v4051_v58 = vpack.c.b16 %v3997_v27, %v3995_v62  ;;  %v4052_v18 = vpack.c.b16 %v3998_v50, %v3996_v2  ;;  %v3428_v30 = vpack.c.bf16 %v10140_v46, %v10139_v45  ;;  %v10143_v62 = vld [vmem:[#allocation63_spill] sm:$0xff]  ;;  %v10148_v46 = vld [vmem:[#allocation46_spill] sm:$0xff] }
 0x48f   : > { %v8770_v19 = vpop.eup %5672  ;;  %v4067_v60 = vpack.c.b16 %v4029_v56, %v4027_v53  ;;  %v4068_v7 = vpack.c.b16 %v4030_v55, %v4028_v54  ;;  %v3991_v52 = vunpack.c.l.b16 %v3427_v26  ;;  %v10144_v2 = vld [vmem:[#allocation87_spill] sm:$0xff]  ;;  %v3992_v27 = vunpack.c.h.b16 %v3427_v26  ;;  %v10146_v55 = vld [vmem:[#allocation26_spill] sm:$0xff]  ;;  %v10150_v26 = vld [vmem:[#allocation29_spill] sm:$0xff] }
 0x490   : > { %v8774_v3 = vpop.eup %5674  ;;  %v3337_v34 = vadd.f32 %v8689_v13, %v3336_v44  ;;  %4110 = vmatpush.bf16.msra.mxu0 %v4051_v58  ;;  %4138 = vmatpush.bf16.msra.mxu2 %v4052_v18  ;;  %v3993_v32 = vunpack.c.l.b16 %v3428_v30  ;;  %v3444_v20 = vpack.c.bf16 %v10144_v2, %v10143_v62  ;;  %v4023_v50 = vunpack.c.l.b16 %v3443_v63  ;;  %v10145_v54 = vld [vmem:[#allocation103_spill] sm:$0xff]  ;;  %v10147_v18 = vld [vmem:[#allocation104_spill] sm:$0xff]  ;;  %v10149_v62 = vld [vmem:[#allocation74_spill] sm:$0xff] }
 0x491   : > { %4124 = vmatpush.bf16.msra.mxu1 %v4067_v60  ;;  %4152 = vmatpush.bf16.msra.mxu3 %v4068_v7  ;;  %v3994_v53 = vunpack.c.h.b16 %v3428_v30  ;;  %v4024_v56 = vunpack.c.h.b16 %v3443_v63  ;;  %v3425_v25 = vpack.c.bf16 %v10146_v55, %v10145_v54  ;;  %v3426_v40 = vpack.c.bf16 %v10148_v46, %v10147_v18  ;;  %v10151_v2 = vld [vmem:[#allocation5_spill] sm:$0xff] }
 0x492   : > { %v3338_v9 = vadd.f32 %v8695_v23, %v3337_v34  ;;  %v4049_v51 = vpack.c.b16 %v3993_v32, %v3991_v52  ;;  %v4025_v45 = vunpack.c.l.b16 %v3444_v20  ;;  %v4026_v44 = vunpack.c.h.b16 %v3444_v20  ;;  %v10152_v54 = vld [vmem:[#allocation57_spill] sm:$0xff] }
 0x493   : > { %v4050_v58 = vpack.c.b16 %v3994_v53, %v3992_v27  ;;  %v3987_v13 = vunpack.c.l.b16 %v3425_v25  ;;  %v3441_v60 = vpack.c.bf16 %v10150_v26, %v10149_v62  ;;  %v3442_v55 = vpack.c.bf16 %v10152_v54, %v10151_v2  ;;  %v10158_v54 = vld [vmem:[#allocation53_spill] sm:$0xff] }
 0x494   : > { %v3339_v7 = vadd.f32 %v8699_v22, %v3338_v9  ;;  %4111 = vmatpush.bf16.msra.mxu0 %v4049_v51  ;;  %v4065_v63 = vpack.c.b16 %v4025_v45, %v4023_v50  ;;  %v4066_v30 = vpack.c.b16 %v4026_v44, %v4024_v56  ;;  %v3989_v52 = vunpack.c.l.b16 %v3426_v40  ;;  %v10153_v51 = vld [vmem:[#allocation18_spill] sm:$0xff]  ;;  %v10154_v50 = vld [vmem:[#allocation19_spill] sm:$0xff]  ;;  %v10155_v45 = vld [vmem:[#allocation25_spill] sm:$0xff] }
 0x495   : > { %4139 = vmatpush.bf16.msra.mxu2 %v4050_v58  ;;  %v4019_v34 = vunpack.c.l.b16 %v3441_v60  ;;  %v3988_v32 = vunpack.c.h.b16 %v3425_v25  ;;  %v3990_v20 = vunpack.c.h.b16 %v3426_v40  ;;  %v4021_v53 = vunpack.c.l.b16 %v3442_v55  ;;  %v10156_v44 = vld [vmem:[#allocation70_spill] sm:$0xff]  ;;  %v10157_v40 = vld [vmem:[#allocation97_spill] sm:$0xff] }
 0x496   : > { %v3340_v27 = vadd.f32 %v8703_v29, %v3339_v7  ;;  %4125 = vmatpush.bf16.msra.mxu1 %v4065_v63  ;;  %4153 = vmatpush.bf16.msra.mxu3 %v4066_v30  ;;  %v4020_v18 = vunpack.c.h.b16 %v3441_v60  ;;  %v4022_v46 = vunpack.c.h.b16 %v3442_v55  ;;  %v4047_v62 = vpack.c.b16 %v3989_v52, %v3987_v13  ;;  %v10159_v30 = vld [vmem:[#allocation8_spill] sm:$0xff]  ;;  %v10160_v13 = vld [vmem:[#allocation43_spill] sm:$0xff] }
 0x497   : > { %v4048_v9 = vpack.c.b16 %v3990_v20, %v3988_v32  ;;  %v3423_v56 = vpack.c.bf16 %v10154_v50, %v10153_v51  ;;  %v3424_v26 = vpack.c.bf16 %v10156_v44, %v10155_v45  ;;  %v4063_v2 = vpack.c.b16 %v4021_v53, %v4019_v34  ;;  %v10162_v50 = vld [vmem:[#allocation52_spill] sm:$0xff]  ;;  %v10163_v44 = vld [vmem:[#allocation21_spill] sm:$0xff] }
 0x498   : > { %v3341_v58 = vadd.f32 %v8709_v36, %v3340_v27  ;;  %v4064_v25 = vpack.c.b16 %v4022_v46, %v4020_v18  ;;  %v3439_v7 = vpack.c.bf16 %v10158_v54, %v10157_v40  ;;  %4112 = vmatpush.bf16.msra.mxu0 %v4047_v62  ;;  %v3440_v55 = vpack.c.bf16 %v10160_v13, %v10159_v30  ;;  %v10161_v46 = vld [vmem:[#allocation7_spill] sm:$0xff]  ;;  %v10164_v40 = vld [vmem:[#allocation38_spill] sm:$0xff]  ;;  %v10166_v30 = vld [vmem:[#allocation100_spill] sm:$0xff] }
 0x499   : > { %4140 = vmatpush.bf16.msra.mxu2 %v4048_v9  ;;  %v3983_v63 = vunpack.c.l.b16 %v3423_v56  ;;  %v3985_v60 = vunpack.c.l.b16 %v3424_v26  ;;  %v3984_v52 = vunpack.c.h.b16 %v3423_v56  ;;  %v3986_v51 = vunpack.c.h.b16 %v3424_v26  ;;  %v10165_v56 = vld [vmem:[#allocation11_spill] sm:$0xff] }
 0x49a   : > { %v3342_v32 = vadd.f32 %v8712_v49, %v3341_v58  ;;  %4126 = vmatpush.bf16.msra.mxu1 %v4063_v2  ;;  %4154 = vmatpush.bf16.msra.mxu3 %v4064_v25  ;;  %v4015_v20 = vunpack.c.l.b16 %v3439_v7  ;;  %v4016_v27 = vunpack.c.h.b16 %v3439_v7  ;;  %v4017_v53 = vunpack.c.l.b16 %v3440_v55  ;;  %v10167_v7 = vld [vmem:[#allocation105_spill] sm:$0xff] }
 0x49b   : > { %v4045_v34 = vpack.c.b16 %v3985_v60, %v3983_v63  ;;  %v4018_v18 = vunpack.c.h.b16 %v3440_v55  ;;  %v3421_v62 = vpack.c.bf16 %v10162_v50, %v10161_v46  ;;  %v4046_v45 = vpack.c.b16 %v3986_v51, %v3984_v52  ;;  %v10168_v63 = vld [vmem:[#allocation56_spill] sm:$0xff]  ;;  %v10169_v46 = vld [vmem:[#allocation106_spill] sm:$0xff] }
 0x49c   : > { %v3343_v9 = vadd.f32 %v8719_v57, %v3342_v32  ;;  %v3422_v54 = vpack.c.bf16 %v10164_v40, %v10163_v44  ;;  %v3437_v58 = vpack.c.bf16 %v10166_v30, %v10165_v56  ;;  %v4061_v2 = vpack.c.b16 %v4017_v53, %v4015_v20  ;;  %v4789_v44 = vld [vmem:[%s7574_s27 + $0x24] sm:$0xf0] }
 0x49d   : > { %4113 = vmatpush.bf16.msra.mxu0 %v4045_v34  ;;  %v4062_v25 = vpack.c.b16 %v4018_v18, %v4016_v27  ;;  %v3979_v26 = vunpack.c.l.b16 %v3421_v62  ;;  %v3438_v60 = vpack.c.bf16 %v10168_v63, %v10167_v7  ;;  %4141 = vmatpush.bf16.msra.mxu2 %v4046_v45  ;;  %v3980_v32 = vunpack.c.h.b16 %v3421_v62  ;;  %v4755_v45 = vld [vmem:[%s7574_s27 + $0x20] sm:$0xf] }
 0x49e   : > { %v3344_v13 = vadd.f32 %v8727_v6, %v3343_v9  ;;  %v3981_v55 = vunpack.c.l.b16 %v3422_v54  ;;  %v4011_v52 = vunpack.c.l.b16 %v3437_v58  ;;  %4127 = vmatpush.bf16.msra.mxu1 %v4061_v2  ;;  %v3982_v34 = vunpack.c.h.b16 %v3422_v54  ;;  %v4788_v2 = vld [vmem:[%s7574_s27 + $0x24] sm:$0xf] }
 0x49f   : > { %4155 = vmatpush.bf16.msra.mxu3 %v4062_v25  ;;  %v4013_v51 = vunpack.c.l.b16 %v3438_v60  ;;  %v4012_v20 = vunpack.c.h.b16 %v3437_v58  ;;  %v4014_v27 = vunpack.c.h.b16 %v3438_v60  ;;  %v3468_v50 = vpack.c.bf16 %v8667_v42, %v10169_v46  ;;  %v4757_v25 = vld [vmem:[%s7574_s27 + $0x28] sm:$0xf0] }
 0x4a0   : > { %v3345_v53 = vadd.f32 %v8732_v14, %v3344_v13  ;;  %v4043_v18 = vpack.c.b16 %v3981_v55, %v3979_v26  ;;  %v4265_v9 = vunpack.c.l.b16 %v8744_v0  ;;  %v4044_v62 = vpack.c.b16 %v3982_v34, %v3980_v32 }
 0x4a1   : > { %v4059_v40 = vpack.c.b16 %v4013_v51, %v4011_v52  ;;  %v4060_v56 = vpack.c.b16 %v4014_v27, %v4012_v20  ;;  %v4267_v30 = vunpack.c.l.b16 %v8749_v24  ;;  %v4235_v58 = vunpack.c.l.b16 %v3468_v50  ;;  %v10171_v27 = vld [vmem:[#allocation42_spill] sm:$0xff] }
 0x4a2   : > { %v3346_v54 = vadd.f32 %v8763_v21, %v3345_v53  ;;  %4114 = vmatpush.bf16.msra.mxu0 %v4043_v18  ;;  %v4234_v26 = vunpack.c.h.b16 %v8679_v41  ;;  %v4236_v7 = vunpack.c.h.b16 %v3468_v50  ;;  %4142 = vmatpush.bf16.msra.mxu2 %v4044_v62  ;;  %v4266_v63 = vunpack.c.h.b16 %v8744_v0  ;;  %v10172_v18 = vld [vmem:[#allocation40_spill] sm:$0xff] }
 0x4a3   : > { %4128 = vmatpush.bf16.msra.mxu1 %v4059_v40  ;;  %v4299_v42 = vpack.c.b16 %v4267_v30, %v4265_v9  ;;  %v4268_v60 = vunpack.c.h.b16 %v8749_v24  ;;  %v4756_v13 = vor.u32 %v4789_v44, %v4755_v45  ;;  %4156 = vmatpush.bf16.msra.mxu3 %v4060_v56  ;;  %v10170_v52 = vunpack.c.l.b16 %v8679_v41 }
 0x4a4   : > { %v3347_v55 = vadd.f32 %v8770_v19, %v3346_v54  ;;  %v4284_v51 = vpack.c.b16 %v4236_v7, %v4234_v26  ;;  %v4760_v34 = vor.u32 %v4788_v2, %v4757_v25  ;;  %v3465_v53 = vpack.c.bf16 %v8650_v43, %v10171_v27  ;;  %v10174_v25 = vld [vmem:[#allocation59_spill] sm:$0xff] }
 0x4a5   : > { %v4283_v32 = vpack.c.b16 %v4235_v58, %v10170_v52  ;;  %v4300_v20 = vpack.c.b16 %v4268_v60, %v4266_v63  ;;  %4115 = vmatmul.bf16.vlgmr.msra.gmra.mxu0 %v4756_v13  ;;  %v3466_v0 = vpack.c.bf16 %v8662_v59, %v10172_v18  ;;  %v3481_v46 = vpack.c.bf16 %v8770_v19, %v10116_v47  ;;  %v10173_v19 = vld [vmem:[#allocation62_spill] sm:$0xff] }
 0x4a6   : > { %v3348_v24 = vadd.f32 %v8774_v3, %v3347_v55  ;;  %4361 = vmatpush.bf16.msrb.mxu2 %v4284_v51  ;;  %v3482_v41 = vpack.c.bf16 %v8774_v3, %v10117_v4  ;;  %4129 = vmatmul.bf16.vlgmr.msra.gmra.mxu1 %v4760_v34  ;;  %v4229_v50 = vunpack.c.l.b16 %v3465_v53  ;;  %v4230_v45 = vunpack.c.h.b16 %v3465_v53 }
 0x4a7   : > { %4347 = vmatpush.bf16.msrb.mxu1 %v4299_v42  ;;  %4333 = vmatpush.bf16.msrb.mxu0 %v4283_v32  ;;  %v4231_v9 = vunpack.c.l.b16 %v3466_v0  ;;  %v4232_v44 = vunpack.c.h.b16 %v3466_v0  ;;  %v4261_v59 = vunpack.c.l.b16 %v3481_v46  ;;  %v4262_v62 = vunpack.c.h.b16 %v3481_v46  ;;  %v10176_v32 = vld [vmem:[#allocation16_spill] sm:$0xff]  ;;  %v10177_v46 = vld [vmem:[#allocation90_spill] sm:$0xff] }
 0x4a8   : > { %4375 = vmatpush.bf16.msrb.mxu3 %v4300_v20  ;;  %v3349_v43 = vadd.f32 %v8736_v28, %v3348_v24  ;;  %4143 = vmatmul.bf16.vlgmr.msra.gmra.mxu2 %v4756_v13  ;;  %v4263_v40 = vunpack.c.l.b16 %v3482_v41  ;;  %v4264_v2 = vunpack.c.h.b16 %v3482_v41  ;;  %v3463_v47 = vpack.c.bf16 %v8633_v17, %v10173_v19 }
 0x4a9   : > { %4157 = vmatmul.bf16.vlgmr.msra.gmra.mxu3 %v4760_v34  ;;  %v4281_v56 = vpack.c.b16 %v4231_v9, %v4229_v50  ;;  %v4282_v30 = vpack.c.b16 %v4232_v44, %v4230_v45  ;;  %v3464_v54 = vpack.c.bf16 %v8643_v35, %v10174_v25  ;;  %v3479_v28 = vpack.c.bf16 %v8732_v14, %v10106_v1  ;;  %v10175_v35 = vld [vmem:[#allocation72_spill] sm:$0xff]  ;;  %v10178_v45 = vld [vmem:[#allocation9_spill] sm:$0xff] }
 0x4aa   : > { %v8839_v4 = vadd.f32 %v8739_v12, %v3349_v43  ;;  %v4297_v3 = vpack.c.b16 %v4263_v40, %v4261_v59  ;;  %v4298_v58 = vpack.c.b16 %v4264_v2, %v4262_v62  ;;  %v4225_v26 = vunpack.c.l.b16 %v3463_v47 }
 0x4ab   : > { %4334 = vmatpush.bf16.msrb.mxu0 %v4281_v56  ;;  %4362 = vmatpush.bf16.msrb.mxu2 %v4282_v30  ;;  %v3480_v7 = vpack.c.bf16 %v8763_v21, %v10113_v5  ;;  %v4226_v42 = vunpack.c.h.b16 %v3463_v47  ;;  %v4227_v17 = vunpack.c.l.b16 %v3464_v54  ;;  %v4257_v63 = vunpack.c.l.b16 %v3479_v28  ;;  %v10179_v47 = vld [vmem:[#allocation98_spill] sm:$0xff] }
 0x4ac   : > { %4348 = vmatpush.bf16.msrb.mxu1 %v4297_v3  ;;  %v4228_v12 = vunpack.c.h.b16 %v3464_v54  ;;  %4376 = vmatpush.bf16.msrb.mxu3 %v4298_v58  ;;  %v4258_v13 = vunpack.c.h.b16 %v3479_v28  ;;  %v3461_v52 = vpack.c.bf16 %v8619_v16, %v10175_v35  ;;  %v3462_v51 = vpack.c.bf16 %v8624_v39, %v10176_v32  ;;  %v10187_v32 = vld [vmem:[#allocation71_spill] sm:$0xff] }
 0x4ad   : > { %v4259_v60 = vunpack.c.l.b16 %v3480_v7  ;;  %v4260_v55 = vunpack.c.h.b16 %v3480_v7  ;;  %v4279_v1 = vpack.c.b16 %v4227_v17, %v4225_v26  ;;  %v3477_v21 = vpack.c.bf16 %v8719_v57, %v8452_v61 }
 0x4ae   : > { %v4280_v14 = vpack.c.b16 %v4228_v12, %v4226_v42  ;;  %v4221_v5 = vunpack.c.l.b16 %v3461_v52  ;;  %v4223_v27 = vunpack.c.l.b16 %v3462_v51  ;;  %v3478_v53 = vpack.c.bf16 %v8727_v6, %v8459_v48 }
 0x4af   : > { %v4295_v34 = vpack.c.b16 %v4259_v60, %v4257_v63  ;;  %v4296_v20 = vpack.c.b16 %v4260_v55, %v4258_v13  ;;  %4335 = vmatpush.bf16.msrb.mxu0 %v4279_v1  ;;  %v4222_v18 = vunpack.c.h.b16 %v3461_v52  ;;  %v4253_v16 = vunpack.c.l.b16 %v3477_v21  ;;  %v10181_v60 = vld [vmem:[#allocation17_spill] sm:$0xff]  ;;  %v10184_v55 = vld [vmem:[#allocation34_spill] sm:$0xff]  ;;  %v10185_v52 = vld [vmem:[#allocation80_spill] sm:$0xff] }
 0x4b0   : > { %4363 = vmatpush.bf16.msrb.mxu2 %v4280_v14  ;;  %v4224_v0 = vunpack.c.h.b16 %v3462_v51  ;;  %v4254_v24 = vunpack.c.h.b16 %v3477_v21  ;;  %v3459_v39 = vpack.c.bf16 %v8606_v10, %v10177_v46  ;;  %v4277_v41 = vpack.c.b16 %v4223_v27, %v4221_v5  ;;  %v10182_v13 = vld [vmem:[#allocation41_spill] sm:$0xff]  ;;  %v10188_v46 = vld [vmem:[#allocation48_spill] sm:$0xff] }
 0x4b1   : > { %4349 = vmatpush.bf16.msrb.mxu1 %v4295_v34  ;;  %4377 = vmatpush.bf16.msrb.mxu3 %v4296_v20  ;;  %v4255_v50 = vunpack.c.l.b16 %v3478_v53  ;;  %v4256_v9 = vunpack.c.h.b16 %v3478_v53  ;;  %v3460_v61 = vpack.c.bf16 %v8614_v15, %v10178_v45  ;;  %v3475_v48 = vpack.c.bf16 %v8709_v36, %v8432_v33  ;;  %v10180_v36 = vld [vmem:[#allocation75_spill] sm:$0xff]  ;;  %v10186_v1 = vld [vmem:[#allocation69_spill] sm:$0xff] }
 0x4b2   : > { %v4278_v57 = vpack.c.b16 %v4224_v0, %v4222_v18  ;;  %v4217_v44 = vunpack.c.l.b16 %v3459_v39  ;;  %v3476_v6 = vpack.c.bf16 %v8712_v49, %v8443_v8  ;;  %v4218_v62 = vunpack.c.h.b16 %v3459_v39  ;;  %v10189_v39 = vld [vmem:[#allocation99_spill] sm:$0xff] }
 0x4b3   : > { %4336 = vmatpush.bf16.msrb.mxu0 %v4277_v41  ;;  %v4293_v43 = vpack.c.b16 %v4255_v50, %v4253_v16  ;;  %v4294_v59 = vpack.c.b16 %v4256_v9, %v4254_v24  ;;  %v4219_v40 = vunpack.c.l.b16 %v3460_v61  ;;  %v4249_v10 = vunpack.c.l.b16 %v3475_v48  ;;  %v10191_v50 = vld [vmem:[#allocation23_spill] sm:$0xff] }
 0x4b4   : > { %4364 = vmatpush.bf16.msrb.mxu2 %v4278_v57  ;;  %v4251_v56 = vunpack.c.l.b16 %v3476_v6  ;;  %v4220_v30 = vunpack.c.h.b16 %v3460_v61  ;;  %v4250_v2 = vunpack.c.h.b16 %v3475_v48  ;;  %v4252_v19 = vunpack.c.h.b16 %v3476_v6  ;;  %v10192_v57 = vld [vmem:[#allocation107_spill] sm:$0xff]  ;;  %v10194_v6 = vld [vmem:[#allocation60_spill] sm:$0xff] }
 0x4b5   : > { %4350 = vmatpush.bf16.msrb.mxu1 %v4293_v43  ;;  %4378 = vmatpush.bf16.msrb.mxu3 %v4294_v59  ;;  %v4275_v15 = vpack.c.b16 %v4219_v40, %v4217_v44  ;;  %v3457_v33 = vpack.c.bf16 %v8586_v38, %v10179_v47  ;;  %v3458_v8 = vpack.c.bf16 %v8598_v11, %v10180_v36  ;;  %v10193_v44 = vld [vmem:[#allocation31_spill] sm:$0xff]  ;;  %v10195_v43 = vld [vmem:[#allocation82_spill] sm:$0xff] }
 0x4b6   : > { %v4291_v49 = vpack.c.b16 %v4251_v56, %v4249_v10  ;;  %v4276_v3 = vpack.c.b16 %v4220_v30, %v4218_v62  ;;  %v3473_v25 = vpack.c.bf16 %v8699_v22, %v8414_v31  ;;  %v3474_v54 = vpack.c.bf16 %v8703_v29, %v8421_v37  ;;  %v10183_v22 = vld [vmem:[#allocation27_spill] sm:$0xff]  ;;  %v4763_v30 = vld [vmem:[%s7574_s27 + $0x30] sm:$0xf] }
 0x4b7   : > { %4337 = vmatpush.bf16.msrb.mxu0 %v4275_v15  ;;  %v4292_v28 = vpack.c.b16 %v4252_v19, %v4250_v2  ;;  %v4213_v58 = vunpack.c.l.b16 %v3457_v33  ;;  %v4215_v26 = vunpack.c.l.b16 %v3458_v8  ;;  %v4214_v7 = vunpack.c.h.b16 %v3457_v33  ;;  %v4791_v2 = vld [vmem:[%s7574_s27 + $0x34] sm:$0xf0] }
 0x4b8   : > { %4365 = vmatpush.bf16.msrb.mxu2 %v4276_v3  ;;  %v4245_v42 = vunpack.c.l.b16 %v3473_v25  ;;  %v4247_v17 = vunpack.c.l.b16 %v3474_v54  ;;  %v4216_v38 = vunpack.c.h.b16 %v3458_v8  ;;  %v4246_v63 = vunpack.c.h.b16 %v3473_v25  ;;  %v4765_v3 = vld [vmem:[%s7574_s27 + $0x38] sm:$0xf0] }
 0x4b9   : > { %4351 = vmatpush.bf16.msrb.mxu1 %v4291_v49  ;;  %4379 = vmatpush.bf16.msrb.mxu3 %v4292_v28  ;;  %v4273_v11 = vpack.c.b16 %v4215_v26, %v4213_v58  ;;  %v4248_v12 = vunpack.c.h.b16 %v3474_v54  ;;  %v3455_v31 = vpack.c.bf16 %v10182_v13, %v10181_v60  ;;  %v3456_v37 = vpack.c.bf16 %v10184_v55, %v10183_v22  ;;  %v4790_v49 = vld [vmem:[%s7574_s27 + $0x34] sm:$0xf] }
 0x4ba   : > { %v4289_v29 = vpack.c.b16 %v4247_v17, %v4245_v42  ;;  %v4274_v35 = vpack.c.b16 %v4216_v38, %v4214_v7  ;;  %v3471_v14 = vpack.c.bf16 %v10186_v1, %v10185_v52  ;;  %v3472_v51 = vpack.c.bf16 %v8695_v23, %v10187_v32  ;;  %v10190_v23 = vld [vmem:[#allocation36_spill] sm:$0xff]  ;;  %v10196_v7 = vld [vmem:[#allocation30_spill] sm:$0xff]  ;;  %v10197_v38 = vld [vmem:[#allocation3_spill] sm:$0xff] }
 0x4bb   : > { %4338 = vmatpush.bf16.msrb.mxu0 %v4273_v11  ;;  %v4290_v34 = vpack.c.b16 %v4248_v12, %v4246_v63  ;;  %v4209_v20 = vunpack.c.l.b16 %v3455_v31  ;;  %v4211_v5 = vunpack.c.l.b16 %v3456_v37  ;;  %v4210_v21 = vunpack.c.h.b16 %v3455_v31 }
 0x4bc   : > { %4366 = vmatpush.bf16.msrb.mxu2 %v4274_v35  ;;  %v4241_v27 = vunpack.c.l.b16 %v3471_v14  ;;  %v4243_v53 = vunpack.c.l.b16 %v3472_v51  ;;  %v4212_v18 = vunpack.c.h.b16 %v3456_v37  ;;  %v4242_v16 = vunpack.c.h.b16 %v3471_v14 }
 0x4bd   : > { %4352 = vmatpush.bf16.msrb.mxu1 %v4289_v29  ;;  %4380 = vmatpush.bf16.msrb.mxu3 %v4290_v34  ;;  %v4271_v0 = vpack.c.b16 %v4211_v5, %v4209_v20  ;;  %v4244_v24 = vunpack.c.h.b16 %v3472_v51  ;;  %v3453_v41 = vpack.c.bf16 %v10189_v39, %v10188_v46  ;;  %v3454_v9 = vpack.c.bf16 %v10191_v50, %v10190_v23  ;;  %v10198_v51 = vld [vmem:[#allocation24_spill] sm:$0xff] }
 0x4be   : > { %v4287_v45 = vpack.c.b16 %v4243_v53, %v4241_v27  ;;  %v4272_v61 = vpack.c.b16 %v4212_v18, %v4210_v21  ;;  %v3469_v48 = vpack.c.bf16 %v10193_v44, %v10192_v57  ;;  %v3470_v59 = vpack.c.bf16 %v10195_v43, %v10194_v6 }
 0x4bf   : > { %4339 = vmatpush.bf16.msrb.mxu0 %v4271_v0  ;;  %v4288_v40 = vpack.c.b16 %v4244_v24, %v4242_v16  ;;  %v4205_v62 = vunpack.c.l.b16 %v3453_v41  ;;  %v4207_v10 = vunpack.c.l.b16 %v3454_v9  ;;  %v4206_v56 = vunpack.c.h.b16 %v3453_v41 }
 0x4c0   : > { %4367 = vmatpush.bf16.msrb.mxu2 %v4272_v61  ;;  %v4237_v15 = vunpack.c.l.b16 %v3469_v48  ;;  %v4239_v19 = vunpack.c.l.b16 %v3470_v59  ;;  %v4208_v47 = vunpack.c.h.b16 %v3454_v9  ;;  %v4238_v33 = vunpack.c.h.b16 %v3469_v48 }
 0x4c1   : > { %4353 = vmatpush.bf16.msrb.mxu1 %v4287_v45  ;;  %4381 = vmatpush.bf16.msrb.mxu3 %v4288_v40  ;;  %v4269_v36 = vpack.c.b16 %v4207_v10, %v4205_v62  ;;  %v4240_v8 = vunpack.c.h.b16 %v3470_v59  ;;  %v4764_v54 = vor.u32 %v4791_v2, %v4763_v30  ;;  %v4768_v26 = vor.u32 %v4790_v49, %v4765_v3 }
 0x4c2   : > { %v4270_v25 = vpack.c.b16 %v4208_v47, %v4206_v56  ;;  %v4285_v28 = vpack.c.b16 %v4239_v19, %v4237_v15  ;;  %v3240_v42 = vrot.slane %v10196_v7, 4  ;;  %v3277_v63 = vrot.slane %v10197_v38, 4 }
 0x4c3   : > { %4340 = vmatpush.bf16.msrb.mxu0 %v4269_v36  ;;  %v4286_v58 = vpack.c.b16 %v4240_v8, %v4238_v33  ;;  %v3314_v34 = vrot.slane %v10198_v51, 4  ;;  %v3351_v39 = vrot.slane %v8839_v4, 4 }
 0x4c4   : > { %4368 = vmatpush.bf16.msrb.mxu2 %v4270_v25  ;;  %v3241_v17 = vadd.f32 %v3240_v42, %v10196_v7  ;;  %v3278_v12 = vadd.f32 %v3277_v63, %v10197_v38 }
 0x4c5   : > { %4354 = vmatpush.bf16.msrb.mxu1 %v4285_v28  ;;  %4382 = vmatpush.bf16.msrb.mxu3 %v4286_v58  ;;  %v3315_v0 = vadd.f32 %v3314_v34, %v10198_v51  ;;  %v3352_v9 = vadd.f32 %v3351_v39, %v8839_v4 }
 0x4c6   : > { %4341 = vmatmul.bf16.vlgmr.msrb.gmra.mxu0 %v4764_v54  ;;  %v3242_v11 = vrot.slane %v3241_v17, 2  ;;  %v3279_v13 = vrot.slane %v3278_v12, 2 }
 0x4c7   : > { %4369 = vmatmul.bf16.vlgmr.msrb.gmra.mxu2 %v4764_v54  ;;  %v3316_v41 = vrot.slane %v3315_v0, 2  ;;  %v3353_v44 = vrot.slane %v3352_v9, 2 }
 0x4c8   : > { %4355 = vmatmul.bf16.vlgmr.msrb.gmra.mxu1 %v4768_v26  ;;  %4383 = vmatmul.bf16.vlgmr.msrb.gmra.mxu3 %v4768_v26  ;;  %v3243_v60 = vadd.f32 %v3242_v11, %v3241_v17  ;;  %v3280_v22 = vadd.f32 %v3279_v13, %v3278_v12 }
 0x4c9   : > { %v3317_v57 = vadd.f32 %v3316_v41, %v3315_v0  ;;  %v3354_v6 = vadd.f32 %v3353_v44, %v3352_v9 }
 0x4ca   : > { %v3244_v31 = vrot.slane %v3243_v60, 1  ;;  %v3281_v37 = vrot.slane %v3280_v22, 1 }
 0x4cb   : > { %v3318_v48 = vrot.slane %v3317_v57, 1  ;;  %v3355_v59 = vrot.slane %v3354_v6, 1 }
 0x4cc   : > { %v3245_v55 = vadd.f32 %v3244_v31, %v3243_v60  ;;  %v3282_v35 = vadd.f32 %v3281_v37, %v3280_v22 }
 0x4cd   : > { %v3319_v43 = vadd.f32 %v3318_v48, %v3317_v57  ;;  %v3356_v62 = vadd.f32 %v3355_v59, %v3354_v6 }
 0x4ce   : > { %5676 = vrcp.f32 %v3245_v55 }
 0x4cf   : > { %5678 = vrcp.f32 %v3282_v35 }
 0x4d0   : > { %5680 = vrcp.f32 %v3319_v43 }
 0x4d1   : > { %5682 = vrcp.f32 %v3356_v62 }
 0x4d4   : > { %v5677_v14 = vpop.eup %5676 }
 0x4d5   : > { %v5679_v18 = vpop.eup %5678 }
 0x4d6   : > { %v5681_v30 = vpop.eup %5680 }
 0x4d7   : > { %v5683_v33 = vpop.eup %5682 }
 0x522   : > { %v4116_v29 = vpop.f32.mrf.mxu0 }
 0x523   : > { %v4130_v52 = vpop.f32.mrf.mxu1 }
 0x524   : > { %v4131_v1 = vadd.f32 %v4130_v52, %v4116_v29 }
 0x526   : > { %v4405_v32 = vmul.f32 %v5677_v14, %v4131_v1 }
 0x528   : > { %4421 = vst [vmem:[%s8492_s4 + $0x40] sm:$0xff] %v4405_v32 }
 0x52a   : > { %v4118_v20 = vpop.f32.mrf.mxu0 }
 0x52b   : > { %v4144_v5 = vpop.f32.mrf.mxu2  ;;  %v4132_v53 = vpop.f32.mrf.mxu1 }
 0x52c   : > { %v4158_v21 = vpop.f32.mrf.mxu3  ;;  %v4133_v16 = vadd.f32 %v4132_v53, %v4118_v20 }
 0x52d   : > { %v4159_v27 = vadd.f32 %v4158_v21, %v4144_v5 }
 0x52e   : > { %v4407_v46 = vmul.f32 %v5677_v14, %v4133_v16 }
 0x52f   : > { %v4406_v24 = vmul.f32 %v5679_v18, %v4159_v27 }
 0x530   : > { %4423 = vst [vmem:[%s8492_s4 + $0x50] sm:$0xff] %v4407_v46 }
 0x531   : > { %4422 = vst [vmem:[%s8492_s4 + $0x48] sm:$0xff] %v4406_v24 }
 0x533   : > { %v4146_v23 = vpop.f32.mrf.mxu2 }
 0x534   : > { %v4160_v50 = vpop.f32.mrf.mxu3 }
 0x535   : > { %v4161_v45 = vadd.f32 %v4160_v50, %v4146_v23 }
 0x537   : > { %v4408_v61 = vmul.f32 %v5679_v18, %v4161_v45 }
 0x539   : > { %4424 = vst [vmem:[%s8492_s4 + $0x58] sm:$0xff] %v4408_v61 }
 0x543   : > { %v4342_v40 = vpop.f32.mrf.mxu0 }
 0x545   : > { %v4356_v10 = vpop.f32.mrf.mxu1 }
 0x546   : > { %v4357_v56 = vadd.f32 %v4356_v10, %v4342_v40 }
 0x548   : > { %v4409_v4 = vmul.f32 %v5681_v30, %v4357_v56 }
 0x54a   : > { %4425 = vst [vmem:[%s8492_s4 + $0x60] sm:$0xff] %v4409_v4  ;;  %v4370_v2 = vpop.f32.mrf.mxu2 }
 0x54b   : > { %v4384_v15 = vpop.f32.mrf.mxu3  ;;  %v4344_v19 = vpop.f32.mrf.mxu0 }
 0x54c   : > { %v4385_v47 = vadd.f32 %v4384_v15, %v4370_v2 }
 0x54d   : > { %v4358_v36 = vpop.f32.mrf.mxu1 }
 0x54e   : > { %v4410_v8 = vmul.f32 %v5683_v33, %v4385_v47  ;;  %v4359_v49 = vadd.f32 %v4358_v36, %v4344_v19 }
 0x550   : > { %4426 = vst [vmem:[%s8492_s4 + $0x68] sm:$0xff] %v4410_v8  ;;  %v4411_v3 = vmul.f32 %v5681_v30, %v4359_v49 }
 0x552   : > { %4427 = vst [vmem:[%s8492_s4 + $0x70] sm:$0xff] %v4411_v3  ;;  %v4372_v25 = vpop.f32.mrf.mxu2 }
 0x553   : > { %v4386_v54 = vpop.f32.mrf.mxu3 }
 0x554   : > { %v4387_v28 = vadd.f32 %v4386_v54, %v4372_v25 }
 0x556   : > { %v4412_v58 = vmul.f32 %v5683_v33, %v4387_v28 }
 0x558   : > { %4428 = vst [vmem:[%s8492_s4 + $0x78] sm:$0xff] %v4412_v58 }
 0x559 PF: > { %s13_s14 = sadd.s32 1, %s5706_s14   ;;  %s10199_s12 = smov %s5702_s13 }
 0x55a   : > { %p10_p5 = scmp.ge.s32.totalorder %s13_s14, 4   ;;  %s10200_s13 = smov %s10202_s15 }
 0x55c   :  { %12 = sbr.rel (!%p10_p5) target bundleno = 2 (0x2), region = 68 }

</bundles_post_ra>
